<compile_context>
chip_gen: v6e
topology: v6e:2x2x1
jax: 0.10.0
libtpu: 0.0.40
codegen_flags: <defaults>
</compile_context>

<pallas_src>
import jax
import jax.numpy as jnp
from jax.experimental import pallas as pl
from jax.experimental.pallas import tpu as pltpu


def _target_mlp_kernel(x_ref, w_ref, b_ref, o_ref):
    # x_ref: [TB, I]   w_ref: [TB, TO, I]   b_ref: [TB, TO]   o_ref: [TB, TO]
    x = x_ref[...].astype(jnp.float32)                       # [TB, I]
    b = b_ref[...].astype(jnp.float32)                       # [TB, TO]
    # y[b, o] = sum_i W[b, o, i] * x[b, i]
    #   - x broadcast along the sublane (O) axis,
    #   - elementwise multiply on the VPU (upcast folded into the multiply,
    #     no separate f32 copy of the W tile),
    #   - reduce over the lane axis (I) on the XLU, f32 accumulation.
    y = jnp.sum(w_ref[...].astype(jnp.float32) * x[:, None, :], axis=-1)
    o_ref[...] = (y + b).astype(o_ref.dtype)


def _vmem_budgets():
    """(per-buffer W tile budget, scoped VMEM limit), sized from the chip."""
    try:
        info = pltpu.get_tpu_info()
        cap = getattr(info, "vmem_capacity_bytes", None) or 64 * 1024 * 1024
    except Exception:  # no TPU info available -> be v7x-conservative
        cap = 64 * 1024 * 1024
    # ~16 MiB/tile on 128 MiB parts (v5e/v6e), ~12.8 MiB on 64 MiB v7x.
    w_tile_budget = min(16 * 1024 * 1024, cap // 5)
    # Scoped limit for the whole pipelined footprint, with headroom.
    vmem_limit = min(int(cap * 0.75), 96 * 1024 * 1024)
    return w_tile_budget, vmem_limit


def _pick_tiles(B, O, I, itemsize, w_tile_budget_bytes):
    """Pick (tb, to): batch tile (mult. of 8 or B) and O tile (mult. of 128 or O)."""
    to = O
    row_bytes = max(O * I * itemsize, 1)
    # If even 8 batch rows at full O blow the per-buffer budget, tile the O
    # (lane) axis in 128-wide chunks so stores stay lane-dense.
    if 8 * row_bytes > w_tile_budget_bytes and O > 128:
        max_to = w_tile_budget_bytes // max(8 * I * itemsize, 1)
        to = min(O, max(128, (max_to // 128) * 128))
        row_bytes = max(to * I * itemsize, 1)
    # TODO(synk): if even (8, 128, I) exceeds the budget (enormous I), an
    # I-axis reduction grid would be needed; not required for TargetMLP sizes.

    tb = w_tile_budget_bytes // row_bytes
    if B >= 32:
        # Keep at least ~4 batch tiles: DMA/compute overlap + both v7x TCs busy.
        tb = min(tb, B // 4)
    if tb >= B:
        tb = B
    else:
        tb = max(8, (tb // 8) * 8)
        if tb > B:
            tb = B
    return tb, to


def target_mlp(x, W, b, *, block_b=None, block_o=None):
    """Pallas TPU implementation of TargetMLP.forward(x, W, b).

    x: [B, I], W: [B, O, I] (native layout, no wrapper transpose), b: [B, O].
    """
    B, O, I = W.shape
    assert x.shape == (B, I), (x.shape, (B, I))
    assert b.shape == (B, O), (b.shape, (B, O))

    itemsize = jnp.dtype(W.dtype).itemsize
    w_tile_budget, vmem_limit = _vmem_budgets()
    tb, to = _pick_tiles(B, O, I, itemsize, w_tile_budget)
    if block_b is not None:
        tb = min(block_b, B)
        if tb < B:
            tb = max(8, (tb // 8) * 8)
    if block_o is not None:
        to = min(block_o, O)
        if to < O:
            to = max(128, (to // 128) * 128)

    grid = (pl.cdiv(B, tb), pl.cdiv(O, to))

    bytes_accessed = (
        W.size * itemsize
        + x.size * jnp.dtype(x.dtype).itemsize
        + b.size * jnp.dtype(b.dtype).itemsize
        + B * O * jnp.dtype(x.dtype).itemsize
    )
    cost = pl.CostEstimate(
        flops=2 * B * O * I,
        transcendentals=0,
        bytes_accessed=bytes_accessed,
    )

    return pl.pallas_call(
        _target_mlp_kernel,
        out_shape=jax.ShapeDtypeStruct((B, O), x.dtype),
        grid=grid,
        in_specs=[
            pl.BlockSpec((tb, I), lambda i, j: (i, 0)),         # x tile
            pl.BlockSpec((tb, to, I), lambda i, j: (i, j, 0)),  # W tile, native layout
            pl.BlockSpec((tb, to), lambda i, j: (i, j)),        # bias tile
        ],
        out_specs=pl.BlockSpec((tb, to), lambda i, j: (i, j)),
        compiler_params=pltpu.CompilerParams(
            dimension_semantics=("parallel", "parallel"),
            vmem_limit_bytes=vmem_limit,
        ),
        cost_estimate=cost,
    )(x, W, b)


if __name__ == "__main__":
    # Small but exercises a multi-tile batch grid (>=4 tiles) and a lane-dense
    # (128-wide) output axis.
    B, O, I = 64, 128, 32
    key = jax.random.PRNGKey(0)
    kx, kw, kb = jax.random.split(key, 3)
    x = jax.random.normal(kx, (B, I), dtype=jnp.float32)
    W = jax.random.normal(kw, (B, O, I), dtype=jnp.float32)
    b = jax.random.normal(kb, (B, O), dtype=jnp.float32)

    out = jax.block_until_ready(target_mlp(x, W, b))

    ref = jnp.einsum("boi,bi->bo", W, x) + b
    assert out.shape == (B, O)
    assert jnp.allclose(out, ref, atol=1e-4, rtol=1e-4), "mismatch vs reference"

    print("KERNEL_OK")
</pallas_src>

<mosaic_0001>
module attributes {stable_mosaic.version = 11 : i64} {
  func.func @_target_mlp_kernel(%arg0: i32, %arg1: i32, %arg2: memref<16x32xf32, #tpu.memory_space<vmem>>, %arg3: memref<16x128x32xf32, #tpu.memory_space<vmem>>, %arg4: memref<16x128xf32, #tpu.memory_space<vmem>>, %arg5: memref<16x128xf32, #tpu.memory_space<vmem>>) attributes {dimension_semantics = [#tpu.dimension_semantics<parallel>, #tpu.dimension_semantics<parallel>], iteration_bounds = array<i64: 4, 1>, scalar_prefetch = 0 : i64, scratch_operands = 0 : i64, tpu.core_type = #tpu.core_type<tc>, window_params = [{transform_indices = @transform_0, window_bounds = array<i64: 16, 32>}, {transform_indices = @transform_1, window_bounds = array<i64: 16, 128, 32>}, {transform_indices = @transform_2, window_bounds = array<i64: 16, 128>}, {transform_indices = @transform_3, window_bounds = array<i64: 16, 128>}]} {
    %c0 = arith.constant 0 : index
    %c0_0 = arith.constant 0 : index
    %0 = vector.load %arg2[%c0, %c0_0] : memref<16x32xf32, #tpu.memory_space<vmem>>, vector<16x32xf32>
    %c0_1 = arith.constant 0 : index
    %c0_2 = arith.constant 0 : index
    %1 = vector.load %arg4[%c0_1, %c0_2] : memref<16x128xf32, #tpu.memory_space<vmem>>, vector<16x128xf32>
    %c0_3 = arith.constant 0 : index
    %c0_4 = arith.constant 0 : index
    %c0_5 = arith.constant 0 : index
    %2 = vector.load %arg3[%c0_3, %c0_4, %c0_5] : memref<16x128x32xf32, #tpu.memory_space<vmem>>, vector<16x128x32xf32>
    %3 = vector.shape_cast %0 : vector<16x32xf32> to vector<16x1x32xf32>
    %4 = vector.broadcast %3 : vector<16x1x32xf32> to vector<16x128x32xf32>
    %5 = arith.mulf %2, %4 : vector<16x128x32xf32>
    %cst = arith.constant dense<0.000000e+00> : vector<16x128xf32>
    %6 = vector.multi_reduction <add>, %5, %cst [2] : vector<16x128x32xf32> to vector<16x128xf32>
    %7 = arith.addf %6, %1 : vector<16x128xf32>
    %c0_6 = arith.constant 0 : index
    %c0_7 = arith.constant 0 : index
    %8 = vector.load %arg5[%c0_6, %c0_7] : memref<16x128xf32, #tpu.memory_space<vmem>>, vector<16x128xf32>
    tpu.vector_store %arg5[%c0_6, %c0_7], %7 {strides = array<i32>} : memref<16x128xf32, #tpu.memory_space<vmem>>, vector<16x128xf32>,
    return
  }
  func.func @transform_0(%arg0: i32, %arg1: i32) -> (i32, i32) {
    %c0_i32 = arith.constant 0 : i32
    %c0_i32_0 = arith.constant 0 : i32
    return %arg0, %c0_i32 : i32, i32
  }
  func.func @transform_1(%arg0: i32, %arg1: i32) -> (i32, i32, i32) {
    %c0_i32 = arith.constant 0 : i32
    %c0_i32_0 = arith.constant 0 : i32
    return %arg0, %arg1, %c0_i32 : i32, i32, i32
  }
  func.func @transform_2(%arg0: i32, %arg1: i32) -> (i32, i32) {
    %c0_i32 = arith.constant 0 : i32
    return %arg0, %arg1 : i32, i32
  }
  func.func @transform_3(%arg0: i32, %arg1: i32) -> (i32, i32) {
    %c0_i32 = arith.constant 0 : i32
    return %arg0, %arg1 : i32, i32
  }
}

</mosaic_0001>

<bundles_post_ra>
// kernel: tpu_custom_call.1
= control target key start
LH: loop header
LB: loop body
LE: loop exit
PB: predicated region body
PF: predicated region fallthrough
CT: control target
= control target key end

     0   :  { %8 = vsyncpa [#allocation3], 0  ;;  %s9606_s0 = inlined_call_operand.vmem [shape: f32[64,32], index: 0, kind: input, shape index: {}]   ;;  %s9607_s1 = inlined_call_operand.vmem [shape: f32[64,128,32], index: 1, kind: input, shape index: {}]   ;;  %s9608_s2 = inlined_call_operand.vmem [shape: f32[64,128], index: 2, kind: input, shape index: {}]   ;;  %s9609_s3 = inlined_call_operand.hbm [shape: f32[64,128], index: 3, kind: output, shape index: {}]  }
   0x1   :  { %10 = vsyncpa [#allocation3 + $0x1], 0  ;;  %s5962_s12 = smov 0   ;;  %s5964_s13 = smov 0  }
   0x2   :  { %s5966_s14 = smov 0   ;;  %s5968_s15 = smov 0  }
   0x3   :  { %s5970_s16 = smov 0   ;;  %s5972_s17 = smov 0  }
   0x4 LB: > { %s5776_s18 = sadd.s32 4294967295, %s5935_s17   ;;  %s5777_s19 = sadd.s32 4294967294, %s5935_s17   ;;  %s5935_s17 = sphi %s5972_s17, %s16_s17   ;;  %s5931_s16 = sphi %s5970_s16, %s10725_s16   ;;  %s5927_s15 = sphi %s5968_s15, %s10724_s15   ;;  %s5923_s14 = sphi %s5966_s14, %s10723_s14   ;;  %s5919_s13 = sphi %s5964_s13, %s10722_s13   ;;  %s5915_s12 = sphi %s5962_s12, %s10721_s12  }
   0x5   : > { %s28_s20 = sadd.s32 1, %s5931_s16  ;;  %s119_s21 = sadd.s32 1, %s5923_s14 }
   0x6   : > { %p30_p0 = scmp.ge.s32.totalorder %s28_s20, 4  ;;  %p129_p1 = scmp.ne.s32.totalorder %s5923_s14, %s5919_s13 }
   0x7   : > { %p130_p2 = scmp.eq.s32.totalorder %s5776_s18, 3  ;;  %p135_p3 = scmp.ne.s32.totalorder %s5919_s13, %s5915_s12 }
   0x8   : > { %s10727_s20 = smov (%p30_p0, %s28_s20), 0  ;;  %p136_p5 = scmp.eq.s32.totalorder %s5777_s19, 3 }
   0x9   : > { %p6002_p4 = por %p130_p2, %p129_p1  ;;  %s114_s23 = ssub.s32 %s5931_s16, %s10727_s20 }
   0xa   : > { %p5780_p6 = scmp.ge.s32.totalorder %s5935_s17, 1  ;;  %p117_p7 = scmp.eq.s32.totalorder %s114_s23, 0 }
   0xb   : > { %p6009_p8 = por %p136_p5, %p135_p3  ;;  %p190_p9 = scmp.lt.s32.totalorder %s5935_s17, 5 }
   0xc   : > { %s6015_s25 = scalar_select %p117_p7, %s5923_s14, %s119_s21  }
   0xd   : > { %p191_p10 = pnand %p5780_p6, %p190_p9 }
   0xf   : > { %194 = sbr.rel (%p191_p10) target bundleno = 1730 (0x6c2), region = 32 }
  0x14   : > { %s5782_s26 = sshll.u32 %s5927_s15, 1  ;;  %s5784_s27 = sshll.u32 %s5927_s15, 4  ;;  %v9610_v0 = vlaneseq  ;;  %v5937_v1 = vmov 1966171168   ;;  %vm956_vm0 = vcmask 261120   ;;  %vm4346_vm1 = vcmask 130112  }
  0x15   : > { %p233_p11 = scmp.lt.s32.totalorder %s5782_s26, 7  ;;  %p240_p12 = scmp.lt.s32.totalorder %s5784_s27, 63  ;;  %v524_v2 = vunpack.c.l.s4 %v5937_v1  ;;  %vm4353_vm2 = vcmask 195712   ;;  %vm4360_vm3 = vcmask 261312   ;;  %vm9623_vm4 = vcmask 326912  }
  0x16   : > { %v6020_v3 = vshrl.u32 %v9610_v0, 7  ;;  %vm9621_vm5 = vcmask 392512   ;;  %vm9622_vm6 = vcmask 458112   ;;  %vm4388_vm7 = vcmask 523712   ;;  %s229_s18 = sand.u32 1, %s5919_s13   ;;  %s5795_s23 = sshll.u32 %s5927_s15, 8 }
  0x17   : > { %s10729_s26 = smov (!%p233_p11, %s5782_s26), 7  ;;  %v525_v4 = vunpack.c.0.s8 %v524_v2  ;;  %s10731_s27 = smov (!%p240_p12, %s5784_s27), 63  ;;  %vm4395_vm8 = vcmask 589312   ;;  %vm4402_vm9 = vcmask 654912   ;;  %vm9624_vm10 = vcmask 720512  }
  0x18   : > { %s5783_s28 = sshll.u32 %s10729_s26, 3  ;;  %s5794_s5 = sshll.u32 %s10731_s27, 7  ;;  %v6046_v8 = vsub.s32 0, %v6020_v3  ;;  %vm4416_vm11 = vcmask 786112   ;;  %vm4423_vm12 = vcmask 851712   ;;  %vm4430_vm13 = vcmask 917312  }
  0x19   : > { %v6026_v5 = vsub.s32 %v525_v4, %v6020_v3  ;;  %s6033_s4 = scalar_lea.vmem %s9606_s0, %s5783_s28  ;;  %s6038_s8 = scalar_lea.vmem %s9607_s1, %s5794_s5  ;;  %vm4437_vm14 = vcmask 982912   ;;  %vm4444_vm15 = vcmask 1048512  }
  0x1a   : > { %v6041_v6 = vld [vmem:[%s6033_s4] sm:$0xff]  ;;  %v266_v9 = vld [vmem:[%s6038_s8 + $0x10] sm:$0xff]  ;;  %v267_v12 = vld [vmem:[%s6038_s8 + $0x18] sm:$0xff]  ;;  %s7305_s11 = scalar_lea.vmem %s9608_s2, %s5783_s28  ;;  %s5781_s19 = sshll.u32 %s229_s18, 4 }
  0x1b   : > { %v529_v7 = vrot.slane %v6041_v6, %v6026_v5  ;;  %v264_v11 = vld [vmem:[%s6038_s8] sm:$0xff]  ;;  %v265_v13 = vld [vmem:[%s6038_s8 + $0x8] sm:$0xff]  ;;  %v271_v27 = vld [vmem:[%s6038_s8 + $0x38] sm:$0xff]  ;;  %s9113_s21 = scalar_lea.vmem [#allocation2], %s5781_s19  ;;  %s9550_s29 = scalar_lea.hbm %s9609_s3, %s5795_s23 }
  0x1c   : > { %v269_v19 = vld [vmem:[%s6038_s8 + $0x28] sm:$0xff]  ;;  %v268_v20 = vld [vmem:[%s6038_s8 + $0x20] sm:$0xff]  ;;  %v270_v28 = vld [vmem:[%s6038_s8 + $0x30] sm:$0xff]  ;;  %s5671_s26 = sshll.u32 %s9113_s21, 4  ;;  %s9561_s15 = scalar_lea.sflag [#allocation3], %s229_s18  ;;  %s9552_s26 = int_to_ptr.vmem [resolvable:$true] %s5671_s26 }
  0x1d   : > { %v6050_v10 = vrot.slane %v529_v7, %v6026_v5  ;;  %v273_v33 = vld [vmem:[%s6038_s8 + $0x48] sm:$0xff]  ;;  %v272_v34 = vld [vmem:[%s6038_s8 + $0x40] sm:$0xff]  ;;  %v275_v39 = vld [vmem:[%s6038_s8 + $0x58] sm:$0xff]  ;;  %v537_v41 = vcombine.high %v529_v7, %v529_v7  ;;  %s5859_s30 = scalar_lea.vmem %s9552_s26, 256 }
  0x1e   : > { %v274_v40 = vld [vmem:[%s6038_s8 + $0x50] sm:$0xff]  ;;  %v277_v46 = vld [vmem:[%s6038_s8 + $0x68] sm:$0xff]  ;;  %v276_v47 = vld [vmem:[%s6038_s8 + $0x60] sm:$0xff]  ;;  %p5860_p13 = scmp.ne.s32.totalorder %s9552_s26, %s5859_s30 }
  0x1f   : > { %v623_v14 = vrot.slane %v6050_v10, %v6046_v8  ;;  %v6078_v48 = vrot.slane %v537_v41, %v6026_v5  ;;  %v279_v53 = vld [vmem:[%s6038_s8 + $0x78] sm:$0xff]  ;;  %v278_v54 = vld [vmem:[%s6038_s8 + $0x70] sm:$0xff]  ;;  %v281_v60 = vld [vmem:[%s6038_s8 + $0x88] sm:$0xff] }
  0x20   : > { %v280_v61 = vld [vmem:[%s6038_s8 + $0x80] sm:$0xff]  ;;  %v283_v4 = vld [vmem:[%s6038_s8 + $0x98] sm:$0xff]  ;;  %v282_v7 = vld [vmem:[%s6038_s8 + $0x90] sm:$0xff]  ;;  %p5861_p0 = pnand %p5860_p13, %p6002_p4 }
  0x21   : > { %v702_v15 = vmul.f32 %v623_v14, %v266_v9  ;;  %v700_v16 = vmul.f32 %v623_v14, %v264_v11  ;;  %v703_v17 = vmul.f32 %v623_v14, %v267_v12  ;;  %v701_v18 = vmul.f32 %v623_v14, %v265_v13  ;;  %v384_v0 = vld [vmem:[%s6038_s8 + $0x3c0] sm:$0xff] }
  0x22   : > { %v705_v25 = vmul.f32 %v623_v14, %v269_v19  ;;  %v704_v26 = vmul.f32 %v623_v14, %v268_v20  ;;  %v707_v31 = vmul.f32 %v623_v14, %v271_v27  ;;  %v706_v32 = vmul.f32 %v623_v14, %v270_v28  ;;  %v287_v20 = vld [vmem:[%s6038_s8 + $0xb8] sm:$0xff]  ;;  %v288_v27 = vld [vmem:[%s6038_s8 + $0xc0] sm:$0xff]  ;;  %p5862_p1 = pneg %p5861_p0 }
  0x23   : > { %v963_v21 = vsel %vm956_vm0, %v702_v15, 0.0  ;;  %v957_v22 = vsel %vm956_vm0, %v700_v16, 0.0  ;;  %v966_v23 = vsel %vm956_vm0, %v703_v17, 0.0  ;;  %v960_v24 = vsel %vm956_vm0, %v701_v18, 0.0  ;;  %v284_v15 = vld [vmem:[%s6038_s8 + $0xa0] sm:$0xff] }
  0x24   : > { %964 = vadd.xlane.f32.xlu1 %v963_v21  ;;  %958 = vadd.xlane.f32.xlu0 %v957_v22  ;;  %v972_v29 = vsel %vm956_vm0, %v705_v25, 0.0  ;;  %v969_v30 = vsel %vm956_vm0, %v704_v26, 0.0  ;;  %v978_v35 = vsel %vm956_vm0, %v707_v31, 0.0  ;;  %v975_v36 = vsel %vm956_vm0, %v706_v32, 0.0  ;;  %v286_v21 = vld [vmem:[%s6038_s8 + $0xb0] sm:$0xff]  ;;  %v289_v26 = vld [vmem:[%s6038_s8 + $0xc8] sm:$0xff] }
  0x25   : > { %v709_v37 = vmul.f32 %v623_v14, %v273_v33  ;;  %v708_v38 = vmul.f32 %v623_v14, %v272_v34  ;;  %v711_v44 = vmul.f32 %v623_v14, %v275_v39  ;;  %v710_v45 = vmul.f32 %v623_v14, %v274_v40  ;;  %v291_v32 = vld [vmem:[%s6038_s8 + $0xd8] sm:$0xff]  ;;  %v290_v33 = vld [vmem:[%s6038_s8 + $0xd0] sm:$0xff]  ;;  %v292_v39 = vld [vmem:[%s6038_s8 + $0xe0] sm:$0xff] }
  0x26   : > { %v713_v51 = vmul.f32 %v623_v14, %v277_v46  ;;  %v712_v52 = vmul.f32 %v623_v14, %v276_v47  ;;  %v715_v55 = vmul.f32 %v623_v14, %v279_v53  ;;  %v714_v58 = vmul.f32 %v623_v14, %v278_v54  ;;  %v285_v14 = vld [vmem:[%s6038_s8 + $0xa8] sm:$0xff]  ;;  %v294_v46 = vld [vmem:[%s6038_s8 + $0xf0] sm:$0xff]  ;;  %v296_v53 = vld [vmem:[%s6038_s8 + $0x100] sm:$0xff] }
  0x27   : > { %v984_v42 = vsel %vm956_vm0, %v709_v37, 0.0  ;;  %v981_v43 = vsel %vm956_vm0, %v708_v38, 0.0  ;;  %v990_v49 = vsel %vm956_vm0, %v711_v44, 0.0  ;;  %v987_v50 = vsel %vm956_vm0, %v710_v45, 0.0  ;;  %v293_v38 = vld [vmem:[%s6038_s8 + $0xe8] sm:$0xff]  ;;  %v295_v45 = vld [vmem:[%s6038_s8 + $0xf8] sm:$0xff] }
  0x28   : > { %967 = vadd.xlane.f32.xlu1 %v966_v23  ;;  %961 = vadd.xlane.f32.xlu0 %v960_v24  ;;  %v996_v56 = vsel %vm956_vm0, %v713_v51, 0.0  ;;  %v993_v57 = vsel %vm956_vm0, %v712_v52, 0.0  ;;  %v6088_v59 = vrot.slane %v6078_v48, %v6046_v8  ;;  %v1002_v62 = vsel %vm956_vm0, %v715_v55, 0.0  ;;  %v297_v52 = vld [vmem:[%s6038_s8 + $0x108] sm:$0xff] }
  0x29   : > { %v999_v63 = vsel %vm956_vm0, %v714_v58, 0.0  ;;  %v567_v40 = vcombine.high %v6050_v10, %v6050_v10  ;;  %v299_v58 = vld [vmem:[%s6038_s8 + $0x118] sm:$0xff] }
  0x2a   : > { %v717_v1 = vmul.f32 %v6088_v59, %v281_v60  ;;  %v716_v2 = vmul.f32 %v6088_v59, %v280_v61  ;;  %v719_v12 = vmul.f32 %v6088_v59, %v283_v4  ;;  %v718_v13 = vmul.f32 %v6088_v59, %v282_v7  ;;  %v298_v60 = vld [vmem:[%s6038_s8 + $0x110] sm:$0xff] }
  0x2b   : > { %v721_v18 = vmul.f32 %v6088_v59, %v285_v14  ;;  %v720_v19 = vmul.f32 %v6088_v59, %v284_v15  ;;  %v723_v24 = vmul.f32 %v6088_v59, %v287_v20  ;;  %v722_v25 = vmul.f32 %v6088_v59, %v286_v21 }
  0x2c   : > { %973 = vadd.xlane.f32.xlu1 %v972_v29  ;;  %970 = vadd.xlane.f32.xlu0 %v969_v30  ;;  %v1008_v9 = vsel %vm956_vm0, %v717_v1, 0.0  ;;  %v1005_v11 = vsel %vm956_vm0, %v716_v2, 0.0  ;;  %v1014_v16 = vsel %vm956_vm0, %v719_v12, 0.0  ;;  %v1011_v17 = vsel %vm956_vm0, %v718_v13, 0.0  ;;  %v301_v1 = vld [vmem:[%s6038_s8 + $0x128] sm:$0xff]  ;;  %v300_v2 = vld [vmem:[%s6038_s8 + $0x120] sm:$0xff] }
  0x2d   : > { %v1020_v22 = vsel %vm956_vm0, %v721_v18, 0.0  ;;  %v1017_v23 = vsel %vm956_vm0, %v720_v19, 0.0  ;;  %v1026_v28 = vsel %vm956_vm0, %v723_v24, 0.0  ;;  %v1023_v29 = vsel %vm956_vm0, %v722_v25, 0.0  ;;  %v303_v12 = vld [vmem:[%s6038_s8 + $0x138] sm:$0xff]  ;;  %v302_v13 = vld [vmem:[%s6038_s8 + $0x130] sm:$0xff] }
  0x2e   : > { %v725_v30 = vmul.f32 %v6088_v59, %v289_v26  ;;  %v724_v31 = vmul.f32 %v6088_v59, %v288_v27  ;;  %v726_v37 = vmul.f32 %v6088_v59, %v290_v33  ;;  %v728_v44 = vmul.f32 %v6088_v59, %v292_v39  ;;  %v305_v18 = vld [vmem:[%s6038_s8 + $0x148] sm:$0xff]  ;;  %v304_v19 = vld [vmem:[%s6038_s8 + $0x140] sm:$0xff]  ;;  %v307_v24 = vld [vmem:[%s6038_s8 + $0x158] sm:$0xff] }
  0x2f   : > { %v6137_v47 = vrot.slane %v567_v40, %v6046_v8  ;;  %v730_v51 = vmul.f32 %v6088_v59, %v294_v46  ;;  %v306_v25 = vld [vmem:[%s6038_s8 + $0x150] sm:$0xff] }
  0x30   : > { %979 = vadd.xlane.f32.xlu1 %v978_v35  ;;  %976 = vadd.xlane.f32.xlu0 %v975_v36  ;;  %v1032_v34 = vsel %vm956_vm0, %v725_v30, 0.0  ;;  %v1029_v35 = vsel %vm956_vm0, %v724_v31, 0.0  ;;  %v727_v36 = vmul.f32 %v6088_v59, %v291_v32  ;;  %v1041_v10 = vsel %vm956_vm0, %v728_v44, 0.0  ;;  %v309_v30 = vld [vmem:[%s6038_s8 + $0x168] sm:$0xff]  ;;  %v308_v31 = vld [vmem:[%s6038_s8 + $0x160] sm:$0xff] }
  0x31   : > { %v1047_v55 = vsel %vm956_vm0, %v730_v51, 0.0  ;;  %v569_v32 = vcombine.high %v6078_v48, %v6078_v48  ;;  %v312_v44 = vld [vmem:[%s6038_s8 + $0x180] sm:$0xff] }
  0x32   : > { %v1038_v41 = vsel %vm956_vm0, %v727_v36, 0.0  ;;  %v744_v36 = vmul.f32 %v6137_v47, %v308_v31 }
  0x34   : > { %985 = vadd.xlane.f32.xlu1 %v984_v42  ;;  %982 = vadd.xlane.f32.xlu0 %v981_v43  ;;  %v1035_v42 = vsel %vm956_vm0, %v726_v37, 0.0  ;;  %v729_v43 = vmul.f32 %v6088_v59, %v293_v38  ;;  %v311_v37 = vld [vmem:[%s6038_s8 + $0x178] sm:$0xff]  ;;  %v310_v38 = vld [vmem:[%s6038_s8 + $0x170] sm:$0xff]  ;;  %v1089_v48 = vsel %vm956_vm0, %v744_v36, 0.0  ;;  %v329_v36 = vld [vmem:[%s6038_s8 + $0x208] sm:$0xff] }
  0x35   : > { %v747_v39 = vmul.f32 %v6137_v47, %v311_v37  ;;  %v328_v37 = vld [vmem:[%s6038_s8 + $0x200] sm:$0xff] }
  0x38   : > { %991 = vadd.xlane.f32.xlu1 %v990_v49  ;;  %988 = vadd.xlane.f32.xlu0 %v987_v50  ;;  %v1044_v49 = vsel %vm956_vm0, %v729_v43, 0.0  ;;  %v731_v50 = vmul.f32 %v6088_v59, %v295_v45  ;;  %v313_v43 = vld [vmem:[%s6038_s8 + $0x188] sm:$0xff]  ;;  %v1098_v45 = vsel %vm956_vm0, %v747_v39, 0.0 }
  0x3a   : > { %v1050_v54 = vsel %vm956_vm0, %v731_v50, 0.0  ;;  %v315_v50 = vld [vmem:[%s6038_s8 + $0x198] sm:$0xff] }
  0x3c   : > { %997 = vadd.xlane.f32.xlu1 %v996_v56  ;;  %994 = vadd.xlane.f32.xlu0 %v993_v57  ;;  %v733_v56 = vmul.f32 %v6137_v47, %v297_v52  ;;  %v732_v57 = vmul.f32 %v6137_v47, %v296_v53 }
  0x3e   : > { %v1056_v59 = vsel %vm956_vm0, %v733_v56, 0.0  ;;  %v1053_v61 = vsel %vm956_vm0, %v732_v57, 0.0  ;;  %v316_v56 = vld [vmem:[%s6038_s8 + $0x1a0] sm:$0xff] }
  0x40   : > { %1003 = vadd.xlane.f32.xlu1 %v1002_v62  ;;  %1000 = vadd.xlane.f32.xlu0 %v999_v63  ;;  %v735_v62 = vmul.f32 %v6137_v47, %v299_v58  ;;  %v734_v63 = vmul.f32 %v6137_v47, %v298_v60 }
  0x42   : > { %v1062_v4 = vsel %vm956_vm0, %v735_v62, 0.0  ;;  %v1059_v7 = vsel %vm956_vm0, %v734_v63, 0.0  ;;  %v318_v62 = vld [vmem:[%s6038_s8 + $0x1b0] sm:$0xff] }
  0x44   : > { %1009 = vadd.xlane.f32.xlu1 %v1008_v9  ;;  %1006 = vadd.xlane.f32.xlu0 %v1005_v11  ;;  %v737_v9 = vmul.f32 %v6137_v47, %v301_v1  ;;  %v736_v11 = vmul.f32 %v6137_v47, %v300_v2 }
  0x46   : > { %v1068_v14 = vsel %vm956_vm0, %v737_v9, 0.0  ;;  %v1065_v15 = vsel %vm956_vm0, %v736_v11, 0.0  ;;  %v320_v9 = vld [vmem:[%s6038_s8 + $0x1c0] sm:$0xff]  ;;  %v522_v11 = vcombine.high %v6041_v6, %v6041_v6 }
  0x48   : > { %1015 = vadd.xlane.f32.xlu1 %v1014_v16  ;;  %1012 = vadd.xlane.f32.xlu0 %v1011_v17  ;;  %v739_v16 = vmul.f32 %v6137_v47, %v303_v12  ;;  %v738_v17 = vmul.f32 %v6137_v47, %v302_v13  ;;  %v6231_v6 = vrot.slane %v522_v11, %v6026_v5 }
  0x4a   : > { %v1074_v20 = vsel %vm956_vm0, %v739_v16, 0.0  ;;  %v1071_v21 = vsel %vm956_vm0, %v738_v17, 0.0  ;;  %v323_v16 = vld [vmem:[%s6038_s8 + $0x1d8] sm:$0xff]  ;;  %v322_v17 = vld [vmem:[%s6038_s8 + $0x1d0] sm:$0xff] }
  0x4c   : > { %1021 = vadd.xlane.f32.xlu1 %v1020_v22  ;;  %1018 = vadd.xlane.f32.xlu0 %v1017_v23  ;;  %v741_v22 = vmul.f32 %v6137_v47, %v305_v18  ;;  %v740_v23 = vmul.f32 %v6137_v47, %v304_v19 }
  0x4e   : > { %v1080_v26 = vsel %vm956_vm0, %v741_v22, 0.0  ;;  %v1077_v27 = vsel %vm956_vm0, %v740_v23, 0.0  ;;  %v325_v22 = vld [vmem:[%s6038_s8 + $0x1e8] sm:$0xff]  ;;  %v324_v23 = vld [vmem:[%s6038_s8 + $0x1e0] sm:$0xff] }
  0x50   : > { %1027 = vadd.xlane.f32.xlu1 %v1026_v28  ;;  %1024 = vadd.xlane.f32.xlu0 %v1023_v29  ;;  %v743_v28 = vmul.f32 %v6137_v47, %v307_v24  ;;  %v742_v29 = vmul.f32 %v6137_v47, %v306_v25  ;;  %v6241_v24 = vrot.slane %v6231_v6, %v6026_v5 }
  0x52   : > { %v1086_v33 = vsel %vm956_vm0, %v743_v28, 0.0  ;;  %v6251_v31 = vrot.slane %v6241_v24, %v6046_v8 }
  0x54   : > { %1033 = vadd.xlane.f32.xlu1 %v1032_v34  ;;  %1030 = vadd.xlane.f32.xlu0 %v1029_v35  ;;  %v1083_v34 = vsel %vm956_vm0, %v742_v29, 0.0  ;;  %v745_v35 = vmul.f32 %v6137_v47, %v309_v30  ;;  %v327_v29 = vld [vmem:[%s6038_s8 + $0x1f8] sm:$0xff]  ;;  %v326_v30 = vld [vmem:[%s6038_s8 + $0x1f0] sm:$0xff] }
  0x56   : > { %v1092_v40 = vsel %vm956_vm0, %v745_v35, 0.0 }
  0x58   : > { %1039 = vadd.xlane.f32.xlu1 %v1038_v41  ;;  %1036 = vadd.xlane.f32.xlu0 %v1035_v42  ;;  %v746_v41 = vmul.f32 %v6137_v47, %v310_v38  ;;  %v6194_v42 = vrot.slane %v569_v32, %v6046_v8  ;;  %v314_v47 = vld [vmem:[%s6038_s8 + $0x190] sm:$0xff] }
  0x5a   : > { %v1095_v46 = vsel %vm956_vm0, %v746_v41, 0.0  ;;  %v751_v53 = vmul.f32 %v6194_v42, %v315_v50  ;;  %v760_v28 = vmul.f32 %v6194_v42, %v324_v23  ;;  %v762_v35 = vmul.f32 %v6194_v42, %v326_v30  ;;  %v331_v41 = vld [vmem:[%s6038_s8 + $0x218] sm:$0xff] }
  0x5c   : > { %1045 = vadd.xlane.f32.xlu1 %v1044_v49  ;;  %1042 = vadd.xlane.f32.xlu0 %v1041_v10  ;;  %v749_v49 = vmul.f32 %v6194_v42, %v313_v43  ;;  %v748_v10 = vmul.f32 %v6194_v42, %v312_v44  ;;  %v1110_v57 = vsel %vm956_vm0, %v751_v53, 0.0  ;;  %v1143_v39 = vsel %vm956_vm0, %v762_v35, 0.0  ;;  %v330_v43 = vld [vmem:[%s6038_s8 + $0x210] sm:$0xff]  ;;  %v335_v53 = vld [vmem:[%s6038_s8 + $0x238] sm:$0xff] }
  0x5e   : > { %v1104_v51 = vsel %vm956_vm0, %v749_v49, 0.0  ;;  %v1101_v52 = vsel %vm956_vm0, %v748_v10, 0.0  ;;  %v333_v49 = vld [vmem:[%s6038_s8 + $0x228] sm:$0xff]  ;;  %v332_v10 = vld [vmem:[%s6038_s8 + $0x220] sm:$0xff] }
  0x60   : > { %1051 = vadd.xlane.f32.xlu1 %v1050_v54  ;;  %1048 = vadd.xlane.f32.xlu0 %v1047_v55  ;;  %v750_v54 = vmul.f32 %v6194_v42, %v314_v47  ;;  %v317_v55 = vld [vmem:[%s6038_s8 + $0x1a8] sm:$0xff] }
  0x61   : > { %v753_v60 = vmul.f32 %v6194_v42, %v317_v55 }
  0x62   : > { %v1107_v58 = vsel %vm956_vm0, %v750_v54, 0.0  ;;  %v334_v54 = vld [vmem:[%s6038_s8 + $0x230] sm:$0xff] }
  0x63   : > { %v1116_v63 = vsel %vm956_vm0, %v753_v60, 0.0  ;;  %v337_v60 = vld [vmem:[%s6038_s8 + $0x248] sm:$0xff] }
  0x64   : > { %1057 = vadd.xlane.f32.xlu1 %v1056_v59  ;;  %1054 = vadd.xlane.f32.xlu0 %v1053_v61  ;;  %v752_v59 = vmul.f32 %v6194_v42, %v316_v56  ;;  %v319_v61 = vld [vmem:[%s6038_s8 + $0x1b8] sm:$0xff] }
  0x65   : > { %v755_v2 = vmul.f32 %v6194_v42, %v319_v61 }
  0x66   : > { %v1113_v1 = vsel %vm956_vm0, %v752_v59, 0.0  ;;  %v336_v59 = vld [vmem:[%s6038_s8 + $0x240] sm:$0xff] }
  0x67   : > { %v1122_v12 = vsel %vm956_vm0, %v755_v2, 0.0  ;;  %v773_v2 = vmul.f32 %v6251_v31, %v337_v60  ;;  %v351_v60 = vld [vmem:[%s6038_s8 + $0x2b8] sm:$0xff] }
  0x68   : > { %1063 = vadd.xlane.f32.xlu1 %v1062_v4  ;;  %1060 = vadd.xlane.f32.xlu0 %v1059_v7  ;;  %v754_v4 = vmul.f32 %v6194_v42, %v318_v62  ;;  %v321_v7 = vld [vmem:[%s6038_s8 + $0x1c8] sm:$0xff] }
  0x6a   : > { %v1119_v13 = vsel %vm956_vm0, %v754_v4, 0.0  ;;  %v772_v4 = vmul.f32 %v6251_v31, %v336_v59  ;;  %v350_v59 = vld [vmem:[%s6038_s8 + $0x2b0] sm:$0xff] }
  0x6c   : > { %1069 = vadd.xlane.f32.xlu1 %v1068_v14  ;;  %1066 = vadd.xlane.f32.xlu0 %v1065_v15  ;;  %v757_v14 = vmul.f32 %v6194_v42, %v321_v7  ;;  %v756_v15 = vmul.f32 %v6194_v42, %v320_v9  ;;  %v339_v7 = vld [vmem:[%s6038_s8 + $0x258] sm:$0xff]  ;;  %v338_v9 = vld [vmem:[%s6038_s8 + $0x250] sm:$0xff] }
  0x6d   : > { %v775_v11 = vmul.f32 %v6251_v31, %v339_v7 }
  0x6e   : > { %v1128_v18 = vsel %vm956_vm0, %v757_v14, 0.0  ;;  %v1125_v19 = vsel %vm956_vm0, %v756_v15, 0.0  ;;  %v1176_v14 = vsel %vm956_vm0, %v773_v2, 0.0  ;;  %v1173_v15 = vsel %vm956_vm0, %v772_v4, 0.0 }
  0x6f   : > { %v1182_v23 = vsel %vm956_vm0, %v775_v11, 0.0  ;;  %v353_v11 = vld [vmem:[%s6038_s8 + $0x2c8] sm:$0xff] }
  0x70   : > { %1075 = vadd.xlane.f32.xlu1 %v1074_v20  ;;  %1072 = vadd.xlane.f32.xlu0 %v1071_v21  ;;  %v759_v20 = vmul.f32 %v6194_v42, %v323_v16  ;;  %v758_v21 = vmul.f32 %v6194_v42, %v322_v17  ;;  %v774_v16 = vmul.f32 %v6251_v31, %v338_v9  ;;  %v341_v17 = vld [vmem:[%s6038_s8 + $0x268] sm:$0xff] }
  0x72   : > { %v1134_v25 = vsel %vm956_vm0, %v759_v20, 0.0  ;;  %v777_v20 = vmul.f32 %v6251_v31, %v341_v17 }
  0x74   : > { %1081 = vadd.xlane.f32.xlu1 %v1080_v26  ;;  %1078 = vadd.xlane.f32.xlu0 %v1077_v27  ;;  %v1131_v26 = vsel %vm956_vm0, %v758_v21, 0.0  ;;  %v761_v27 = vmul.f32 %v6194_v42, %v325_v22 }
  0x76   : > { %v1140_v32 = vsel %vm956_vm0, %v761_v27, 0.0 }
  0x78   : > { %1087 = vadd.xlane.f32.xlu1 %v1086_v33  ;;  %1084 = vadd.xlane.f32.xlu0 %v1083_v34  ;;  %v1137_v33 = vsel %vm956_vm0, %v760_v28, 0.0  ;;  %v763_v34 = vmul.f32 %v6194_v42, %v327_v29  ;;  %v342_v28 = vld [vmem:[%s6038_s8 + $0x270] sm:$0xff]  ;;  %v1188_v29 = vsel %vm956_vm0, %v777_v20, 0.0 }
  0x79   : > { %v778_v35 = vmul.f32 %v6251_v31, %v342_v28 }
  0x7a   : > { %v1146_v38 = vsel %vm956_vm0, %v763_v34, 0.0 }
  0x7c   : > { %1093 = vadd.xlane.f32.xlu1 %v1092_v40  ;;  %1090 = vadd.xlane.f32.xlu0 %v1089_v48  ;;  %v765_v40 = vmul.f32 %v6251_v31, %v329_v36  ;;  %v764_v48 = vmul.f32 %v6251_v31, %v328_v37  ;;  %v345_v37 = vld [vmem:[%s6038_s8 + $0x288] sm:$0xff] }
  0x7e   : > { %v1152_v42 = vsel %vm956_vm0, %v765_v40, 0.0  ;;  %v1149_v44 = vsel %vm956_vm0, %v764_v48, 0.0 }
  0x80   : > { %1099 = vadd.xlane.f32.xlu1 %v1098_v45  ;;  %1096 = vadd.xlane.f32.xlu0 %v1095_v46  ;;  %v767_v45 = vmul.f32 %v6251_v31, %v331_v41  ;;  %v766_v46 = vmul.f32 %v6251_v31, %v330_v43  ;;  %v1191_v41 = vsel %vm956_vm0, %v778_v35, 0.0  ;;  %v357_v35 = vld [vmem:[%s6038_s8 + $0x2e8] sm:$0xff] }
  0x82   : > { %v1158_v50 = vsel %vm956_vm0, %v767_v45, 0.0  ;;  %v1155_v47 = vsel %vm956_vm0, %v766_v46, 0.0 }
  0x84   : > { %1105 = vadd.xlane.f32.xlu1 %v1104_v51  ;;  %1102 = vadd.xlane.f32.xlu0 %v1101_v52  ;;  %v769_v51 = vmul.f32 %v6251_v31, %v333_v49  ;;  %v768_v52 = vmul.f32 %v6251_v31, %v332_v10 }
  0x86   : > { %v1164_v55 = vsel %vm956_vm0, %v769_v51, 0.0  ;;  %v1161_v56 = vsel %vm956_vm0, %v768_v52, 0.0  ;;  %v349_v51 = vld [vmem:[%s6038_s8 + $0x2a8] sm:$0xff]  ;;  %v348_v52 = vld [vmem:[%s6038_s8 + $0x2a0] sm:$0xff] }
  0x88   : > { %1111 = vadd.xlane.f32.xlu1 %v1110_v57  ;;  %1108 = vadd.xlane.f32.xlu0 %v1107_v58  ;;  %v771_v57 = vmul.f32 %v6251_v31, %v335_v53  ;;  %v770_v58 = vmul.f32 %v6251_v31, %v334_v54 }
  0x8c   : > { %1117 = vadd.xlane.f32.xlu1 %v1116_v63  ;;  %1114 = vadd.xlane.f32.xlu0 %v1113_v1  ;;  %v1170_v63 = vsel %vm956_vm0, %v771_v57, 0.0  ;;  %v1167_v1 = vsel %vm956_vm0, %v770_v58, 0.0 }
  0x90   : > { %1123 = vadd.xlane.f32.xlu1 %v1122_v12  ;;  %1120 = vadd.xlane.f32.xlu0 %v1119_v13 }
  0x94   : > { %1129 = vadd.xlane.f32.xlu1 %v1128_v18  ;;  %1126 = vadd.xlane.f32.xlu0 %v1125_v19  ;;  %v538_v18 = vcombine.high %v6231_v6, %v6231_v6  ;;  %v340_v19 = vld [vmem:[%s6038_s8 + $0x260] sm:$0xff]  ;;  %v343_v6 = vld [vmem:[%s6038_s8 + $0x278] sm:$0xff] }
  0x95   : > { %v779_v34 = vmul.f32 %v6251_v31, %v343_v6 }
  0x96   : > { %v6314_v27 = vrot.slane %v538_v18, %v6026_v5 }
  0x97   : > { %v1194_v48 = vsel %vm956_vm0, %v779_v34, 0.0 }
  0x98   : > { %1135 = vadd.xlane.f32.xlu1 %v1134_v25  ;;  %1132 = vadd.xlane.f32.xlu0 %v1131_v26  ;;  %v1179_v25 = vsel %vm956_vm0, %v774_v16, 0.0  ;;  %v776_v26 = vmul.f32 %v6251_v31, %v340_v19  ;;  %v6328_v36 = vrot.slane %v6314_v27, %v6046_v8 }
  0x9a   : > { %v781_v31 = vmul.f32 %v6328_v36, %v345_v37  ;;  %v785_v57 = vmul.f32 %v6328_v36, %v349_v51  ;;  %v784_v58 = vmul.f32 %v6328_v36, %v348_v52  ;;  %v787_v7 = vmul.f32 %v6328_v36, %v351_v60  ;;  %v356_v37 = vld [vmem:[%s6038_s8 + $0x2e0] sm:$0xff] }
  0x9b   : > { %v786_v9 = vmul.f32 %v6328_v36, %v350_v59  ;;  %v789_v19 = vmul.f32 %v6328_v36, %v353_v11  ;;  %v362_v11 = vld [vmem:[%s6038_s8 + $0x310] sm:$0xff] }
  0x9c   : > { %1141 = vadd.xlane.f32.xlu1 %v1140_v32  ;;  %1138 = vadd.xlane.f32.xlu0 %v1137_v33  ;;  %v1185_v33 = vsel %vm956_vm0, %v776_v26, 0.0  ;;  %v1200_v49 = vsel %vm956_vm0, %v781_v31, 0.0  ;;  %v1212_v2 = vsel %vm956_vm0, %v785_v57, 0.0  ;;  %v1209_v4 = vsel %vm956_vm0, %v784_v58, 0.0  ;;  %v361_v57 = vld [vmem:[%s6038_s8 + $0x308] sm:$0xff]  ;;  %v360_v58 = vld [vmem:[%s6038_s8 + $0x300] sm:$0xff] }
  0x9d   : > { %v1218_v17 = vsel %vm956_vm0, %v787_v7, 0.0  ;;  %v1215_v18 = vsel %vm956_vm0, %v786_v9, 0.0  ;;  %v1224_v28 = vsel %vm956_vm0, %v789_v19, 0.0  ;;  %v363_v9 = vld [vmem:[%s6038_s8 + $0x318] sm:$0xff] }
  0xa0   : > { %1147 = vadd.xlane.f32.xlu1 %v1146_v38  ;;  %1144 = vadd.xlane.f32.xlu0 %v1143_v39  ;;  %v344_v38 = vld [vmem:[%s6038_s8 + $0x280] sm:$0xff] }
  0xa1   : > { %v780_v43 = vmul.f32 %v6328_v36, %v344_v38  ;;  %v793_v38 = vmul.f32 %v6328_v36, %v357_v35 }
  0xa3   : > { %v1197_v10 = vsel %vm956_vm0, %v780_v43, 0.0 }
  0xa4   : > { %1153 = vadd.xlane.f32.xlu1 %v1152_v42  ;;  %1150 = vadd.xlane.f32.xlu0 %v1149_v44  ;;  %v347_v42 = vld [vmem:[%s6038_s8 + $0x298] sm:$0xff]  ;;  %v346_v44 = vld [vmem:[%s6038_s8 + $0x290] sm:$0xff] }
  0xa8   : > { %1159 = vadd.xlane.f32.xlu1 %v1158_v50  ;;  %1156 = vadd.xlane.f32.xlu0 %v1155_v47  ;;  %v783_v50 = vmul.f32 %v6328_v36, %v347_v42  ;;  %v782_v47 = vmul.f32 %v6328_v36, %v346_v44  ;;  %v792_v42 = vmul.f32 %v6328_v36, %v356_v37 }
  0xa9   : > { %v568_v44 = vcombine.high %v6241_v24, %v6241_v24 }
  0xaa   : > { %v1233_v52 = vsel %vm956_vm0, %v792_v42, 0.0 }
  0xab   : > { %v6413_v24 = vrot.slane %v568_v44, %v6046_v8 }
  0xac   : > { %1165 = vadd.xlane.f32.xlu1 %v1164_v55  ;;  %1162 = vadd.xlane.f32.xlu0 %v1161_v56  ;;  %v1206_v55 = vsel %vm956_vm0, %v783_v50, 0.0  ;;  %v1203_v56 = vsel %vm956_vm0, %v782_v47, 0.0  ;;  %v1236_v50 = vsel %vm956_vm0, %v793_v38, 0.0 }
  0xad   : > { %v6283_v61 = vpop.xlane.xlu1 %964  ;;  %v6285_v62 = vpop.xlane.xlu0 %958  ;;  %v797_v7 = vmul.f32 %v6413_v24, %v361_v57 }
  0xb0   : > { %1171 = vadd.xlane.f32.xlu1 %v1170_v63  ;;  %1168 = vadd.xlane.f32.xlu0 %v1167_v1 }
  0xb1   : > { %v6294_v12 = vpop.xlane.xlu1 %967  ;;  %v6296_v13 = vpop.xlane.xlu0 %961 }
  0xb4   : > { %1177 = vadd.xlane.f32.xlu1 %v1176_v14  ;;  %1174 = vadd.xlane.f32.xlu0 %v1173_v15  ;;  %v352_v14 = vld [vmem:[%s6038_s8 + $0x2c0] sm:$0xff] }
  0xb5   : > { %v6306_v21 = vpop.xlane.xlu1 %973  ;;  %v6308_v22 = vpop.xlane.xlu0 %970  ;;  %v788_v20 = vmul.f32 %v6328_v36, %v352_v14 }
  0xb8   : > { %1183 = vadd.xlane.f32.xlu1 %v1182_v23  ;;  %1180 = vadd.xlane.f32.xlu0 %v1179_v25  ;;  %v355_v23 = vld [vmem:[%s6038_s8 + $0x2d8] sm:$0xff]  ;;  %v354_v25 = vld [vmem:[%s6038_s8 + $0x2d0] sm:$0xff] }
  0xb9   : > { %v6319_v30 = vpop.xlane.xlu1 %979  ;;  %v6321_v32 = vpop.xlane.xlu0 %976  ;;  %v790_v34 = vmul.f32 %v6328_v36, %v354_v25  ;;  %v365_v25 = vld [vmem:[%s6038_s8 + $0x328] sm:$0xff] }
  0xba   : > { %v801_v37 = vmul.f32 %v6413_v24, %v365_v25 }
  0xbb   : > { %v1227_v43 = vsel %vm956_vm0, %v790_v34, 0.0 }
  0xbc   : > { %1189 = vadd.xlane.f32.xlu1 %v1188_v29  ;;  %1186 = vadd.xlane.f32.xlu0 %v1185_v33  ;;  %v1221_v29 = vsel %vm956_vm0, %v788_v20, 0.0  ;;  %v791_v33 = vmul.f32 %v6328_v36, %v355_v23  ;;  %v799_v20 = vmul.f32 %v6413_v24, %v363_v9  ;;  %v798_v23 = vmul.f32 %v6413_v24, %v362_v11  ;;  %v371_v9 = vld [vmem:[%s6038_s8 + $0x358] sm:$0xff]  ;;  %v370_v11 = vld [vmem:[%s6038_s8 + $0x350] sm:$0xff] }
  0xbd   : > { %v6332_v39 = vpop.xlane.xlu1 %985  ;;  %v6334_v40 = vpop.xlane.xlu0 %982  ;;  %v807_v25 = vmul.f32 %v6413_v24, %v371_v9 }
  0xbe   : > { %v1230_v31 = vsel %vm956_vm0, %v791_v33, 0.0  ;;  %v1254_v34 = vsel %vm956_vm0, %v799_v20, 0.0  ;;  %v1251_v35 = vsel %vm956_vm0, %v798_v23, 0.0 }
  0xc0   : > { %1195 = vadd.xlane.f32.xlu1 %v1194_v48  ;;  %1192 = vadd.xlane.f32.xlu0 %v1191_v41 }
  0xc1   : > { %v6342_v45 = vpop.xlane.xlu1 %991  ;;  %v6344_v46 = vpop.xlane.xlu0 %988 }
  0xc4   : > { %1201 = vadd.xlane.f32.xlu1 %v1200_v49  ;;  %1198 = vadd.xlane.f32.xlu0 %v1197_v10  ;;  %v359_v49 = vld [vmem:[%s6038_s8 + $0x2f8] sm:$0xff]  ;;  %v358_v10 = vld [vmem:[%s6038_s8 + $0x2f0] sm:$0xff] }
  0xc5   : > { %v6352_v53 = vpop.xlane.xlu1 %997  ;;  %v6354_v54 = vpop.xlane.xlu0 %994 }
  0xc8   : > { %1207 = vadd.xlane.f32.xlu1 %v1206_v55  ;;  %1204 = vadd.xlane.f32.xlu0 %v1203_v56  ;;  %v795_v55 = vmul.f32 %v6328_v36, %v359_v49  ;;  %v794_v56 = vmul.f32 %v6328_v36, %v358_v10  ;;  %v796_v36 = vmul.f32 %v6413_v24, %v360_v58  ;;  %v1260_v49 = vsel %vm956_vm0, %v801_v37, 0.0 }
  0xc9   : > { %v6362_v63 = vpop.xlane.xlu1 %1003  ;;  %v6364_v1 = vpop.xlane.xlu0 %1000 }
  0xca   : > { %v1245_v19 = vsel %vm956_vm0, %v796_v36, 0.0 }
  0xcc   : > { %1213 = vadd.xlane.f32.xlu1 %v1212_v2  ;;  %1210 = vadd.xlane.f32.xlu0 %v1209_v4  ;;  %v1242_v2 = vsel %vm956_vm0, %v795_v55, 0.0  ;;  %v1239_v4 = vsel %vm956_vm0, %v794_v56, 0.0  ;;  %v369_v55 = vld [vmem:[%s6038_s8 + $0x348] sm:$0xff]  ;;  %v368_v56 = vld [vmem:[%s6038_s8 + $0x340] sm:$0xff] }
  0xcd   : > { %v6372_v15 = vpop.xlane.xlu1 %1009  ;;  %v6374_v16 = vpop.xlane.xlu0 %1006  ;;  %v804_v36 = vmul.f32 %v6413_v24, %v368_v56 }
  0xcf   : > { %v1269_v23 = vsel %vm956_vm0, %v804_v36, 0.0 }
  0xd0   : > { %1219 = vadd.xlane.f32.xlu1 %v1218_v17  ;;  %1216 = vadd.xlane.f32.xlu0 %v1215_v18  ;;  %v1248_v18 = vsel %vm956_vm0, %v797_v7, 0.0  ;;  %v805_v7 = vmul.f32 %v6413_v24, %v369_v55  ;;  %v374_v55 = vld [vmem:[%s6038_s8 + $0x370] sm:$0xff] }
  0xd1   : > { %v6382_v26 = vpop.xlane.xlu1 %1015  ;;  %v6384_v6 = vpop.xlane.xlu0 %1012  ;;  %v810_v9 = vmul.f32 %v6413_v24, %v374_v55 }
  0xd2   : > { %v1272_v20 = vsel %vm956_vm0, %v805_v7, 0.0 }
  0xd4   : > { %1225 = vadd.xlane.f32.xlu1 %v1224_v28  ;;  %1222 = vadd.xlane.f32.xlu0 %v1221_v29  ;;  %v364_v28 = vld [vmem:[%s6038_s8 + $0x320] sm:$0xff] }
  0xd5   : > { %v6393_v48 = vpop.xlane.xlu1 %1021  ;;  %v6395_v41 = vpop.xlane.xlu0 %1018  ;;  %v800_v38 = vmul.f32 %v6413_v24, %v364_v28  ;;  %v806_v28 = vmul.f32 %v6413_v24, %v370_v11  ;;  %v377_v11 = vld [vmem:[%s6038_s8 + $0x388] sm:$0xff] }
  0xd7   : > { %v1257_v10 = vsel %vm956_vm0, %v800_v38, 0.0 }
  0xd8   : > { %1231 = vadd.xlane.f32.xlu1 %v1230_v31  ;;  %1228 = vadd.xlane.f32.xlu0 %v1227_v43  ;;  %v367_v31 = vld [vmem:[%s6038_s8 + $0x338] sm:$0xff]  ;;  %v366_v43 = vld [vmem:[%s6038_s8 + $0x330] sm:$0xff] }
  0xd9   : > { %v6405_v47 = vpop.xlane.xlu1 %1027  ;;  %v6407_v51 = vpop.xlane.xlu0 %1024 }
  0xdc   : > { %1237 = vadd.xlane.f32.xlu1 %v1236_v50  ;;  %1234 = vadd.xlane.f32.xlu0 %v1233_v52  ;;  %v803_v50 = vmul.f32 %v6413_v24, %v367_v31  ;;  %v802_v52 = vmul.f32 %v6413_v24, %v366_v43  ;;  %v1278_v43 = vsel %vm956_vm0, %v807_v25, 0.0 }
  0xdd   : > { %v6417_v60 = vpop.xlane.xlu1 %1033  ;;  %v6419_v59 = vpop.xlane.xlu0 %1030 }
  0xe0   : > { %1243 = vadd.xlane.f32.xlu1 %v1242_v2  ;;  %1240 = vadd.xlane.f32.xlu0 %v1239_v4  ;;  %v1266_v2 = vsel %vm956_vm0, %v803_v50, 0.0  ;;  %v1263_v4 = vsel %vm956_vm0, %v802_v52, 0.0  ;;  %v570_v50 = vcombine.high %v6314_v27, %v6314_v27  ;;  %v375_v52 = vld [vmem:[%s6038_s8 + $0x378] sm:$0xff] }
  0xe1   : > { %v6427_v14 = vpop.xlane.xlu1 %1039  ;;  %v6429_v17 = vpop.xlane.xlu0 %1036  ;;  %v811_v36 = vmul.f32 %v6413_v24, %v375_v52 }
  0xe2   : > { %9633 = vst [vmem:[#allocation5_spill] sm:$0xff] %v6427_v14  ;;  %9634 = vst [vmem:[#allocation6_spill] sm:$0xff] %v6429_v17  ;;  %v6498_v27 = vrot.slane %v570_v50, %v6046_v8 }
  0xe4   : > { %1249 = vadd.xlane.f32.xlu1 %v1248_v18  ;;  %1246 = vadd.xlane.f32.xlu0 %v1245_v19 }
  0xe5   : > { %v6437_v29 = vpop.xlane.xlu1 %1045  ;;  %v6439_v33 = vpop.xlane.xlu0 %1042 }
  0xe6   : > { %9635 = vst [vmem:[#allocation7_spill] sm:$0xff] %v6437_v29  ;;  %9636 = vst [vmem:[#allocation8_spill] sm:$0xff] %v6439_v33 }
  0xe8   : > { %1255 = vadd.xlane.f32.xlu1 %v1254_v34  ;;  %1252 = vadd.xlane.f32.xlu0 %v1251_v35  ;;  %v373_v34 = vld [vmem:[%s6038_s8 + $0x368] sm:$0xff]  ;;  %v372_v35 = vld [vmem:[%s6038_s8 + $0x360] sm:$0xff] }
  0xe9   : > { %v6447_v42 = vpop.xlane.xlu1 %1051  ;;  %v6449_v44 = vpop.xlane.xlu0 %1048  ;;  %v809_v37 = vmul.f32 %v6413_v24, %v373_v34  ;;  %v1287_v34 = vsel %vm956_vm0, %v810_v9, 0.0 }
  0xea   : > { %9637 = vst [vmem:[#allocation9_spill] sm:$0xff] %v6447_v42  ;;  %9638 = vst [vmem:[#allocation10_spill] sm:$0xff] %v6449_v44 }
  0xeb   : > { %v1284_v56 = vsel %vm956_vm0, %v809_v37, 0.0  ;;  %v379_v37 = vld [vmem:[%s6038_s8 + $0x398] sm:$0xff] }
  0xec   : > { %1261 = vadd.xlane.f32.xlu1 %v1260_v49  ;;  %1258 = vadd.xlane.f32.xlu0 %v1257_v10  ;;  %v1275_v49 = vsel %vm956_vm0, %v806_v28, 0.0  ;;  %v808_v10 = vmul.f32 %v6413_v24, %v372_v35  ;;  %v1290_v28 = vsel %vm956_vm0, %v811_v36, 0.0  ;;  %v813_v35 = vmul.f32 %v6498_v27, %v377_v11  ;;  %v380_v36 = vld [vmem:[%s6038_s8 + $0x3a0] sm:$0xff] }
  0xed   : > { %v6457_v57 = vpop.xlane.xlu1 %1057  ;;  %v6459_v58 = vpop.xlane.xlu0 %1054  ;;  %v815_v55 = vmul.f32 %v6498_v27, %v379_v37  ;;  %v382_v37 = vld [vmem:[%s6038_s8 + $0x3b0] sm:$0xff] }
  0xee   : > { %9639 = vst [vmem:[#allocation11_spill] sm:$0xff] %v6457_v57  ;;  %9640 = vst [vmem:[#allocation12_spill] sm:$0xff] %v6459_v58  ;;  %v1281_v7 = vsel %vm956_vm0, %v808_v10, 0.0  ;;  %v1296_v50 = vsel %vm956_vm0, %v813_v35, 0.0  ;;  %v816_v35 = vmul.f32 %v6498_v27, %v380_v36  ;;  %v385_v36 = vld [vmem:[%s6038_s8 + $0x3c8] sm:$0xff] }
  0xf0   : > { %1267 = vadd.xlane.f32.xlu1 %v1266_v2  ;;  %1264 = vadd.xlane.f32.xlu0 %v1263_v4 }
  0xf1   : > { %v6467_v18 = vpop.xlane.xlu1 %1063  ;;  %v6469_v19 = vpop.xlane.xlu0 %1060 }
  0xf2   : > { %9641 = vst [vmem:[#allocation13_spill] sm:$0xff] %v6467_v18  ;;  %9642 = vst [vmem:[#allocation14_spill] sm:$0xff] %v6469_v19 }
  0xf4   : > { %1273 = vadd.xlane.f32.xlu1 %v1272_v20  ;;  %1270 = vadd.xlane.f32.xlu0 %v1269_v23  ;;  %v376_v20 = vld [vmem:[%s6038_s8 + $0x380] sm:$0xff] }
  0xf5   : > { %v6478_v38 = vpop.xlane.xlu1 %1069  ;;  %v6480_v31 = vpop.xlane.xlu0 %1066  ;;  %v812_v24 = vmul.f32 %v6498_v27, %v376_v20  ;;  %v1302_v20 = vsel %vm956_vm0, %v815_v55, 0.0  ;;  %v1305_v55 = vsel %vm956_vm0, %v816_v35, 0.0 }
  0xf6   : > { %9643 = vst [vmem:[#allocation15_spill] sm:$0xff] %v6478_v38  ;;  %9644 = vst [vmem:[#allocation16_spill] sm:$0xff] %v6480_v31 }
  0xf7   : > { %v1293_v52 = vsel %vm956_vm0, %v812_v24, 0.0  ;;  %v383_v24 = vld [vmem:[%s6038_s8 + $0x3b8] sm:$0xff] }
  0xf8   : > { %1279 = vadd.xlane.f32.xlu1 %v1278_v43  ;;  %1276 = vadd.xlane.f32.xlu0 %v1275_v49  ;;  %v378_v43 = vld [vmem:[%s6038_s8 + $0x390] sm:$0xff] }
  0xf9   : > { %v6490_v2 = vpop.xlane.xlu1 %1075  ;;  %v6492_v4 = vpop.xlane.xlu0 %1072 }
  0xfa   : > { %9645 = vst [vmem:[#allocation17_spill] sm:$0xff] %v6490_v2  ;;  %9646 = vst [vmem:[#allocation18_spill] sm:$0xff] %v6492_v4 }
  0xfc   : > { %1285 = vadd.xlane.f32.xlu1 %v1284_v56  ;;  %1282 = vadd.xlane.f32.xlu0 %v1281_v7  ;;  %v814_v56 = vmul.f32 %v6498_v27, %v378_v43  ;;  %v381_v7 = vld [vmem:[%s6038_s8 + $0x3a8] sm:$0xff] }
  0xfd   : > { %v6502_v23 = vpop.xlane.xlu1 %1081  ;;  %v6504_v25 = vpop.xlane.xlu0 %1078 }
  0xfe   : > { %9647 = vst [vmem:[#allocation19_spill] sm:$0xff] %v6502_v23  ;;  %9648 = vst [vmem:[#allocation20_spill] sm:$0xff] %v6504_v25 }
 0x100   : > { %1291 = vadd.xlane.f32.xlu1 %v1290_v28  ;;  %1288 = vadd.xlane.f32.xlu0 %v1287_v34  ;;  %v1299_v28 = vsel %vm956_vm0, %v814_v56, 0.0  ;;  %v817_v34 = vmul.f32 %v6498_v27, %v381_v7  ;;  %v819_v56 = vmul.f32 %v6498_v27, %v383_v24  ;;  %v818_v7 = vmul.f32 %v6498_v27, %v382_v37  ;;  %v386_v37 = vld [vmem:[%s6038_s8 + $0x3d0] sm:$0xff] }
 0x101   : > { %v6512_v49 = vpop.xlane.xlu1 %1087  ;;  %v6514_v10 = vpop.xlane.xlu0 %1084  ;;  %v820_v24 = vmul.f32 %v6498_v27, %v384_v0  ;;  %v822_v0 = vmul.f32 %v6498_v27, %v386_v37 }
 0x102   : > { %9649 = vst [vmem:[#allocation21_spill] sm:$0xff] %v6512_v49  ;;  %9650 = vst [vmem:[#allocation22_spill] sm:$0xff] %v6514_v10  ;;  %v1311_v35 = vsel %vm956_vm0, %v818_v7, 0.0  ;;  %v394_v10 = vld [vmem:[%s6038_s8 + $0x410] sm:$0xff] }
 0x104   : > { %1297 = vadd.xlane.f32.xlu1 %v1296_v50  ;;  %1294 = vadd.xlane.f32.xlu0 %v1293_v52  ;;  %v1308_v52 = vsel %vm956_vm0, %v817_v34, 0.0  ;;  %v1314_v34 = vsel %vm956_vm0, %v819_v56, 0.0  ;;  %v1317_v56 = vsel %vm956_vm0, %v820_v24, 0.0 }
 0x105   : > { %v6522_v9 = vpop.xlane.xlu1 %1093  ;;  %v6524_v11 = vpop.xlane.xlu0 %1090 }
 0x106   : > { %9651 = vst [vmem:[#allocation23_spill] sm:$0xff] %v6522_v9  ;;  %9652 = vst [vmem:[#allocation24_spill] sm:$0xff] %v6524_v11  ;;  %v6553_v11 = vld [vmem:[%s6033_s4 + $0x8] sm:$0xff]  ;;  %s5939_s4 = smov [#allocation2]  }
 0x107   : > { %s5863_s5 = sshll.u32 %s5939_s4, 4  ;;  %s5864_s5 = int_to_ptr.vmem [resolvable:$false] %s5863_s5 }
 0x108   : > { %1303 = vadd.xlane.f32.xlu1 %v1302_v20  ;;  %1300 = vadd.xlane.f32.xlu0 %v1299_v28  ;;  %v821_v20 = vmul.f32 %v6498_v27, %v385_v36  ;;  %s5865_s6 = scalar_lea.vmem %s5864_s5, 512  ;;  %p5866_p2 = scmp.lt.s32.totalorder %s9552_s26, %s5864_s5 }
 0x109   : > { %v6532_v43 = vpop.xlane.xlu1 %1099  ;;  %v6534_v50 = vpop.xlane.xlu0 %1096  ;;  %p5867_p3 = scmp.lt.s32.totalorder %s5865_s6, %s5859_s30 }
 0x10a   : > { %9653 = vst [vmem:[#allocation25_spill] sm:$0xff] %v6532_v43  ;;  %9654 = vst [vmem:[#allocation26_spill] sm:$0xff] %v6534_v50  ;;  %v387_v43 = vld [vmem:[%s6038_s8 + $0x3d8] sm:$0xff] }
 0x10b   : > { %v823_v7 = vmul.f32 %v6498_v27, %v387_v43  ;;  %v1323_v43 = vsel %vm956_vm0, %v822_v0, 0.0  ;;  %p5868_p5 = por %p5867_p3, %p5866_p2 }
 0x10c   : > { %1309 = vadd.xlane.f32.xlu1 %v1308_v52  ;;  %1306 = vadd.xlane.f32.xlu0 %v1305_v55  ;;  %v1320_v52 = vsel %vm956_vm0, %v821_v20, 0.0 }
 0x10d   : > { %v6543_v28 = vpop.xlane.xlu1 %1105  ;;  %v6545_v50 = vpop.xlane.xlu0 %1102  ;;  %v1326_v24 = vsel %vm956_vm0, %v823_v7, 0.0  ;;  %p5869_p6 = pnand %p5868_p5, %p5862_p1 }
 0x10e   : > { %9655 = vst [vmem:[#allocation27_spill] sm:$0xff] %v6543_v28  ;;  %9656 = vst [vmem:[#allocation28_spill] sm:$0xff] %v6545_v50  ;;  %v389_v50 = vld [vmem:[%s6038_s8 + $0x3e8] sm:$0xff]  ;;  %v6566_v28 = vrot.slane %v6553_v11, %v6026_v5 }
 0x10f   : > { %v825_v20 = vmul.f32 %v6498_v27, %v389_v50 }
 0x110   : > { %1315 = vadd.xlane.f32.xlu1 %v1314_v34  ;;  %1312 = vadd.xlane.f32.xlu0 %v1311_v35  ;;  %v388_v34 = vld [vmem:[%s6038_s8 + $0x3e0] sm:$0xff] }
 0x111   : > { %v6556_v55 = vpop.xlane.xlu1 %1111  ;;  %v6558_v36 = vpop.xlane.xlu0 %1108  ;;  %v824_v37 = vmul.f32 %v6498_v27, %v388_v34  ;;  %v1332_v50 = vsel %vm956_vm0, %v825_v20, 0.0 }
 0x112   : > { %9657 = vst [vmem:[#allocation29_spill] sm:$0xff] %v6556_v55  ;;  %9658 = vst [vmem:[#allocation30_spill] sm:$0xff] %v6558_v36  ;;  %v6579_v55 = vrot.slane %v6566_v28, %v6026_v5 }
 0x113   : > { %v1329_v7 = vsel %vm956_vm0, %v824_v37, 0.0 }
 0x114   : > { %1321 = vadd.xlane.f32.xlu1 %v1320_v52  ;;  %1318 = vadd.xlane.f32.xlu0 %v1317_v56  ;;  %v391_v52 = vld [vmem:[%s6038_s8 + $0x3f8] sm:$0xff]  ;;  %v390_v56 = vld [vmem:[%s6038_s8 + $0x3f0] sm:$0xff]  ;;  %v6593_v9 = vrot.slane %v6579_v55, %v6046_v8 }
 0x115   : > { %v6570_v35 = vpop.xlane.xlu1 %1117  ;;  %v6572_v36 = vpop.xlane.xlu0 %1114  ;;  %v827_v0 = vmul.f32 %v6498_v27, %v391_v52  ;;  %v826_v34 = vmul.f32 %v6498_v27, %v390_v56 }
 0x116   : > { %9659 = vst [vmem:[#allocation31_spill] sm:$0xff] %v6570_v35  ;;  %9660 = vst [vmem:[#allocation32_spill] sm:$0xff] %v6572_v36 }
 0x117   : > { %v1338_v37 = vsel %vm956_vm0, %v827_v0, 0.0  ;;  %v1335_v52 = vsel %vm956_vm0, %v826_v34, 0.0 }
 0x118   : > { %1327 = vadd.xlane.f32.xlu1 %v1326_v24  ;;  %1324 = vadd.xlane.f32.xlu0 %v1323_v43  ;;  %v393_v24 = vld [vmem:[%s6038_s8 + $0x408] sm:$0xff]  ;;  %v392_v43 = vld [vmem:[%s6038_s8 + $0x400] sm:$0xff] }
 0x119   : > { %v6584_v35 = vpop.xlane.xlu1 %1123  ;;  %v6586_v36 = vpop.xlane.xlu0 %1120  ;;  %v829_v27 = vmul.f32 %v6593_v9, %v393_v24  ;;  %v828_v56 = vmul.f32 %v6593_v9, %v392_v43  ;;  %v830_v24 = vmul.f32 %v6593_v9, %v394_v10  ;;  %v396_v43 = vld [vmem:[%s6038_s8 + $0x420] sm:$0xff]  ;;  %v398_v10 = vld [vmem:[%s6038_s8 + $0x430] sm:$0xff] }
 0x11a   : > { %9661 = vst [vmem:[#allocation33_spill] sm:$0xff] %v6584_v35  ;;  %9662 = vst [vmem:[#allocation34_spill] sm:$0xff] %v6586_v36  ;;  %v395_v36 = vld [vmem:[%s6038_s8 + $0x418] sm:$0xff] }
 0x11b   : > { %v1341_v0 = vsel %vm956_vm0, %v828_v56, 0.0  ;;  %v831_v34 = vmul.f32 %v6593_v9, %v395_v36  ;;  %v832_v36 = vmul.f32 %v6593_v9, %v396_v43  ;;  %v400_v43 = vld [vmem:[%s6038_s8 + $0x440] sm:$0xff] }
 0x11c   : > { %1333 = vadd.xlane.f32.xlu1 %v1332_v50  ;;  %1330 = vadd.xlane.f32.xlu0 %v1329_v7 }
 0x11d   : > { %v6597_v20 = vpop.xlane.xlu1 %1129  ;;  %v6599_v35 = vpop.xlane.xlu0 %1126 }
 0x11e   : > { %9663 = vst [vmem:[#allocation35_spill] sm:$0xff] %v6597_v20  ;;  %9664 = vst [vmem:[#allocation36_spill] sm:$0xff] %v6599_v35  ;;  %v1344_v35 = vsel %vm956_vm0, %v829_v27, 0.0  ;;  %v397_v20 = vld [vmem:[%s6038_s8 + $0x428] sm:$0xff]  ;;  %v1347_v27 = vsel %vm956_vm0, %v830_v24, 0.0 }
 0x11f   : > { %v833_v56 = vmul.f32 %v6593_v9, %v397_v20  ;;  %v834_v20 = vmul.f32 %v6593_v9, %v398_v10  ;;  %v402_v10 = vld [vmem:[%s6038_s8 + $0x450] sm:$0xff] }
 0x120   : > { %1339 = vadd.xlane.f32.xlu1 %v1338_v37  ;;  %1336 = vadd.xlane.f32.xlu0 %v1335_v52 }
 0x121   : > { %v6607_v50 = vpop.xlane.xlu1 %1135  ;;  %v6609_v7 = vpop.xlane.xlu0 %1132 }
 0x122   : > { %9665 = vst [vmem:[#allocation37_spill] sm:$0xff] %v6607_v50  ;;  %9666 = vst [vmem:[#allocation38_spill] sm:$0xff] %v6609_v7  ;;  %v1350_v7 = vsel %vm956_vm0, %v831_v34, 0.0  ;;  %v399_v50 = vld [vmem:[%s6038_s8 + $0x438] sm:$0xff]  ;;  %v1353_v34 = vsel %vm956_vm0, %v832_v36, 0.0  ;;  %v1359_v36 = vsel %vm956_vm0, %v834_v20, 0.0  ;;  %v838_v20 = vmul.f32 %v6593_v9, %v402_v10 }
 0x123   : > { %v835_v24 = vmul.f32 %v6593_v9, %v399_v50  ;;  %v836_v50 = vmul.f32 %v6593_v9, %v400_v43  ;;  %v586_v43 = vcombine.high %v6566_v28, %v6566_v28  ;;  %v407_v28 = vld [vmem:[%s6038_s8 + $0x478] sm:$0xff] }
 0x124   : > { %1345 = vadd.xlane.f32.xlu1 %v1344_v35  ;;  %1342 = vadd.xlane.f32.xlu0 %v1341_v0 }
 0x125   : > { %v6617_v37 = vpop.xlane.xlu1 %1141  ;;  %v6619_v52 = vpop.xlane.xlu0 %1138 }
 0x126   : > { %9667 = vst [vmem:[#allocation39_spill] sm:$0xff] %v6617_v37  ;;  %9668 = vst [vmem:[#allocation40_spill] sm:$0xff] %v6619_v52  ;;  %v1356_v52 = vsel %vm956_vm0, %v833_v56, 0.0  ;;  %v401_v37 = vld [vmem:[%s6038_s8 + $0x448] sm:$0xff]  ;;  %v1362_v56 = vsel %vm956_vm0, %v835_v24, 0.0 }
 0x128   : > { %1351 = vadd.xlane.f32.xlu1 %v1350_v7  ;;  %1348 = vadd.xlane.f32.xlu0 %v1347_v27  ;;  %v837_v7 = vmul.f32 %v6593_v9, %v401_v37 }
 0x129   : > { %v6627_v35 = vpop.xlane.xlu1 %1147  ;;  %v6629_v0 = vpop.xlane.xlu0 %1144 }
 0x12a   : > { %9669 = vst [vmem:[#allocation41_spill] sm:$0xff] %v6627_v35  ;;  %9670 = vst [vmem:[#allocation42_spill] sm:$0xff] %v6629_v0  ;;  %v403_v0 = vld [vmem:[%s6038_s8 + $0x458] sm:$0xff] }
 0x12b   : > { %v839_v24 = vmul.f32 %v6593_v9, %v403_v0  ;;  %v1371_v0 = vsel %vm956_vm0, %v838_v20, 0.0  ;;  %v843_v20 = vmul.f32 %v6593_v9, %v407_v28 }
 0x12c   : > { %1357 = vadd.xlane.f32.xlu1 %v1356_v52  ;;  %1354 = vadd.xlane.f32.xlu0 %v1353_v34  ;;  %v1368_v52 = vsel %vm956_vm0, %v837_v7, 0.0 }
 0x12d   : > { %v6638_v27 = vpop.xlane.xlu1 %1153  ;;  %v6640_v35 = vpop.xlane.xlu0 %1150 }
 0x12e   : > { %9671 = vst [vmem:[#allocation43_spill] sm:$0xff] %v6638_v27  ;;  %9672 = vst [vmem:[#allocation44_spill] sm:$0xff] %v6640_v35  ;;  %v1365_v35 = vsel %vm956_vm0, %v836_v50, 0.0  ;;  %v405_v27 = vld [vmem:[%s6038_s8 + $0x468] sm:$0xff]  ;;  %v1374_v50 = vsel %vm956_vm0, %v839_v24, 0.0 }
 0x12f   : > { %v841_v7 = vmul.f32 %v6593_v9, %v405_v27 }
 0x130   : > { %1363 = vadd.xlane.f32.xlu1 %v1362_v56  ;;  %1360 = vadd.xlane.f32.xlu0 %v1359_v36  ;;  %v404_v56 = vld [vmem:[%s6038_s8 + $0x460] sm:$0xff] }
 0x131   : > { %v6648_v34 = vpop.xlane.xlu1 %1159  ;;  %v6650_v37 = vpop.xlane.xlu0 %1156  ;;  %v840_v10 = vmul.f32 %v6593_v9, %v404_v56 }
 0x132   : > { %9673 = vst [vmem:[#allocation45_spill] sm:$0xff] %v6648_v34  ;;  %9674 = vst [vmem:[#allocation46_spill] sm:$0xff] %v6650_v37  ;;  %v6668_v34 = vrot.slane %v586_v43, %v6026_v5 }
 0x133   : > { %v1377_v24 = vsel %vm956_vm0, %v840_v10, 0.0  ;;  %v1386_v10 = vsel %vm956_vm0, %v843_v20, 0.0 }
 0x134   : > { %1369 = vadd.xlane.f32.xlu1 %v1368_v52  ;;  %1366 = vadd.xlane.f32.xlu0 %v1365_v35  ;;  %v406_v52 = vld [vmem:[%s6038_s8 + $0x470] sm:$0xff]  ;;  %v1380_v35 = vsel %vm956_vm0, %v841_v7, 0.0  ;;  %v6682_v43 = vrot.slane %v6668_v34, %v6046_v8 }
 0x135   : > { %v6660_v36 = vpop.xlane.xlu1 %1165  ;;  %v6662_v37 = vpop.xlane.xlu0 %1162  ;;  %v842_v56 = vmul.f32 %v6593_v9, %v406_v52 }
 0x136   : > { %9675 = vst [vmem:[#allocation47_spill] sm:$0xff] %v6660_v36  ;;  %9676 = vst [vmem:[#allocation48_spill] sm:$0xff] %v6662_v37  ;;  %v410_v36 = vld [vmem:[%s6038_s8 + $0x490] sm:$0xff] }
 0x137   : > { %v1383_v28 = vsel %vm956_vm0, %v842_v56, 0.0 }
 0x138   : > { %1375 = vadd.xlane.f32.xlu1 %v1374_v50  ;;  %1372 = vadd.xlane.f32.xlu0 %v1371_v0  ;;  %v409_v50 = vld [vmem:[%s6038_s8 + $0x488] sm:$0xff]  ;;  %v408_v0 = vld [vmem:[%s6038_s8 + $0x480] sm:$0xff] }
 0x139   : > { %v6673_v27 = vpop.xlane.xlu1 %1171  ;;  %v6675_v37 = vpop.xlane.xlu0 %1168  ;;  %v845_v9 = vmul.f32 %v6682_v43, %v409_v50  ;;  %v844_v52 = vmul.f32 %v6682_v43, %v408_v0  ;;  %v846_v50 = vmul.f32 %v6682_v43, %v410_v36  ;;  %v412_v0 = vld [vmem:[%s6038_s8 + $0x4a0] sm:$0xff]  ;;  %v414_v36 = vld [vmem:[%s6038_s8 + $0x4b0] sm:$0xff] }
 0x13a   : > { %9677 = vst [vmem:[#allocation49_spill] sm:$0xff] %v6673_v27  ;;  %9678 = vst [vmem:[#allocation50_spill] sm:$0xff] %v6675_v37  ;;  %v411_v37 = vld [vmem:[%s6038_s8 + $0x498] sm:$0xff] }
 0x13b   : > { %v1389_v20 = vsel %vm956_vm0, %v844_v52, 0.0  ;;  %v847_v56 = vmul.f32 %v6682_v43, %v411_v37  ;;  %v848_v37 = vmul.f32 %v6682_v43, %v412_v0  ;;  %v416_v0 = vld [vmem:[%s6038_s8 + $0x4c0] sm:$0xff] }
 0x13c   : > { %1381 = vadd.xlane.f32.xlu1 %v1380_v35  ;;  %1378 = vadd.xlane.f32.xlu0 %v1377_v24 }
 0x13d   : > { %v6686_v7 = vpop.xlane.xlu1 %1177  ;;  %v6688_v27 = vpop.xlane.xlu0 %1174 }
 0x13e   : > { %9679 = vst [vmem:[#allocation51_spill] sm:$0xff] %v6686_v7  ;;  %9680 = vst [vmem:[#allocation52_spill] sm:$0xff] %v6688_v27  ;;  %v1392_v27 = vsel %vm956_vm0, %v845_v9, 0.0  ;;  %v413_v7 = vld [vmem:[%s6038_s8 + $0x4a8] sm:$0xff]  ;;  %v1395_v9 = vsel %vm956_vm0, %v846_v50, 0.0 }
 0x13f   : > { %v849_v52 = vmul.f32 %v6682_v43, %v413_v7  ;;  %v850_v7 = vmul.f32 %v6682_v43, %v414_v36  ;;  %v418_v36 = vld [vmem:[%s6038_s8 + $0x4d0] sm:$0xff] }
 0x140   : > { %1387 = vadd.xlane.f32.xlu1 %v1386_v10  ;;  %1384 = vadd.xlane.f32.xlu0 %v1383_v28 }
 0x141   : > { %v6696_v35 = vpop.xlane.xlu1 %1183  ;;  %v6698_v24 = vpop.xlane.xlu0 %1180 }
 0x142   : > { %9681 = vst [vmem:[#allocation53_spill] sm:$0xff] %v6696_v35  ;;  %9682 = vst [vmem:[#allocation54_spill] sm:$0xff] %v6698_v24  ;;  %v1398_v24 = vsel %vm956_vm0, %v847_v56, 0.0  ;;  %v415_v35 = vld [vmem:[%s6038_s8 + $0x4b8] sm:$0xff]  ;;  %v1401_v56 = vsel %vm956_vm0, %v848_v37, 0.0 }
 0x143   : > { %v851_v50 = vmul.f32 %v6682_v43, %v415_v35  ;;  %v852_v35 = vmul.f32 %v6682_v43, %v416_v0  ;;  %v420_v0 = vld [vmem:[%s6038_s8 + $0x4e0] sm:$0xff] }
 0x144   : > { %1393 = vadd.xlane.f32.xlu1 %v1392_v27  ;;  %1390 = vadd.xlane.f32.xlu0 %v1389_v20 }
 0x145   : > { %v6706_v10 = vpop.xlane.xlu1 %1189  ;;  %v6708_v28 = vpop.xlane.xlu0 %1186 }
 0x146   : > { %9683 = vst [vmem:[#allocation55_spill] sm:$0xff] %v6706_v10  ;;  %9684 = vst [vmem:[#allocation56_spill] sm:$0xff] %v6708_v28  ;;  %v1404_v28 = vsel %vm956_vm0, %v849_v52, 0.0  ;;  %v417_v10 = vld [vmem:[%s6038_s8 + $0x4c8] sm:$0xff]  ;;  %v1407_v52 = vsel %vm956_vm0, %v850_v7, 0.0 }
 0x147   : > { %v853_v37 = vmul.f32 %v6682_v43, %v417_v10  ;;  %v854_v10 = vmul.f32 %v6682_v43, %v418_v36  ;;  %v616_v36 = vcombine.high %v6579_v55, %v6579_v55 }
 0x148   : > { %1399 = vadd.xlane.f32.xlu1 %v1398_v24  ;;  %1396 = vadd.xlane.f32.xlu0 %v1395_v9 }
 0x149   : > { %v6716_v27 = vpop.xlane.xlu1 %1195  ;;  %v6718_v20 = vpop.xlane.xlu0 %1192  ;;  %v6767_v55 = vrot.slane %v616_v36, %v6046_v8  ;;  %v427_v36 = vld [vmem:[%s6038_s8 + $0x518] sm:$0xff] }
 0x14a   : > { %9685 = vst [vmem:[#allocation57_spill] sm:$0xff] %v6716_v27  ;;  %9686 = vst [vmem:[#allocation58_spill] sm:$0xff] %v6718_v20  ;;  %v1410_v20 = vsel %vm956_vm0, %v851_v50, 0.0  ;;  %v419_v27 = vld [vmem:[%s6038_s8 + $0x4d8] sm:$0xff]  ;;  %v1413_v50 = vsel %vm956_vm0, %v852_v35, 0.0  ;;  %v1419_v35 = vsel %vm956_vm0, %v854_v10, 0.0 }
 0x14b   : > { %v855_v7 = vmul.f32 %v6682_v43, %v419_v27  ;;  %v856_v27 = vmul.f32 %v6682_v43, %v420_v0 }
 0x14c   : > { %1405 = vadd.xlane.f32.xlu1 %v1404_v28  ;;  %1402 = vadd.xlane.f32.xlu0 %v1401_v56 }
 0x14d   : > { %v6726_v24 = vpop.xlane.xlu1 %1201  ;;  %v6728_v9 = vpop.xlane.xlu0 %1198 }
 0x14e   : > { %9687 = vst [vmem:[#allocation59_spill] sm:$0xff] %v6726_v24  ;;  %9688 = vst [vmem:[#allocation60_spill] sm:$0xff] %v6728_v9  ;;  %v1416_v9 = vsel %vm956_vm0, %v853_v37, 0.0  ;;  %v421_v24 = vld [vmem:[%s6038_s8 + $0x4e8] sm:$0xff]  ;;  %v1422_v37 = vsel %vm956_vm0, %v855_v7, 0.0  ;;  %v1425_v7 = vsel %vm956_vm0, %v856_v27, 0.0 }
 0x150   : > { %1411 = vadd.xlane.f32.xlu1 %v1410_v20  ;;  %1408 = vadd.xlane.f32.xlu0 %v1407_v52  ;;  %v857_v20 = vmul.f32 %v6682_v43, %v421_v24 }
 0x151   : > { %v6736_v28 = vpop.xlane.xlu1 %1207  ;;  %v6738_v56 = vpop.xlane.xlu0 %1204 }
 0x152   : > { %9689 = vst [vmem:[#allocation61_spill] sm:$0xff] %v6736_v28  ;;  %9690 = vst [vmem:[#allocation62_spill] sm:$0xff] %v6738_v56  ;;  %v423_v56 = vld [vmem:[%s6038_s8 + $0x4f8] sm:$0xff]  ;;  %v1428_v24 = vsel %vm956_vm0, %v857_v20, 0.0 }
 0x153   : > { %v859_v10 = vmul.f32 %v6682_v43, %v423_v56 }
 0x154   : > { %1417 = vadd.xlane.f32.xlu1 %v1416_v9  ;;  %1414 = vadd.xlane.f32.xlu0 %v1413_v50  ;;  %v422_v9 = vld [vmem:[%s6038_s8 + $0x4f0] sm:$0xff] }
 0x155   : > { %v6747_v52 = vpop.xlane.xlu1 %1213  ;;  %v6749_v28 = vpop.xlane.xlu0 %1210  ;;  %v858_v0 = vmul.f32 %v6682_v43, %v422_v9  ;;  %v426_v9 = vld [vmem:[%s6038_s8 + $0x510] sm:$0xff] }
 0x156   : > { %9691 = vst [vmem:[#allocation63_spill] sm:$0xff] %v6747_v52  ;;  %9692 = vst [vmem:[#allocation64_spill] sm:$0xff] %v6749_v28  ;;  %v425_v52 = vld [vmem:[%s6038_s8 + $0x508] sm:$0xff] }
 0x157   : > { %v1431_v27 = vsel %vm956_vm0, %v858_v0, 0.0  ;;  %v861_v56 = vmul.f32 %v6767_v55, %v425_v52  ;;  %v863_v0 = vmul.f32 %v6767_v55, %v427_v36  ;;  %v862_v52 = vmul.f32 %v6767_v55, %v426_v9  ;;  %v430_v9 = vld [vmem:[%s6038_s8 + $0x530] sm:$0xff] }
 0x158   : > { %1423 = vadd.xlane.f32.xlu1 %v1422_v37  ;;  %1420 = vadd.xlane.f32.xlu0 %v1419_v35  ;;  %v424_v37 = vld [vmem:[%s6038_s8 + $0x500] sm:$0xff] }
 0x159   : > { %v6759_v50 = vpop.xlane.xlu1 %1219  ;;  %v6761_v28 = vpop.xlane.xlu0 %1216  ;;  %v860_v43 = vmul.f32 %v6767_v55, %v424_v37  ;;  %v428_v37 = vld [vmem:[%s6038_s8 + $0x520] sm:$0xff] }
 0x15a   : > { %9693 = vst [vmem:[#allocation65_spill] sm:$0xff] %v6759_v50  ;;  %9694 = vst [vmem:[#allocation66_spill] sm:$0xff] %v6761_v28  ;;  %v1434_v28 = vsel %vm956_vm0, %v859_v10, 0.0  ;;  %v864_v36 = vmul.f32 %v6767_v55, %v428_v37  ;;  %v432_v37 = vld [vmem:[%s6038_s8 + $0x540] sm:$0xff]  ;;  %v9615_v50 = vsub.s32 5, %v6020_v3 }
 0x15b   : > { %v1437_v10 = vsel %vm956_vm0, %v860_v43, 0.0 }
 0x15c   : > { %1429 = vadd.xlane.f32.xlu1 %v1428_v24  ;;  %1426 = vadd.xlane.f32.xlu0 %v1425_v7 }
 0x15d   : > { %v6771_v20 = vpop.xlane.xlu1 %1225  ;;  %v6773_v35 = vpop.xlane.xlu0 %1222 }
 0x15e   : > { %9695 = vst [vmem:[#allocation67_spill] sm:$0xff] %v6771_v20  ;;  %9696 = vst [vmem:[#allocation68_spill] sm:$0xff] %v6773_v35  ;;  %v1440_v35 = vsel %vm956_vm0, %v861_v56, 0.0  ;;  %v429_v20 = vld [vmem:[%s6038_s8 + $0x528] sm:$0xff]  ;;  %v1443_v56 = vsel %vm956_vm0, %v862_v52, 0.0 }
 0x15f   : > { %v865_v43 = vmul.f32 %v6767_v55, %v429_v20  ;;  %v866_v20 = vmul.f32 %v6767_v55, %v430_v9  ;;  %v434_v9 = vld [vmem:[%s6038_s8 + $0x550] sm:$0xff] }
 0x160   : > { %1435 = vadd.xlane.f32.xlu1 %v1434_v28  ;;  %1432 = vadd.xlane.f32.xlu0 %v1431_v27 }
 0x161   : > { %v6781_v24 = vpop.xlane.xlu1 %1231  ;;  %v6783_v7 = vpop.xlane.xlu0 %1228 }
 0x162   : > { %9697 = vst [vmem:[#allocation69_spill] sm:$0xff] %v6781_v24  ;;  %9698 = vst [vmem:[#allocation70_spill] sm:$0xff] %v6783_v7  ;;  %v1446_v7 = vsel %vm956_vm0, %v863_v0, 0.0  ;;  %v431_v24 = vld [vmem:[%s6038_s8 + $0x538] sm:$0xff]  ;;  %v1449_v0 = vsel %vm956_vm0, %v864_v36, 0.0 }
 0x163   : > { %v867_v52 = vmul.f32 %v6767_v55, %v431_v24  ;;  %v868_v24 = vmul.f32 %v6767_v55, %v432_v37  ;;  %v436_v37 = vld [vmem:[%s6038_s8 + $0x560] sm:$0xff] }
 0x164   : > { %1441 = vadd.xlane.f32.xlu1 %v1440_v35  ;;  %1438 = vadd.xlane.f32.xlu0 %v1437_v10 }
 0x165   : > { %v6791_v28 = vpop.xlane.xlu1 %1237  ;;  %v6793_v27 = vpop.xlane.xlu0 %1234 }
 0x166   : > { %9699 = vst [vmem:[#allocation71_spill] sm:$0xff] %v6791_v28  ;;  %9700 = vst [vmem:[#allocation72_spill] sm:$0xff] %v6793_v27  ;;  %v1452_v27 = vsel %vm956_vm0, %v865_v43, 0.0  ;;  %v433_v28 = vld [vmem:[%s6038_s8 + $0x548] sm:$0xff]  ;;  %v1455_v43 = vsel %vm956_vm0, %v866_v20, 0.0 }
 0x167   : > { %v869_v36 = vmul.f32 %v6767_v55, %v433_v28  ;;  %v870_v28 = vmul.f32 %v6767_v55, %v434_v9  ;;  %v618_v9 = vcombine.high %v6668_v34, %v6668_v34 }
 0x168   : > { %1447 = vadd.xlane.f32.xlu1 %v1446_v7  ;;  %1444 = vadd.xlane.f32.xlu0 %v1443_v56 }
 0x169   : > { %v6801_v35 = vpop.xlane.xlu1 %1243  ;;  %v6803_v10 = vpop.xlane.xlu0 %1240  ;;  %v6852_v34 = vrot.slane %v618_v9, %v6046_v8  ;;  %v443_v9 = vld [vmem:[%s6038_s8 + $0x598] sm:$0xff] }
 0x16a   : > { %9701 = vst [vmem:[#allocation73_spill] sm:$0xff] %v6801_v35  ;;  %9702 = vst [vmem:[#allocation74_spill] sm:$0xff] %v6803_v10  ;;  %v1458_v10 = vsel %vm956_vm0, %v867_v52, 0.0  ;;  %v435_v35 = vld [vmem:[%s6038_s8 + $0x558] sm:$0xff]  ;;  %v1461_v52 = vsel %vm956_vm0, %v868_v24, 0.0  ;;  %v1467_v24 = vsel %vm956_vm0, %v870_v28, 0.0 }
 0x16b   : > { %v871_v20 = vmul.f32 %v6767_v55, %v435_v35  ;;  %v872_v35 = vmul.f32 %v6767_v55, %v436_v37 }
 0x16c   : > { %1453 = vadd.xlane.f32.xlu1 %v1452_v27  ;;  %1450 = vadd.xlane.f32.xlu0 %v1449_v0 }
 0x16d   : > { %v6811_v7 = vpop.xlane.xlu1 %1249  ;;  %v6813_v56 = vpop.xlane.xlu0 %1246 }
 0x16e   : > { %9703 = vst [vmem:[#allocation75_spill] sm:$0xff] %v6811_v7  ;;  %9704 = vst [vmem:[#allocation76_spill] sm:$0xff] %v6813_v56  ;;  %v1464_v56 = vsel %vm956_vm0, %v869_v36, 0.0  ;;  %v437_v7 = vld [vmem:[%s6038_s8 + $0x568] sm:$0xff]  ;;  %v1470_v36 = vsel %vm956_vm0, %v871_v20, 0.0  ;;  %v1473_v20 = vsel %vm956_vm0, %v872_v35, 0.0 }
 0x170   : > { %1459 = vadd.xlane.f32.xlu1 %v1458_v10  ;;  %1456 = vadd.xlane.f32.xlu0 %v1455_v43  ;;  %v873_v10 = vmul.f32 %v6767_v55, %v437_v7 }
 0x171   : > { %v6821_v27 = vpop.xlane.xlu1 %1255  ;;  %v6823_v0 = vpop.xlane.xlu0 %1252 }
 0x172   : > { %9705 = vst [vmem:[#allocation77_spill] sm:$0xff] %v6821_v27  ;;  %9706 = vst [vmem:[#allocation78_spill] sm:$0xff] %v6823_v0  ;;  %v439_v0 = vld [vmem:[%s6038_s8 + $0x578] sm:$0xff]  ;;  %v1476_v7 = vsel %vm956_vm0, %v873_v10, 0.0 }
 0x173   : > { %v875_v28 = vmul.f32 %v6767_v55, %v439_v0 }
 0x174   : > { %1465 = vadd.xlane.f32.xlu1 %v1464_v56  ;;  %1462 = vadd.xlane.f32.xlu0 %v1461_v52  ;;  %v438_v56 = vld [vmem:[%s6038_s8 + $0x570] sm:$0xff] }
 0x175   : > { %v6832_v43 = vpop.xlane.xlu1 %1261  ;;  %v6834_v27 = vpop.xlane.xlu0 %1258  ;;  %v874_v37 = vmul.f32 %v6767_v55, %v438_v56  ;;  %v442_v56 = vld [vmem:[%s6038_s8 + $0x590] sm:$0xff] }
 0x176   : > { %9707 = vst [vmem:[#allocation79_spill] sm:$0xff] %v6832_v43  ;;  %9708 = vst [vmem:[#allocation80_spill] sm:$0xff] %v6834_v27  ;;  %v441_v43 = vld [vmem:[%s6038_s8 + $0x588] sm:$0xff] }
 0x177   : > { %v1479_v35 = vsel %vm956_vm0, %v874_v37, 0.0  ;;  %v877_v0 = vmul.f32 %v6852_v34, %v441_v43  ;;  %v879_v37 = vmul.f32 %v6852_v34, %v443_v9  ;;  %v878_v43 = vmul.f32 %v6852_v34, %v442_v56  ;;  %v446_v56 = vld [vmem:[%s6038_s8 + $0x5b0] sm:$0xff] }
 0x178   : > { %1471 = vadd.xlane.f32.xlu1 %v1470_v36  ;;  %1468 = vadd.xlane.f32.xlu0 %v1467_v24  ;;  %v440_v36 = vld [vmem:[%s6038_s8 + $0x580] sm:$0xff] }
 0x179   : > { %v6844_v52 = vpop.xlane.xlu1 %1267  ;;  %v6846_v27 = vpop.xlane.xlu0 %1264  ;;  %v876_v55 = vmul.f32 %v6852_v34, %v440_v36  ;;  %v444_v36 = vld [vmem:[%s6038_s8 + $0x5a0] sm:$0xff] }
 0x17a   : > { %9709 = vst [vmem:[#allocation81_spill] sm:$0xff] %v6844_v52  ;;  %9710 = vst [vmem:[#allocation82_spill] sm:$0xff] %v6846_v27  ;;  %v1482_v27 = vsel %vm956_vm0, %v875_v28, 0.0  ;;  %v880_v9 = vmul.f32 %v6852_v34, %v444_v36  ;;  %v448_v36 = vld [vmem:[%s6038_s8 + $0x5c0] sm:$0xff]  ;;  %v458_v52 = vld [vmem:[%s6038_s8 + $0x610] sm:$0xff] }
 0x17b   : > { %v1485_v28 = vsel %vm956_vm0, %v876_v55, 0.0 }
 0x17c   : > { %1477 = vadd.xlane.f32.xlu1 %v1476_v7  ;;  %1474 = vadd.xlane.f32.xlu0 %v1473_v20 }
 0x17d   : > { %v6856_v10 = vpop.xlane.xlu1 %1273  ;;  %v6858_v24 = vpop.xlane.xlu0 %1270 }
 0x17e   : > { %9711 = vst [vmem:[#allocation83_spill] sm:$0xff] %v6856_v10  ;;  %9712 = vst [vmem:[#allocation84_spill] sm:$0xff] %v6858_v24  ;;  %v1488_v24 = vsel %vm956_vm0, %v877_v0, 0.0  ;;  %v445_v10 = vld [vmem:[%s6038_s8 + $0x5a8] sm:$0xff]  ;;  %v1491_v0 = vsel %vm956_vm0, %v878_v43, 0.0 }
 0x17f   : > { %v881_v55 = vmul.f32 %v6852_v34, %v445_v10  ;;  %v882_v10 = vmul.f32 %v6852_v34, %v446_v56  ;;  %v571_v56 = vcombine.high %v6553_v11, %v6553_v11 }
 0x180   : > { %1483 = vadd.xlane.f32.xlu1 %v1482_v27  ;;  %1480 = vadd.xlane.f32.xlu0 %v1479_v35 }
 0x181   : > { %v6866_v7 = vpop.xlane.xlu1 %1279  ;;  %v6868_v20 = vpop.xlane.xlu0 %1276  ;;  %v6918_v11 = vrot.slane %v571_v56, %v6026_v5 }
 0x182   : > { %9713 = vst [vmem:[#allocation85_spill] sm:$0xff] %v6866_v7  ;;  %9714 = vst [vmem:[#allocation86_spill] sm:$0xff] %v6868_v20  ;;  %v1494_v20 = vsel %vm956_vm0, %v879_v37, 0.0  ;;  %v447_v7 = vld [vmem:[%s6038_s8 + $0x5b8] sm:$0xff]  ;;  %v1497_v37 = vsel %vm956_vm0, %v880_v9, 0.0  ;;  %v1503_v9 = vsel %vm956_vm0, %v882_v10, 0.0 }
 0x183   : > { %v883_v43 = vmul.f32 %v6852_v34, %v447_v7  ;;  %v884_v7 = vmul.f32 %v6852_v34, %v448_v36  ;;  %v6931_v56 = vrot.slane %v6918_v11, %v6026_v5 }
 0x184   : > { %1489 = vadd.xlane.f32.xlu1 %v1488_v24  ;;  %1486 = vadd.xlane.f32.xlu0 %v1485_v28 }
 0x185   : > { %v6876_v27 = vpop.xlane.xlu1 %1285  ;;  %v6878_v35 = vpop.xlane.xlu0 %1282 }
 0x186   : > { %9715 = vst [vmem:[#allocation87_spill] sm:$0xff] %v6876_v27  ;;  %9716 = vst [vmem:[#allocation88_spill] sm:$0xff] %v6878_v35  ;;  %v1500_v35 = vsel %vm956_vm0, %v881_v55, 0.0  ;;  %v449_v27 = vld [vmem:[%s6038_s8 + $0x5c8] sm:$0xff]  ;;  %v1506_v55 = vsel %vm956_vm0, %v883_v43, 0.0  ;;  %v1509_v43 = vsel %vm956_vm0, %v884_v7, 0.0 }
 0x188   : > { %1495 = vadd.xlane.f32.xlu1 %v1494_v20  ;;  %1492 = vadd.xlane.f32.xlu0 %v1491_v0  ;;  %v885_v20 = vmul.f32 %v6852_v34, %v449_v27 }
 0x189   : > { %v6886_v24 = vpop.xlane.xlu1 %1291  ;;  %v6888_v28 = vpop.xlane.xlu0 %1288 }
 0x18a   : > { %9717 = vst [vmem:[#allocation89_spill] sm:$0xff] %v6886_v24  ;;  %9718 = vst [vmem:[#allocation90_spill] sm:$0xff] %v6888_v28  ;;  %v451_v24 = vld [vmem:[%s6038_s8 + $0x5d8] sm:$0xff]  ;;  %v1512_v27 = vsel %vm956_vm0, %v885_v20, 0.0 }
 0x18b   : > { %v887_v10 = vmul.f32 %v6852_v34, %v451_v24 }
 0x18c   : > { %1501 = vadd.xlane.f32.xlu1 %v1500_v35  ;;  %1498 = vadd.xlane.f32.xlu0 %v1497_v37  ;;  %v450_v35 = vld [vmem:[%s6038_s8 + $0x5d0] sm:$0xff] }
 0x18d   : > { %v6897_v0 = vpop.xlane.xlu1 %1297  ;;  %v6899_v28 = vpop.xlane.xlu0 %1294  ;;  %v886_v36 = vmul.f32 %v6852_v34, %v450_v35  ;;  %v1518_v7 = vsel %vm956_vm0, %v887_v10, 0.0 }
 0x18e   : > { %9719 = vst [vmem:[#allocation91_spill] sm:$0xff] %v6897_v0  ;;  %9720 = vst [vmem:[#allocation92_spill] sm:$0xff] %v6899_v28  ;;  %v453_v28 = vld [vmem:[%s6038_s8 + $0x5e8] sm:$0xff] }
 0x18f   : > { %v889_v20 = vmul.f32 %v6852_v34, %v453_v28  ;;  %v1515_v24 = vsel %vm956_vm0, %v886_v36, 0.0 }
 0x190   : > { %1507 = vadd.xlane.f32.xlu1 %v1506_v55  ;;  %1504 = vadd.xlane.f32.xlu0 %v1503_v9  ;;  %v452_v55 = vld [vmem:[%s6038_s8 + $0x5e0] sm:$0xff] }
 0x191   : > { %v6909_v37 = vpop.xlane.xlu1 %1303  ;;  %v6911_v0 = vpop.xlane.xlu0 %1300  ;;  %v888_v35 = vmul.f32 %v6852_v34, %v452_v55  ;;  %v1524_v28 = vsel %vm956_vm0, %v889_v20, 0.0 }
 0x192   : > { %9721 = vst [vmem:[#allocation93_spill] sm:$0xff] %v6909_v37  ;;  %9722 = vst [vmem:[#allocation94_spill] sm:$0xff] %v6911_v0  ;;  %v6945_v37 = vrot.slane %v6931_v56, %v6046_v8 }
 0x193   : > { %v1521_v10 = vsel %vm956_vm0, %v888_v35, 0.0 }
 0x194   : > { %1513 = vadd.xlane.f32.xlu1 %v1512_v27  ;;  %1510 = vadd.xlane.f32.xlu0 %v1509_v43  ;;  %v455_v27 = vld [vmem:[%s6038_s8 + $0x5f8] sm:$0xff]  ;;  %v454_v43 = vld [vmem:[%s6038_s8 + $0x5f0] sm:$0xff] }
 0x195   : > { %v6922_v9 = vpop.xlane.xlu1 %1309  ;;  %v6924_v0 = vpop.xlane.xlu0 %1306  ;;  %v891_v36 = vmul.f32 %v6852_v34, %v455_v27  ;;  %v890_v55 = vmul.f32 %v6852_v34, %v454_v43 }
 0x196   : > { %9723 = vst [vmem:[#allocation95_spill] sm:$0xff] %v6922_v9  ;;  %9724 = vst [vmem:[#allocation96_spill] sm:$0xff] %v6924_v0 }
 0x197   : > { %v1530_v35 = vsel %vm956_vm0, %v891_v36, 0.0  ;;  %v1527_v27 = vsel %vm956_vm0, %v890_v55, 0.0 }
 0x198   : > { %1519 = vadd.xlane.f32.xlu1 %v1518_v7  ;;  %1516 = vadd.xlane.f32.xlu0 %v1515_v24  ;;  %v457_v7 = vld [vmem:[%s6038_s8 + $0x608] sm:$0xff]  ;;  %v456_v24 = vld [vmem:[%s6038_s8 + $0x600] sm:$0xff] }
 0x199   : > { %v6936_v9 = vpop.xlane.xlu1 %1315  ;;  %v6938_v0 = vpop.xlane.xlu0 %1312  ;;  %v893_v34 = vmul.f32 %v6945_v37, %v457_v7  ;;  %v892_v43 = vmul.f32 %v6945_v37, %v456_v24  ;;  %v894_v7 = vmul.f32 %v6945_v37, %v458_v52  ;;  %v460_v24 = vld [vmem:[%s6038_s8 + $0x620] sm:$0xff]  ;;  %v462_v52 = vld [vmem:[%s6038_s8 + $0x630] sm:$0xff] }
 0x19a   : > { %9725 = vst [vmem:[#allocation97_spill] sm:$0xff] %v6936_v9  ;;  %9726 = vst [vmem:[#allocation98_spill] sm:$0xff] %v6938_v0  ;;  %v459_v0 = vld [vmem:[%s6038_s8 + $0x618] sm:$0xff] }
 0x19b   : > { %v1533_v36 = vsel %vm956_vm0, %v892_v43, 0.0  ;;  %v895_v55 = vmul.f32 %v6945_v37, %v459_v0  ;;  %v896_v0 = vmul.f32 %v6945_v37, %v460_v24  ;;  %v464_v24 = vld [vmem:[%s6038_s8 + $0x640] sm:$0xff] }
 0x19c   : > { %1525 = vadd.xlane.f32.xlu1 %v1524_v28  ;;  %1522 = vadd.xlane.f32.xlu0 %v1521_v10 }
 0x19d   : > { %v6949_v20 = vpop.xlane.xlu1 %1321  ;;  %v6951_v9 = vpop.xlane.xlu0 %1318 }
 0x19e   : > { %9727 = vst [vmem:[#allocation99_spill] sm:$0xff] %v6949_v20  ;;  %9728 = vst [vmem:[#allocation100_spill] sm:$0xff] %v6951_v9  ;;  %v1536_v9 = vsel %vm956_vm0, %v893_v34, 0.0  ;;  %v461_v20 = vld [vmem:[%s6038_s8 + $0x628] sm:$0xff]  ;;  %v1539_v34 = vsel %vm956_vm0, %v894_v7, 0.0 }
 0x19f   : > { %v897_v43 = vmul.f32 %v6945_v37, %v461_v20  ;;  %v898_v20 = vmul.f32 %v6945_v37, %v462_v52  ;;  %v466_v52 = vld [vmem:[%s6038_s8 + $0x650] sm:$0xff] }
 0x1a0   : > { %1531 = vadd.xlane.f32.xlu1 %v1530_v35  ;;  %1528 = vadd.xlane.f32.xlu0 %v1527_v27 }
 0x1a1   : > { %v6959_v28 = vpop.xlane.xlu1 %1327  ;;  %v6961_v10 = vpop.xlane.xlu0 %1324 }
 0x1a2   : > { %9729 = vst [vmem:[#allocation101_spill] sm:$0xff] %v6959_v28  ;;  %9730 = vst [vmem:[#allocation102_spill] sm:$0xff] %v6961_v10  ;;  %v1542_v10 = vsel %vm956_vm0, %v895_v55, 0.0  ;;  %v463_v28 = vld [vmem:[%s6038_s8 + $0x638] sm:$0xff]  ;;  %v1545_v55 = vsel %vm956_vm0, %v896_v0, 0.0  ;;  %v1551_v0 = vsel %vm956_vm0, %v898_v20, 0.0  ;;  %v902_v20 = vmul.f32 %v6945_v37, %v466_v52 }
 0x1a3   : > { %v899_v7 = vmul.f32 %v6945_v37, %v463_v28  ;;  %v900_v28 = vmul.f32 %v6945_v37, %v464_v24  ;;  %v587_v24 = vcombine.high %v6918_v11, %v6918_v11  ;;  %v471_v11 = vld [vmem:[%s6038_s8 + $0x678] sm:$0xff] }
 0x1a4   : > { %1537 = vadd.xlane.f32.xlu1 %v1536_v9  ;;  %1534 = vadd.xlane.f32.xlu0 %v1533_v36 }
 0x1a5   : > { %v6969_v35 = vpop.xlane.xlu1 %1333  ;;  %v6971_v27 = vpop.xlane.xlu0 %1330 }
 0x1a6   : > { %9731 = vst [vmem:[#allocation103_spill] sm:$0xff] %v6969_v35  ;;  %9732 = vst [vmem:[#allocation104_spill] sm:$0xff] %v6971_v27  ;;  %v1548_v27 = vsel %vm956_vm0, %v897_v43, 0.0  ;;  %v465_v35 = vld [vmem:[%s6038_s8 + $0x648] sm:$0xff]  ;;  %v1554_v43 = vsel %vm956_vm0, %v899_v7, 0.0 }
 0x1a8   : > { %1543 = vadd.xlane.f32.xlu1 %v1542_v10  ;;  %1540 = vadd.xlane.f32.xlu0 %v1539_v34  ;;  %v901_v10 = vmul.f32 %v6945_v37, %v465_v35 }
 0x1a9   : > { %v6979_v9 = vpop.xlane.xlu1 %1339  ;;  %v6981_v36 = vpop.xlane.xlu0 %1336 }
 0x1aa   : > { %9733 = vst [vmem:[#allocation105_spill] sm:$0xff] %v6979_v9  ;;  %9734 = vst [vmem:[#allocation106_spill] sm:$0xff] %v6981_v36  ;;  %v467_v36 = vld [vmem:[%s6038_s8 + $0x658] sm:$0xff] }
 0x1ab   : > { %v903_v7 = vmul.f32 %v6945_v37, %v467_v36  ;;  %v1563_v36 = vsel %vm956_vm0, %v902_v20, 0.0  ;;  %v907_v20 = vmul.f32 %v6945_v37, %v471_v11 }
 0x1ac   : > { %1549 = vadd.xlane.f32.xlu1 %v1548_v27  ;;  %1546 = vadd.xlane.f32.xlu0 %v1545_v55  ;;  %v1560_v27 = vsel %vm956_vm0, %v901_v10, 0.0 }
 0x1ad   : > { %v6990_v34 = vpop.xlane.xlu1 %1345  ;;  %v6992_v9 = vpop.xlane.xlu0 %1342 }
 0x1ae   : > { %9735 = vst [vmem:[#allocation107_spill] sm:$0xff] %v6990_v34  ;;  %9736 = vst [vmem:[#allocation108_spill] sm:$0xff] %v6992_v9  ;;  %v1557_v9 = vsel %vm956_vm0, %v900_v28, 0.0  ;;  %v469_v34 = vld [vmem:[%s6038_s8 + $0x668] sm:$0xff]  ;;  %v1566_v28 = vsel %vm956_vm0, %v903_v7, 0.0 }
 0x1af   : > { %v905_v10 = vmul.f32 %v6945_v37, %v469_v34 }
 0x1b0   : > { %1555 = vadd.xlane.f32.xlu1 %v1554_v43  ;;  %1552 = vadd.xlane.f32.xlu0 %v1551_v0  ;;  %v468_v43 = vld [vmem:[%s6038_s8 + $0x660] sm:$0xff] }
 0x1b1   : > { %v7000_v55 = vpop.xlane.xlu1 %1351  ;;  %v7002_v35 = vpop.xlane.xlu0 %1348  ;;  %v904_v52 = vmul.f32 %v6945_v37, %v468_v43 }
 0x1b2   : > { %9737 = vst [vmem:[#allocation109_spill] sm:$0xff] %v7000_v55  ;;  %9738 = vst [vmem:[#allocation110_spill] sm:$0xff] %v7002_v35  ;;  %v7020_v55 = vrot.slane %v587_v24, %v6026_v5  ;;  %v473_v24 = vld [vmem:[%s6038_s8 + $0x688] sm:$0xff] }
 0x1b3   : > { %v1569_v7 = vsel %vm956_vm0, %v904_v52, 0.0  ;;  %v1578_v52 = vsel %vm956_vm0, %v907_v20, 0.0 }
 0x1b4   : > { %1561 = vadd.xlane.f32.xlu1 %v1560_v27  ;;  %1558 = vadd.xlane.f32.xlu0 %v1557_v9  ;;  %v470_v27 = vld [vmem:[%s6038_s8 + $0x670] sm:$0xff]  ;;  %v1572_v9 = vsel %vm956_vm0, %v905_v10, 0.0  ;;  %v7034_v5 = vrot.slane %v7020_v55, %v6046_v8 }
 0x1b5   : > { %v7012_v0 = vpop.xlane.xlu1 %1357  ;;  %v7014_v35 = vpop.xlane.xlu0 %1354  ;;  %v906_v43 = vmul.f32 %v6945_v37, %v470_v27 }
 0x1b6   : > { %9739 = vst [vmem:[#allocation111_spill] sm:$0xff] %v7012_v0  ;;  %9740 = vst [vmem:[#allocation112_spill] sm:$0xff] %v7014_v35  ;;  %v909_v37 = vmul.f32 %v7034_v5, %v473_v24 }
 0x1b7   : > { %v1575_v11 = vsel %vm956_vm0, %v906_v43, 0.0 }
 0x1b8   : > { %1567 = vadd.xlane.f32.xlu1 %v1566_v28  ;;  %1564 = vadd.xlane.f32.xlu0 %v1563_v36  ;;  %v472_v28 = vld [vmem:[%s6038_s8 + $0x680] sm:$0xff] }
 0x1b9   : > { %v7025_v34 = vpop.xlane.xlu1 %1363  ;;  %v7027_v35 = vpop.xlane.xlu0 %1360  ;;  %v908_v27 = vmul.f32 %v7034_v5, %v472_v28  ;;  %v476_v28 = vld [vmem:[%s6038_s8 + $0x6a0] sm:$0xff] }
 0x1ba   : > { %9741 = vst [vmem:[#allocation113_spill] sm:$0xff] %v7025_v34  ;;  %9742 = vst [vmem:[#allocation114_spill] sm:$0xff] %v7027_v35  ;;  %v475_v35 = vld [vmem:[%s6038_s8 + $0x698] sm:$0xff]  ;;  %v474_v34 = vld [vmem:[%s6038_s8 + $0x690] sm:$0xff] }
 0x1bb   : > { %v1581_v20 = vsel %vm956_vm0, %v908_v27, 0.0  ;;  %v911_v43 = vmul.f32 %v7034_v5, %v475_v35  ;;  %v910_v24 = vmul.f32 %v7034_v5, %v474_v34  ;;  %v912_v35 = vmul.f32 %v7034_v5, %v476_v28  ;;  %v478_v34 = vld [vmem:[%s6038_s8 + $0x6b0] sm:$0xff]  ;;  %v480_v28 = vld [vmem:[%s6038_s8 + $0x6c0] sm:$0xff] }
 0x1bc   : > { %1573 = vadd.xlane.f32.xlu1 %v1572_v9  ;;  %1570 = vadd.xlane.f32.xlu0 %v1569_v7 }
 0x1bd   : > { %v7038_v10 = vpop.xlane.xlu1 %1369  ;;  %v7040_v36 = vpop.xlane.xlu0 %1366 }
 0x1be   : > { %9743 = vst [vmem:[#allocation115_spill] sm:$0xff] %v7038_v10  ;;  %9744 = vst [vmem:[#allocation116_spill] sm:$0xff] %v7040_v36  ;;  %v1584_v36 = vsel %vm956_vm0, %v909_v37, 0.0  ;;  %v477_v10 = vld [vmem:[%s6038_s8 + $0x6a8] sm:$0xff]  ;;  %v1587_v37 = vsel %vm956_vm0, %v910_v24, 0.0 }
 0x1bf   : > { %v913_v27 = vmul.f32 %v7034_v5, %v477_v10  ;;  %v914_v10 = vmul.f32 %v7034_v5, %v478_v34  ;;  %v482_v34 = vld [vmem:[%s6038_s8 + $0x6d0] sm:$0xff] }
 0x1c0   : > { %1579 = vadd.xlane.f32.xlu1 %v1578_v52  ;;  %1576 = vadd.xlane.f32.xlu0 %v1575_v11 }
 0x1c1   : > { %v7048_v9 = vpop.xlane.xlu1 %1375  ;;  %v7050_v7 = vpop.xlane.xlu0 %1372 }
 0x1c2   : > { %9745 = vst [vmem:[#allocation117_spill] sm:$0xff] %v7048_v9  ;;  %9746 = vst [vmem:[#allocation118_spill] sm:$0xff] %v7050_v7  ;;  %v1590_v7 = vsel %vm956_vm0, %v911_v43, 0.0  ;;  %v479_v9 = vld [vmem:[%s6038_s8 + $0x6b8] sm:$0xff]  ;;  %v1593_v43 = vsel %vm956_vm0, %v912_v35, 0.0 }
 0x1c3   : > { %v915_v24 = vmul.f32 %v7034_v5, %v479_v9  ;;  %v916_v9 = vmul.f32 %v7034_v5, %v480_v28  ;;  %v484_v28 = vld [vmem:[%s6038_s8 + $0x6e0] sm:$0xff] }
 0x1c4   : > { %1585 = vadd.xlane.f32.xlu1 %v1584_v36  ;;  %1582 = vadd.xlane.f32.xlu0 %v1581_v20 }
 0x1c5   : > { %v7058_v52 = vpop.xlane.xlu1 %1381  ;;  %v7060_v11 = vpop.xlane.xlu0 %1378 }
 0x1c6   : > { %9747 = vst [vmem:[#allocation119_spill] sm:$0xff] %v7058_v52  ;;  %9748 = vst [vmem:[#allocation120_spill] sm:$0xff] %v7060_v11  ;;  %v1596_v11 = vsel %vm956_vm0, %v913_v27, 0.0  ;;  %v481_v52 = vld [vmem:[%s6038_s8 + $0x6c8] sm:$0xff]  ;;  %v1599_v27 = vsel %vm956_vm0, %v914_v10, 0.0 }
 0x1c7   : > { %v917_v35 = vmul.f32 %v7034_v5, %v481_v52  ;;  %v918_v52 = vmul.f32 %v7034_v5, %v482_v34  ;;  %v617_v34 = vcombine.high %v6931_v56, %v6931_v56 }
 0x1c8   : > { %1591 = vadd.xlane.f32.xlu1 %v1590_v7  ;;  %1588 = vadd.xlane.f32.xlu0 %v1587_v37 }
 0x1c9   : > { %v7068_v36 = vpop.xlane.xlu1 %1387  ;;  %v7070_v20 = vpop.xlane.xlu0 %1384  ;;  %v7119_v56 = vrot.slane %v617_v34, %v6046_v8  ;;  %v491_v34 = vld [vmem:[%s6038_s8 + $0x718] sm:$0xff] }
 0x1ca   : > { %9749 = vst [vmem:[#allocation121_spill] sm:$0xff] %v7068_v36  ;;  %9750 = vst [vmem:[#allocation122_spill] sm:$0xff] %v7070_v20  ;;  %v1602_v20 = vsel %vm956_vm0, %v915_v24, 0.0  ;;  %v483_v36 = vld [vmem:[%s6038_s8 + $0x6d8] sm:$0xff]  ;;  %v1605_v24 = vsel %vm956_vm0, %v916_v9, 0.0  ;;  %v1611_v9 = vsel %vm956_vm0, %v918_v52, 0.0 }
 0x1cb   : > { %v919_v10 = vmul.f32 %v7034_v5, %v483_v36  ;;  %v920_v36 = vmul.f32 %v7034_v5, %v484_v28 }
 0x1cc   : > { %1597 = vadd.xlane.f32.xlu1 %v1596_v11  ;;  %1594 = vadd.xlane.f32.xlu0 %v1593_v43 }
 0x1cd   : > { %v7078_v7 = vpop.xlane.xlu1 %1393  ;;  %v7080_v37 = vpop.xlane.xlu0 %1390 }
 0x1ce   : > { %9751 = vst [vmem:[#allocation123_spill] sm:$0xff] %v7078_v7  ;;  %9752 = vst [vmem:[#allocation124_spill] sm:$0xff] %v7080_v37  ;;  %v1608_v37 = vsel %vm956_vm0, %v917_v35, 0.0  ;;  %v485_v7 = vld [vmem:[%s6038_s8 + $0x6e8] sm:$0xff]  ;;  %v1614_v35 = vsel %vm956_vm0, %v919_v10, 0.0  ;;  %v1617_v10 = vsel %vm956_vm0, %v920_v36, 0.0 }
 0x1d0   : > { %1603 = vadd.xlane.f32.xlu1 %v1602_v20  ;;  %1600 = vadd.xlane.f32.xlu0 %v1599_v27  ;;  %v921_v20 = vmul.f32 %v7034_v5, %v485_v7 }
 0x1d1   : > { %v7088_v11 = vpop.xlane.xlu1 %1399  ;;  %v7090_v43 = vpop.xlane.xlu0 %1396 }
 0x1d2   : > { %9753 = vst [vmem:[#allocation125_spill] sm:$0xff] %v7088_v11  ;;  %9754 = vst [vmem:[#allocation126_spill] sm:$0xff] %v7090_v43  ;;  %v487_v43 = vld [vmem:[%s6038_s8 + $0x6f8] sm:$0xff]  ;;  %v1620_v7 = vsel %vm956_vm0, %v921_v20, 0.0 }
 0x1d3   : > { %v923_v52 = vmul.f32 %v7034_v5, %v487_v43 }
 0x1d4   : > { %1609 = vadd.xlane.f32.xlu1 %v1608_v37  ;;  %1606 = vadd.xlane.f32.xlu0 %v1605_v24  ;;  %v486_v37 = vld [vmem:[%s6038_s8 + $0x6f0] sm:$0xff] }
 0x1d5   : > { %v7099_v27 = vpop.xlane.xlu1 %1405  ;;  %v7101_v11 = vpop.xlane.xlu0 %1402  ;;  %v922_v28 = vmul.f32 %v7034_v5, %v486_v37  ;;  %v490_v37 = vld [vmem:[%s6038_s8 + $0x710] sm:$0xff] }
 0x1d6   : > { %9755 = vst [vmem:[#allocation127_spill] sm:$0xff] %v7099_v27  ;;  %9756 = vst [vmem:[#allocation128_spill] sm:$0xff] %v7101_v11  ;;  %v489_v27 = vld [vmem:[%s6038_s8 + $0x708] sm:$0xff] }
 0x1d7   : > { %v1623_v36 = vsel %vm956_vm0, %v922_v28, 0.0  ;;  %v925_v43 = vmul.f32 %v7119_v56, %v489_v27  ;;  %v927_v28 = vmul.f32 %v7119_v56, %v491_v34  ;;  %v926_v27 = vmul.f32 %v7119_v56, %v490_v37  ;;  %v494_v37 = vld [vmem:[%s6038_s8 + $0x730] sm:$0xff] }
 0x1d8   : > { %1615 = vadd.xlane.f32.xlu1 %v1614_v35  ;;  %1612 = vadd.xlane.f32.xlu0 %v1611_v9  ;;  %v488_v35 = vld [vmem:[%s6038_s8 + $0x700] sm:$0xff] }
 0x1d9   : > { %v7111_v24 = vpop.xlane.xlu1 %1411  ;;  %v7113_v11 = vpop.xlane.xlu0 %1408  ;;  %v924_v5 = vmul.f32 %v7119_v56, %v488_v35  ;;  %v492_v35 = vld [vmem:[%s6038_s8 + $0x720] sm:$0xff] }
 0x1da   : > { %9757 = vst [vmem:[#allocation129_spill] sm:$0xff] %v7111_v24  ;;  %9758 = vst [vmem:[#allocation130_spill] sm:$0xff] %v7113_v11  ;;  %v1626_v11 = vsel %vm956_vm0, %v923_v52, 0.0  ;;  %v928_v34 = vmul.f32 %v7119_v56, %v492_v35  ;;  %v496_v35 = vld [vmem:[%s6038_s8 + $0x740] sm:$0xff] }
 0x1db   : > { %v1629_v52 = vsel %vm956_vm0, %v924_v5, 0.0 }
 0x1dc   : > { %1621 = vadd.xlane.f32.xlu1 %v1620_v7  ;;  %1618 = vadd.xlane.f32.xlu0 %v1617_v10 }
 0x1dd   : > { %v7123_v20 = vpop.xlane.xlu1 %1417  ;;  %v7125_v9 = vpop.xlane.xlu0 %1414 }
 0x1de   : > { %9759 = vst [vmem:[#allocation131_spill] sm:$0xff] %v7123_v20  ;;  %9760 = vst [vmem:[#allocation132_spill] sm:$0xff] %v7125_v9  ;;  %v1632_v9 = vsel %vm956_vm0, %v925_v43, 0.0  ;;  %v493_v20 = vld [vmem:[%s6038_s8 + $0x728] sm:$0xff]  ;;  %v1635_v43 = vsel %vm956_vm0, %v926_v27, 0.0 }
 0x1df   : > { %v929_v5 = vmul.f32 %v7119_v56, %v493_v20  ;;  %v930_v20 = vmul.f32 %v7119_v56, %v494_v37  ;;  %v498_v37 = vld [vmem:[%s6038_s8 + $0x750] sm:$0xff] }
 0x1e0   : > { %1627 = vadd.xlane.f32.xlu1 %v1626_v11  ;;  %1624 = vadd.xlane.f32.xlu0 %v1623_v36 }
 0x1e1   : > { %v7133_v7 = vpop.xlane.xlu1 %1423  ;;  %v7135_v10 = vpop.xlane.xlu0 %1420 }
 0x1e2   : > { %9761 = vst [vmem:[#allocation133_spill] sm:$0xff] %v7133_v7  ;;  %9762 = vst [vmem:[#allocation134_spill] sm:$0xff] %v7135_v10  ;;  %v1638_v10 = vsel %vm956_vm0, %v927_v28, 0.0  ;;  %v495_v7 = vld [vmem:[%s6038_s8 + $0x738] sm:$0xff]  ;;  %v1641_v28 = vsel %vm956_vm0, %v928_v34, 0.0 }
 0x1e3   : > { %v931_v27 = vmul.f32 %v7119_v56, %v495_v7  ;;  %v932_v7 = vmul.f32 %v7119_v56, %v496_v35  ;;  %v500_v35 = vld [vmem:[%s6038_s8 + $0x760] sm:$0xff] }
 0x1e4   : > { %1633 = vadd.xlane.f32.xlu1 %v1632_v9  ;;  %1630 = vadd.xlane.f32.xlu0 %v1629_v52 }
 0x1e5   : > { %v7143_v11 = vpop.xlane.xlu1 %1429  ;;  %v7145_v36 = vpop.xlane.xlu0 %1426 }
 0x1e6   : > { %9763 = vst [vmem:[#allocation135_spill] sm:$0xff] %v7143_v11  ;;  %9764 = vst [vmem:[#allocation136_spill] sm:$0xff] %v7145_v36  ;;  %v1644_v36 = vsel %vm956_vm0, %v929_v5, 0.0  ;;  %v497_v11 = vld [vmem:[%s6038_s8 + $0x748] sm:$0xff]  ;;  %v1647_v5 = vsel %vm956_vm0, %v930_v20, 0.0 }
 0x1e7   : > { %v933_v34 = vmul.f32 %v7119_v56, %v497_v11  ;;  %v934_v11 = vmul.f32 %v7119_v56, %v498_v37  ;;  %v619_v37 = vcombine.high %v7020_v55, %v7020_v55 }
 0x1e8   : > { %1639 = vadd.xlane.f32.xlu1 %v1638_v10  ;;  %1636 = vadd.xlane.f32.xlu0 %v1635_v43 }
 0x1e9   : > { %v7153_v9 = vpop.xlane.xlu1 %1435  ;;  %v7155_v52 = vpop.xlane.xlu0 %1432  ;;  %v7204_v55 = vrot.slane %v619_v37, %v6046_v8  ;;  %v507_v37 = vld [vmem:[%s6038_s8 + $0x798] sm:$0xff] }
 0x1ea   : > { %9765 = vst [vmem:[#allocation137_spill] sm:$0xff] %v7153_v9  ;;  %9766 = vst [vmem:[#allocation138_spill] sm:$0xff] %v7155_v52  ;;  %v1650_v52 = vsel %vm956_vm0, %v931_v27, 0.0  ;;  %v499_v9 = vld [vmem:[%s6038_s8 + $0x758] sm:$0xff]  ;;  %v1653_v27 = vsel %vm956_vm0, %v932_v7, 0.0  ;;  %v1659_v7 = vsel %vm956_vm0, %v934_v11, 0.0 }
 0x1eb   : > { %v935_v20 = vmul.f32 %v7119_v56, %v499_v9  ;;  %v936_v9 = vmul.f32 %v7119_v56, %v500_v35 }
 0x1ec   : > { %1645 = vadd.xlane.f32.xlu1 %v1644_v36  ;;  %1642 = vadd.xlane.f32.xlu0 %v1641_v28 }
 0x1ed   : > { %v7163_v10 = vpop.xlane.xlu1 %1441  ;;  %v7165_v43 = vpop.xlane.xlu0 %1438 }
 0x1ee   : > { %9767 = vst [vmem:[#allocation139_spill] sm:$0xff] %v7163_v10  ;;  %9768 = vst [vmem:[#allocation140_spill] sm:$0xff] %v7165_v43  ;;  %v1656_v10 = vsel %vm956_vm0, %v933_v34, 0.0  ;;  %v501_v43 = vld [vmem:[%s6038_s8 + $0x768] sm:$0xff]  ;;  %v1662_v34 = vsel %vm956_vm0, %v935_v20, 0.0  ;;  %v1665_v20 = vsel %vm956_vm0, %v936_v9, 0.0 }
 0x1f0   : > { %1651 = vadd.xlane.f32.xlu1 %v1650_v52  ;;  %1648 = vadd.xlane.f32.xlu0 %v1647_v5  ;;  %v937_v52 = vmul.f32 %v7119_v56, %v501_v43 }
 0x1f1   : > { %v7173_v36 = vpop.xlane.xlu1 %1447  ;;  %v7175_v28 = vpop.xlane.xlu0 %1444 }
 0x1f2   : > { %9769 = vst [vmem:[#allocation141_spill] sm:$0xff] %v7173_v36  ;;  %9770 = vst [vmem:[#allocation142_spill] sm:$0xff] %v7175_v28  ;;  %v503_v28 = vld [vmem:[%s6038_s8 + $0x778] sm:$0xff]  ;;  %v1668_v43 = vsel %vm956_vm0, %v937_v52, 0.0 }
 0x1f3   : > { %v939_v11 = vmul.f32 %v7119_v56, %v503_v28 }
 0x1f4   : > { %1657 = vadd.xlane.f32.xlu1 %v1656_v10  ;;  %1654 = vadd.xlane.f32.xlu0 %v1653_v27  ;;  %v502_v10 = vld [vmem:[%s6038_s8 + $0x770] sm:$0xff] }
 0x1f5   : > { %v7184_v5 = vpop.xlane.xlu1 %1453  ;;  %v7186_v36 = vpop.xlane.xlu0 %1450  ;;  %v938_v35 = vmul.f32 %v7119_v56, %v502_v10  ;;  %v506_v10 = vld [vmem:[%s6038_s8 + $0x790] sm:$0xff] }
 0x1f6   : > { %9771 = vst [vmem:[#allocation143_spill] sm:$0xff] %v7184_v5  ;;  %9772 = vst [vmem:[#allocation144_spill] sm:$0xff] %v7186_v36  ;;  %v505_v36 = vld [vmem:[%s6038_s8 + $0x788] sm:$0xff] }
 0x1f7   : > { %v1671_v9 = vsel %vm956_vm0, %v938_v35, 0.0  ;;  %v941_v28 = vmul.f32 %v7204_v55, %v505_v36  ;;  %v943_v35 = vmul.f32 %v7204_v55, %v507_v37  ;;  %v942_v36 = vmul.f32 %v7204_v55, %v506_v10  ;;  %v510_v10 = vld [vmem:[%s6038_s8 + $0x7b0] sm:$0xff] }
 0x1f8   : > { %1663 = vadd.xlane.f32.xlu1 %v1662_v34  ;;  %1660 = vadd.xlane.f32.xlu0 %v1659_v7  ;;  %v504_v34 = vld [vmem:[%s6038_s8 + $0x780] sm:$0xff] }
 0x1f9   : > { %v7196_v27 = vpop.xlane.xlu1 %1459  ;;  %v7198_v5 = vpop.xlane.xlu0 %1456  ;;  %v940_v56 = vmul.f32 %v7204_v55, %v504_v34  ;;  %v508_v34 = vld [vmem:[%s6038_s8 + $0x7a0] sm:$0xff] }
 0x1fa   : > { %9773 = vst [vmem:[#allocation145_spill] sm:$0xff] %v7196_v27  ;;  %9774 = vst [vmem:[#allocation146_spill] sm:$0xff] %v7198_v5  ;;  %v1674_v27 = vsel %vm956_vm0, %v939_v11, 0.0  ;;  %v944_v37 = vmul.f32 %v7204_v55, %v508_v34  ;;  %v512_v34 = vld [vmem:[%s6038_s8 + $0x7c0] sm:$0xff]  ;;  %v519_v5 = vld [vmem:[%s6038_s8 + $0x7f8] sm:$0xff] }
 0x1fb   : > { %v1677_v11 = vsel %vm956_vm0, %v940_v56, 0.0 }
 0x1fc   : > { %1669 = vadd.xlane.f32.xlu1 %v1668_v43  ;;  %1666 = vadd.xlane.f32.xlu0 %v1665_v20 }
 0x1fd   : > { %v7208_v52 = vpop.xlane.xlu1 %1465  ;;  %v7210_v7 = vpop.xlane.xlu0 %1462 }
 0x1fe   : > { %9775 = vst [vmem:[#allocation147_spill] sm:$0xff] %v7208_v52  ;;  %9776 = vst [vmem:[#allocation148_spill] sm:$0xff] %v7210_v7  ;;  %v1680_v52 = vsel %vm956_vm0, %v941_v28, 0.0  ;;  %v509_v7 = vld [vmem:[%s6038_s8 + $0x7a8] sm:$0xff]  ;;  %v1683_v28 = vsel %vm956_vm0, %v942_v36, 0.0 }
 0x1ff   : > { %v945_v56 = vmul.f32 %v7204_v55, %v509_v7  ;;  %v946_v7 = vmul.f32 %v7204_v55, %v510_v10  ;;  %v514_v10 = vld [vmem:[%s6038_s8 + $0x7d0] sm:$0xff] }
 0x200   : > { %1675 = vadd.xlane.f32.xlu1 %v1674_v27  ;;  %1672 = vadd.xlane.f32.xlu0 %v1671_v9 }
 0x201   : > { %v7218_v43 = vpop.xlane.xlu1 %1471  ;;  %v7220_v20 = vpop.xlane.xlu0 %1468 }
 0x202   : > { %9777 = vst [vmem:[#allocation149_spill] sm:$0xff] %v7218_v43  ;;  %9778 = vst [vmem:[#allocation150_spill] sm:$0xff] %v7220_v20  ;;  %v1686_v43 = vsel %vm956_vm0, %v943_v35, 0.0  ;;  %v511_v20 = vld [vmem:[%s6038_s8 + $0x7b8] sm:$0xff]  ;;  %v1689_v35 = vsel %vm956_vm0, %v944_v37, 0.0 }
 0x203   : > { %v947_v36 = vmul.f32 %v7204_v55, %v511_v20  ;;  %v948_v20 = vmul.f32 %v7204_v55, %v512_v34  ;;  %v516_v34 = vld [vmem:[%s6038_s8 + $0x7e0] sm:$0xff] }
 0x204   : > { %1681 = vadd.xlane.f32.xlu1 %v1680_v52  ;;  %1678 = vadd.xlane.f32.xlu0 %v1677_v11 }
 0x205   : > { %v7228_v27 = vpop.xlane.xlu1 %1477  ;;  %v7230_v9 = vpop.xlane.xlu0 %1474 }
 0x206   : > { %9779 = vst [vmem:[#allocation151_spill] sm:$0xff] %v7228_v27  ;;  %9780 = vst [vmem:[#allocation152_spill] sm:$0xff] %v7230_v9  ;;  %v1692_v27 = vsel %vm956_vm0, %v945_v56, 0.0  ;;  %v513_v9 = vld [vmem:[%s6038_s8 + $0x7c8] sm:$0xff]  ;;  %v1695_v56 = vsel %vm956_vm0, %v946_v7, 0.0 }
 0x207   : > { %v949_v37 = vmul.f32 %v7204_v55, %v513_v9  ;;  %v950_v9 = vmul.f32 %v7204_v55, %v514_v10 }
 0x208   : > { %1687 = vadd.xlane.f32.xlu1 %v1686_v43  ;;  %1684 = vadd.xlane.f32.xlu0 %v1683_v28 }
 0x209   : > { %v7238_v52 = vpop.xlane.xlu1 %1483  ;;  %v7240_v11 = vpop.xlane.xlu0 %1480 }
 0x20a   : > { %9781 = vst [vmem:[#allocation153_spill] sm:$0xff] %v7238_v52  ;;  %9782 = vst [vmem:[#allocation154_spill] sm:$0xff] %v7240_v11  ;;  %v1698_v52 = vsel %vm956_vm0, %v947_v36, 0.0  ;;  %v515_v11 = vld [vmem:[%s6038_s8 + $0x7d8] sm:$0xff]  ;;  %v1701_v36 = vsel %vm956_vm0, %v948_v20, 0.0  ;;  %v952_v20 = vmul.f32 %v7204_v55, %v516_v34 }
 0x20b   : > { %v951_v7 = vmul.f32 %v7204_v55, %v515_v11  ;;  %v518_v11 = vld [vmem:[%s6038_s8 + $0x7f0] sm:$0xff] }
 0x20c   : > { %1693 = vadd.xlane.f32.xlu1 %v1692_v27  ;;  %1690 = vadd.xlane.f32.xlu0 %v1689_v35 }
 0x20d   : > { %v7248_v43 = vpop.xlane.xlu1 %1489  ;;  %v7250_v28 = vpop.xlane.xlu0 %1486 }
 0x20e   : > { %9783 = vst [vmem:[#allocation155_spill] sm:$0xff] %v7248_v43  ;;  %9784 = vst [vmem:[#allocation156_spill] sm:$0xff] %v7250_v28  ;;  %v1704_v43 = vsel %vm956_vm0, %v949_v37, 0.0  ;;  %v517_v28 = vld [vmem:[%s6038_s8 + $0x7e8] sm:$0xff] }
 0x20f   : > { %v953_v37 = vmul.f32 %v7204_v55, %v517_v28 }
 0x210   : > { %1699 = vadd.xlane.f32.xlu1 %v1698_v52  ;;  %1696 = vadd.xlane.f32.xlu0 %v1695_v56 }
 0x211   : > { %v7258_v27 = vpop.xlane.xlu1 %1495  ;;  %v7260_v35 = vpop.xlane.xlu0 %1492 }
 0x212   : > { %9785 = vst [vmem:[#allocation157_spill] sm:$0xff] %v7258_v27  ;;  %9786 = vst [vmem:[#allocation158_spill] sm:$0xff] %v7260_v35  ;;  %v1710_v27 = vsel %vm956_vm0, %v951_v7, 0.0  ;;  %v1707_v35 = vsel %vm956_vm0, %v950_v9, 0.0  ;;  %v955_v7 = vmul.f32 %v7204_v55, %v519_v5  ;;  %v954_v9 = vmul.f32 %v7204_v55, %v518_v11  ;;  %v7312_v11 = vld [vmem:[%s7305_s11] sm:$0xff] }
 0x213   : > { %v2065_v23 = vrot.slane %v7312_v11, %v9615_v50 }
 0x214   : > { %1705 = vadd.xlane.f32.xlu1 %v1704_v43  ;;  %1702 = vadd.xlane.f32.xlu0 %v1701_v36  ;;  %v1716_v36 = vsel %vm956_vm0, %v953_v37, 0.0 }
 0x215   : > { %v7268_v52 = vpop.xlane.xlu1 %1501  ;;  %v7270_v56 = vpop.xlane.xlu0 %1498 }
 0x216   : > { %9787 = vst [vmem:[#allocation159_spill] sm:$0xff] %v7268_v52  ;;  %9788 = vst [vmem:[#allocation160_spill] sm:$0xff] %v7270_v56  ;;  %v1713_v52 = vsel %vm956_vm0, %v952_v20, 0.0 }
 0x218   : > { %1711 = vadd.xlane.f32.xlu1 %v1710_v27  ;;  %1708 = vadd.xlane.f32.xlu0 %v1707_v35  ;;  %v1722_v27 = vsel %vm956_vm0, %v955_v7, 0.0  ;;  %v1719_v35 = vsel %vm956_vm0, %v954_v9, 0.0  ;;  %v1730_v9 = vrot.slane %v7312_v11, %v6046_v8  ;;  %vm9626_vm0 = vcmask 1041409  }
 0x219   : > { %v7278_v10 = vpop.xlane.xlu1 %1507  ;;  %v7280_v43 = vpop.xlane.xlu0 %1504 }
 0x21a   : > { %9789 = vst [vmem:[#allocation161_spill] sm:$0xff] %v7278_v10  ;;  %9790 = vst [vmem:[#allocation162_spill] sm:$0xff] %v7280_v43 }
 0x21c   : > { %1717 = vadd.xlane.f32.xlu1 %v1716_v36  ;;  %1714 = vadd.xlane.f32.xlu0 %v1713_v52 }
 0x21d   : > { %v7286_v28 = vpop.xlane.xlu1 %1513  ;;  %v7288_v34 = vpop.xlane.xlu0 %1510 }
 0x21e   : > { %9791 = vst [vmem:[#allocation163_spill] sm:$0xff] %v7286_v28  ;;  %9792 = vst [vmem:[#allocation164_spill] sm:$0xff] %v7288_v34 }
 0x220   : > { %1723 = vadd.xlane.f32.xlu1 %v1722_v27  ;;  %1720 = vadd.xlane.f32.xlu0 %v1719_v35 }
 0x221   : > { %v7292_v37 = vpop.xlane.xlu1 %1519  ;;  %v7294_v10 = vpop.xlane.xlu0 %1516 }
 0x222   : > { %9793 = vst [vmem:[#allocation165_spill] sm:$0xff] %v7292_v37  ;;  %9794 = vst [vmem:[#allocation166_spill] sm:$0xff] %v7294_v10 }
 0x225   : > { %v7296_v20 = vpop.xlane.xlu1 %1525  ;;  %v7298_v5 = vpop.xlane.xlu0 %1522 }
 0x226   : > { %9795 = vst [vmem:[#allocation167_spill] sm:$0xff] %v7296_v20  ;;  %9796 = vst [vmem:[#allocation168_spill] sm:$0xff] %v7298_v5 }
 0x229   : > { %v7307_v55 = vpop.xlane.xlu1 %1531  ;;  %v7309_v52 = vpop.xlane.xlu0 %1528 }
 0x22a   : > { %9797 = vst [vmem:[#allocation169_spill] sm:$0xff] %v7307_v55  ;;  %9798 = vst [vmem:[#allocation170_spill] sm:$0xff] %v7309_v52 }
 0x22d   : > { %v7314_v36 = vpop.xlane.xlu1 %1537  ;;  %v7316_v7 = vpop.xlane.xlu0 %1534 }
 0x22e   : > { %9799 = vst [vmem:[#allocation171_spill] sm:$0xff] %v7314_v36  ;;  %9800 = vst [vmem:[#allocation172_spill] sm:$0xff] %v7316_v7 }
 0x231   : > { %1736 = vbcast.lane.b32.xlu1 %v1730_v9, 264  ;;  %v7320_v27 = vpop.xlane.xlu1 %1543  ;;  %v7322_v35 = vpop.xlane.xlu0 %1540 }
 0x232   : > { %9801 = vst [vmem:[#allocation173_spill] sm:$0xff] %v7320_v27  ;;  %9802 = vst [vmem:[#allocation174_spill] sm:$0xff] %v7322_v35 }
 0x235   : > { %1740 = vbcast.lane.b32.xlu1 %v1730_v9, 272  ;;  %v7324_v20 = vpop.xlane.xlu1 %1549  ;;  %v7326_v55 = vpop.xlane.xlu0 %1546 }
 0x236   : > { %9803 = vst [vmem:[#allocation175_spill] sm:$0xff] %v7324_v20  ;;  %9804 = vst [vmem:[#allocation176_spill] sm:$0xff] %v7326_v55  ;;  %1732 = vbcast.lane.b32.xlu0 %v1730_v9, 256 }
 0x239   : > { %1744 = vbcast.lane.b32.xlu1 %v1730_v9, 280  ;;  %v7328_v52 = vpop.xlane.xlu1 %1555  ;;  %v7330_v36 = vpop.xlane.xlu0 %1552 }
 0x23a   : > { %9805 = vst [vmem:[#allocation177_spill] sm:$0xff] %v7328_v52  ;;  %9806 = vst [vmem:[#allocation178_spill] sm:$0xff] %v7330_v36  ;;  %1748 = vbcast.lane.b32.xlu0 %v1730_v9, 288 }
 0x23d   : > { %1752 = vbcast.lane.b32.xlu1 %v1730_v9, 296  ;;  %v7332_v7 = vpop.xlane.xlu1 %1561  ;;  %v7334_v37 = vpop.xlane.xlu0 %1558 }
 0x23e   : > { %9807 = vst [vmem:[#allocation179_spill] sm:$0xff] %v7332_v7  ;;  %9808 = vst [vmem:[#allocation180_spill] sm:$0xff] %v7334_v37  ;;  %1756 = vbcast.lane.b32.xlu0 %v1730_v9, 304  ;;  %v9611_v37 = vsub.s32 1, %v6020_v3 }
 0x241   : > { %1760 = vbcast.lane.b32.xlu1 %v1730_v9, 312  ;;  %v7336_v35 = vpop.xlane.xlu1 %1567  ;;  %v7338_v27 = vpop.xlane.xlu0 %1564 }
 0x242   : > { %9809 = vst [vmem:[#allocation181_spill] sm:$0xff] %v7336_v35  ;;  %9810 = vst [vmem:[#allocation182_spill] sm:$0xff] %v7338_v27  ;;  %1764 = vbcast.lane.b32.xlu0 %v1730_v9, 320 }
 0x245   : > { %1768 = vbcast.lane.b32.xlu1 %v1730_v9, 328  ;;  %v7340_v55 = vpop.xlane.xlu1 %1573  ;;  %v7342_v20 = vpop.xlane.xlu0 %1570 }
 0x246   : > { %9811 = vst [vmem:[#allocation183_spill] sm:$0xff] %v7340_v55  ;;  %9812 = vst [vmem:[#allocation184_spill] sm:$0xff] %v7342_v20  ;;  %1772 = vbcast.lane.b32.xlu0 %v1730_v9, 336  ;;  %v1797_v55 = vrot.slane %v7312_v11, %v9611_v37 }
 0x249   : > { %1776 = vbcast.lane.b32.xlu1 %v1730_v9, 344  ;;  %v7344_v36 = vpop.xlane.xlu1 %1579  ;;  %v7346_v52 = vpop.xlane.xlu0 %1576 }
 0x24a   : > { %9813 = vst [vmem:[#allocation185_spill] sm:$0xff] %v7344_v36  ;;  %9814 = vst [vmem:[#allocation186_spill] sm:$0xff] %v7346_v52  ;;  %1780 = vbcast.lane.b32.xlu0 %v1730_v9, 352 }
 0x24d   : > { %1784 = vbcast.lane.b32.xlu1 %v1730_v9, 360  ;;  %v7349_v7 = vpop.xlane.xlu1 %1585  ;;  %v7351_v35 = vpop.xlane.xlu0 %1582 }
 0x24e   : > { %9815 = vst [vmem:[#allocation187_spill] sm:$0xff] %v7349_v7  ;;  %9816 = vst [vmem:[#allocation188_spill] sm:$0xff] %v7351_v35  ;;  %1788 = vbcast.lane.b32.xlu0 %v1730_v9, 368 }
 0x251   : > { %1792 = vbcast.lane.b32.xlu1 %v1730_v9, 376  ;;  %v7356_v20 = vpop.xlane.xlu1 %1591  ;;  %v7358_v27 = vpop.xlane.xlu0 %1588 }
 0x252   : > { %9817 = vst [vmem:[#allocation189_spill] sm:$0xff] %v7356_v20  ;;  %9818 = vst [vmem:[#allocation190_spill] sm:$0xff] %v7358_v27  ;;  %1799 = vbcast.lane.b32.xlu0 %v1797_v55, 256 }
 0x255   : > { %1803 = vbcast.lane.b32.xlu1 %v1797_v55, 264  ;;  %v7360_v52 = vpop.xlane.xlu1 %1597  ;;  %v7362_v36 = vpop.xlane.xlu0 %1594 }
 0x256   : > { %9819 = vst [vmem:[#allocation191_spill] sm:$0xff] %v7360_v52  ;;  %9820 = vst [vmem:[#allocation192_spill] sm:$0xff] %v7362_v36  ;;  %1807 = vbcast.lane.b32.xlu0 %v1797_v55, 272 }
 0x259   : > { %1811 = vbcast.lane.b32.xlu1 %v1797_v55, 280  ;;  %v7364_v7 = vpop.xlane.xlu1 %1603  ;;  %v7366_v35 = vpop.xlane.xlu0 %1600 }
 0x25a   : > { %9821 = vst [vmem:[#allocation193_spill] sm:$0xff] %v7364_v7  ;;  %9822 = vst [vmem:[#allocation194_spill] sm:$0xff] %v7366_v35  ;;  %1815 = vbcast.lane.b32.xlu0 %v1797_v55, 288 }
 0x25d   : > { %1819 = vbcast.lane.b32.xlu1 %v1797_v55, 296  ;;  %v7368_v37 = vpop.xlane.xlu1 %1609  ;;  %v7370_v9 = vpop.xlane.xlu0 %1606 }
 0x25e   : > { %9823 = vst [vmem:[#allocation195_spill] sm:$0xff] %v7368_v37  ;;  %9824 = vst [vmem:[#allocation196_spill] sm:$0xff] %v7370_v9  ;;  %1823 = vbcast.lane.b32.xlu0 %v1797_v55, 304  ;;  %v9612_v9 = vsub.s32 2, %v6020_v3 }
 0x261   : > { %1827 = vbcast.lane.b32.xlu1 %v1797_v55, 312  ;;  %v7372_v27 = vpop.xlane.xlu1 %1615  ;;  %v7374_v20 = vpop.xlane.xlu0 %1612 }
 0x262   : > { %9825 = vst [vmem:[#allocation197_spill] sm:$0xff] %v7372_v27  ;;  %9826 = vst [vmem:[#allocation198_spill] sm:$0xff] %v7374_v20  ;;  %1831 = vbcast.lane.b32.xlu0 %v1797_v55, 320 }
 0x265   : > { %1835 = vbcast.lane.b32.xlu1 %v1797_v55, 328  ;;  %v7376_v36 = vpop.xlane.xlu1 %1621  ;;  %v7378_v52 = vpop.xlane.xlu0 %1618 }
 0x266   : > { %9827 = vst [vmem:[#allocation199_spill] sm:$0xff] %v7376_v36  ;;  %9828 = vst [vmem:[#allocation200_spill] sm:$0xff] %v7378_v52  ;;  %1839 = vbcast.lane.b32.xlu0 %v1797_v55, 336  ;;  %v1864_v36 = vrot.slane %v7312_v11, %v9612_v9 }
 0x269   : > { %1843 = vbcast.lane.b32.xlu1 %v1797_v55, 344  ;;  %v7380_v35 = vpop.xlane.xlu1 %1627  ;;  %v7382_v7 = vpop.xlane.xlu0 %1624 }
 0x26a   : > { %9829 = vst [vmem:[#allocation201_spill] sm:$0xff] %v7380_v35  ;;  %9830 = vst [vmem:[#allocation202_spill] sm:$0xff] %v7382_v7  ;;  %1847 = vbcast.lane.b32.xlu0 %v1797_v55, 352 }
 0x26d   : > { %1851 = vbcast.lane.b32.xlu1 %v1797_v55, 360  ;;  %v7385_v37 = vpop.xlane.xlu1 %1633  ;;  %v7387_v27 = vpop.xlane.xlu0 %1630 }
 0x26e   : > { %9831 = vst [vmem:[#allocation203_spill] sm:$0xff] %v7385_v37  ;;  %9832 = vst [vmem:[#allocation204_spill] sm:$0xff] %v7387_v27  ;;  %1855 = vbcast.lane.b32.xlu0 %v1797_v55, 368 }
 0x271   : > { %1859 = vbcast.lane.b32.xlu1 %v1797_v55, 376  ;;  %v7392_v52 = vpop.xlane.xlu1 %1639  ;;  %v7394_v20 = vpop.xlane.xlu0 %1636 }
 0x272   : > { %9833 = vst [vmem:[#allocation205_spill] sm:$0xff] %v7392_v52  ;;  %9834 = vst [vmem:[#allocation206_spill] sm:$0xff] %v7394_v20  ;;  %1866 = vbcast.lane.b32.xlu0 %v1864_v36, 256 }
 0x275   : > { %1870 = vbcast.lane.b32.xlu1 %v1864_v36, 264  ;;  %v7396_v7 = vpop.xlane.xlu1 %1645  ;;  %v7398_v35 = vpop.xlane.xlu0 %1642 }
 0x276   : > { %9835 = vst [vmem:[#allocation207_spill] sm:$0xff] %v7396_v7  ;;  %9836 = vst [vmem:[#allocation208_spill] sm:$0xff] %v7398_v35  ;;  %1874 = vbcast.lane.b32.xlu0 %v1864_v36, 272 }
 0x279   : > { %1878 = vbcast.lane.b32.xlu1 %v1864_v36, 280  ;;  %v7400_v37 = vpop.xlane.xlu1 %1651  ;;  %v7402_v27 = vpop.xlane.xlu0 %1648 }
 0x27a   : > { %9837 = vst [vmem:[#allocation209_spill] sm:$0xff] %v7400_v37  ;;  %9838 = vst [vmem:[#allocation210_spill] sm:$0xff] %v7402_v27  ;;  %1882 = vbcast.lane.b32.xlu0 %v1864_v36, 288 }
 0x27d   : > { %1886 = vbcast.lane.b32.xlu1 %v1864_v36, 296  ;;  %v7404_v9 = vpop.xlane.xlu1 %1657  ;;  %v7406_v55 = vpop.xlane.xlu0 %1654 }
 0x27e   : > { %9839 = vst [vmem:[#allocation211_spill] sm:$0xff] %v7404_v9  ;;  %9840 = vst [vmem:[#allocation212_spill] sm:$0xff] %v7406_v55  ;;  %1890 = vbcast.lane.b32.xlu0 %v1864_v36, 304  ;;  %v9613_v55 = vsub.s32 3, %v6020_v3 }
 0x281   : > { %1894 = vbcast.lane.b32.xlu1 %v1864_v36, 312  ;;  %v7408_v20 = vpop.xlane.xlu1 %1663  ;;  %v7410_v52 = vpop.xlane.xlu0 %1660 }
 0x282   : > { %9841 = vst [vmem:[#allocation213_spill] sm:$0xff] %v7408_v20  ;;  %9842 = vst [vmem:[#allocation214_spill] sm:$0xff] %v7410_v52  ;;  %1898 = vbcast.lane.b32.xlu0 %v1864_v36, 320 }
 0x285   : > { %1902 = vbcast.lane.b32.xlu1 %v1864_v36, 328  ;;  %v7412_v35 = vpop.xlane.xlu1 %1669  ;;  %v7414_v7 = vpop.xlane.xlu0 %1666 }
 0x286   : > { %9843 = vst [vmem:[#allocation215_spill] sm:$0xff] %v7412_v35  ;;  %9844 = vst [vmem:[#allocation216_spill] sm:$0xff] %v7414_v7  ;;  %1906 = vbcast.lane.b32.xlu0 %v1864_v36, 336  ;;  %v1931_v35 = vrot.slane %v7312_v11, %v9613_v55 }
 0x289   : > { %1910 = vbcast.lane.b32.xlu1 %v1864_v36, 344  ;;  %v7416_v27 = vpop.xlane.xlu1 %1675  ;;  %v7418_v37 = vpop.xlane.xlu0 %1672 }
 0x28a   : > { %9845 = vst [vmem:[#allocation217_spill] sm:$0xff] %v7416_v27  ;;  %9846 = vst [vmem:[#allocation218_spill] sm:$0xff] %v7418_v37  ;;  %1914 = vbcast.lane.b32.xlu0 %v1864_v36, 352 }
 0x28d   : > { %1918 = vbcast.lane.b32.xlu1 %v1864_v36, 360  ;;  %v7421_v9 = vpop.xlane.xlu1 %1681  ;;  %v7423_v20 = vpop.xlane.xlu0 %1678 }
 0x28e   : > { %9847 = vst [vmem:[#allocation219_spill] sm:$0xff] %v7421_v9  ;;  %9848 = vst [vmem:[#allocation220_spill] sm:$0xff] %v7423_v20  ;;  %1922 = vbcast.lane.b32.xlu0 %v1864_v36, 368 }
 0x291   : > { %1926 = vbcast.lane.b32.xlu1 %v1864_v36, 376  ;;  %v7428_v7 = vpop.xlane.xlu1 %1687  ;;  %v7430_v52 = vpop.xlane.xlu0 %1684 }
 0x292   : > { %9849 = vst [vmem:[#allocation221_spill] sm:$0xff] %v7428_v7  ;;  %9850 = vst [vmem:[#allocation222_spill] sm:$0xff] %v7430_v52  ;;  %1933 = vbcast.lane.b32.xlu0 %v1931_v35, 256 }
 0x295   : > { %1937 = vbcast.lane.b32.xlu1 %v1931_v35, 264  ;;  %v7432_v27 = vpop.xlane.xlu1 %1693  ;;  %v7434_v37 = vpop.xlane.xlu0 %1690 }
 0x296   : > { %9851 = vst [vmem:[#allocation223_spill] sm:$0xff] %v7432_v27  ;;  %9852 = vst [vmem:[#allocation224_spill] sm:$0xff] %v7434_v37  ;;  %1941 = vbcast.lane.b32.xlu0 %v1931_v35, 272 }
 0x299   : > { %1945 = vbcast.lane.b32.xlu1 %v1931_v35, 280  ;;  %v7436_v9 = vpop.xlane.xlu1 %1699  ;;  %v7438_v20 = vpop.xlane.xlu0 %1696 }
 0x29a   : > { %9853 = vst [vmem:[#allocation225_spill] sm:$0xff] %v7436_v9  ;;  %9854 = vst [vmem:[#allocation226_spill] sm:$0xff] %v7438_v20  ;;  %1949 = vbcast.lane.b32.xlu0 %v1931_v35, 288 }
 0x29d   : > { %1953 = vbcast.lane.b32.xlu1 %v1931_v35, 296  ;;  %v7440_v55 = vpop.xlane.xlu1 %1705  ;;  %v7442_v36 = vpop.xlane.xlu0 %1702 }
 0x29e   : > { %9855 = vst [vmem:[#allocation227_spill] sm:$0xff] %v7440_v55  ;;  %9856 = vst [vmem:[#allocation228_spill] sm:$0xff] %v7442_v36  ;;  %1957 = vbcast.lane.b32.xlu0 %v1931_v35, 304  ;;  %v9614_v36 = vsub.s32 4, %v6020_v3 }
 0x2a1   : > { %1961 = vbcast.lane.b32.xlu1 %v1931_v35, 312  ;;  %v7444_v52 = vpop.xlane.xlu1 %1711  ;;  %v7446_v7 = vpop.xlane.xlu0 %1708 }
 0x2a2   : > { %9857 = vst [vmem:[#allocation229_spill] sm:$0xff] %v7444_v52  ;;  %9858 = vst [vmem:[#allocation230_spill] sm:$0xff] %v7446_v7  ;;  %1965 = vbcast.lane.b32.xlu0 %v1931_v35, 320 }
 0x2a5   : > { %1969 = vbcast.lane.b32.xlu1 %v1931_v35, 328  ;;  %v7448_v37 = vpop.xlane.xlu1 %1717  ;;  %v7450_v27 = vpop.xlane.xlu0 %1714 }
 0x2a6   : > { %9859 = vst [vmem:[#allocation231_spill] sm:$0xff] %v7448_v37  ;;  %9860 = vst [vmem:[#allocation232_spill] sm:$0xff] %v7450_v27  ;;  %1973 = vbcast.lane.b32.xlu0 %v1931_v35, 336  ;;  %v1998_v37 = vrot.slane %v7312_v11, %v9614_v36 }
 0x2a9   : > { %1977 = vbcast.lane.b32.xlu1 %v1931_v35, 344  ;;  %v7452_v20 = vpop.xlane.xlu1 %1723  ;;  %v7454_v9 = vpop.xlane.xlu0 %1720 }
 0x2aa   : > { %9861 = vst [vmem:[#allocation233_spill] sm:$0xff] %v7452_v20  ;;  %9862 = vst [vmem:[#allocation234_spill] sm:$0xff] %v7454_v9  ;;  %1981 = vbcast.lane.b32.xlu0 %v1931_v35, 352 }
 0x2ad   : > { %1985 = vbcast.lane.b32.xlu1 %v1931_v35, 360  ;;  %v7457_v55 = vpop.permute.xlu1 %1736  ;;  %v7459_v52 = vpop.permute.xlu0 %1732 }
 0x2ae   : > { %1989 = vbcast.lane.b32.xlu0 %v1931_v35, 368 }
 0x2b1   : > { %1993 = vbcast.lane.b32.xlu1 %v1931_v35, 376  ;;  %v7464_v27 = vpop.permute.xlu1 %1740  ;;  %v7466_v7 = vpop.permute.xlu0 %1748 }
 0x2b2   : > { %2000 = vbcast.lane.b32.xlu0 %v1998_v37, 256 }
 0x2b5   : > { %2004 = vbcast.lane.b32.xlu1 %v1998_v37, 264  ;;  %v7468_v9 = vpop.permute.xlu1 %1744  ;;  %v7470_v20 = vpop.permute.xlu0 %1756 }
 0x2b6   : > { %2008 = vbcast.lane.b32.xlu0 %v1998_v37, 272 }
 0x2b9   : > { %2012 = vbcast.lane.b32.xlu1 %v1998_v37, 280  ;;  %v7472_v5 = vpop.permute.xlu1 %1752  ;;  %v7474_v28 = vpop.permute.xlu0 %1764 }
 0x2ba   : > { %2016 = vbcast.lane.b32.xlu0 %v1998_v37, 288 }
 0x2bd   : > { %2020 = vbcast.lane.b32.xlu1 %v1998_v37, 296  ;;  %v7476_v36 = vpop.permute.xlu1 %1760  ;;  %v7478_v35 = vpop.permute.xlu0 %1772 }
 0x2be   : > { %2024 = vbcast.lane.b32.xlu0 %v1998_v37, 304 }
 0x2c1   : > { %2028 = vbcast.lane.b32.xlu1 %v1998_v37, 312  ;;  %v7480_v10 = vpop.permute.xlu1 %1768  ;;  %v7482_v34 = vpop.permute.xlu0 %1780 }
 0x2c2   : > { %2032 = vbcast.lane.b32.xlu0 %v1998_v37, 320 }
 0x2c5   : > { %2036 = vbcast.lane.b32.xlu1 %v1998_v37, 328  ;;  %v7484_v43 = vpop.permute.xlu1 %1776  ;;  %v7486_v56 = vpop.permute.xlu0 %1788 }
 0x2c6   : > { %2040 = vbcast.lane.b32.xlu0 %v1998_v37, 336 }
 0x2c9   : > { %2044 = vbcast.lane.b32.xlu1 %v1998_v37, 344  ;;  %v7488_v24 = vpop.permute.xlu1 %1784  ;;  %v7490_v0 = vpop.permute.xlu0 %1799 }
 0x2ca   : > { %2048 = vbcast.lane.b32.xlu0 %v1998_v37, 352 }
 0x2cd   : > { %2052 = vbcast.lane.b32.xlu1 %v1998_v37, 360  ;;  %v7493_v49 = vpop.permute.xlu1 %1792  ;;  %v7495_v25 = vpop.permute.xlu0 %1807 }
 0x2ce   : > { %2056 = vbcast.lane.b32.xlu0 %v1998_v37, 368 }
 0x2d1   : > { %2060 = vbcast.lane.b32.xlu1 %v1998_v37, 376  ;;  %v7500_v4 = vpop.permute.xlu1 %1803  ;;  %v7502_v2 = vpop.permute.xlu0 %1815 }
 0x2d2   : > { %2067 = vbcast.lane.b32.xlu0 %v2065_v23, 256 }
 0x2d5   : > { %2071 = vbcast.lane.b32.xlu1 %v2065_v23, 264  ;;  %v7504_v31 = vpop.permute.xlu1 %1811  ;;  %v7506_v38 = vpop.permute.xlu0 %1823 }
 0x2d6   : > { %2075 = vbcast.lane.b32.xlu0 %v2065_v23, 272 }
 0x2d9   : > { %2079 = vbcast.lane.b32.xlu1 %v2065_v23, 280  ;;  %v7508_v19 = vpop.permute.xlu1 %1819  ;;  %v7510_v18 = vpop.permute.xlu0 %1831 }
 0x2da   : > { %2083 = vbcast.lane.b32.xlu0 %v2065_v23, 288 }
 0x2dd   : > { %2087 = vbcast.lane.b32.xlu1 %v2065_v23, 296  ;;  %v7512_v50 = vpop.permute.xlu1 %1827  ;;  %v7514_v37 = vpop.permute.xlu0 %1839 }
 0x2de   : > { %9863 = vst [vmem:[#allocation235_spill] sm:$0xff] %v7514_v37  ;;  %2091 = vbcast.lane.b32.xlu0 %v2065_v23, 304  ;;  %v9616_v37 = vsub.s32 6, %v6020_v3 }
 0x2e1   : > { %2095 = vbcast.lane.b32.xlu1 %v2065_v23, 312  ;;  %v7516_v58 = vpop.permute.xlu1 %1835  ;;  %v7518_v57 = vpop.permute.xlu0 %1847 }
 0x2e2   : > { %9864 = vst [vmem:[#allocation236_spill] sm:$0xff] %v7518_v57  ;;  %2099 = vbcast.lane.b32.xlu0 %v2065_v23, 320  ;;  %v2132_v57 = vrot.slane %v7312_v11, %v9616_v37 }
 0x2e5   : > { %2103 = vbcast.lane.b32.xlu1 %v2065_v23, 328  ;;  %v7520_v44 = vpop.permute.xlu1 %1843  ;;  %v7522_v42 = vpop.permute.xlu0 %1855 }
 0x2e6   : > { %9865 = vst [vmem:[#allocation237_spill] sm:$0xff] %v7520_v44  ;;  %9866 = vst [vmem:[#allocation238_spill] sm:$0xff] %v7522_v42  ;;  %2107 = vbcast.lane.b32.xlu0 %v2065_v23, 336 }
 0x2e9   : > { %2111 = vbcast.lane.b32.xlu1 %v2065_v23, 344  ;;  %v7524_v33 = vpop.permute.xlu1 %1851  ;;  %v7526_v29 = vpop.permute.xlu0 %1866 }
 0x2ea   : > { %9867 = vst [vmem:[#allocation239_spill] sm:$0xff] %v7524_v33  ;;  %9868 = vst [vmem:[#allocation240_spill] sm:$0xff] %v7526_v29  ;;  %2115 = vbcast.lane.b32.xlu0 %v2065_v23, 352 }
 0x2ed   : > { %2119 = vbcast.lane.b32.xlu1 %v2065_v23, 360  ;;  %v7529_v17 = vpop.permute.xlu1 %1859  ;;  %v7531_v14 = vpop.permute.xlu0 %1874 }
 0x2ee   : > { %9869 = vst [vmem:[#allocation241_spill] sm:$0xff] %v7529_v17  ;;  %9870 = vst [vmem:[#allocation242_spill] sm:$0xff] %v7531_v14  ;;  %2123 = vbcast.lane.b32.xlu0 %v2065_v23, 368 }
 0x2f1   : > { %2127 = vbcast.lane.b32.xlu1 %v2065_v23, 376  ;;  %v7536_v42 = vpop.permute.xlu1 %1870  ;;  %v7538_v44 = vpop.permute.xlu0 %1882 }
 0x2f2   : > { %9871 = vst [vmem:[#allocation243_spill] sm:$0xff] %v7536_v42  ;;  %9872 = vst [vmem:[#allocation244_spill] sm:$0xff] %v7538_v44  ;;  %2134 = vbcast.lane.b32.xlu0 %v2132_v57, 256 }
 0x2f5   : > { %2138 = vbcast.lane.b32.xlu1 %v2132_v57, 264  ;;  %v7540_v29 = vpop.permute.xlu1 %1878  ;;  %v7542_v33 = vpop.permute.xlu0 %1890 }
 0x2f6   : > { %9873 = vst [vmem:[#allocation245_spill] sm:$0xff] %v7540_v29  ;;  %9874 = vst [vmem:[#allocation246_spill] sm:$0xff] %v7542_v33  ;;  %2142 = vbcast.lane.b32.xlu0 %v2132_v57, 272 }
 0x2f9   : > { %2146 = vbcast.lane.b32.xlu1 %v2132_v57, 280  ;;  %v7544_v17 = vpop.permute.xlu1 %1886  ;;  %v7546_v14 = vpop.permute.xlu0 %1898 }
 0x2fa   : > { %9875 = vst [vmem:[#allocation247_spill] sm:$0xff] %v7544_v17  ;;  %9876 = vst [vmem:[#allocation248_spill] sm:$0xff] %v7546_v14  ;;  %2150 = vbcast.lane.b32.xlu0 %v2132_v57, 288 }
 0x2fd   : > { %2154 = vbcast.lane.b32.xlu1 %v2132_v57, 296  ;;  %v7548_v37 = vpop.permute.xlu1 %1894  ;;  %v7550_v23 = vpop.permute.xlu0 %1906 }
 0x2fe   : > { %9877 = vst [vmem:[#allocation249_spill] sm:$0xff] %v7548_v37  ;;  %9878 = vst [vmem:[#allocation250_spill] sm:$0xff] %v7550_v23  ;;  %2158 = vbcast.lane.b32.xlu0 %v2132_v57, 304  ;;  %v9617_v23 = vsub.s32 7, %v6020_v3 }
 0x301   : > { %2162 = vbcast.lane.b32.xlu1 %v2132_v57, 312  ;;  %v7552_v44 = vpop.permute.xlu1 %1902  ;;  %v7554_v42 = vpop.permute.xlu0 %1914 }
 0x302   : > { %9879 = vst [vmem:[#allocation251_spill] sm:$0xff] %v7552_v44  ;;  %9880 = vst [vmem:[#allocation252_spill] sm:$0xff] %v7554_v42  ;;  %2166 = vbcast.lane.b32.xlu0 %v2132_v57, 320  ;;  %v2199_v42 = vrot.slane %v7312_v11, %v9617_v23 }
 0x305   : > { %2170 = vbcast.lane.b32.xlu1 %v2132_v57, 328  ;;  %v7556_v33 = vpop.permute.xlu1 %1910  ;;  %v7558_v29 = vpop.permute.xlu0 %1922 }
 0x306   : > { %9881 = vst [vmem:[#allocation253_spill] sm:$0xff] %v7556_v33  ;;  %9882 = vst [vmem:[#allocation254_spill] sm:$0xff] %v7558_v29  ;;  %2174 = vbcast.lane.b32.xlu0 %v2132_v57, 336 }
 0x309   : > { %2178 = vbcast.lane.b32.xlu1 %v2132_v57, 344  ;;  %v7560_v14 = vpop.permute.xlu1 %1918  ;;  %v7562_v17 = vpop.permute.xlu0 %1933 }
 0x30a   : > { %9883 = vst [vmem:[#allocation255_spill] sm:$0xff] %v7560_v14  ;;  %9884 = vst [vmem:[#allocation256_spill] sm:$0xff] %v7562_v17  ;;  %2182 = vbcast.lane.b32.xlu0 %v2132_v57, 352 }
 0x30d   : > { %2186 = vbcast.lane.b32.xlu1 %v2132_v57, 360  ;;  %v7565_v37 = vpop.permute.xlu1 %1926  ;;  %v7567_v44 = vpop.permute.xlu0 %1941 }
 0x30e   : > { %9885 = vst [vmem:[#allocation257_spill] sm:$0xff] %v7565_v37  ;;  %9886 = vst [vmem:[#allocation258_spill] sm:$0xff] %v7567_v44  ;;  %2190 = vbcast.lane.b32.xlu0 %v2132_v57, 368 }
 0x311   : > { %2194 = vbcast.lane.b32.xlu1 %v2132_v57, 376  ;;  %v7572_v29 = vpop.permute.xlu1 %1937  ;;  %v7574_v33 = vpop.permute.xlu0 %1949 }
 0x312   : > { %9887 = vst [vmem:[#allocation259_spill] sm:$0xff] %v7572_v29  ;;  %9888 = vst [vmem:[#allocation260_spill] sm:$0xff] %v7574_v33  ;;  %2201 = vbcast.lane.b32.xlu0 %v2199_v42, 256 }
 0x315   : > { %2205 = vbcast.lane.b32.xlu1 %v2199_v42, 264  ;;  %v7576_v17 = vpop.permute.xlu1 %1945  ;;  %v7578_v14 = vpop.permute.xlu0 %1957 }
 0x316   : > { %9889 = vst [vmem:[#allocation261_spill] sm:$0xff] %v7576_v17  ;;  %9890 = vst [vmem:[#allocation262_spill] sm:$0xff] %v7578_v14  ;;  %2209 = vbcast.lane.b32.xlu0 %v2199_v42, 272 }
 0x319   : > { %2213 = vbcast.lane.b32.xlu1 %v2199_v42, 280  ;;  %v7580_v37 = vpop.permute.xlu1 %1953  ;;  %v7582_v44 = vpop.permute.xlu0 %1965 }
 0x31a   : > { %9891 = vst [vmem:[#allocation263_spill] sm:$0xff] %v7580_v37  ;;  %9892 = vst [vmem:[#allocation264_spill] sm:$0xff] %v7582_v44  ;;  %2217 = vbcast.lane.b32.xlu0 %v2199_v42, 288 }
 0x31d   : > { %2221 = vbcast.lane.b32.xlu1 %v2199_v42, 296  ;;  %v7584_v57 = vpop.permute.xlu1 %1961  ;;  %v7586_v11 = vpop.permute.xlu0 %1973 }
 0x31e   : > { %9893 = vst [vmem:[#allocation265_spill] sm:$0xff] %v7584_v57  ;;  %9894 = vst [vmem:[#allocation266_spill] sm:$0xff] %v7586_v11  ;;  %2225 = vbcast.lane.b32.xlu0 %v2199_v42, 304  ;;  %v7601_v11 = vld [vmem:[%s7305_s11 + $0x8] sm:$0xff] }
 0x321   : > { %2229 = vbcast.lane.b32.xlu1 %v2199_v42, 312  ;;  %v7588_v23 = vpop.permute.xlu1 %1969  ;;  %v7590_v33 = vpop.permute.xlu0 %1981 }
 0x322   : > { %9895 = vst [vmem:[#allocation267_spill] sm:$0xff] %v7588_v23  ;;  %9896 = vst [vmem:[#allocation268_spill] sm:$0xff] %v7590_v33  ;;  %2233 = vbcast.lane.b32.xlu0 %v2199_v42, 320  ;;  %v2266_v33 = vrot.slane %v7601_v11, %v6046_v8 }
 0x325   : > { %2237 = vbcast.lane.b32.xlu1 %v2199_v42, 328  ;;  %v7592_v14 = vpop.permute.xlu1 %1977  ;;  %v7594_v37 = vpop.permute.xlu0 %1989 }
 0x326   : > { %9897 = vst [vmem:[#allocation269_spill] sm:$0xff] %v7592_v14  ;;  %9898 = vst [vmem:[#allocation270_spill] sm:$0xff] %v7594_v37  ;;  %2241 = vbcast.lane.b32.xlu0 %v2199_v42, 336 }
 0x329   : > { %2245 = vbcast.lane.b32.xlu1 %v2199_v42, 344  ;;  %v7596_v44 = vpop.permute.xlu1 %1985  ;;  %v7598_v17 = vpop.permute.xlu0 %2000 }
 0x32a   : > { %9899 = vst [vmem:[#allocation271_spill] sm:$0xff] %v7596_v44  ;;  %9900 = vst [vmem:[#allocation272_spill] sm:$0xff] %v7598_v17  ;;  %2249 = vbcast.lane.b32.xlu0 %v2199_v42, 352 }
 0x32d   : > { %2253 = vbcast.lane.b32.xlu1 %v2199_v42, 360  ;;  %v7603_v57 = vpop.permute.xlu1 %1993  ;;  %v7605_v23 = vpop.permute.xlu0 %2008 }
 0x32e   : > { %9901 = vst [vmem:[#allocation273_spill] sm:$0xff] %v7603_v57  ;;  %9902 = vst [vmem:[#allocation274_spill] sm:$0xff] %v7605_v23  ;;  %2257 = vbcast.lane.b32.xlu0 %v2199_v42, 368 }
 0x331   : > { %2261 = vbcast.lane.b32.xlu1 %v2199_v42, 376  ;;  %v7609_v37 = vpop.permute.xlu1 %2004  ;;  %v7611_v14 = vpop.permute.xlu0 %2016 }
 0x332   : > { %9903 = vst [vmem:[#allocation275_spill] sm:$0xff] %v7609_v37  ;;  %9904 = vst [vmem:[#allocation276_spill] sm:$0xff] %v7611_v14  ;;  %2268 = vbcast.lane.b32.xlu0 %v2266_v33, 256 }
 0x335   : > { %2272 = vbcast.lane.b32.xlu1 %v2266_v33, 264  ;;  %v7613_v17 = vpop.permute.xlu1 %2012  ;;  %v7615_v44 = vpop.permute.xlu0 %2024 }
 0x336   : > { %9905 = vst [vmem:[#allocation277_spill] sm:$0xff] %v7613_v17  ;;  %9906 = vst [vmem:[#allocation278_spill] sm:$0xff] %v7615_v44  ;;  %2276 = vbcast.lane.b32.xlu0 %v2266_v33, 272 }
 0x339   : > { %2280 = vbcast.lane.b32.xlu1 %v2266_v33, 280  ;;  %v7617_v57 = vpop.permute.xlu1 %2020  ;;  %v7619_v23 = vpop.permute.xlu0 %2032 }
 0x33a   : > { %9907 = vst [vmem:[#allocation279_spill] sm:$0xff] %v7617_v57  ;;  %9908 = vst [vmem:[#allocation280_spill] sm:$0xff] %v7619_v23  ;;  %2284 = vbcast.lane.b32.xlu0 %v2266_v33, 288 }
 0x33d   : > { %2288 = vbcast.lane.b32.xlu1 %v2266_v33, 296  ;;  %v7621_v8 = vpop.permute.xlu1 %2028  ;;  %v7623_v42 = vpop.permute.xlu0 %2040 }
 0x33e   : > { %9909 = vst [vmem:[#allocation281_spill] sm:$0xff] %v7621_v8  ;;  %9910 = vst [vmem:[#allocation282_spill] sm:$0xff] %v7623_v42  ;;  %2292 = vbcast.lane.b32.xlu0 %v2266_v33, 304 }
 0x341   : > { %2296 = vbcast.lane.b32.xlu1 %v2266_v33, 312  ;;  %v7625_v14 = vpop.permute.xlu1 %2036  ;;  %v7627_v37 = vpop.permute.xlu0 %2048 }
 0x342   : > { %9911 = vst [vmem:[#allocation283_spill] sm:$0xff] %v7625_v14  ;;  %9912 = vst [vmem:[#allocation284_spill] sm:$0xff] %v7627_v37  ;;  %2300 = vbcast.lane.b32.xlu0 %v2266_v33, 320  ;;  %v9919_v37 = vsub.s32 1, %v6020_v3 }
 0x344   : > { %v2333_v14 = vrot.slane %v7601_v11, %v9919_v37 }
 0x345   : > { %2304 = vbcast.lane.b32.xlu1 %v2266_v33, 328  ;;  %v7629_v44 = vpop.permute.xlu1 %2044  ;;  %v7631_v17 = vpop.permute.xlu0 %2056 }
 0x346   : > { %9913 = vst [vmem:[#allocation285_spill] sm:$0xff] %v7629_v44  ;;  %9914 = vst [vmem:[#allocation286_spill] sm:$0xff] %v7631_v17  ;;  %2308 = vbcast.lane.b32.xlu0 %v2266_v33, 336 }
 0x349   : > { %2312 = vbcast.lane.b32.xlu1 %v2266_v33, 344  ;;  %v7633_v23 = vpop.permute.xlu1 %2052  ;;  %v7635_v57 = vpop.permute.xlu0 %2067 }
 0x34a   : > { %9915 = vst [vmem:[#allocation287_spill] sm:$0xff] %v7633_v23  ;;  %9916 = vst [vmem:[#allocation288_spill] sm:$0xff] %v7635_v57  ;;  %2316 = vbcast.lane.b32.xlu0 %v2266_v33, 352 }
 0x34d   : > { %2320 = vbcast.lane.b32.xlu1 %v2266_v33, 360  ;;  %v7637_v42 = vpop.permute.xlu1 %2060  ;;  %v7639_v8 = vpop.permute.xlu0 %2075 }
 0x34e   : > { %9917 = vst [vmem:[#allocation289_spill] sm:$0xff] %v7637_v42  ;;  %9918 = vst [vmem:[#allocation290_spill] sm:$0xff] %v7639_v8  ;;  %2324 = vbcast.lane.b32.xlu0 %v2266_v33, 368 }
 0x351   : > { %2328 = vbcast.lane.b32.xlu1 %v2266_v33, 376  ;;  %v7644_v44 = vpop.permute.xlu1 %2071  ;;  %v7646_v17 = vpop.permute.xlu0 %2083 }
 0x352   : > { %9920 = vst [vmem:[#allocation291_spill] sm:$0xff] %v7644_v44  ;;  %9921 = vst [vmem:[#allocation292_spill] sm:$0xff] %v7646_v17  ;;  %2335 = vbcast.lane.b32.xlu0 %v2333_v14, 256 }
 0x355   : > { %2339 = vbcast.lane.b32.xlu1 %v2333_v14, 264  ;;  %v7648_v23 = vpop.permute.xlu1 %2079  ;;  %v7650_v57 = vpop.permute.xlu0 %2091 }
 0x356   : > { %9922 = vst [vmem:[#allocation293_spill] sm:$0xff] %v7648_v23  ;;  %9923 = vst [vmem:[#allocation294_spill] sm:$0xff] %v7650_v57  ;;  %2343 = vbcast.lane.b32.xlu0 %v2333_v14, 272 }
 0x359   : > { %2347 = vbcast.lane.b32.xlu1 %v2333_v14, 280  ;;  %v7652_v42 = vpop.permute.xlu1 %2087  ;;  %v7654_v8 = vpop.permute.xlu0 %2099 }
 0x35a   : > { %9924 = vst [vmem:[#allocation295_spill] sm:$0xff] %v7652_v42  ;;  %9925 = vst [vmem:[#allocation296_spill] sm:$0xff] %v7654_v8  ;;  %2351 = vbcast.lane.b32.xlu0 %v2333_v14, 288 }
 0x35d   : > { %2355 = vbcast.lane.b32.xlu1 %v2333_v14, 296  ;;  %v7656_v37 = vpop.permute.xlu1 %2095  ;;  %v7658_v33 = vpop.permute.xlu0 %2107 }
 0x35e   : > { %9926 = vst [vmem:[#allocation297_spill] sm:$0xff] %v7656_v37  ;;  %9927 = vst [vmem:[#allocation298_spill] sm:$0xff] %v7658_v33  ;;  %2359 = vbcast.lane.b32.xlu0 %v2333_v14, 304 }
 0x361   : > { %2363 = vbcast.lane.b32.xlu1 %v2333_v14, 312  ;;  %v7660_v17 = vpop.permute.xlu1 %2103  ;;  %v7662_v44 = vpop.permute.xlu0 %2115 }
 0x362   : > { %9928 = vst [vmem:[#allocation299_spill] sm:$0xff] %v7660_v17  ;;  %9929 = vst [vmem:[#allocation300_spill] sm:$0xff] %v7662_v44  ;;  %2367 = vbcast.lane.b32.xlu0 %v2333_v14, 320  ;;  %v9936_v44 = vsub.s32 2, %v6020_v3 }
 0x364   : > { %v2400_v17 = vrot.slane %v7601_v11, %v9936_v44 }
 0x365   : > { %2371 = vbcast.lane.b32.xlu1 %v2333_v14, 328  ;;  %v7664_v57 = vpop.permute.xlu1 %2111  ;;  %v7666_v23 = vpop.permute.xlu0 %2123 }
 0x366   : > { %9930 = vst [vmem:[#allocation301_spill] sm:$0xff] %v7664_v57  ;;  %9931 = vst [vmem:[#allocation302_spill] sm:$0xff] %v7666_v23  ;;  %2375 = vbcast.lane.b32.xlu0 %v2333_v14, 336 }
 0x369   : > { %2379 = vbcast.lane.b32.xlu1 %v2333_v14, 344  ;;  %v7668_v8 = vpop.permute.xlu1 %2119  ;;  %v7670_v42 = vpop.permute.xlu0 %2134 }
 0x36a   : > { %9932 = vst [vmem:[#allocation303_spill] sm:$0xff] %v7668_v8  ;;  %9933 = vst [vmem:[#allocation304_spill] sm:$0xff] %v7670_v42  ;;  %2383 = vbcast.lane.b32.xlu0 %v2333_v14, 352 }
 0x36d   : > { %2387 = vbcast.lane.b32.xlu1 %v2333_v14, 360  ;;  %v7672_v33 = vpop.permute.xlu1 %2127  ;;  %v7674_v37 = vpop.permute.xlu0 %2142 }
 0x36e   : > { %9934 = vst [vmem:[#allocation305_spill] sm:$0xff] %v7672_v33  ;;  %9935 = vst [vmem:[#allocation306_spill] sm:$0xff] %v7674_v37  ;;  %2391 = vbcast.lane.b32.xlu0 %v2333_v14, 368 }
 0x371   : > { %2395 = vbcast.lane.b32.xlu1 %v2333_v14, 376  ;;  %v7679_v57 = vpop.permute.xlu1 %2138  ;;  %v7681_v23 = vpop.permute.xlu0 %2150 }
 0x372   : > { %9937 = vst [vmem:[#allocation307_spill] sm:$0xff] %v7679_v57  ;;  %9938 = vst [vmem:[#allocation308_spill] sm:$0xff] %v7681_v23  ;;  %2402 = vbcast.lane.b32.xlu0 %v2400_v17, 256 }
 0x375   : > { %2406 = vbcast.lane.b32.xlu1 %v2400_v17, 264  ;;  %v7683_v8 = vpop.permute.xlu1 %2146  ;;  %v7685_v42 = vpop.permute.xlu0 %2158 }
 0x376   : > { %9939 = vst [vmem:[#allocation309_spill] sm:$0xff] %v7683_v8  ;;  %9940 = vst [vmem:[#allocation310_spill] sm:$0xff] %v7685_v42  ;;  %2410 = vbcast.lane.b32.xlu0 %v2400_v17, 272 }
 0x379   : > { %2414 = vbcast.lane.b32.xlu1 %v2400_v17, 280  ;;  %v7687_v33 = vpop.permute.xlu1 %2154  ;;  %v7689_v37 = vpop.permute.xlu0 %2166 }
 0x37a   : > { %9941 = vst [vmem:[#allocation311_spill] sm:$0xff] %v7687_v33  ;;  %9942 = vst [vmem:[#allocation312_spill] sm:$0xff] %v7689_v37  ;;  %2418 = vbcast.lane.b32.xlu0 %v2400_v17, 288 }
 0x37d   : > { %2422 = vbcast.lane.b32.xlu1 %v2400_v17, 296  ;;  %v7691_v44 = vpop.permute.xlu1 %2162  ;;  %v7693_v14 = vpop.permute.xlu0 %2174 }
 0x37e   : > { %9943 = vst [vmem:[#allocation313_spill] sm:$0xff] %v7691_v44  ;;  %9944 = vst [vmem:[#allocation314_spill] sm:$0xff] %v7693_v14  ;;  %2426 = vbcast.lane.b32.xlu0 %v2400_v17, 304 }
 0x381   : > { %2430 = vbcast.lane.b32.xlu1 %v2400_v17, 312  ;;  %v7695_v23 = vpop.permute.xlu1 %2170  ;;  %v7697_v57 = vpop.permute.xlu0 %2182 }
 0x382   : > { %9945 = vst [vmem:[#allocation315_spill] sm:$0xff] %v7695_v23  ;;  %9946 = vst [vmem:[#allocation316_spill] sm:$0xff] %v7697_v57  ;;  %2434 = vbcast.lane.b32.xlu0 %v2400_v17, 320  ;;  %v9953_v57 = vsub.s32 3, %v6020_v3 }
 0x384   : > { %v2467_v23 = vrot.slane %v7601_v11, %v9953_v57 }
 0x385   : > { %2438 = vbcast.lane.b32.xlu1 %v2400_v17, 328  ;;  %v7699_v42 = vpop.permute.xlu1 %2178  ;;  %v7701_v8 = vpop.permute.xlu0 %2190 }
 0x386   : > { %9947 = vst [vmem:[#allocation317_spill] sm:$0xff] %v7699_v42  ;;  %9948 = vst [vmem:[#allocation318_spill] sm:$0xff] %v7701_v8  ;;  %2442 = vbcast.lane.b32.xlu0 %v2400_v17, 336 }
 0x389   : > { %2446 = vbcast.lane.b32.xlu1 %v2400_v17, 344  ;;  %v7703_v37 = vpop.permute.xlu1 %2186  ;;  %v7705_v33 = vpop.permute.xlu0 %2201 }
 0x38a   : > { %9949 = vst [vmem:[#allocation319_spill] sm:$0xff] %v7703_v37  ;;  %9950 = vst [vmem:[#allocation320_spill] sm:$0xff] %v7705_v33  ;;  %2450 = vbcast.lane.b32.xlu0 %v2400_v17, 352 }
 0x38d   : > { %2454 = vbcast.lane.b32.xlu1 %v2400_v17, 360  ;;  %v7707_v14 = vpop.permute.xlu1 %2194  ;;  %v7709_v44 = vpop.permute.xlu0 %2209 }
 0x38e   : > { %9951 = vst [vmem:[#allocation321_spill] sm:$0xff] %v7707_v14  ;;  %9952 = vst [vmem:[#allocation322_spill] sm:$0xff] %v7709_v44  ;;  %2458 = vbcast.lane.b32.xlu0 %v2400_v17, 368 }
 0x391   : > { %2462 = vbcast.lane.b32.xlu1 %v2400_v17, 376  ;;  %v7714_v42 = vpop.permute.xlu1 %2205  ;;  %v7716_v8 = vpop.permute.xlu0 %2217 }
 0x392   : > { %9954 = vst [vmem:[#allocation323_spill] sm:$0xff] %v7714_v42  ;;  %9955 = vst [vmem:[#allocation324_spill] sm:$0xff] %v7716_v8  ;;  %2469 = vbcast.lane.b32.xlu0 %v2467_v23, 256 }
 0x395   : > { %2473 = vbcast.lane.b32.xlu1 %v2467_v23, 264  ;;  %v7718_v37 = vpop.permute.xlu1 %2213  ;;  %v7720_v33 = vpop.permute.xlu0 %2225 }
 0x396   : > { %9956 = vst [vmem:[#allocation325_spill] sm:$0xff] %v7718_v37  ;;  %9957 = vst [vmem:[#allocation326_spill] sm:$0xff] %v7720_v33  ;;  %2477 = vbcast.lane.b32.xlu0 %v2467_v23, 272 }
 0x399   : > { %2481 = vbcast.lane.b32.xlu1 %v2467_v23, 280  ;;  %v7722_v14 = vpop.permute.xlu1 %2221  ;;  %v7724_v44 = vpop.permute.xlu0 %2233 }
 0x39a   : > { %9958 = vst [vmem:[#allocation327_spill] sm:$0xff] %v7722_v14  ;;  %9959 = vst [vmem:[#allocation328_spill] sm:$0xff] %v7724_v44  ;;  %2485 = vbcast.lane.b32.xlu0 %v2467_v23, 288 }
 0x39d   : > { %2489 = vbcast.lane.b32.xlu1 %v2467_v23, 296  ;;  %v7726_v57 = vpop.permute.xlu1 %2229  ;;  %v7728_v17 = vpop.permute.xlu0 %2241 }
 0x39e   : > { %9960 = vst [vmem:[#allocation329_spill] sm:$0xff] %v7726_v57  ;;  %9961 = vst [vmem:[#allocation330_spill] sm:$0xff] %v7728_v17  ;;  %2493 = vbcast.lane.b32.xlu0 %v2467_v23, 304 }
 0x3a1   : > { %2497 = vbcast.lane.b32.xlu1 %v2467_v23, 312  ;;  %v7730_v8 = vpop.permute.xlu1 %2237  ;;  %v7732_v42 = vpop.permute.xlu0 %2249 }
 0x3a2   : > { %9962 = vst [vmem:[#allocation331_spill] sm:$0xff] %v7730_v8  ;;  %9963 = vst [vmem:[#allocation332_spill] sm:$0xff] %v7732_v42  ;;  %2501 = vbcast.lane.b32.xlu0 %v2467_v23, 320  ;;  %v9970_v42 = vsub.s32 4, %v6020_v3 }
 0x3a4   : > { %v2534_v8 = vrot.slane %v7601_v11, %v9970_v42 }
 0x3a5   : > { %2505 = vbcast.lane.b32.xlu1 %v2467_v23, 328  ;;  %v7734_v33 = vpop.permute.xlu1 %2245  ;;  %v7736_v37 = vpop.permute.xlu0 %2257 }
 0x3a6   : > { %9964 = vst [vmem:[#allocation333_spill] sm:$0xff] %v7734_v33  ;;  %9965 = vst [vmem:[#allocation334_spill] sm:$0xff] %v7736_v37  ;;  %2509 = vbcast.lane.b32.xlu0 %v2467_v23, 336  ;;  %v5938_v33 = vmov 0  }
 0x3a7   : > { %5855 = vset.pattern.permute.xlu0 %v5938_v33  ;;  %5856 = vset.pattern.permute.xlu1 %v5938_v33 }
 0x3a9   : > { %2513 = vbcast.lane.b32.xlu1 %v2467_v23, 344  ;;  %v7738_v44 = vpop.permute.xlu1 %2253  ;;  %v7740_v14 = vpop.permute.xlu0 %2268 }
 0x3aa   : > { %9966 = vst [vmem:[#allocation335_spill] sm:$0xff] %v7738_v44  ;;  %9967 = vst [vmem:[#allocation336_spill] sm:$0xff] %v7740_v14  ;;  %2517 = vbcast.lane.b32.xlu0 %v2467_v23, 352 }
 0x3ad   : > { %2521 = vbcast.lane.b32.xlu1 %v2467_v23, 360  ;;  %v7742_v17 = vpop.permute.xlu1 %2261  ;;  %v7744_v57 = vpop.permute.xlu0 %2276 }
 0x3ae   : > { %9968 = vst [vmem:[#allocation337_spill] sm:$0xff] %v7742_v17  ;;  %9969 = vst [vmem:[#allocation338_spill] sm:$0xff] %v7744_v57  ;;  %2525 = vbcast.lane.b32.xlu0 %v2467_v23, 368 }
 0x3b1   : > { %2529 = vbcast.lane.b32.xlu1 %v2467_v23, 376  ;;  %v7749_v37 = vpop.permute.xlu1 %2272  ;;  %v7751_v44 = vpop.permute.xlu0 %2284 }
 0x3b2   : > { %9971 = vst [vmem:[#allocation339_spill] sm:$0xff] %v7751_v44  ;;  %2536 = vbcast.lane.b32.xlu0 %v2534_v8, 256 }
 0x3b5   : > { %2540 = vbcast.lane.b32.xlu1 %v2534_v8, 264  ;;  %v7753_v14 = vpop.permute.xlu1 %2280  ;;  %v7755_v17 = vpop.permute.xlu0 %2292 }
 0x3b6   : > { %9972 = vst [vmem:[#allocation340_spill] sm:$0xff] %v7753_v14  ;;  %9973 = vst [vmem:[#allocation341_spill] sm:$0xff] %v7755_v17  ;;  %2544 = vbcast.lane.b32.xlu0 %v2534_v8, 272 }
 0x3b9   : > { %2548 = vbcast.lane.b32.xlu1 %v2534_v8, 280  ;;  %v7757_v57 = vpop.permute.xlu1 %2288  ;;  %v7759_v29 = vpop.permute.xlu0 %2300 }
 0x3ba   : > { %9974 = vst [vmem:[#allocation342_spill] sm:$0xff] %v7757_v57  ;;  %9975 = vst [vmem:[#allocation343_spill] sm:$0xff] %v7759_v29  ;;  %2552 = vbcast.lane.b32.xlu0 %v2534_v8, 288 }
 0x3bd   : > { %2556 = vbcast.lane.b32.xlu1 %v2534_v8, 296  ;;  %v7761_v42 = vpop.permute.xlu1 %2296  ;;  %v7763_v23 = vpop.permute.xlu0 %2308 }
 0x3be   : > { %9976 = vst [vmem:[#allocation344_spill] sm:$0xff] %v7761_v42  ;;  %9977 = vst [vmem:[#allocation345_spill] sm:$0xff] %v7763_v23  ;;  %2560 = vbcast.lane.b32.xlu0 %v2534_v8, 304 }
 0x3c1   : > { %2564 = vbcast.lane.b32.xlu1 %v2534_v8, 312  ;;  %v7765_v33 = vpop.permute.xlu1 %2304  ;;  %v7767_v44 = vpop.permute.xlu0 %2316 }
 0x3c2   : > { %9978 = vst [vmem:[#allocation346_spill] sm:$0xff] %v7765_v33  ;;  %9979 = vst [vmem:[#allocation347_spill] sm:$0xff] %v7767_v44  ;;  %2568 = vbcast.lane.b32.xlu0 %v2534_v8, 320  ;;  %v9986_v44 = vsub.s32 5, %v6020_v3 }
 0x3c4   : > { %v2601_v33 = vrot.slane %v7601_v11, %v9986_v44 }
 0x3c5   : > { %2572 = vbcast.lane.b32.xlu1 %v2534_v8, 328  ;;  %v7769_v17 = vpop.permute.xlu1 %2312  ;;  %v7771_v14 = vpop.permute.xlu0 %2324 }
 0x3c6   : > { %9980 = vst [vmem:[#allocation348_spill] sm:$0xff] %v7769_v17  ;;  %9981 = vst [vmem:[#allocation349_spill] sm:$0xff] %v7771_v14  ;;  %2576 = vbcast.lane.b32.xlu0 %v2534_v8, 336 }
 0x3c9   : > { %2580 = vbcast.lane.b32.xlu1 %v2534_v8, 344  ;;  %v7773_v29 = vpop.permute.xlu1 %2320  ;;  %v7775_v57 = vpop.permute.xlu0 %2335 }
 0x3ca   : > { %9982 = vst [vmem:[#allocation350_spill] sm:$0xff] %v7773_v29  ;;  %9983 = vst [vmem:[#allocation351_spill] sm:$0xff] %v7775_v57  ;;  %2584 = vbcast.lane.b32.xlu0 %v2534_v8, 352 }
 0x3cd   : > { %2588 = vbcast.lane.b32.xlu1 %v2534_v8, 360  ;;  %v7777_v23 = vpop.permute.xlu1 %2328  ;;  %v7779_v42 = vpop.permute.xlu0 %2343 }
 0x3ce   : > { %9984 = vst [vmem:[#allocation352_spill] sm:$0xff] %v7777_v23  ;;  %9985 = vst [vmem:[#allocation353_spill] sm:$0xff] %v7779_v42  ;;  %2592 = vbcast.lane.b32.xlu0 %v2534_v8, 368 }
 0x3d1   : > { %2596 = vbcast.lane.b32.xlu1 %v2534_v8, 376  ;;  %v7784_v17 = vpop.permute.xlu1 %2339  ;;  %v7786_v14 = vpop.permute.xlu0 %2351 }
 0x3d2   : > { %9987 = vst [vmem:[#allocation354_spill] sm:$0xff] %v7784_v17  ;;  %9988 = vst [vmem:[#allocation355_spill] sm:$0xff] %v7786_v14  ;;  %2603 = vbcast.lane.b32.xlu0 %v2601_v33, 256 }
 0x3d5   : > { %2607 = vbcast.lane.b32.xlu1 %v2601_v33, 264  ;;  %v7788_v29 = vpop.permute.xlu1 %2347  ;;  %v7790_v57 = vpop.permute.xlu0 %2359 }
 0x3d6   : > { %9989 = vst [vmem:[#allocation356_spill] sm:$0xff] %v7788_v29  ;;  %9990 = vst [vmem:[#allocation357_spill] sm:$0xff] %v7790_v57  ;;  %2611 = vbcast.lane.b32.xlu0 %v2601_v33, 272 }
 0x3d9   : > { %2615 = vbcast.lane.b32.xlu1 %v2601_v33, 280  ;;  %v7792_v23 = vpop.permute.xlu1 %2355  ;;  %v7794_v42 = vpop.permute.xlu0 %2367 }
 0x3da   : > { %9991 = vst [vmem:[#allocation358_spill] sm:$0xff] %v7792_v23  ;;  %9992 = vst [vmem:[#allocation359_spill] sm:$0xff] %v7794_v42  ;;  %2619 = vbcast.lane.b32.xlu0 %v2601_v33, 288 }
 0x3dd   : > { %2623 = vbcast.lane.b32.xlu1 %v2601_v33, 296  ;;  %v7796_v44 = vpop.permute.xlu1 %2363  ;;  %v7798_v8 = vpop.permute.xlu0 %2375 }
 0x3de   : > { %9993 = vst [vmem:[#allocation360_spill] sm:$0xff] %v7796_v44  ;;  %9994 = vst [vmem:[#allocation361_spill] sm:$0xff] %v7798_v8  ;;  %2627 = vbcast.lane.b32.xlu0 %v2601_v33, 304 }
 0x3e1   : > { %2631 = vbcast.lane.b32.xlu1 %v2601_v33, 312  ;;  %v7800_v14 = vpop.permute.xlu1 %2371  ;;  %v7802_v17 = vpop.permute.xlu0 %2383 }
 0x3e2   : > { %9995 = vst [vmem:[#allocation362_spill] sm:$0xff] %v7800_v14  ;;  %9996 = vst [vmem:[#allocation363_spill] sm:$0xff] %v7802_v17  ;;  %2635 = vbcast.lane.b32.xlu0 %v2601_v33, 320  ;;  %v10003_v17 = vsub.s32 6, %v6020_v3 }
 0x3e4   : > { %v2668_v14 = vrot.slane %v7601_v11, %v10003_v17 }
 0x3e5   : > { %2639 = vbcast.lane.b32.xlu1 %v2601_v33, 328  ;;  %v7804_v57 = vpop.permute.xlu1 %2379  ;;  %v7806_v29 = vpop.permute.xlu0 %2391 }
 0x3e6   : > { %9997 = vst [vmem:[#allocation364_spill] sm:$0xff] %v7804_v57  ;;  %9998 = vst [vmem:[#allocation365_spill] sm:$0xff] %v7806_v29  ;;  %2643 = vbcast.lane.b32.xlu0 %v2601_v33, 336 }
 0x3e9   : > { %2647 = vbcast.lane.b32.xlu1 %v2601_v33, 344  ;;  %v7808_v42 = vpop.permute.xlu1 %2387  ;;  %v7810_v23 = vpop.permute.xlu0 %2402 }
 0x3ea   : > { %9999 = vst [vmem:[#allocation366_spill] sm:$0xff] %v7808_v42  ;;  %10000 = vst [vmem:[#allocation367_spill] sm:$0xff] %v7810_v23  ;;  %2651 = vbcast.lane.b32.xlu0 %v2601_v33, 352 }
 0x3ed   : > { %2655 = vbcast.lane.b32.xlu1 %v2601_v33, 360  ;;  %v7812_v8 = vpop.permute.xlu1 %2395  ;;  %v7814_v44 = vpop.permute.xlu0 %2410 }
 0x3ee   : > { %10001 = vst [vmem:[#allocation368_spill] sm:$0xff] %v7812_v8  ;;  %10002 = vst [vmem:[#allocation369_spill] sm:$0xff] %v7814_v44  ;;  %2659 = vbcast.lane.b32.xlu0 %v2601_v33, 368 }
 0x3f1   : > { %2663 = vbcast.lane.b32.xlu1 %v2601_v33, 376  ;;  %v7819_v57 = vpop.permute.xlu1 %2406  ;;  %v7821_v29 = vpop.permute.xlu0 %2418 }
 0x3f2   : > { %10004 = vst [vmem:[#allocation370_spill] sm:$0xff] %v7819_v57  ;;  %10005 = vst [vmem:[#allocation371_spill] sm:$0xff] %v7821_v29  ;;  %2670 = vbcast.lane.b32.xlu0 %v2668_v14, 256 }
 0x3f5   : > { %2674 = vbcast.lane.b32.xlu1 %v2668_v14, 264  ;;  %v7823_v42 = vpop.permute.xlu1 %2414  ;;  %v7825_v23 = vpop.permute.xlu0 %2426 }
 0x3f6   : > { %10006 = vst [vmem:[#allocation372_spill] sm:$0xff] %v7823_v42  ;;  %10007 = vst [vmem:[#allocation373_spill] sm:$0xff] %v7825_v23  ;;  %2678 = vbcast.lane.b32.xlu0 %v2668_v14, 272 }
 0x3f9   : > { %2682 = vbcast.lane.b32.xlu1 %v2668_v14, 280  ;;  %v7827_v8 = vpop.permute.xlu1 %2422  ;;  %v7829_v44 = vpop.permute.xlu0 %2434 }
 0x3fa   : > { %10008 = vst [vmem:[#allocation374_spill] sm:$0xff] %v7827_v8  ;;  %10009 = vst [vmem:[#allocation375_spill] sm:$0xff] %v7829_v44  ;;  %2686 = vbcast.lane.b32.xlu0 %v2668_v14, 288 }
 0x3fd   : > { %2690 = vbcast.lane.b32.xlu1 %v2668_v14, 296  ;;  %v7831_v17 = vpop.permute.xlu1 %2430  ;;  %v7833_v33 = vpop.permute.xlu0 %2442 }
 0x3fe   : > { %10010 = vst [vmem:[#allocation376_spill] sm:$0xff] %v7831_v17  ;;  %10011 = vst [vmem:[#allocation377_spill] sm:$0xff] %v7833_v33  ;;  %2694 = vbcast.lane.b32.xlu0 %v2668_v14, 304 }
 0x401   : > { %2698 = vbcast.lane.b32.xlu1 %v2668_v14, 312  ;;  %v7835_v29 = vpop.permute.xlu1 %2438  ;;  %v7837_v57 = vpop.permute.xlu0 %2450 }
 0x402   : > { %10012 = vst [vmem:[#allocation378_spill] sm:$0xff] %v7835_v29  ;;  %10013 = vst [vmem:[#allocation379_spill] sm:$0xff] %v7837_v57  ;;  %2702 = vbcast.lane.b32.xlu0 %v2668_v14, 320  ;;  %v10020_v57 = vsub.s32 7, %v6020_v3 }
 0x404   : > { %v2735_v29 = vrot.slane %v7601_v11, %v10020_v57 }
 0x405   : > { %2706 = vbcast.lane.b32.xlu1 %v2668_v14, 328  ;;  %v7839_v23 = vpop.permute.xlu1 %2446  ;;  %v7841_v42 = vpop.permute.xlu0 %2458 }
 0x406   : > { %10014 = vst [vmem:[#allocation380_spill] sm:$0xff] %v7839_v23  ;;  %10015 = vst [vmem:[#allocation381_spill] sm:$0xff] %v7841_v42  ;;  %2710 = vbcast.lane.b32.xlu0 %v2668_v14, 336 }
 0x409   : > { %2714 = vbcast.lane.b32.xlu1 %v2668_v14, 344  ;;  %v7843_v44 = vpop.permute.xlu1 %2454  ;;  %v7845_v8 = vpop.permute.xlu0 %2469 }
 0x40a   : > { %10016 = vst [vmem:[#allocation382_spill] sm:$0xff] %v7843_v44  ;;  %10017 = vst [vmem:[#allocation383_spill] sm:$0xff] %v7845_v8  ;;  %2718 = vbcast.lane.b32.xlu0 %v2668_v14, 352 }
 0x40d   : > { %2722 = vbcast.lane.b32.xlu1 %v2668_v14, 360  ;;  %v7847_v33 = vpop.permute.xlu1 %2462  ;;  %v7849_v17 = vpop.permute.xlu0 %2477 }
 0x40e   : > { %10018 = vst [vmem:[#allocation384_spill] sm:$0xff] %v7847_v33  ;;  %10019 = vst [vmem:[#allocation385_spill] sm:$0xff] %v7849_v17  ;;  %2726 = vbcast.lane.b32.xlu0 %v2668_v14, 368 }
 0x411   : > { %2730 = vbcast.lane.b32.xlu1 %v2668_v14, 376  ;;  %v7854_v23 = vpop.permute.xlu1 %2473  ;;  %v7856_v42 = vpop.permute.xlu0 %2485 }
 0x412   : > { %10021 = vst [vmem:[#allocation386_spill] sm:$0xff] %v7856_v42  ;;  %2737 = vbcast.lane.b32.xlu0 %v2735_v29, 256 }
 0x415   : > { %2741 = vbcast.lane.b32.xlu1 %v2735_v29, 264  ;;  %v7858_v44 = vpop.permute.xlu1 %2481  ;;  %v7860_v8 = vpop.permute.xlu0 %2493 }
 0x416   : > { %10022 = vst [vmem:[#allocation387_spill] sm:$0xff] %v7858_v44  ;;  %10023 = vst [vmem:[#allocation388_spill] sm:$0xff] %v7860_v8  ;;  %2745 = vbcast.lane.b32.xlu0 %v2735_v29, 272 }
 0x419   : > { %2749 = vbcast.lane.b32.xlu1 %v2735_v29, 280  ;;  %v7862_v33 = vpop.permute.xlu1 %2489  ;;  %v7864_v17 = vpop.permute.xlu0 %2501 }
 0x41a   : > { %10024 = vst [vmem:[#allocation389_spill] sm:$0xff] %v7862_v33  ;;  %10025 = vst [vmem:[#allocation390_spill] sm:$0xff] %v7864_v17  ;;  %2753 = vbcast.lane.b32.xlu0 %v2735_v29, 288 }
 0x41d   : > { %2757 = vbcast.lane.b32.xlu1 %v2735_v29, 296  ;;  %v7866_v11 = vpop.permute.xlu1 %2497  ;;  %v7868_v14 = vpop.permute.xlu0 %2509 }
 0x41e   : > { %10026 = vst [vmem:[#allocation391_spill] sm:$0xff] %v7866_v11  ;;  %10027 = vst [vmem:[#allocation392_spill] sm:$0xff] %v7868_v14  ;;  %2761 = vbcast.lane.b32.xlu0 %v2735_v29, 304 }
 0x421   : > { %2765 = vbcast.lane.b32.xlu1 %v2735_v29, 312  ;;  %v7870_v57 = vpop.permute.xlu1 %2505  ;;  %v7872_v42 = vpop.permute.xlu0 %2517 }
 0x422   : > { %10028 = vst [vmem:[#allocation393_spill] sm:$0xff] %v7872_v42  ;;  %2769 = vbcast.lane.b32.xlu0 %v2735_v29, 320  ;;  %v3055_v42 = vadd.f32 %v7459_v52, %v6285_v62  ;;  %v3057_v62 = vadd.f32 %v7464_v27, %v6283_v61  ;;  %v3061_v61 = vadd.f32 %v7470_v20, %v6321_v32 }
 0x423   : > { %v3065_v32 = vadd.f32 %v7478_v35, %v6344_v46  ;;  %v3069_v46 = vadd.f32 %v7486_v56, %v6364_v1  ;;  %v3073_v1 = vadd.f32 %v7495_v25, %v6384_v6  ;;  %v3077_v6 = vadd.f32 %v7506_v38, %v6407_v51  ;;  %v10065_v51 = vld [vmem:[#allocation6_spill] sm:$0xff]  ;;  %v10067_v38 = vld [vmem:[#allocation7_spill] sm:$0xff] }
 0x425   : > { %2773 = vbcast.lane.b32.xlu1 %v2735_v29, 328  ;;  %v7874_v8 = vpop.permute.xlu1 %2513  ;;  %v7876_v44 = vpop.permute.xlu0 %2525 }
 0x426   : > { %10029 = vst [vmem:[#allocation394_spill] sm:$0xff] %v7874_v8  ;;  %10030 = vst [vmem:[#allocation395_spill] sm:$0xff] %v7876_v44  ;;  %2777 = vbcast.lane.b32.xlu0 %v2735_v29, 336 }
 0x429   : > { %2781 = vbcast.lane.b32.xlu1 %v2735_v29, 344  ;;  %v7878_v17 = vpop.permute.xlu1 %2521  ;;  %v7880_v33 = vpop.permute.xlu0 %2536 }
 0x42a   : > { %10031 = vst [vmem:[#allocation396_spill] sm:$0xff] %v7878_v17  ;;  %10032 = vst [vmem:[#allocation397_spill] sm:$0xff] %v7880_v33  ;;  %2785 = vbcast.lane.b32.xlu0 %v2735_v29, 352  ;;  %v3056_v17 = vadd.f32 %v7457_v55, %v6296_v13  ;;  %v3058_v33 = vadd.f32 %v7468_v9, %v6294_v12  ;;  %v3059_v12 = vadd.f32 %v7466_v7, %v6308_v22 }
 0x42b   : > { %v3062_v13 = vadd.f32 %v7476_v36, %v6319_v30  ;;  %v3063_v22 = vadd.f32 %v7474_v28, %v6334_v40  ;;  %v3066_v30 = vadd.f32 %v7484_v43, %v6342_v45  ;;  %v3067_v40 = vadd.f32 %v7482_v34, %v6354_v54 }
 0x42c   : > { %v3070_v45 = vadd.f32 %v7493_v49, %v6362_v63  ;;  %v3071_v54 = vadd.f32 %v7490_v0, %v6374_v16  ;;  %v3074_v63 = vadd.f32 %v7504_v31, %v6382_v26  ;;  %v3075_v16 = vadd.f32 %v7502_v2, %v6395_v41  ;;  %v10062_v2 = vld [vmem:[#allocation237_spill] sm:$0xff] }
 0x42d   : > { %2789 = vbcast.lane.b32.xlu1 %v2735_v29, 360  ;;  %v7882_v14 = vpop.permute.xlu1 %2529  ;;  %v7884_v11 = vpop.permute.xlu0 %2544  ;;  %v3078_v26 = vadd.f32 %v7512_v50, %v6405_v47  ;;  %v3079_v41 = vadd.f32 %v7510_v18, %v6419_v59  ;;  %v10061_v47 = vld [vmem:[#allocation5_spill] sm:$0xff]  ;;  %v10071_v59 = vld [vmem:[#allocation8_spill] sm:$0xff] }
 0x42e   : > { %10033 = vst [vmem:[#allocation398_spill] sm:$0xff] %v7882_v14  ;;  %10034 = vst [vmem:[#allocation399_spill] sm:$0xff] %v7884_v11  ;;  %2793 = vbcast.lane.b32.xlu0 %v2735_v29, 368  ;;  %v3082_v50 = vadd.f32 %v10062_v2, %v10061_v47  ;;  %v10072_v18 = vld [vmem:[#allocation236_spill] sm:$0xff] }
 0x431   : > { %2797 = vbcast.lane.b32.xlu1 %v2735_v29, 376  ;;  %v7888_v8 = vpop.permute.xlu1 %2540  ;;  %v7890_v44 = vpop.permute.xlu0 %2552  ;;  %v3060_v29 = vadd.f32 %v7472_v5, %v6306_v21  ;;  %v3064_v21 = vadd.f32 %v7480_v10, %v6332_v39  ;;  %v3068_v39 = vadd.f32 %v7488_v24, %v6352_v53  ;;  %v3072_v53 = vadd.f32 %v7500_v4, %v6372_v15 }
 0x432   : > { %10035 = vst [vmem:[#allocation400_spill] sm:$0xff] %v7888_v8  ;;  %10036 = vst [vmem:[#allocation401_spill] sm:$0xff] %v7890_v44  ;;  %3568 = vperm.xlu0 %5855, %v3055_v42   ;;  %v3076_v15 = vadd.f32 %v7508_v19, %v6393_v48  ;;  %v3080_v48 = vadd.f32 %v7516_v58, %v6417_v60  ;;  %v10066_v60 = vld [vmem:[#allocation235_spill] sm:$0xff] }
 0x433   : > { %v3081_v58 = vadd.f32 %v10066_v60, %v10065_v51  ;;  %v10089_v51 = vld [vmem:[#allocation14_spill] sm:$0xff] }
 0x434   : > { %v10090_v60 = vld [vmem:[#allocation242_spill] sm:$0xff] }
 0x435   : > { %3571 = vperm.xlu1 %5856, %v3056_v17   ;;  %v7896_v14 = vpop.permute.xlu1 %2548  ;;  %v7898_v11 = vpop.permute.xlu0 %2560 }
 0x436   : > { %10037 = vst [vmem:[#allocation402_spill] sm:$0xff] %v7896_v14  ;;  %10038 = vst [vmem:[#allocation403_spill] sm:$0xff] %v7898_v11  ;;  %3577 = vperm.xlu0 %5855, %v3058_v33  }
 0x439   : > { %3574 = vperm.xlu1 %5856, %v3057_v62   ;;  %v7904_v52 = vpop.permute.xlu1 %2556  ;;  %v7906_v42 = vpop.permute.xlu0 %2568  ;;  %v10068_v62 = vld [vmem:[#allocation239_spill] sm:$0xff] }
 0x43a   : > { %10039 = vst [vmem:[#allocation404_spill] sm:$0xff] %v7904_v52  ;;  %10040 = vst [vmem:[#allocation405_spill] sm:$0xff] %v7906_v42  ;;  %3583 = vperm.xlu0 %5855, %v3060_v29   ;;  %v3084_v29 = vadd.f32 %v10068_v62, %v10067_v38  ;;  %v10091_v38 = vld [vmem:[#allocation15_spill] sm:$0xff] }
 0x43b   : > { %v10092_v62 = vld [vmem:[#allocation247_spill] sm:$0xff] }
 0x43d   : > { %v7912_v9 = vpop.permute.xlu1 %2564  ;;  %3580 = vperm.xlu1 %5856, %v3059_v12   ;;  %v7914_v55 = vpop.permute.xlu0 %2576 }
 0x43e   : > { %10041 = vst [vmem:[#allocation406_spill] sm:$0xff] %v7912_v9  ;;  %10042 = vst [vmem:[#allocation407_spill] sm:$0xff] %v7914_v55  ;;  %3589 = vperm.xlu0 %5855, %v3062_v13  }
 0x441   : > { %v7920_v5 = vpop.permute.xlu1 %2572  ;;  %3586 = vperm.xlu1 %5856, %v3061_v61   ;;  %v7922_v27 = vpop.permute.xlu0 %2584  ;;  %v3083_v61 = vadd.f32 %v10072_v18, %v10071_v59 }
 0x442   : > { %10043 = vst [vmem:[#allocation408_spill] sm:$0xff] %v7920_v5  ;;  %10044 = vst [vmem:[#allocation409_spill] sm:$0xff] %v7922_v27  ;;  %3595 = vperm.xlu0 %5855, %v3064_v21   ;;  %v10073_v21 = vld [vmem:[#allocation9_spill] sm:$0xff] }
 0x445   : > { %v7928_v7 = vpop.permute.xlu1 %2580  ;;  %3592 = vperm.xlu1 %5856, %v3063_v22   ;;  %v7930_v36 = vpop.permute.xlu0 %2592  ;;  %v10074_v22 = vld [vmem:[#allocation241_spill] sm:$0xff] }
 0x446   : > { %10045 = vst [vmem:[#allocation410_spill] sm:$0xff] %v7928_v7  ;;  %10046 = vst [vmem:[#allocation411_spill] sm:$0xff] %v7930_v36  ;;  %3601 = vperm.xlu0 %5855, %v3066_v30   ;;  %v3086_v30 = vadd.f32 %v10074_v22, %v10073_v21  ;;  %v10096_v21 = vld [vmem:[#allocation244_spill] sm:$0xff] }
 0x449   : > { %v7936_v10 = vpop.permute.xlu1 %2588  ;;  %3598 = vperm.xlu1 %5856, %v3065_v32   ;;  %v7938_v20 = vpop.permute.xlu0 %2603 }
 0x44a   : > { %10047 = vst [vmem:[#allocation412_spill] sm:$0xff] %v7936_v10  ;;  %10048 = vst [vmem:[#allocation413_spill] sm:$0xff] %v7938_v20  ;;  %3607 = vperm.xlu0 %5855, %v3068_v39  }
 0x44d   : > { %v7944_v43 = vpop.permute.xlu1 %2596  ;;  %3604 = vperm.xlu1 %5856, %v3067_v40   ;;  %v7946_v28 = vpop.permute.xlu0 %2611  ;;  %v10077_v40 = vld [vmem:[#allocation10_spill] sm:$0xff] }
 0x44e   : > { %10049 = vst [vmem:[#allocation414_spill] sm:$0xff] %v7944_v43  ;;  %10050 = vst [vmem:[#allocation415_spill] sm:$0xff] %v7946_v28  ;;  %3613 = vperm.xlu0 %5855, %v3070_v45   ;;  %v10078_v45 = vld [vmem:[#allocation238_spill] sm:$0xff] }
 0x451   : > { %v7952_v24 = vpop.permute.xlu1 %2607  ;;  %3610 = vperm.xlu1 %5856, %v3069_v46   ;;  %v7954_v35 = vpop.permute.xlu0 %2619  ;;  %v3085_v46 = vadd.f32 %v10078_v45, %v10077_v40  ;;  %v10098_v40 = vld [vmem:[#allocation249_spill] sm:$0xff] }
 0x452   : > { %10051 = vst [vmem:[#allocation416_spill] sm:$0xff] %v7952_v24  ;;  %10052 = vst [vmem:[#allocation417_spill] sm:$0xff] %v7954_v35  ;;  %3619 = vperm.xlu0 %5855, %v3072_v53   ;;  %v10079_v53 = vld [vmem:[#allocation11_spill] sm:$0xff] }
 0x455   : > { %v7960_v49 = vpop.permute.xlu1 %2615  ;;  %3616 = vperm.xlu1 %5856, %v3071_v54   ;;  %v7962_v34 = vpop.permute.xlu0 %2627  ;;  %v10080_v54 = vld [vmem:[#allocation243_spill] sm:$0xff] }
 0x456   : > { %10053 = vst [vmem:[#allocation418_spill] sm:$0xff] %v7960_v49  ;;  %10054 = vst [vmem:[#allocation419_spill] sm:$0xff] %v7962_v34  ;;  %3625 = vperm.xlu0 %5855, %v3074_v63   ;;  %v3088_v63 = vadd.f32 %v10080_v54, %v10079_v53  ;;  %v10101_v54 = vld [vmem:[#allocation18_spill] sm:$0xff] }
 0x459   : > { %v7968_v4 = vpop.permute.xlu1 %2623  ;;  %3622 = vperm.xlu1 %5856, %v3073_v1   ;;  %v7970_v56 = vpop.permute.xlu0 %2635 }
 0x45a   : > { %10055 = vst [vmem:[#allocation420_spill] sm:$0xff] %v7968_v4  ;;  %10056 = vst [vmem:[#allocation421_spill] sm:$0xff] %v7970_v56  ;;  %3631 = vperm.xlu0 %5855, %v3076_v15  }
 0x45d   : > { %v7976_v31 = vpop.permute.xlu1 %2631  ;;  %3628 = vperm.xlu1 %5856, %v3075_v16   ;;  %v7978_v0 = vpop.permute.xlu0 %2643  ;;  %v10083_v16 = vld [vmem:[#allocation12_spill] sm:$0xff] }
 0x45e   : > { %10057 = vst [vmem:[#allocation422_spill] sm:$0xff] %v7976_v31  ;;  %10058 = vst [vmem:[#allocation423_spill] sm:$0xff] %v7978_v0  ;;  %3637 = vperm.xlu0 %5855, %v3078_v26   ;;  %v10084_v26 = vld [vmem:[#allocation240_spill] sm:$0xff] }
 0x461   : > { %v7984_v19 = vpop.permute.xlu1 %2639  ;;  %3634 = vperm.xlu1 %5856, %v3077_v6   ;;  %v7986_v25 = vpop.permute.xlu0 %2651  ;;  %v3087_v6 = vadd.f32 %v10084_v26, %v10083_v16  ;;  %v10103_v26 = vld [vmem:[#allocation19_spill] sm:$0xff] }
 0x462   : > { %10059 = vst [vmem:[#allocation424_spill] sm:$0xff] %v7984_v19  ;;  %10060 = vst [vmem:[#allocation425_spill] sm:$0xff] %v7986_v25  ;;  %3643 = vperm.xlu0 %5855, %v3080_v48   ;;  %v10085_v48 = vld [vmem:[#allocation13_spill] sm:$0xff] }
 0x465   : > { %v7992_v17 = vpop.permute.xlu1 %2647  ;;  %3640 = vperm.xlu1 %5856, %v3079_v41   ;;  %v7994_v33 = vpop.permute.xlu0 %2659  ;;  %v10086_v41 = vld [vmem:[#allocation245_spill] sm:$0xff] }
 0x466   : > { %10063 = vst [vmem:[#allocation5_spill] sm:$0xff] %v7992_v17  ;;  %10064 = vst [vmem:[#allocation237_spill] sm:$0xff] %v7994_v33  ;;  %3649 = vperm.xlu0 %5855, %v3082_v50   ;;  %v3090_v47 = vadd.f32 %v10086_v41, %v10085_v48 }
 0x469   : > { %v8000_v12 = vpop.permute.xlu1 %2655  ;;  %3646 = vperm.xlu1 %5856, %v3081_v58   ;;  %v8002_v13 = vpop.permute.xlu0 %2670  ;;  %v3089_v58 = vadd.f32 %v10090_v60, %v10089_v51  ;;  %v10107_v51 = vld [vmem:[#allocation20_spill] sm:$0xff] }
 0x46a   : > { %10069 = vst [vmem:[#allocation6_spill] sm:$0xff] %v8000_v12  ;;  %10070 = vst [vmem:[#allocation235_spill] sm:$0xff] %v8002_v13  ;;  %3655 = vperm.xlu0 %5855, %v3084_v29   ;;  %v3092_v29 = vadd.f32 %v10092_v62, %v10091_v38  ;;  %v10108_v60 = vld [vmem:[#allocation248_spill] sm:$0xff]  ;;  %v10109_v38 = vld [vmem:[#allocation21_spill] sm:$0xff] }
 0x46b   : > { %v10110_v62 = vld [vmem:[#allocation253_spill] sm:$0xff] }
 0x46d   : > { %v8008_v32 = vpop.permute.xlu1 %2663  ;;  %3652 = vperm.xlu1 %5856, %v3083_v61   ;;  %v8010_v39 = vpop.permute.xlu0 %2678  ;;  %v10095_v61 = vld [vmem:[#allocation16_spill] sm:$0xff] }
 0x46e   : > { %10075 = vst [vmem:[#allocation7_spill] sm:$0xff] %v8008_v32  ;;  %10076 = vst [vmem:[#allocation239_spill] sm:$0xff] %v8010_v39  ;;  %3661 = vperm.xlu0 %5855, %v3086_v30   ;;  %v3091_v22 = vadd.f32 %v10096_v21, %v10095_v61  ;;  %v10097_v30 = vld [vmem:[#allocation17_spill] sm:$0xff] }
 0x46f   : > { %v3094_v45 = vadd.f32 %v10098_v40, %v10097_v30  ;;  %v10114_v30 = vld [vmem:[#allocation250_spill] sm:$0xff] }
 0x471   : > { %v8016_v1 = vpop.permute.xlu1 %2674  ;;  %3658 = vperm.xlu1 %5856, %v3085_v46   ;;  %v8018_v15 = vpop.permute.xlu0 %2686 }
 0x472   : > { %10081 = vst [vmem:[#allocation8_spill] sm:$0xff] %v8016_v1  ;;  %10082 = vst [vmem:[#allocation236_spill] sm:$0xff] %v8018_v15  ;;  %3667 = vperm.xlu0 %5855, %v3088_v63   ;;  %v10102_v63 = vld [vmem:[#allocation246_spill] sm:$0xff] }
 0x473   : > { %v3093_v16 = vadd.f32 %v10102_v63, %v10101_v54  ;;  %v10116_v54 = vld [vmem:[#allocation255_spill] sm:$0xff] }
 0x475   : > { %v8024_v2 = vpop.permute.xlu1 %2682  ;;  %3664 = vperm.xlu1 %5856, %v3087_v6   ;;  %v8026_v50 = vpop.permute.xlu0 %2694  ;;  %v10104_v6 = vld [vmem:[#allocation251_spill] sm:$0xff] }
 0x476   : > { %10087 = vst [vmem:[#allocation9_spill] sm:$0xff] %v8024_v2  ;;  %10088 = vst [vmem:[#allocation241_spill] sm:$0xff] %v8026_v50  ;;  %3673 = vperm.xlu0 %5855, %v3090_v47   ;;  %v3096_v48 = vadd.f32 %v10104_v6, %v10103_v26  ;;  %v10119_v6 = vld [vmem:[#allocation24_spill] sm:$0xff] }
 0x479   : > { %v8032_v59 = vpop.permute.xlu1 %2690  ;;  %3670 = vperm.xlu1 %5856, %v3089_v58   ;;  %v8034_v18 = vpop.permute.xlu0 %2702  ;;  %v3095_v58 = vadd.f32 %v10108_v60, %v10107_v51  ;;  %v10121_v60 = vld [vmem:[#allocation25_spill] sm:$0xff] }
 0x47a   : > { %10093 = vst [vmem:[#allocation10_spill] sm:$0xff] %v8032_v59  ;;  %10094 = vst [vmem:[#allocation238_spill] sm:$0xff] %v8034_v18  ;;  %3679 = vperm.xlu0 %5855, %v3092_v29   ;;  %v3098_v29 = vadd.f32 %v10110_v62, %v10109_v38 }
 0x47d   : > { %v8040_v46 = vpop.permute.xlu1 %2698  ;;  %3676 = vperm.xlu1 %5856, %v3091_v22   ;;  %v8042_v53 = vpop.permute.xlu0 %2710  ;;  %v10113_v22 = vld [vmem:[#allocation22_spill] sm:$0xff] }
 0x47e   : > { %10099 = vst [vmem:[#allocation11_spill] sm:$0xff] %v8040_v46  ;;  %10100 = vst [vmem:[#allocation243_spill] sm:$0xff] %v8042_v53  ;;  %3685 = vperm.xlu0 %5855, %v3094_v45   ;;  %v3097_v40 = vadd.f32 %v10114_v30, %v10113_v22  ;;  %v10115_v45 = vld [vmem:[#allocation23_spill] sm:$0xff]  ;;  %v10125_v22 = vld [vmem:[#allocation26_spill] sm:$0xff] }
 0x47f   : > { %v3100_v63 = vadd.f32 %v10116_v54, %v10115_v45  ;;  %v10126_v30 = vld [vmem:[#allocation254_spill] sm:$0xff]  ;;  %v10127_v54 = vld [vmem:[#allocation27_spill] sm:$0xff] }
 0x480   : > { %v3101_v45 = vadd.f32 %v10126_v30, %v10125_v22  ;;  %v10137_v22 = vld [vmem:[#allocation30_spill] sm:$0xff] }
 0x481   : > { %v8048_v41 = vpop.permute.xlu1 %2706  ;;  %3682 = vperm.xlu1 %5856, %v3093_v16   ;;  %v8050_v47 = vpop.permute.xlu0 %2718  ;;  %v10138_v30 = vld [vmem:[#allocation258_spill] sm:$0xff] }
 0x482   : > { %10105 = vst [vmem:[#allocation12_spill] sm:$0xff] %v8048_v41  ;;  %10106 = vst [vmem:[#allocation240_spill] sm:$0xff] %v8050_v47  ;;  %3691 = vperm.xlu0 %5855, %v3096_v48   ;;  %v10120_v48 = vld [vmem:[#allocation252_spill] sm:$0xff] }
 0x483   : > { %v3099_v51 = vadd.f32 %v10120_v48, %v10119_v6  ;;  %v10131_v6 = vld [vmem:[#allocation28_spill] sm:$0xff] }
 0x484   : > { %v10132_v48 = vld [vmem:[#allocation256_spill] sm:$0xff] }
 0x485   : > { %v8056_v61 = vpop.permute.xlu1 %2714  ;;  %3688 = vperm.xlu1 %5856, %v3095_v58   ;;  %v8058_v21 = vpop.permute.xlu0 %2726  ;;  %v10122_v58 = vld [vmem:[#allocation257_spill] sm:$0xff] }
 0x486   : > { %10111 = vst [vmem:[#allocation13_spill] sm:$0xff] %v8056_v61  ;;  %10112 = vst [vmem:[#allocation245_spill] sm:$0xff] %v8058_v21  ;;  %3697 = vperm.xlu0 %5855, %v3098_v29   ;;  %v3102_v38 = vadd.f32 %v10122_v58, %v10121_v60  ;;  %v3103_v60 = vadd.f32 %v10132_v48, %v10131_v6  ;;  %v10133_v58 = vld [vmem:[#allocation29_spill] sm:$0xff]  ;;  %v10143_v6 = vld [vmem:[#allocation32_spill] sm:$0xff] }
 0x487   : > { %v10144_v48 = vld [vmem:[#allocation260_spill] sm:$0xff] }
 0x489   : > { %v8064_v16 = vpop.permute.xlu1 %2722  ;;  %3694 = vperm.xlu1 %5856, %v3097_v40   ;;  %v8066_v26 = vpop.permute.xlu0 %2737  ;;  %v10128_v40 = vld [vmem:[#allocation259_spill] sm:$0xff] }
 0x48a   : > { %10117 = vst [vmem:[#allocation14_spill] sm:$0xff] %v8064_v16  ;;  %10118 = vst [vmem:[#allocation242_spill] sm:$0xff] %v8066_v26  ;;  %3703 = vperm.xlu0 %5855, %v3100_v63   ;;  %v3104_v21 = vadd.f32 %v10128_v40, %v10127_v54  ;;  %v3105_v54 = vadd.f32 %v10138_v30, %v10137_v22  ;;  %v10139_v40 = vld [vmem:[#allocation31_spill] sm:$0xff]  ;;  %v10149_v22 = vld [vmem:[#allocation34_spill] sm:$0xff] }
 0x48b   : > { %v10150_v30 = vld [vmem:[#allocation262_spill] sm:$0xff] }
 0x48d   : > { %v8072_v62 = vpop.permute.xlu1 %2730  ;;  %3700 = vperm.xlu1 %5856, %v3099_v51   ;;  %v8074_v29 = vpop.permute.xlu0 %2745  ;;  %v10134_v51 = vld [vmem:[#allocation261_spill] sm:$0xff] }
 0x48e   : > { %10123 = vst [vmem:[#allocation15_spill] sm:$0xff] %v8072_v62  ;;  %10124 = vst [vmem:[#allocation247_spill] sm:$0xff] %v8074_v29  ;;  %3709 = vperm.xlu0 %5855, %v3102_v38   ;;  %v3106_v62 = vadd.f32 %v10134_v51, %v10133_v58  ;;  %v3107_v58 = vadd.f32 %v10144_v48, %v10143_v6  ;;  %v10145_v51 = vld [vmem:[#allocation33_spill] sm:$0xff]  ;;  %v10155_v6 = vld [vmem:[#allocation264_spill] sm:$0xff] }
 0x491   : > { %v8080_v16 = vpop.permute.xlu1 %2741  ;;  %3706 = vperm.xlu1 %5856, %v3101_v45   ;;  %v8082_v63 = vpop.permute.xlu0 %2753  ;;  %v10140_v45 = vld [vmem:[#allocation263_spill] sm:$0xff] }
 0x492   : > { %10129 = vst [vmem:[#allocation16_spill] sm:$0xff] %v8080_v16  ;;  %10130 = vst [vmem:[#allocation244_spill] sm:$0xff] %v8082_v63  ;;  %3715 = vperm.xlu0 %5855, %v3104_v21   ;;  %v3108_v29 = vadd.f32 %v10140_v45, %v10139_v40  ;;  %v3109_v40 = vadd.f32 %v10150_v30, %v10149_v22  ;;  %v10151_v45 = vld [vmem:[#allocation35_spill] sm:$0xff]  ;;  %v10161_v22 = vld [vmem:[#allocation266_spill] sm:$0xff] }
 0x495   : > { %v8088_v47 = vpop.permute.xlu1 %2749  ;;  %3712 = vperm.xlu1 %5856, %v3103_v60   ;;  %v8090_v38 = vpop.permute.xlu0 %2761  ;;  %v10146_v60 = vld [vmem:[#allocation265_spill] sm:$0xff] }
 0x496   : > { %10135 = vst [vmem:[#allocation17_spill] sm:$0xff] %v8088_v47  ;;  %10136 = vst [vmem:[#allocation249_spill] sm:$0xff] %v8090_v38  ;;  %3721 = vperm.xlu0 %5855, %v3106_v62   ;;  %v3110_v47 = vadd.f32 %v10146_v60, %v10145_v51  ;;  %v10157_v60 = vld [vmem:[#allocation37_spill] sm:$0xff] }
 0x499   : > { %v8096_v63 = vpop.permute.xlu1 %2757  ;;  %3718 = vperm.xlu1 %5856, %v3105_v54   ;;  %v8098_v21 = vpop.permute.xlu0 %2769  ;;  %v10152_v54 = vld [vmem:[#allocation267_spill] sm:$0xff] }
 0x49a   : > { %10141 = vst [vmem:[#allocation18_spill] sm:$0xff] %v8096_v63  ;;  %10142 = vst [vmem:[#allocation246_spill] sm:$0xff] %v8098_v21  ;;  %3727 = vperm.xlu0 %5855, %v3108_v29   ;;  %v3112_v63 = vadd.f32 %v10152_v54, %v10151_v45  ;;  %v10154_v29 = vld [vmem:[#allocation36_spill] sm:$0xff]  ;;  %v10162_v45 = vld [vmem:[#allocation39_spill] sm:$0xff] }
 0x49b   : > { %v3111_v48 = vadd.f32 %v10155_v6, %v10154_v29  ;;  %v10163_v54 = vld [vmem:[#allocation271_spill] sm:$0xff]  ;;  %v10166_v29 = vld [vmem:[#allocation40_spill] sm:$0xff] }
 0x49c   : > { %v10167_v6 = vld [vmem:[#allocation268_spill] sm:$0xff] }
 0x49d   : > { %v8104_v38 = vpop.permute.xlu1 %2765  ;;  %3724 = vperm.xlu1 %5856, %v3107_v58   ;;  %v8106_v62 = vpop.permute.xlu0 %2777  ;;  %v10158_v58 = vld [vmem:[#allocation269_spill] sm:$0xff] }
 0x49e   : > { %10147 = vst [vmem:[#allocation19_spill] sm:$0xff] %v8104_v38  ;;  %10148 = vst [vmem:[#allocation251_spill] sm:$0xff] %v8106_v62  ;;  %3733 = vperm.xlu0 %5855, %v3110_v47   ;;  %v3114_v38 = vadd.f32 %v10158_v58, %v10157_v60  ;;  %v10160_v47 = vld [vmem:[#allocation38_spill] sm:$0xff]  ;;  %v10168_v60 = vld [vmem:[#allocation41_spill] sm:$0xff] }
 0x49f   : > { %v3113_v30 = vadd.f32 %v10161_v22, %v10160_v47  ;;  %v10169_v58 = vld [vmem:[#allocation273_spill] sm:$0xff]  ;;  %v10171_v47 = vld [vmem:[#allocation42_spill] sm:$0xff] }
 0x4a0   : > { %v10172_v22 = vld [vmem:[#allocation270_spill] sm:$0xff] }
 0x4a1   : > { %v8112_v21 = vpop.permute.xlu1 %2773  ;;  %3730 = vperm.xlu1 %5856, %v3109_v40   ;;  %v8116_v51 = vpop.permute.xlu0 %2785 }
 0x4a2   : > { %10153 = vst [vmem:[#allocation20_spill] sm:$0xff] %v8112_v21  ;;  %3739 = vperm.xlu0 %5855, %v3112_v63   ;;  %10156 = vst [vmem:[#allocation248_spill] sm:$0xff] %v8116_v51  ;;  %v3116_v21 = vadd.f32 %v10163_v54, %v10162_v45  ;;  %v3115_v51 = vadd.f32 %v10167_v6, %v10166_v29  ;;  %v3117_v45 = vadd.f32 %v10172_v22, %v10171_v47  ;;  %v10173_v54 = vld [vmem:[#allocation43_spill] sm:$0xff]  ;;  %v10175_v29 = vld [vmem:[#allocation44_spill] sm:$0xff] }
 0x4a3   : > { %v10176_v6 = vld [vmem:[#allocation272_spill] sm:$0xff]  ;;  %v10179_v47 = vld [vmem:[#allocation46_spill] sm:$0xff] }
 0x4a5   : > { %v8120_v62 = vpop.permute.xlu1 %2781  ;;  %3736 = vperm.xlu1 %5856, %v3111_v48   ;;  %v8126_v40 = vpop.permute.xlu0 %2793 }
 0x4a6   : > { %10159 = vst [vmem:[#allocation21_spill] sm:$0xff] %v8120_v62  ;;  %3745 = vperm.xlu0 %5855, %v3114_v38   ;;  %10164 = vst [vmem:[#allocation253_spill] sm:$0xff] %v8126_v40  ;;  %v3118_v62 = vadd.f32 %v10169_v58, %v10168_v60  ;;  %v10174_v40 = vld [vmem:[#allocation275_spill] sm:$0xff]  ;;  %v3119_v60 = vadd.f32 %v10176_v6, %v10175_v29  ;;  %v10177_v58 = vld [vmem:[#allocation45_spill] sm:$0xff] }
 0x4a7   : > { %v10183_v29 = vld [vmem:[#allocation48_spill] sm:$0xff] }
 0x4a8   : > { %v10184_v6 = vld [vmem:[#allocation276_spill] sm:$0xff] }
 0x4a9   : > { %v8128_v63 = vpop.permute.xlu1 %2789  ;;  %3742 = vperm.xlu1 %5856, %v3113_v30  }
 0x4aa   : > { %10165 = vst [vmem:[#allocation22_spill] sm:$0xff] %v8128_v63  ;;  %3751 = vperm.xlu0 %5855, %v3116_v21   ;;  %v3120_v63 = vadd.f32 %v10174_v40, %v10173_v54  ;;  %v10180_v40 = vld [vmem:[#allocation274_spill] sm:$0xff]  ;;  %v10181_v54 = vld [vmem:[#allocation47_spill] sm:$0xff] }
 0x4ab   : > { %v3121_v22 = vadd.f32 %v10180_v40, %v10179_v47  ;;  %v10187_v47 = vld [vmem:[#allocation50_spill] sm:$0xff] }
 0x4ac   : > { %v10188_v40 = vld [vmem:[#allocation278_spill] sm:$0xff] }
 0x4ad   : > { %v8134_v48 = vpop.permute.xlu1 %2797  ;;  %3748 = vperm.xlu1 %5856, %v3115_v51   ;;  %v8136_v38 = vpop.permute.xlu0 %3568  ;;  %v10178_v51 = vld [vmem:[#allocation277_spill] sm:$0xff] }
 0x4ae   : > { %10170 = vst [vmem:[#allocation250_spill] sm:$0xff] %v8134_v48  ;;  %3757 = vperm.xlu0 %5855, %v3118_v62   ;;  %v3122_v48 = vadd.f32 %v10178_v51, %v10177_v58  ;;  %v3123_v58 = vadd.f32 %v10184_v6, %v10183_v29  ;;  %v10185_v51 = vld [vmem:[#allocation49_spill] sm:$0xff]  ;;  %v10192_v29 = vld [vmem:[#allocation52_spill] sm:$0xff] }
 0x4af   : > { %v10193_v6 = vld [vmem:[#allocation280_spill] sm:$0xff] }
 0x4b1   : > { %v8142_v30 = vpop.permute.xlu1 %3571  ;;  %3754 = vperm.xlu1 %5856, %v3117_v45   ;;  %v8144_v21 = vpop.permute.xlu0 %3577  ;;  %v10182_v45 = vld [vmem:[#allocation279_spill] sm:$0xff] }
 0x4b2   : > { %3763 = vperm.xlu0 %5855, %v3120_v63   ;;  %v3124_v16 = vadd.f32 %v10182_v45, %v10181_v54  ;;  %v3125_v54 = vadd.f32 %v10188_v40, %v10187_v47  ;;  %v10189_v45 = vld [vmem:[#allocation51_spill] sm:$0xff]  ;;  %v10197_v47 = vld [vmem:[#allocation54_spill] sm:$0xff] }
 0x4b3   : > { %v10198_v40 = vld [vmem:[#allocation282_spill] sm:$0xff] }
 0x4b5   : > { %v8150_v26 = vpop.permute.xlu1 %3574  ;;  %3760 = vperm.xlu1 %5856, %v3119_v60   ;;  %v8152_v62 = vpop.permute.xlu0 %3583  ;;  %v10186_v60 = vld [vmem:[#allocation281_spill] sm:$0xff] }
 0x4b6   : > { %3769 = vperm.xlu0 %5855, %v3122_v48   ;;  %v3126_v61 = vadd.f32 %v10186_v60, %v10185_v51  ;;  %v3127_v51 = vadd.f32 %v10193_v6, %v10192_v29  ;;  %v10194_v60 = vld [vmem:[#allocation53_spill] sm:$0xff]  ;;  %v10202_v29 = vld [vmem:[#allocation56_spill] sm:$0xff] }
 0x4b7   : > { %v10203_v6 = vld [vmem:[#allocation284_spill] sm:$0xff] }
 0x4b9   : > { %v8158_v53 = vpop.permute.xlu1 %3580  ;;  %3766 = vperm.xlu1 %5856, %v3121_v22   ;;  %v8160_v63 = vpop.permute.xlu0 %3589  ;;  %v10190_v22 = vld [vmem:[#allocation283_spill] sm:$0xff] }
 0x4ba   : > { %3775 = vperm.xlu0 %5855, %v3124_v16   ;;  %v3128_v41 = vadd.f32 %v10190_v22, %v10189_v45  ;;  %v3129_v45 = vadd.f32 %v10198_v40, %v10197_v47  ;;  %v10199_v22 = vld [vmem:[#allocation55_spill] sm:$0xff]  ;;  %v10207_v47 = vld [vmem:[#allocation58_spill] sm:$0xff] }
 0x4bb   : > { %v10208_v40 = vld [vmem:[#allocation286_spill] sm:$0xff] }
 0x4bd   : > { %v8166_v18 = vpop.permute.xlu1 %3586  ;;  %3772 = vperm.xlu1 %5856, %v3123_v58   ;;  %v8168_v48 = vpop.permute.xlu0 %3595  ;;  %v10195_v58 = vld [vmem:[#allocation285_spill] sm:$0xff] }
 0x4be   : > { %3781 = vperm.xlu0 %5855, %v3126_v61   ;;  %v3130_v46 = vadd.f32 %v10195_v58, %v10194_v60  ;;  %v3131_v60 = vadd.f32 %v10203_v6, %v10202_v29  ;;  %v10204_v58 = vld [vmem:[#allocation57_spill] sm:$0xff]  ;;  %v10211_v29 = vld [vmem:[#allocation60_spill] sm:$0xff] }
 0x4bf   : > { %v10212_v6 = vld [vmem:[#allocation288_spill] sm:$0xff] }
 0x4c1   : > { %v8174_v50 = vpop.permute.xlu1 %3592  ;;  %3778 = vperm.xlu1 %5856, %v3125_v54   ;;  %v8176_v16 = vpop.permute.xlu0 %3601  ;;  %v10200_v54 = vld [vmem:[#allocation287_spill] sm:$0xff] }
 0x4c2   : > { %10191 = vst [vmem:[#allocation23_spill] sm:$0xff] %v8176_v16  ;;  %3787 = vperm.xlu0 %5855, %v3128_v41   ;;  %v3132_v59 = vadd.f32 %v10200_v54, %v10199_v22  ;;  %v3133_v22 = vadd.f32 %v10208_v40, %v10207_v47  ;;  %v10209_v54 = vld [vmem:[#allocation59_spill] sm:$0xff]  ;;  %v10215_v47 = vld [vmem:[#allocation62_spill] sm:$0xff] }
 0x4c3   : > { %v10216_v40 = vld [vmem:[#allocation290_spill] sm:$0xff] }
 0x4c5   : > { %v8182_v15 = vpop.permute.xlu1 %3598  ;;  %3784 = vperm.xlu1 %5856, %v3127_v51   ;;  %v8184_v61 = vpop.permute.xlu0 %3607  ;;  %v10205_v51 = vld [vmem:[#allocation289_spill] sm:$0xff] }
 0x4c6   : > { %10196 = vst [vmem:[#allocation255_spill] sm:$0xff] %v8184_v61  ;;  %3793 = vperm.xlu0 %5855, %v3130_v46   ;;  %v3134_v2 = vadd.f32 %v10205_v51, %v10204_v58  ;;  %v3135_v58 = vadd.f32 %v10212_v6, %v10211_v29  ;;  %v10213_v51 = vld [vmem:[#allocation61_spill] sm:$0xff]  ;;  %v10219_v29 = vld [vmem:[#allocation64_spill] sm:$0xff] }
 0x4c7   : > { %v10220_v6 = vld [vmem:[#allocation292_spill] sm:$0xff] }
 0x4c9   : > { %v8190_v39 = vpop.permute.xlu1 %3604  ;;  %3790 = vperm.xlu1 %5856, %v3129_v45   ;;  %v8192_v41 = vpop.permute.xlu0 %3613  ;;  %v10210_v45 = vld [vmem:[#allocation291_spill] sm:$0xff] }
 0x4ca   : > { %10201 = vst [vmem:[#allocation24_spill] sm:$0xff] %v8192_v41  ;;  %3799 = vperm.xlu0 %5855, %v3132_v59   ;;  %v3136_v1 = vadd.f32 %v10210_v45, %v10209_v54  ;;  %v3137_v54 = vadd.f32 %v10216_v40, %v10215_v47  ;;  %v10217_v45 = vld [vmem:[#allocation63_spill] sm:$0xff]  ;;  %v10223_v47 = vld [vmem:[#allocation66_spill] sm:$0xff] }
 0x4cb   : > { %v10224_v40 = vld [vmem:[#allocation294_spill] sm:$0xff] }
 0x4cd   : > { %v8198_v13 = vpop.permute.xlu1 %3610  ;;  %3796 = vperm.xlu1 %5856, %v3131_v60   ;;  %v8200_v46 = vpop.permute.xlu0 %3619  ;;  %v10214_v60 = vld [vmem:[#allocation293_spill] sm:$0xff] }
 0x4ce   : > { %10206 = vst [vmem:[#allocation252_spill] sm:$0xff] %v8198_v13  ;;  %3805 = vperm.xlu0 %5855, %v3134_v2   ;;  %v3138_v32 = vadd.f32 %v10214_v60, %v10213_v51  ;;  %v3139_v51 = vadd.f32 %v10220_v6, %v10219_v29  ;;  %v10221_v60 = vld [vmem:[#allocation65_spill] sm:$0xff]  ;;  %v10228_v29 = vld [vmem:[#allocation68_spill] sm:$0xff] }
 0x4cf   : > { %v10229_v6 = vld [vmem:[#allocation296_spill] sm:$0xff]  ;;  %v10400_v13 = vld [vmem:[#allocation357_spill] sm:$0xff] }
 0x4d1   : > { %v8206_v33 = vpop.permute.xlu1 %3616  ;;  %3802 = vperm.xlu1 %5856, %v3133_v22   ;;  %v8208_v59 = vpop.permute.xlu0 %3625  ;;  %v10218_v22 = vld [vmem:[#allocation295_spill] sm:$0xff] }
 0x4d2   : > { %3811 = vperm.xlu0 %5855, %v3136_v1   ;;  %v3140_v12 = vadd.f32 %v10218_v22, %v10217_v45  ;;  %v3141_v45 = vadd.f32 %v10224_v40, %v10223_v47  ;;  %v10225_v22 = vld [vmem:[#allocation67_spill] sm:$0xff]  ;;  %v10233_v47 = vld [vmem:[#allocation70_spill] sm:$0xff] }
 0x4d3   : > { %v10234_v40 = vld [vmem:[#allocation298_spill] sm:$0xff] }
 0x4d5   : > { %v8214_v25 = vpop.permute.xlu1 %3622  ;;  %3808 = vperm.xlu1 %5856, %v3135_v58   ;;  %v8216_v2 = vpop.permute.xlu0 %3631  ;;  %v10222_v58 = vld [vmem:[#allocation297_spill] sm:$0xff] }
 0x4d6   : > { %3817 = vperm.xlu0 %5855, %v3138_v32   ;;  %v3142_v17 = vadd.f32 %v10222_v58, %v10221_v60  ;;  %v3143_v60 = vadd.f32 %v10229_v6, %v10228_v29  ;;  %v10230_v58 = vld [vmem:[#allocation69_spill] sm:$0xff]  ;;  %v10239_v29 = vld [vmem:[#allocation72_spill] sm:$0xff] }
 0x4d7   : > { %v10240_v6 = vld [vmem:[#allocation300_spill] sm:$0xff] }
 0x4d9   : > { %v8222_v0 = vpop.permute.xlu1 %3628  ;;  %3814 = vperm.xlu1 %5856, %v3137_v54   ;;  %v8224_v1 = vpop.permute.xlu0 %3637  ;;  %v10226_v54 = vld [vmem:[#allocation299_spill] sm:$0xff] }
 0x4da   : > { %3823 = vperm.xlu0 %5855, %v3140_v12   ;;  %v3144_v19 = vadd.f32 %v10226_v54, %v10225_v22  ;;  %v3145_v22 = vadd.f32 %v10234_v40, %v10233_v47  ;;  %v10235_v54 = vld [vmem:[#allocation71_spill] sm:$0xff]  ;;  %v10244_v47 = vld [vmem:[#allocation74_spill] sm:$0xff] }
 0x4db   : > { %v10245_v40 = vld [vmem:[#allocation302_spill] sm:$0xff] }
 0x4dd   : > { %v8230_v56 = vpop.permute.xlu1 %3634  ;;  %3820 = vperm.xlu1 %5856, %v3139_v51   ;;  %v8232_v32 = vpop.permute.xlu0 %3643  ;;  %v10231_v51 = vld [vmem:[#allocation301_spill] sm:$0xff] }
 0x4de   : > { %3829 = vperm.xlu0 %5855, %v3142_v17   ;;  %v3146_v31 = vadd.f32 %v10231_v51, %v10230_v58  ;;  %v3147_v58 = vadd.f32 %v10240_v6, %v10239_v29  ;;  %v10241_v51 = vld [vmem:[#allocation73_spill] sm:$0xff]  ;;  %v10248_v29 = vld [vmem:[#allocation76_spill] sm:$0xff] }
 0x4df   : > { %v10249_v6 = vld [vmem:[#allocation304_spill] sm:$0xff] }
 0x4e1   : > { %v8238_v34 = vpop.permute.xlu1 %3640  ;;  %3826 = vperm.xlu1 %5856, %v3141_v45   ;;  %v8240_v12 = vpop.permute.xlu0 %3649  ;;  %v10236_v45 = vld [vmem:[#allocation303_spill] sm:$0xff] }
 0x4e2   : > { %10227 = vst [vmem:[#allocation25_spill] sm:$0xff] %v8240_v12  ;;  %3835 = vperm.xlu0 %5855, %v3144_v19   ;;  %v3148_v4 = vadd.f32 %v10236_v45, %v10235_v54  ;;  %v3149_v54 = vadd.f32 %v10245_v40, %v10244_v47  ;;  %v10246_v45 = vld [vmem:[#allocation75_spill] sm:$0xff]  ;;  %v10253_v47 = vld [vmem:[#allocation78_spill] sm:$0xff] }
 0x4e3   : > { %v10254_v40 = vld [vmem:[#allocation306_spill] sm:$0xff] }
 0x4e4   : > { %v10410_v12 = vld [vmem:[#allocation366_spill] sm:$0xff] }
 0x4e5   : > { %v8246_v35 = vpop.permute.xlu1 %3646  ;;  %3832 = vperm.xlu1 %5856, %v3143_v60   ;;  %v8248_v17 = vpop.permute.xlu0 %3655  ;;  %v10242_v60 = vld [vmem:[#allocation305_spill] sm:$0xff] }
 0x4e6   : > { %10232 = vst [vmem:[#allocation257_spill] sm:$0xff] %v8248_v17  ;;  %3841 = vperm.xlu0 %5855, %v3146_v31   ;;  %v3150_v49 = vadd.f32 %v10242_v60, %v10241_v51  ;;  %v3151_v51 = vadd.f32 %v10249_v6, %v10248_v29  ;;  %v10250_v60 = vld [vmem:[#allocation77_spill] sm:$0xff]  ;;  %v10258_v29 = vld [vmem:[#allocation80_spill] sm:$0xff]  ;;  %v10396_v17 = vld [vmem:[#allocation355_spill] sm:$0xff] }
 0x4e7   : > { %v10259_v6 = vld [vmem:[#allocation308_spill] sm:$0xff] }
 0x4e9   : > { %v8254_v28 = vpop.permute.xlu1 %3652  ;;  %3838 = vperm.xlu1 %5856, %v3145_v22   ;;  %v8256_v19 = vpop.permute.xlu0 %3661  ;;  %v10247_v22 = vld [vmem:[#allocation307_spill] sm:$0xff] }
 0x4ea   : > { %10237 = vst [vmem:[#allocation26_spill] sm:$0xff] %v8254_v28  ;;  %10238 = vst [vmem:[#allocation254_spill] sm:$0xff] %v8256_v19  ;;  %3847 = vperm.xlu0 %5855, %v3148_v4   ;;  %v3152_v24 = vadd.f32 %v10247_v22, %v10246_v45  ;;  %v3153_v45 = vadd.f32 %v10254_v40, %v10253_v47  ;;  %v10255_v22 = vld [vmem:[#allocation79_spill] sm:$0xff]  ;;  %v10264_v47 = vld [vmem:[#allocation82_spill] sm:$0xff] }
 0x4eb   : > { %v10265_v40 = vld [vmem:[#allocation310_spill] sm:$0xff] }
 0x4ed   : > { %v8262_v20 = vpop.permute.xlu1 %3658  ;;  %3844 = vperm.xlu1 %5856, %v3147_v58   ;;  %v8264_v31 = vpop.permute.xlu0 %3667  ;;  %v10251_v58 = vld [vmem:[#allocation309_spill] sm:$0xff] }
 0x4ee   : > { %10243 = vst [vmem:[#allocation27_spill] sm:$0xff] %v8262_v20  ;;  %3853 = vperm.xlu0 %5855, %v3150_v49   ;;  %v3154_v43 = vadd.f32 %v10251_v58, %v10250_v60  ;;  %v3155_v60 = vadd.f32 %v10259_v6, %v10258_v29  ;;  %v10260_v58 = vld [vmem:[#allocation81_spill] sm:$0xff]  ;;  %v10270_v29 = vld [vmem:[#allocation84_spill] sm:$0xff] }
 0x4ef   : > { %v10271_v6 = vld [vmem:[#allocation312_spill] sm:$0xff] }
 0x4f1   : > { %v8270_v36 = vpop.permute.xlu1 %3664  ;;  %3850 = vperm.xlu1 %5856, %v3149_v54   ;;  %v8272_v4 = vpop.permute.xlu0 %3673  ;;  %v10256_v54 = vld [vmem:[#allocation311_spill] sm:$0xff] }
 0x4f2   : > { %3859 = vperm.xlu0 %5855, %v3152_v24   ;;  %v3156_v10 = vadd.f32 %v10256_v54, %v10255_v22  ;;  %v3157_v22 = vadd.f32 %v10265_v40, %v10264_v47  ;;  %v10266_v54 = vld [vmem:[#allocation83_spill] sm:$0xff]  ;;  %v10276_v47 = vld [vmem:[#allocation86_spill] sm:$0xff] }
 0x4f3   : > { %v10277_v40 = vld [vmem:[#allocation314_spill] sm:$0xff] }
 0x4f5   : > { %v8278_v27 = vpop.permute.xlu1 %3670  ;;  %3856 = vperm.xlu1 %5856, %v3151_v51   ;;  %v8280_v49 = vpop.permute.xlu0 %3679  ;;  %v10261_v51 = vld [vmem:[#allocation313_spill] sm:$0xff] }
 0x4f6   : > { %10252 = vst [vmem:[#allocation259_spill] sm:$0xff] %v8280_v49  ;;  %3865 = vperm.xlu0 %5855, %v3154_v43   ;;  %v3158_v7 = vadd.f32 %v10261_v51, %v10260_v58  ;;  %v3159_v58 = vadd.f32 %v10271_v6, %v10270_v29  ;;  %v10272_v51 = vld [vmem:[#allocation85_spill] sm:$0xff]  ;;  %v10282_v29 = vld [vmem:[#allocation88_spill] sm:$0xff]  ;;  %v10404_v49 = vld [vmem:[#allocation359_spill] sm:$0xff] }
 0x4f7   : > { %v10283_v6 = vld [vmem:[#allocation316_spill] sm:$0xff] }
 0x4f9   : > { %v8286_v55 = vpop.permute.xlu1 %3676  ;;  %3862 = vperm.xlu1 %5856, %v3153_v45   ;;  %v8288_v24 = vpop.permute.xlu0 %3685  ;;  %v10267_v45 = vld [vmem:[#allocation315_spill] sm:$0xff] }
 0x4fa   : > { %10257 = vst [vmem:[#allocation28_spill] sm:$0xff] %v8288_v24  ;;  %3871 = vperm.xlu0 %5855, %v3156_v10   ;;  %v3160_v5 = vadd.f32 %v10267_v45, %v10266_v54  ;;  %v3161_v54 = vadd.f32 %v10277_v40, %v10276_v47  ;;  %v10278_v45 = vld [vmem:[#allocation87_spill] sm:$0xff]  ;;  %v10288_v47 = vld [vmem:[#allocation90_spill] sm:$0xff] }
 0x4fb   : > { %v10289_v40 = vld [vmem:[#allocation318_spill] sm:$0xff] }
 0x4fd   : > { %v8294_v42 = vpop.permute.xlu1 %3682  ;;  %3868 = vperm.xlu1 %5856, %v3155_v60   ;;  %v8296_v43 = vpop.permute.xlu0 %3691  ;;  %v10273_v60 = vld [vmem:[#allocation317_spill] sm:$0xff] }
 0x4fe   : > { %10262 = vst [vmem:[#allocation256_spill] sm:$0xff] %v8294_v42  ;;  %10263 = vst [vmem:[#allocation29_spill] sm:$0xff] %v8296_v43  ;;  %3877 = vperm.xlu0 %5855, %v3158_v7   ;;  %v3162_v9 = vadd.f32 %v10273_v60, %v10272_v51  ;;  %v3163_v51 = vadd.f32 %v10283_v6, %v10282_v29  ;;  %v10284_v60 = vld [vmem:[#allocation89_spill] sm:$0xff]  ;;  %v10294_v29 = vld [vmem:[#allocation92_spill] sm:$0xff] }
 0x4ff   : > { %v10295_v6 = vld [vmem:[#allocation320_spill] sm:$0xff] }
 0x501   : > { %v8302_v11 = vpop.permute.xlu1 %3688  ;;  %3874 = vperm.xlu1 %5856, %v3157_v22   ;;  %v8304_v10 = vpop.permute.xlu0 %3697  ;;  %v10279_v22 = vld [vmem:[#allocation319_spill] sm:$0xff] }
 0x502   : > { %10268 = vst [vmem:[#allocation261_spill] sm:$0xff] %v8302_v11  ;;  %10269 = vst [vmem:[#allocation30_spill] sm:$0xff] %v8304_v10  ;;  %3883 = vperm.xlu0 %5855, %v3160_v5   ;;  %v3164_v52 = vadd.f32 %v10279_v22, %v10278_v45  ;;  %v3165_v45 = vadd.f32 %v10289_v40, %v10288_v47  ;;  %v10290_v22 = vld [vmem:[#allocation91_spill] sm:$0xff]  ;;  %v10300_v47 = vld [vmem:[#allocation94_spill] sm:$0xff] }
 0x503   : > { %v10301_v40 = vld [vmem:[#allocation322_spill] sm:$0xff]  ;;  %v10395_v11 = vld [vmem:[#allocation128_spill] sm:$0xff] }
 0x504   : > { %v3203_v20 = vadd.f32 %v10396_v17, %v10395_v11 }
 0x505   : > { %v8310_v44 = vpop.permute.xlu1 %3694  ;;  %3880 = vperm.xlu1 %5856, %v3159_v58   ;;  %v8312_v7 = vpop.permute.xlu0 %3703  ;;  %v10285_v58 = vld [vmem:[#allocation321_spill] sm:$0xff] }
 0x506   : > { %10274 = vst [vmem:[#allocation258_spill] sm:$0xff] %v8310_v44  ;;  %10275 = vst [vmem:[#allocation31_spill] sm:$0xff] %v8312_v7  ;;  %3889 = vperm.xlu0 %5855, %v3162_v9   ;;  %v3166_v8 = vadd.f32 %v10285_v58, %v10284_v60  ;;  %v3167_v60 = vadd.f32 %v10295_v6, %v10294_v29  ;;  %v10296_v58 = vld [vmem:[#allocation93_spill] sm:$0xff]  ;;  %v10306_v29 = vld [vmem:[#allocation96_spill] sm:$0xff] }
 0x507   : > { %v10307_v6 = vld [vmem:[#allocation324_spill] sm:$0xff] }
 0x509   : > { %v8318_v14 = vpop.permute.xlu1 %3700  ;;  %3886 = vperm.xlu1 %5856, %v3161_v54   ;;  %v8320_v5 = vpop.permute.xlu0 %3709  ;;  %v10291_v54 = vld [vmem:[#allocation323_spill] sm:$0xff] }
 0x50a   : > { %10280 = vst [vmem:[#allocation263_spill] sm:$0xff] %v8318_v14  ;;  %10281 = vst [vmem:[#allocation32_spill] sm:$0xff] %v8320_v5  ;;  %3895 = vperm.xlu0 %5855, %v3164_v52   ;;  %v3168_v14 = vadd.f32 %v10291_v54, %v10290_v22  ;;  %v3169_v22 = vadd.f32 %v10301_v40, %v10300_v47  ;;  %v10302_v54 = vld [vmem:[#allocation95_spill] sm:$0xff]  ;;  %v10312_v47 = vld [vmem:[#allocation98_spill] sm:$0xff] }
 0x50b   : > { %v10313_v40 = vld [vmem:[#allocation326_spill] sm:$0xff] }
 0x50d   : > { %v8326_v7 = vpop.permute.xlu1 %3706  ;;  %3892 = vperm.xlu1 %5856, %v3163_v51   ;;  %v8328_v9 = vpop.permute.xlu0 %3715  ;;  %v10297_v51 = vld [vmem:[#allocation325_spill] sm:$0xff] }
 0x50e   : > { %10286 = vst [vmem:[#allocation260_spill] sm:$0xff] %v8326_v7  ;;  %10287 = vst [vmem:[#allocation33_spill] sm:$0xff] %v8328_v9  ;;  %3901 = vperm.xlu0 %5855, %v3166_v8   ;;  %v3170_v7 = vadd.f32 %v10297_v51, %v10296_v58  ;;  %v3171_v58 = vadd.f32 %v10307_v6, %v10306_v29  ;;  %v10308_v51 = vld [vmem:[#allocation97_spill] sm:$0xff]  ;;  %v10318_v29 = vld [vmem:[#allocation100_spill] sm:$0xff] }
 0x50f   : > { %v10319_v6 = vld [vmem:[#allocation328_spill] sm:$0xff] }
 0x511   : > { %v8334_v5 = vpop.permute.xlu1 %3712  ;;  %3898 = vperm.xlu1 %5856, %v3165_v45   ;;  %v8336_v52 = vpop.permute.xlu0 %3721  ;;  %v10303_v45 = vld [vmem:[#allocation327_spill] sm:$0xff] }
 0x512   : > { %10292 = vst [vmem:[#allocation265_spill] sm:$0xff] %v8334_v5  ;;  %10293 = vst [vmem:[#allocation34_spill] sm:$0xff] %v8336_v52  ;;  %3907 = vperm.xlu0 %5855, %v3168_v14   ;;  %v3172_v43 = vadd.f32 %v10303_v45, %v10302_v54  ;;  %v3173_v54 = vadd.f32 %v10313_v40, %v10312_v47  ;;  %v10314_v45 = vld [vmem:[#allocation99_spill] sm:$0xff]  ;;  %v10324_v47 = vld [vmem:[#allocation102_spill] sm:$0xff] }
 0x513   : > { %v10325_v40 = vld [vmem:[#allocation330_spill] sm:$0xff] }
 0x515   : > { %v8342_v10 = vpop.permute.xlu1 %3718  ;;  %3904 = vperm.xlu1 %5856, %v3167_v60   ;;  %v8344_v8 = vpop.permute.xlu0 %3727  ;;  %v10309_v60 = vld [vmem:[#allocation329_spill] sm:$0xff] }
 0x516   : > { %10298 = vst [vmem:[#allocation262_spill] sm:$0xff] %v8342_v10  ;;  %10299 = vst [vmem:[#allocation35_spill] sm:$0xff] %v8344_v8  ;;  %3913 = vperm.xlu0 %5855, %v3170_v7   ;;  %v3174_v44 = vadd.f32 %v10309_v60, %v10308_v51  ;;  %v3175_v51 = vadd.f32 %v10319_v6, %v10318_v29  ;;  %v10320_v60 = vld [vmem:[#allocation101_spill] sm:$0xff]  ;;  %v10330_v29 = vld [vmem:[#allocation104_spill] sm:$0xff] }
 0x517   : > { %v10331_v6 = vld [vmem:[#allocation332_spill] sm:$0xff] }
 0x519   : > { %v8350_v52 = vpop.permute.xlu1 %3724  ;;  %3910 = vperm.xlu1 %5856, %v3169_v22   ;;  %v8352_v14 = vpop.permute.xlu0 %3733  ;;  %v10315_v22 = vld [vmem:[#allocation331_spill] sm:$0xff] }
 0x51a   : > { %10304 = vst [vmem:[#allocation267_spill] sm:$0xff] %v8350_v52  ;;  %10305 = vst [vmem:[#allocation36_spill] sm:$0xff] %v8352_v14  ;;  %3919 = vperm.xlu0 %5855, %v3172_v43   ;;  %v3176_v52 = vadd.f32 %v10315_v22, %v10314_v45  ;;  %v3177_v45 = vadd.f32 %v10325_v40, %v10324_v47  ;;  %v10326_v22 = vld [vmem:[#allocation103_spill] sm:$0xff]  ;;  %v10336_v47 = vld [vmem:[#allocation106_spill] sm:$0xff] }
 0x51b   : > { %v10337_v40 = vld [vmem:[#allocation334_spill] sm:$0xff] }
 0x51d   : > { %v8358_v8 = vpop.permute.xlu1 %3730  ;;  %3916 = vperm.xlu1 %5856, %v3171_v58   ;;  %v8360_v7 = vpop.permute.xlu0 %3739  ;;  %v10321_v58 = vld [vmem:[#allocation333_spill] sm:$0xff] }
 0x51e   : > { %10310 = vst [vmem:[#allocation264_spill] sm:$0xff] %v8358_v8  ;;  %10311 = vst [vmem:[#allocation37_spill] sm:$0xff] %v8360_v7  ;;  %3925 = vperm.xlu0 %5855, %v3174_v44   ;;  %v3178_v8 = vadd.f32 %v10321_v58, %v10320_v60  ;;  %v3179_v60 = vadd.f32 %v10331_v6, %v10330_v29  ;;  %v10332_v58 = vld [vmem:[#allocation105_spill] sm:$0xff]  ;;  %v10341_v29 = vld [vmem:[#allocation108_spill] sm:$0xff] }
 0x51f   : > { %v10342_v6 = vld [vmem:[#allocation336_spill] sm:$0xff] }
 0x521   : > { %v8366_v14 = vpop.permute.xlu1 %3736  ;;  %3922 = vperm.xlu1 %5856, %v3173_v54   ;;  %v8368_v43 = vpop.permute.xlu0 %3745  ;;  %v10327_v54 = vld [vmem:[#allocation335_spill] sm:$0xff] }
 0x522   : > { %10316 = vst [vmem:[#allocation269_spill] sm:$0xff] %v8366_v14  ;;  %10317 = vst [vmem:[#allocation38_spill] sm:$0xff] %v8368_v43  ;;  %3931 = vperm.xlu0 %5855, %v3176_v52   ;;  %v3180_v14 = vadd.f32 %v10327_v54, %v10326_v22  ;;  %v3181_v22 = vadd.f32 %v10337_v40, %v10336_v47  ;;  %v10338_v54 = vld [vmem:[#allocation107_spill] sm:$0xff]  ;;  %v10347_v47 = vld [vmem:[#allocation110_spill] sm:$0xff] }
 0x525   : > { %v8374_v7 = vpop.permute.xlu1 %3742  ;;  %3928 = vperm.xlu1 %5856, %v3175_v51   ;;  %v8376_v44 = vpop.permute.xlu0 %3751  ;;  %v10333_v51 = vld [vmem:[#allocation337_spill] sm:$0xff] }
 0x526   : > { %10322 = vst [vmem:[#allocation266_spill] sm:$0xff] %v8374_v7  ;;  %10323 = vst [vmem:[#allocation39_spill] sm:$0xff] %v8376_v44  ;;  %3937 = vperm.xlu0 %5855, %v3178_v8   ;;  %v3182_v7 = vadd.f32 %v10333_v51, %v10332_v58  ;;  %v3183_v58 = vadd.f32 %v10342_v6, %v10341_v29  ;;  %v10343_v51 = vld [vmem:[#allocation109_spill] sm:$0xff]  ;;  %v10353_v29 = vld [vmem:[#allocation112_spill] sm:$0xff] }
 0x527   : > { %v10354_v6 = vld [vmem:[#allocation339_spill] sm:$0xff] }
 0x529   : > { %v8382_v43 = vpop.permute.xlu1 %3748  ;;  %3934 = vperm.xlu1 %5856, %v3177_v45   ;;  %v8384_v52 = vpop.permute.xlu0 %3757  ;;  %v3184_v45 = vadd.f32 %v7749_v37, %v10338_v54  ;;  %v10348_v37 = vld [vmem:[#allocation338_spill] sm:$0xff]  ;;  %v10349_v54 = vld [vmem:[#allocation111_spill] sm:$0xff] }
 0x52a   : > { %10328 = vst [vmem:[#allocation271_spill] sm:$0xff] %v8382_v43  ;;  %10329 = vst [vmem:[#allocation40_spill] sm:$0xff] %v8384_v52  ;;  %3943 = vperm.xlu0 %5855, %v3180_v14   ;;  %v3185_v40 = vadd.f32 %v10348_v37, %v10347_v47  ;;  %v10359_v47 = vld [vmem:[#allocation114_spill] sm:$0xff]  ;;  %v10360_v37 = vld [vmem:[#allocation341_spill] sm:$0xff] }
 0x52d   : > { %v8390_v44 = vpop.permute.xlu1 %3754  ;;  %3940 = vperm.xlu1 %5856, %v3179_v60   ;;  %v8392_v8 = vpop.permute.xlu0 %3763  ;;  %v10344_v60 = vld [vmem:[#allocation340_spill] sm:$0xff] }
 0x52e   : > { %10334 = vst [vmem:[#allocation268_spill] sm:$0xff] %v8390_v44  ;;  %10335 = vst [vmem:[#allocation41_spill] sm:$0xff] %v8392_v8  ;;  %3949 = vperm.xlu0 %5855, %v3182_v7   ;;  %v3186_v44 = vadd.f32 %v10344_v60, %v10343_v51  ;;  %v3187_v51 = vadd.f32 %v10354_v6, %v10353_v29  ;;  %v10355_v60 = vld [vmem:[#allocation113_spill] sm:$0xff]  ;;  %v10365_v29 = vld [vmem:[#allocation116_spill] sm:$0xff] }
 0x52f   : > { %v10366_v6 = vld [vmem:[#allocation343_spill] sm:$0xff] }
 0x531   : > { %v8398_v52 = vpop.permute.xlu1 %3760  ;;  %3946 = vperm.xlu1 %5856, %v3181_v22   ;;  %v8400_v14 = vpop.permute.xlu0 %3769  ;;  %v10350_v22 = vld [vmem:[#allocation342_spill] sm:$0xff] }
 0x532   : > { %10339 = vst [vmem:[#allocation273_spill] sm:$0xff] %v8398_v52  ;;  %10340 = vst [vmem:[#allocation42_spill] sm:$0xff] %v8400_v14  ;;  %3955 = vperm.xlu0 %5855, %v3184_v45   ;;  %v3188_v8 = vadd.f32 %v10350_v22, %v10349_v54  ;;  %v3189_v54 = vadd.f32 %v10360_v37, %v10359_v47  ;;  %v10361_v22 = vld [vmem:[#allocation115_spill] sm:$0xff]  ;;  %v10371_v47 = vld [vmem:[#allocation118_spill] sm:$0xff] }
 0x533   : > { %v10372_v37 = vld [vmem:[#allocation345_spill] sm:$0xff] }
 0x535   : > { %v8406_v43 = vpop.permute.xlu1 %3766  ;;  %3952 = vperm.xlu1 %5856, %v3183_v58   ;;  %v8408_v7 = vpop.permute.xlu0 %3775  ;;  %v10356_v58 = vld [vmem:[#allocation344_spill] sm:$0xff] }
 0x536   : > { %10345 = vst [vmem:[#allocation270_spill] sm:$0xff] %v8406_v43  ;;  %10346 = vst [vmem:[#allocation43_spill] sm:$0xff] %v8408_v7  ;;  %3961 = vperm.xlu0 %5855, %v3186_v44   ;;  %v3190_v43 = vadd.f32 %v10356_v58, %v10355_v60  ;;  %v3191_v60 = vadd.f32 %v10366_v6, %v10365_v29  ;;  %v10367_v58 = vld [vmem:[#allocation117_spill] sm:$0xff]  ;;  %v10377_v29 = vld [vmem:[#allocation120_spill] sm:$0xff] }
 0x537   : > { %v10378_v6 = vld [vmem:[#allocation347_spill] sm:$0xff] }
 0x539   : > { %v8414_v14 = vpop.permute.xlu1 %3772  ;;  %3958 = vperm.xlu1 %5856, %v3185_v40   ;;  %v8416_v45 = vpop.permute.xlu0 %3781  ;;  %v10362_v40 = vld [vmem:[#allocation346_spill] sm:$0xff] }
 0x53a   : > { %10351 = vst [vmem:[#allocation275_spill] sm:$0xff] %v8414_v14  ;;  %10352 = vst [vmem:[#allocation44_spill] sm:$0xff] %v8416_v45  ;;  %3967 = vperm.xlu0 %5855, %v3188_v8   ;;  %v3192_v14 = vadd.f32 %v10362_v40, %v10361_v22  ;;  %v3193_v22 = vadd.f32 %v10372_v37, %v10371_v47  ;;  %v10373_v40 = vld [vmem:[#allocation119_spill] sm:$0xff]  ;;  %v10383_v37 = vld [vmem:[#allocation122_spill] sm:$0xff] }
 0x53d   : > { %v8422_v7 = vpop.permute.xlu1 %3778  ;;  %3964 = vperm.xlu1 %5856, %v3187_v51   ;;  %v8424_v44 = vpop.permute.xlu0 %3787  ;;  %v10368_v51 = vld [vmem:[#allocation348_spill] sm:$0xff] }
 0x53e   : > { %10357 = vst [vmem:[#allocation272_spill] sm:$0xff] %v8422_v7  ;;  %10358 = vst [vmem:[#allocation45_spill] sm:$0xff] %v8424_v44  ;;  %3973 = vperm.xlu0 %5855, %v3190_v43   ;;  %v3194_v7 = vadd.f32 %v10368_v51, %v10367_v58  ;;  %v3195_v58 = vadd.f32 %v10378_v6, %v10377_v29  ;;  %v10379_v51 = vld [vmem:[#allocation121_spill] sm:$0xff] }
 0x541   : > { %v8430_v45 = vpop.permute.xlu1 %3784  ;;  %3970 = vperm.xlu1 %5856, %v3189_v54   ;;  %v8432_v8 = vpop.permute.xlu0 %3793  ;;  %v10374_v54 = vld [vmem:[#allocation350_spill] sm:$0xff] }
 0x542   : > { %10363 = vst [vmem:[#allocation277_spill] sm:$0xff] %v8430_v45  ;;  %10364 = vst [vmem:[#allocation46_spill] sm:$0xff] %v8432_v8  ;;  %3979 = vperm.xlu0 %5855, %v3192_v14   ;;  %v3196_v45 = vadd.f32 %v10374_v54, %v10373_v40  ;;  %v10384_v40 = vld [vmem:[#allocation349_spill] sm:$0xff] }
 0x545   : > { %v8438_v44 = vpop.permute.xlu1 %3790  ;;  %3976 = vperm.xlu1 %5856, %v3191_v60   ;;  %v8440_v43 = vpop.permute.xlu0 %3799  ;;  %v10380_v60 = vld [vmem:[#allocation352_spill] sm:$0xff] }
 0x546   : > { %10369 = vst [vmem:[#allocation274_spill] sm:$0xff] %v8438_v44  ;;  %10370 = vst [vmem:[#allocation47_spill] sm:$0xff] %v8440_v43  ;;  %3985 = vperm.xlu0 %5855, %v3194_v7   ;;  %v3198_v44 = vadd.f32 %v10380_v60, %v10379_v51  ;;  %v10381_v43 = vlaneseq }
 0x548   : > { %v8455_v7 = vand.u32 127, %v10381_v43 }
 0x549   : > { %v8446_v8 = vpop.permute.xlu1 %3796  ;;  %3982 = vperm.xlu1 %5856, %v3193_v22   ;;  %v8448_v14 = vpop.permute.xlu0 %3805  ;;  %v3197_v22 = vadd.f32 %v10384_v40, %v10383_v37 }
 0x54a   : > { %10375 = vst [vmem:[#allocation279_spill] sm:$0xff] %v8446_v8  ;;  %10376 = vst [vmem:[#allocation48_spill] sm:$0xff] %v8448_v14  ;;  %3991 = vperm.xlu0 %5855, %v3196_v45   ;;  %v4341_v54 = vadd.s32 4294967288, %v8455_v7  ;;  %v10385_v45 = vld [vmem:[#allocation123_spill] sm:$0xff]  ;;  %v10386_v14 = vld [vmem:[#allocation354_spill] sm:$0xff]  ;;  %v4348_v29 = vadd.s32 4294967280, %v8455_v7  ;;  %v8467_v6 = vsub.s32 %v8455_v7, %v6020_v3 }
 0x54b   : > { %v3200_v8 = vadd.f32 %v10386_v14, %v10385_v45  ;;  %v4355_v40 = vadd.s32 4294967272, %v8455_v7  ;;  %v10389_v45 = vld [vmem:[#allocation125_spill] sm:$0xff]  ;;  %v4390_v11 = vadd.s32 4294967232, %v8455_v7 }
 0x54c   : > { %v8472_v37 = vsub.s32 %v4341_v54, %v6020_v3  ;;  %v8479_v41 = vsub.s32 %v4348_v29, %v6020_v3  ;;  %v10392_v54 = vld [vmem:[#allocation353_spill] sm:$0xff] }
 0x54d   : > { %v8457_v52 = vpop.permute.xlu1 %3802  ;;  %3988 = vperm.xlu1 %5856, %v3195_v58   ;;  %v3812_v47 = vpop.permute.xlu0 %3811  ;;  %v10387_v58 = vld [vmem:[#allocation124_spill] sm:$0xff] }
 0x54e   : > { %10382 = vst [vmem:[#allocation276_spill] sm:$0xff] %v8457_v52  ;;  %3997 = vperm.xlu0 %5855, %v3198_v44   ;;  %v10388_v44 = vld [vmem:[#allocation351_spill] sm:$0xff]  ;;  %v10390_v52 = vld [vmem:[#allocation356_spill] sm:$0xff] }
 0x54f   : > { %v3199_v60 = vadd.f32 %v10388_v44, %v10387_v58  ;;  %v3202_v19 = vadd.f32 %v10390_v52, %v10389_v45  ;;  %v10391_v44 = vld [vmem:[#allocation126_spill] sm:$0xff]  ;;  %v4369_v52 = vadd.s32 4294967256, %v8455_v7  ;;  %v10393_v45 = vld [vmem:[#allocation127_spill] sm:$0xff] }
 0x550   : > { %v3201_v10 = vadd.f32 %v10392_v54, %v10391_v44  ;;  %v4376_v44 = vadd.s32 4294967248, %v8455_v7 }
 0x551   : > { %v3809_v43 = vpop.permute.xlu1 %3808  ;;  %3994 = vperm.xlu1 %5856, %v3197_v22   ;;  %v3818_v51 = vpop.permute.xlu0 %3817  ;;  %v4362_v22 = vadd.s32 4294967264, %v8455_v7 }
 0x552   : > { %4003 = vperm.xlu0 %5855, %v3200_v8   ;;  %v4765_v14 = vrot.slane %v3809_v43, %v8467_v6  ;;  %v4769_v8 = vrot.slane %v3812_v47, %v8472_v37  ;;  %v8487_v43 = vsub.s32 %v4355_v40, %v6020_v3  ;;  %v10394_v47 = vld [vmem:[#allocation358_spill] sm:$0xff] }
 0x553   : > { %v3204_v5 = vadd.f32 %v10394_v47, %v10393_v45 }
 0x554   : > { %v4770_v29 = vsel %vm4346_vm1, %v4769_v8, %v4765_v14  ;;  %v8503_v8 = vsub.s32 %v4369_v52, %v6020_v3 }
 0x555   : > { %v3815_v9 = vpop.permute.xlu1 %3814  ;;  %4000 = vperm.xlu1 %5856, %v3199_v60   ;;  %v3824_v58 = vpop.permute.xlu0 %3823  ;;  %v8494_v60 = vsub.s32 %v4362_v22, %v6020_v3  ;;  %v4383_v22 = vadd.s32 4294967240, %v8455_v7 }
 0x556   : > { %v4774_v24 = vrot.slane %v3815_v9, %v8479_v41  ;;  %4009 = vperm.xlu0 %5855, %v3202_v19   ;;  %v4779_v19 = vrot.slane %v3818_v51, %v8487_v43  ;;  %v10398_v51 = vld [vmem:[#allocation360_spill] sm:$0xff] }
 0x558   : > { %v4775_v54 = vsel %vm4353_vm2, %v4774_v24, %v4770_v29  ;;  %v10397_v29 = vld [vmem:[#allocation129_spill] sm:$0xff] }
 0x559   : > { %v3821_v9 = vpop.permute.xlu1 %3820  ;;  %4006 = vperm.xlu1 %5856, %v3201_v10   ;;  %v3830_v40 = vpop.permute.xlu0 %3829  ;;  %v4780_v24 = vsel %vm4360_vm3, %v4779_v19, %v4775_v54  ;;  %v3206_v45 = vadd.f32 %v10398_v51, %v10397_v29  ;;  %v8510_v10 = vsub.s32 %v4376_v44, %v6020_v3  ;;  %v8519_v19 = vsub.s32 %v4383_v22, %v6020_v3 }
 0x55a   : > { %v4784_v14 = vrot.slane %v3821_v9, %v8494_v60  ;;  %4015 = vperm.xlu0 %5855, %v3204_v5   ;;  %v4789_v5 = vrot.slane %v3824_v58, %v8503_v8  ;;  %v10399_v9 = vld [vmem:[#allocation130_spill] sm:$0xff]  ;;  %v4397_v44 = vadd.s32 4294967224, %v8455_v7 }
 0x55b   : > { %v3205_v61 = vadd.f32 %v10400_v13, %v10399_v9  ;;  %v10402_v58 = vld [vmem:[#allocation362_spill] sm:$0xff]  ;;  %v4404_v13 = vadd.s32 4294967216, %v8455_v7  ;;  %v10403_v9 = vld [vmem:[#allocation132_spill] sm:$0xff] }
 0x55c   : > { %v4785_v17 = vsel %vm9623_vm4, %v4784_v14, %v4780_v24  ;;  %v10401_v24 = vld [vmem:[#allocation131_spill] sm:$0xff]  ;;  %v3207_v42 = vadd.f32 %v10404_v49, %v10403_v9  ;;  %v4418_v49 = vadd.s32 4294967200, %v8455_v7 }
 0x55d   : > { %v3827_v47 = vpop.permute.xlu1 %3826  ;;  %4012 = vperm.xlu1 %5856, %v3203_v20   ;;  %v3836_v52 = vpop.permute.xlu0 %3835  ;;  %v4790_v14 = vsel %vm9621_vm5, %v4789_v5, %v4785_v17  ;;  %v3208_v29 = vadd.f32 %v10402_v58, %v10401_v24  ;;  %v8526_v20 = vsub.s32 %v4390_v11, %v6020_v3  ;;  %v8535_v5 = vsub.s32 %v4397_v44, %v6020_v3 }
 0x55e   : > { %v4794_v54 = vrot.slane %v3827_v47, %v8510_v10  ;;  %4021 = vperm.xlu0 %5855, %v3206_v45   ;;  %v4799_v45 = vrot.slane %v3830_v40, %v8519_v19  ;;  %v4411_v11 = vadd.s32 4294967208, %v8455_v7  ;;  %v10406_v40 = vld [vmem:[#allocation364_spill] sm:$0xff] }
 0x55f   : > { %v4809_v44 = vrot.slane %v3836_v52, %v8535_v5  ;;  %v8558_v52 = vsub.s32 %v4418_v49, %v6020_v3 }
 0x560   : > { %v4795_v51 = vsel %vm9622_vm6, %v4794_v54, %v4790_v14  ;;  %v10405_v14 = vld [vmem:[#allocation133_spill] sm:$0xff] }
 0x561   : > { %v3833_v47 = vpop.permute.xlu1 %3832  ;;  %4018 = vperm.xlu1 %5856, %v3205_v61   ;;  %v3842_v22 = vpop.permute.xlu0 %3841  ;;  %v4800_v54 = vsel %vm4388_vm7, %v4799_v45, %v4795_v51  ;;  %v3210_v24 = vadd.f32 %v10406_v40, %v10405_v14  ;;  %v8542_v61 = vsub.s32 %v4404_v13, %v6020_v3  ;;  %v10407_v45 = vld [vmem:[#allocation134_spill] sm:$0xff]  ;;  %v10408_v14 = vld [vmem:[#allocation361_spill] sm:$0xff]  ;;  %v8552_v13 = vsub.s32 %v4411_v11, %v6020_v3 }
 0x562   : > { %v4804_v17 = vrot.slane %v3833_v47, %v8526_v20  ;;  %4027 = vperm.xlu0 %5855, %v3208_v29   ;;  %v4425_v29 = vadd.s32 4294967192, %v8455_v7  ;;  %v3209_v40 = vadd.f32 %v10408_v14, %v10407_v45 }
 0x564   : > { %v4805_v58 = vsel %vm4395_vm8, %v4804_v17, %v4800_v54  ;;  %v10409_v54 = vld [vmem:[#allocation135_spill] sm:$0xff] }
 0x565   : > { %v3839_v47 = vpop.permute.xlu1 %3838  ;;  %4024 = vperm.xlu1 %5856, %v3207_v42   ;;  %v3848_v9 = vpop.permute.xlu0 %3847  ;;  %v4810_v17 = vsel %vm4402_vm9, %v4809_v44, %v4805_v58  ;;  %v3212_v28 = vadd.f32 %v10410_v12, %v10409_v54  ;;  %v10413_v44 = vld [vmem:[#allocation136_spill] sm:$0xff]  ;;  %v10414_v12 = vld [vmem:[#allocation363_spill] sm:$0xff] }
 0x566   : > { %v4814_v51 = vrot.slane %v3839_v47, %v8542_v61  ;;  %4033 = vperm.xlu0 %5855, %v3210_v24   ;;  %v8562_v47 = vsub.s32 %v4425_v29, %v6020_v3  ;;  %v4819_v24 = vrot.slane %v3842_v22, %v8552_v13  ;;  %v3211_v14 = vadd.f32 %v10414_v12, %v10413_v44  ;;  %v10415_v29 = vld [vmem:[#allocation137_spill] sm:$0xff] }
 0x567   : > { %v4345_v22 = vrot.slane %v8142_v30, %v8472_v37  ;;  %v4340_v30 = vrot.slane %v8136_v38, %v8467_v6  ;;  %v10428_v38 = vld [vmem:[#allocation144_spill] sm:$0xff] }
 0x568   : > { %v4815_v42 = vsel %vm9624_vm10, %v4814_v51, %v4810_v17  ;;  %10411 = vst [vmem:[#allocation49_spill] sm:$0xff] %v8562_v47  ;;  %v4829_v49 = vrot.slane %v3848_v9, %v8562_v47  ;;  %v10416_v17 = vld [vmem:[#allocation368_spill] sm:$0xff] }
 0x569   : > { %v3845_v45 = vpop.permute.xlu1 %3844  ;;  %4030 = vperm.xlu1 %5856, %v3209_v40   ;;  %v8565_v11 = vpop.permute.xlu0 %3853  ;;  %v4820_v51 = vsel %vm4416_vm11, %v4819_v24, %v4815_v42  ;;  %v3214_v54 = vadd.f32 %v10416_v17, %v10415_v29  ;;  %v4458_v24 = vrot.slane %v8214_v25, %v8479_v41  ;;  %v10424_v17 = vld [vmem:[#allocation142_spill] sm:$0xff]  ;;  %v10430_v25 = vld [vmem:[#allocation141_spill] sm:$0xff] }
 0x56a   : > { %10412 = vst [vmem:[#allocation281_spill] sm:$0xff] %v8565_v11  ;;  %v4824_v58 = vrot.slane %v3845_v45, %v8558_v52  ;;  %4039 = vperm.xlu0 %5855, %v3212_v28   ;;  %v4352_v28 = vrot.slane %v8150_v26, %v8479_v41  ;;  %v4449_v45 = vrot.slane %v8206_v33, %v8467_v6  ;;  %v10421_v26 = vld [vmem:[#allocation365_spill] sm:$0xff]  ;;  %v10423_v33 = vld [vmem:[#allocation367_spill] sm:$0xff] }
 0x56b   : > { %v10425_v11 = vld [vmem:[#allocation369_spill] sm:$0xff] }
 0x56c   : > { %v4825_v40 = vsel %vm4423_vm12, %v4824_v58, %v4820_v51  ;;  %v10420_v58 = vld [vmem:[#allocation138_spill] sm:$0xff]  ;;  %v10422_v51 = vld [vmem:[#allocation140_spill] sm:$0xff] }
 0x56d   : > { %v8581_v44 = vpop.permute.xlu1 %3850  ;;  %v8584_v9 = vsel %vm4430_vm13, %v4829_v49, %v4825_v40  ;;  %4036 = vperm.xlu1 %5856, %v3211_v14   ;;  %v8586_v42 = vpop.permute.xlu0 %3859  ;;  %v3213_v12 = vadd.f32 %v10421_v26, %v10420_v58  ;;  %v3215_v29 = vadd.f32 %v10423_v33, %v10422_v51  ;;  %v3217_v49 = vadd.f32 %v10425_v11, %v10424_v17  ;;  %v10426_v40 = vld [vmem:[#allocation139_spill] sm:$0xff]  ;;  %v10432_v26 = vld [vmem:[#allocation146_spill] sm:$0xff]  ;;  %v10433_v51 = vld [vmem:[#allocation373_spill] sm:$0xff] }
 0x56e   : > { %10417 = vst [vmem:[#allocation50_spill] sm:$0xff] %v8581_v44  ;;  %10418 = vst [vmem:[#allocation278_spill] sm:$0xff] %v8584_v9  ;;  %4045 = vperm.xlu0 %5855, %v3214_v54   ;;  %v4453_v14 = vrot.slane %v8200_v46, %v8472_v37  ;;  %v10427_v9 = vld [vmem:[#allocation370_spill] sm:$0xff]  ;;  %v10431_v54 = vld [vmem:[#allocation372_spill] sm:$0xff]  ;;  %v4347_v58 = vsel %vm4346_vm1, %v4345_v22, %v4340_v30  ;;  %v8611_v33 = vadd.f32 %v10433_v51, %v10432_v26 }
 0x56f   : > { %10419 = vst [vmem:[#allocation51_spill] sm:$0xff] %v8586_v42  ;;  %v3216_v44 = vadd.f32 %v10427_v9, %v10426_v40  ;;  %v10429_v42 = vld [vmem:[#allocation371_spill] sm:$0xff]  ;;  %v3218_v16 = vadd.f32 %v10431_v54, %v10430_v25  ;;  %v4354_v11 = vsel %vm4353_vm2, %v4352_v28, %v4347_v58  ;;  %v4366_v46 = vrot.slane %v8158_v53, %v8494_v60  ;;  %v10438_v53 = vld [vmem:[#allocation148_spill] sm:$0xff]  ;;  %v10442_v26 = vld [vmem:[#allocation150_spill] sm:$0xff] }
 0x570   : > { %v8604_v47 = vadd.f32 %v10429_v42, %v10428_v38  ;;  %v4454_v9 = vsel %vm4346_vm1, %v4453_v14, %v4449_v45  ;;  %v10436_v40 = vld [vmem:[#allocation143_spill] sm:$0xff]  ;;  %v10437_v38 = vld [vmem:[#allocation374_spill] sm:$0xff]  ;;  %v4359_v22 = vrot.slane %v8144_v21, %v8487_v43  ;;  %v4468_v28 = vrot.slane %v8222_v0, %v8494_v60  ;;  %v10440_v14 = vld [vmem:[#allocation145_spill] sm:$0xff] }
 0x571   : > { %v8617_v17 = vpop.permute.xlu1 %3856  ;;  %4042 = vperm.xlu1 %5856, %v3213_v12   ;;  %v8619_v42 = vpop.permute.xlu0 %3865  ;;  %v3220_v25 = vadd.f32 %v10437_v38, %v10436_v40  ;;  %v4459_v30 = vsel %vm4353_vm2, %v4458_v24, %v4454_v9  ;;  %v10439_v54 = vld [vmem:[#allocation375_spill] sm:$0xff]  ;;  %v10441_v12 = vld [vmem:[#allocation376_spill] sm:$0xff]  ;;  %v10443_v51 = vld [vmem:[#allocation377_spill] sm:$0xff]  ;;  %v4463_v21 = vrot.slane %v8208_v59, %v8487_v43 }
 0x572   : > { %10434 = vst [vmem:[#allocation283_spill] sm:$0xff] %v8617_v17  ;;  %10435 = vst [vmem:[#allocation52_spill] sm:$0xff] %v8619_v42  ;;  %4051 = vperm.xlu0 %5855, %v3216_v44   ;;  %v8630_v45 = vadd.f32 %v10439_v54, %v10438_v53  ;;  %v3222_v58 = vadd.f32 %v10441_v12, %v10440_v14  ;;  %v8636_v42 = vadd.f32 %v10443_v51, %v10442_v26  ;;  %v10445_v40 = vld [vmem:[#allocation147_spill] sm:$0xff]  ;;  %v10446_v24 = vld [vmem:[#allocation378_spill] sm:$0xff] }
 0x573   : > { %v8642_v9 = vadd.f32 %v10446_v24, %v10445_v40  ;;  %v10447_v0 = vld [vmem:[#allocation152_spill] sm:$0xff]  ;;  %v10448_v44 = vld [vmem:[#allocation379_spill] sm:$0xff]  ;;  %v10449_v53 = vld [vmem:[#allocation149_spill] sm:$0xff]  ;;  %v4361_v14 = vsel %vm4360_vm3, %v4359_v22, %v4354_v11  ;;  %v4380_v40 = vrot.slane %v8166_v18, %v8510_v10  ;;  %v4464_v24 = vsel %vm4360_vm3, %v4463_v21, %v4459_v30 }
 0x574   : > { %10444 = vst [vmem:[#allocation280_spill] sm:$0xff] %v8636_v42  ;;  %v8646_v38 = vadd.f32 %v10448_v44, %v10447_v0  ;;  %v10450_v54 = vld [vmem:[#allocation380_spill] sm:$0xff]  ;;  %v10451_v12 = vld [vmem:[#allocation154_spill] sm:$0xff]  ;;  %v10452_v26 = vld [vmem:[#allocation381_spill] sm:$0xff]  ;;  %v4368_v59 = vsel %vm9623_vm4, %v4366_v46, %v4361_v14  ;;  %v4373_v11 = vrot.slane %v8152_v62, %v8503_v8  ;;  %v4469_v22 = vsel %vm9623_vm4, %v4468_v28, %v4464_v24 }
 0x575   : > { %v8650_v17 = vadd.f32 %v10450_v54, %v10449_v53  ;;  %v8655_v51 = vadd.f32 %v10452_v26, %v10451_v12  ;;  %v8661_v42 = vpop.permute.xlu1 %3862  ;;  %4048 = vperm.xlu1 %5856, %v3215_v29   ;;  %v8663_v0 = vpop.permute.xlu0 %3871  ;;  %v10454_v44 = vld [vmem:[#allocation151_spill] sm:$0xff]  ;;  %v10455_v53 = vld [vmem:[#allocation382_spill] sm:$0xff]  ;;  %v4478_v46 = vrot.slane %v8230_v56, %v8510_v10  ;;  %v10456_v18 = vld [vmem:[#allocation156_spill] sm:$0xff]  ;;  %v4473_v62 = vrot.slane %v8216_v2, %v8503_v8 }
 0x576   : > { %10453 = vst [vmem:[#allocation53_spill] sm:$0xff] %v8663_v0  ;;  %v8667_v54 = vadd.f32 %v10455_v53, %v10454_v44  ;;  %4057 = vperm.xlu0 %5855, %v3218_v16   ;;  %v10457_v30 = vld [vmem:[#allocation383_spill] sm:$0xff]  ;;  %v10459_v29 = vld [vmem:[#allocation153_spill] sm:$0xff]  ;;  %v10460_v14 = vld [vmem:[#allocation384_spill] sm:$0xff] }
 0x577   : > { %v8676_v21 = vadd.f32 %v10457_v30, %v10456_v18  ;;  %v8680_v12 = vadd.f32 %v10460_v14, %v10459_v29  ;;  %v10461_v26 = vld [vmem:[#allocation158_spill] sm:$0xff]  ;;  %v10462_v44 = vld [vmem:[#allocation385_spill] sm:$0xff]  ;;  %v10464_v28 = vld [vmem:[#allocation155_spill] sm:$0xff]  ;;  %v4375_v29 = vsel %vm9621_vm5, %v4373_v11, %v4368_v59  ;;  %v4488_v11 = vrot.slane %v8238_v34, %v8526_v20 }
 0x578   : > { %v8684_v53 = vadd.f32 %v10462_v44, %v10461_v26  ;;  %v8690_v24 = vadd.f32 %v7854_v23, %v10464_v28  ;;  %v10465_v56 = vld [vmem:[#allocation160_spill] sm:$0xff]  ;;  %v10466_v16 = vld [vmem:[#allocation386_spill] sm:$0xff]  ;;  %v10467_v18 = vld [vmem:[#allocation157_spill] sm:$0xff]  ;;  %v4382_v2 = vsel %vm9622_vm6, %v4380_v40, %v4375_v29  ;;  %v4394_v23 = vrot.slane %v8174_v50, %v8526_v20 }
 0x579   : > { %10458 = vst [vmem:[#allocation285_spill] sm:$0xff] %v8676_v21  ;;  %v8694_v0 = vadd.f32 %v10466_v16, %v10465_v56  ;;  %v10468_v30 = vld [vmem:[#allocation387_spill] sm:$0xff]  ;;  %v10469_v14 = vld [vmem:[#allocation162_spill] sm:$0xff]  ;;  %v10470_v26 = vld [vmem:[#allocation388_spill] sm:$0xff]  ;;  %v4474_v28 = vsel %vm9621_vm5, %v4473_v62, %v4469_v22  ;;  %4054 = vperm.xlu1 %5856, %v3217_v49   ;;  %v8711_v56 = vpop.permute.xlu0 %3877  ;;  %v4387_v16 = vrot.slane %v8160_v63, %v8519_v19 }
 0x57a   : > { %10463 = vst [vmem:[#allocation54_spill] sm:$0xff] %v8684_v53  ;;  %v8698_v21 = vadd.f32 %v10468_v30, %v10467_v18  ;;  %v8703_v44 = vadd.f32 %v10470_v26, %v10469_v14  ;;  %v8709_v53 = vpop.permute.xlu1 %3868  ;;  %v4479_v59 = vsel %vm9622_vm6, %v4478_v46, %v4474_v28  ;;  %v4528_v40 = vrot.slane %v8270_v36, %v8467_v6  ;;  %v10471_v50 = vld [vmem:[#allocation159_spill] sm:$0xff]  ;;  %v10472_v18 = vld [vmem:[#allocation389_spill] sm:$0xff]  ;;  %v10473_v62 = vld [vmem:[#allocation164_spill] sm:$0xff] }
 0x57b   : > { %4063 = vperm.xlu0 %5855, %v3220_v25   ;;  %v8722_v22 = vadd.f32 %v10472_v18, %v10471_v50  ;;  %v10474_v49 = vld [vmem:[#allocation390_spill] sm:$0xff]  ;;  %v4483_v63 = vrot.slane %v8224_v1, %v8519_v19  ;;  %v4537_v46 = vrot.slane %v8278_v27, %v8479_v41  ;;  %v10475_v29 = vld [vmem:[#allocation161_spill] sm:$0xff]  ;;  %v10476_v34 = vld [vmem:[#allocation391_spill] sm:$0xff]  ;;  %v4389_v28 = vsel %vm4388_vm7, %v4387_v16, %v4382_v2 }
 0x57c   : > { %v8726_v30 = vadd.f32 %v10474_v49, %v10473_v62  ;;  %v8734_v14 = vadd.f32 %v10476_v34, %v10475_v29  ;;  %v10477_v36 = vld [vmem:[#allocation166_spill] sm:$0xff]  ;;  %v10478_v25 = vld [vmem:[#allocation392_spill] sm:$0xff]  ;;  %v4532_v50 = vrot.slane %v8264_v31, %v8472_v37  ;;  %v4396_v18 = vsel %vm4395_vm8, %v4394_v23, %v4389_v28  ;;  %v10479_v16 = vld [vmem:[#allocation163_spill] sm:$0xff] }
 0x57d   : > { %v8738_v26 = vadd.f32 %v10478_v25, %v10477_v36  ;;  %v4408_v1 = vrot.slane %v8182_v15, %v8542_v61  ;;  %v4432_v27 = vadd.s32 4294967184, %v8455_v7  ;;  %v4484_v62 = vsel %vm4388_vm7, %v4483_v63, %v4479_v59  ;;  %4060 = vperm.xlu1 %5856, %v8604_v47   ;;  %v8751_v29 = vpop.permute.xlu0 %3883  ;;  %v10480_v34 = vld [vmem:[#allocation168_spill] sm:$0xff] }
 0x57e   : > { %v8748_v49 = vpop.permute.xlu1 %3874  ;;  %v4401_v2 = vrot.slane %v8168_v48, %v8535_v5  ;;  %v4489_v31 = vsel %vm4395_vm8, %v4488_v11, %v4484_v62  ;;  %v4498_v23 = vrot.slane %v8246_v35, %v8542_v61  ;;  %v4533_v15 = vsel %vm4346_vm1, %v4532_v50, %v4528_v40  ;;  %v10481_v11 = vld [vmem:[#allocation393_spill] sm:$0xff]  ;;  %v10486_v62 = vld [vmem:[#allocation394_spill] sm:$0xff] }
 0x57f   : > { %4069 = vperm.xlu0 %5855, %v3222_v58   ;;  %v8761_v59 = vadd.f32 %v7870_v57, %v10479_v16  ;;  %v4493_v47 = vrot.slane %v8232_v32, %v8535_v5  ;;  %v4538_v63 = vsel %vm4353_vm2, %v4537_v46, %v4533_v15  ;;  %v4547_v48 = vrot.slane %v8286_v55, %v8494_v60  ;;  %v10488_v16 = vld [vmem:[#allocation256_spill] sm:$0xff] }
 0x580   : > { %v8770_v36 = vadd.f32 %v10481_v11, %v10480_v34  ;;  %v4403_v35 = vsel %vm4402_vm9, %v4401_v2, %v4396_v18  ;;  %v4439_v58 = vadd.s32 4294967176, %v8455_v7  ;;  %v4542_v57 = vrot.slane %v8272_v4, %v8487_v43  ;;  %v10483_v7 = vld [vmem:[#allocation23_spill] sm:$0xff]  ;;  %v10484_v18 = vld [vmem:[#allocation26_spill] sm:$0xff] }
 0x581   : > { %v4410_v40 = vsel %vm9624_vm10, %v4408_v1, %v4403_v35  ;;  %v4422_v32 = vrot.slane %v8190_v39, %v8558_v52  ;;  %v8780_v46 = vsub.s32 %v4432_v27, %v6020_v3  ;;  %v4494_v55 = vsel %vm4402_vm9, %v4493_v47, %v4489_v31  ;;  %4066 = vperm.xlu1 %5856, %v8611_v33   ;;  %v8786_v28 = vpop.permute.xlu0 %3889  ;;  %v10485_v27 = vld [vmem:[#allocation165_spill] sm:$0xff]  ;;  %v10490_v34 = vld [vmem:[#allocation395_spill] sm:$0xff] }
 0x582   : > { %10482 = vst [vmem:[#allocation282_spill] sm:$0xff] %v8770_v36  ;;  %v8783_v25 = vpop.permute.xlu1 %3880  ;;  %v4415_v50 = vrot.slane %v10483_v7, %v8552_v13  ;;  %v4499_v4 = vsel %vm9624_vm10, %v4498_v23, %v4494_v55  ;;  %v4508_v1 = vrot.slane %v10484_v18, %v8558_v52  ;;  %v4543_v39 = vsel %vm4360_vm3, %v4542_v57, %v4538_v63  ;;  %v10487_v33 = vld [vmem:[#allocation25_spill] sm:$0xff]  ;;  %v10489_v23 = vld [vmem:[#allocation170_spill] sm:$0xff]  ;;  %v10492_v35 = vld [vmem:[#allocation259_spill] sm:$0xff] }
 0x583   : > { %4075 = vperm.xlu0 %5855, %v8642_v9   ;;  %v8797_v2 = vadd.f32 %v10486_v62, %v10485_v27  ;;  %v4503_v31 = vrot.slane %v10487_v33, %v8552_v13  ;;  %v4548_v15 = vsel %vm9623_vm4, %v4547_v48, %v4543_v39  ;;  %v4557_v47 = vrot.slane %v10488_v16, %v8510_v10  ;;  %v10493_v55 = vld [vmem:[#allocation49_spill] sm:$0xff]  ;;  %v10494_v7 = vld [vmem:[#allocation255_spill] sm:$0xff] }
 0x584   : > { %v8806_v11 = vadd.f32 %v10490_v34, %v10489_v23  ;;  %v4417_v63 = vsel %vm4416_vm11, %v4415_v50, %v4410_v40  ;;  %v8810_v9 = vsub.s32 %v4439_v58, %v6020_v3  ;;  %v4552_v57 = vrot.slane %v10492_v35, %v8503_v8  ;;  %v10495_v3 = vld [vmem:[#allocation252_spill] sm:$0xff]  ;;  %v10496_v50 = vld [vmem:[#allocation27_spill] sm:$0xff]  ;;  %v10499_v34 = vld [vmem:[#allocation265_spill] sm:$0xff] }
 0x585   : > { %v4429_v18 = vrot.slane %v10494_v7, %v10493_v55  ;;  %v4424_v48 = vsel %vm4423_vm12, %v4422_v32, %v4417_v63  ;;  %v4504_v39 = vsel %vm4416_vm11, %v4503_v31, %v4499_v4  ;;  %4072 = vperm.xlu1 %5856, %v8630_v45   ;;  %v8821_v62 = vpop.permute.xlu0 %3895  ;;  %v4436_v58 = vrot.slane %v10495_v3, %v8780_v46  ;;  %v10497_v32 = vld [vmem:[#allocation257_spill] sm:$0xff]  ;;  %v10500_v35 = vld [vmem:[#allocation167_spill] sm:$0xff]  ;;  %v10503_v3 = vld [vmem:[#allocation398_spill] sm:$0xff] }
 0x586   : > { %10491 = vst [vmem:[#allocation55_spill] sm:$0xff] %v8806_v11  ;;  %v8818_v27 = vpop.permute.xlu1 %3886  ;;  %v4509_v40 = vsel %vm4423_vm12, %v4508_v1, %v4504_v39  ;;  %v4518_v33 = vrot.slane %v10496_v50, %v8780_v46  ;;  %v4553_v16 = vsel %vm9621_vm5, %v4552_v57, %v4548_v15  ;;  %v4513_v4 = vrot.slane %v10497_v32, %v10493_v55  ;;  %v10498_v45 = vld [vmem:[#allocation261_spill] sm:$0xff]  ;;  %v10501_v1 = vld [vmem:[#allocation396_spill] sm:$0xff]  ;;  %v10506_v50 = vld [vmem:[#allocation262_spill] sm:$0xff] }
 0x587   : > { %4081 = vperm.xlu0 %5855, %v8650_v17   ;;  %v4558_v31 = vsel %vm9622_vm6, %v4557_v47, %v4553_v16  ;;  %v4567_v23 = vrot.slane %v10498_v45, %v8526_v20  ;;  %v4607_v63 = vrot.slane %v10499_v34, %v8467_v6  ;;  %v8839_v7 = vadd.f32 %v10501_v1, %v10500_v35  ;;  %v10502_v39 = vld [vmem:[#allocation169_spill] sm:$0xff]  ;;  %v10505_v17 = vld [vmem:[#allocation28_spill] sm:$0xff] }
 0x588   : > { %v8843_v15 = vadd.f32 %v10503_v3, %v10502_v39  ;;  %v4562_v57 = vrot.slane %v10505_v17, %v8519_v19  ;;  %v4616_v47 = vrot.slane %v10506_v50, %v8479_v41  ;;  %v4431_v16 = vsel %vm4430_vm13, %v4429_v18, %v4424_v48  ;;  %v10507_v45 = vld [vmem:[#allocation33_spill] sm:$0xff]  ;;  %v10508_v1 = vld [vmem:[#allocation280_spill] sm:$0xff]  ;;  %v10511_v48 = vld [vmem:[#allocation254_spill] sm:$0xff] }
 0x589   : > { %v4514_v32 = vsel %vm4430_vm13, %v4513_v4, %v4509_v40  ;;  %v4611_v34 = vrot.slane %v10507_v45, %v8472_v37  ;;  %4078 = vperm.xlu1 %5856, %v10508_v1   ;;  %v8856_v39 = vpop.permute.xlu0 %3901  ;;  %v10510_v3 = vld [vmem:[#allocation24_spill] sm:$0xff]  ;;  %v4438_v11 = vsel %vm4437_vm14, %v4436_v58, %v4431_v16  ;;  %v4523_v40 = vrot.slane %v10511_v48, %v8810_v9  ;;  %v10512_v45 = vld [vmem:[#allocation258_spill] sm:$0xff] }
 0x58a   : > { %10504 = vst [vmem:[#allocation287_spill] sm:$0xff] %v8843_v15  ;;  %v8853_v35 = vpop.permute.xlu1 %3892  ;;  %10509 = vst [vmem:[#allocation56_spill] sm:$0xff] %v8856_v39  ;;  %v4443_v17 = vrot.slane %v10510_v3, %v8810_v9  ;;  %v4519_v50 = vsel %vm4437_vm14, %v4518_v33, %v4514_v32  ;;  %v4563_v18 = vsel %vm4388_vm7, %v4562_v57, %v4558_v31  ;;  %v10513_v3 = vld [vmem:[#allocation29_spill] sm:$0xff]  ;;  %v10514_v33 = vld [vmem:[#allocation267_spill] sm:$0xff] }
 0x58b   : > { %4087 = vperm.xlu0 %5855, %v8667_v54   ;;  %v4568_v4 = vsel %vm4395_vm8, %v4567_v23, %v4563_v18  ;;  %v4577_v1 = vrot.slane %v10512_v45, %v8542_v61  ;;  %v4612_v15 = vsel %vm4346_vm1, %v4611_v34, %v4607_v63  ;;  %v4572_v36 = vrot.slane %v10513_v3, %v8535_v5  ;;  %v10515_v54 = vld [vmem:[#allocation273_spill] sm:$0xff]  ;;  %v10517_v32 = vld [vmem:[#allocation34_spill] sm:$0xff] }
 0x58c   : > { %v4617_v58 = vsel %vm4353_vm2, %v4616_v47, %v4612_v15  ;;  %v4626_v31 = vrot.slane %v10514_v33, %v8494_v60  ;;  %v4686_v57 = vrot.slane %v10515_v54, %v8467_v6  ;;  %v8878_v16 = vsel %vm4444_vm15, %v4443_v17, %v4438_v11  ;;  %v10518_v34 = vld [vmem:[#allocation270_spill] sm:$0xff]  ;;  %v10520_v17 = vld [vmem:[#allocation41_spill] sm:$0xff]  ;;  %v10522_v54 = vld [vmem:[#allocation263_spill] sm:$0xff] }
 0x58d   : > { %v8881_v23 = vsel %vm4444_vm15, %v4523_v40, %v4519_v50  ;;  %v4621_v63 = vrot.slane %v10517_v32, %v8487_v43  ;;  %v4695_v18 = vrot.slane %v10518_v34, %v8479_v41  ;;  %4084 = vperm.xlu1 %5856, %v8646_v38   ;;  %v3908_v15 = vpop.permute.xlu0 %3907  ;;  %v10519_v47 = vld [vmem:[#allocation30_spill] sm:$0xff]  ;;  %v4573_v11 = vsel %vm4402_vm9, %v4572_v36, %v4568_v4  ;;  %v10521_v40 = vld [vmem:[#allocation283_spill] sm:$0xff]  ;;  %v10523_v4 = vld [vmem:[#allocation264_spill] sm:$0xff] }
 0x58e   : > { %10516 = vst [vmem:[#allocation284_spill] sm:$0xff] %v8881_v23  ;;  %v8887_v48 = vpop.permute.xlu1 %3898  ;;  %v4582_v45 = vrot.slane %v10519_v47, %v8552_v13  ;;  %v4690_v50 = vrot.slane %v10520_v17, %v8472_v37  ;;  %v4844_v3 = vrot.slane %v10521_v40, %v8467_v6  ;;  %v4578_v33 = vsel %vm9624_vm10, %v4577_v1, %v4573_v11  ;;  %v10524_v40 = vld [vmem:[#allocation51_spill] sm:$0xff] }
 0x58f   : > { %4093 = vperm.xlu0 %5855, %v8680_v12   ;;  %v4587_v32 = vrot.slane %v10522_v54, %v8558_v52  ;;  %v4622_v38 = vsel %vm4360_vm3, %v4621_v63, %v4617_v58  ;;  %v4853_v34 = vrot.slane %v8661_v42, %v8479_v41  ;;  %v4636_v47 = vrot.slane %v10523_v4, %v8510_v10  ;;  %v10525_v1 = vld [vmem:[#allocation31_spill] sm:$0xff] }
 0x590   : > { %v4627_v36 = vsel %vm9623_vm4, %v4626_v31, %v4622_v38  ;;  %v4691_v17 = vsel %vm4346_vm1, %v4690_v50, %v4686_v57  ;;  %v4848_v12 = vrot.slane %v10524_v40, %v8472_v37  ;;  %v4592_v11 = vrot.slane %v10525_v1, %v10493_v55  ;;  %v10526_v54 = vld [vmem:[#allocation35_spill] sm:$0xff]  ;;  %v10528_v50 = vld [vmem:[#allocation32_spill] sm:$0xff]  ;;  %v10529_v40 = vld [vmem:[#allocation42_spill] sm:$0xff] }
 0x591   : > { %v4631_v39 = vrot.slane %v10526_v54, %v8503_v8  ;;  %v4696_v58 = vsel %vm4353_vm2, %v4695_v18, %v4691_v17  ;;  %v10527_v42 = vld [vmem:[#allocation275_spill] sm:$0xff]  ;;  %4090 = vperm.xlu1 %5856, %v8655_v51   ;;  %v3914_v38 = vpop.permute.xlu0 %3913  ;;  %v4583_v57 = vsel %vm4416_vm11, %v4582_v45, %v4578_v33  ;;  %v4602_v4 = vrot.slane %v10528_v50, %v8810_v9 }
 0x592   : > { %v4705_v63 = vrot.slane %v10527_v42, %v8494_v60  ;;  %v3905_v31 = vpop.permute.xlu1 %3904  ;;  %v4700_v1 = vrot.slane %v10529_v40, %v8487_v43  ;;  %v4849_v23 = vsel %vm4346_vm1, %v4848_v12, %v4844_v3  ;;  %v4863_v51 = vrot.slane %v8709_v53, %v8494_v60  ;;  %v10530_v40 = vld [vmem:[#allocation52_spill] sm:$0xff] }
 0x593   : > { %4099 = vperm.xlu0 %5855, %v8690_v24   ;;  %v4632_v18 = vsel %vm9621_vm5, %v4631_v39, %v4627_v36  ;;  %v4854_v17 = vsel %vm4353_vm2, %v4853_v34, %v4849_v23  ;;  %v4923_v54 = vrot.slane %v3905_v31, %v8467_v6  ;;  %v4588_v45 = vsel %vm4423_vm12, %v4587_v32, %v4583_v57  ;;  %v10531_v24 = vld [vmem:[#allocation269_spill] sm:$0xff]  ;;  %v10532_v23 = vld [vmem:[#allocation272_spill] sm:$0xff]  ;;  %v10535_v57 = vld [vmem:[#allocation43_spill] sm:$0xff] }
 0x594   : > { %v4637_v33 = vsel %vm9622_vm6, %v4636_v47, %v4632_v18  ;;  %v4701_v42 = vsel %vm4360_vm3, %v4700_v1, %v4696_v58  ;;  %v4858_v3 = vrot.slane %v10530_v40, %v8487_v43  ;;  %v4646_v12 = vrot.slane %v10531_v24, %v8526_v20  ;;  %v10533_v31 = vld [vmem:[#allocation285_spill] sm:$0xff]  ;;  %v10534_v47 = vld [vmem:[#allocation36_spill] sm:$0xff] }
 0x595   : > { %v4706_v39 = vsel %vm9623_vm4, %v4705_v63, %v4701_v42  ;;  %v4715_v34 = vrot.slane %v10532_v23, %v8510_v10  ;;  %v4927_v53 = vrot.slane %v3908_v15, %v8472_v37  ;;  %4096 = vperm.xlu1 %5856, %v10533_v31   ;;  %v3920_v32 = vpop.permute.xlu0 %3919  ;;  %v4641_v58 = vrot.slane %v10534_v47, %v8519_v19  ;;  %v10536_v47 = vld [vmem:[#allocation53_spill] sm:$0xff] }
 0x596   : > { %v3911_v36 = vpop.permute.xlu1 %3910  ;;  %v4710_v1 = vrot.slane %v10535_v57, %v8503_v8  ;;  %v4859_v18 = vsel %vm4360_vm3, %v4858_v3, %v4854_v17  ;;  %v4593_v63 = vsel %vm4430_vm13, %v4592_v11, %v4588_v45  ;;  %v4873_v42 = vrot.slane %v8748_v49, %v8510_v10 }
 0x597   : > { %v4932_v40 = vrot.slane %v3911_v36, %v8479_v41  ;;  %4105 = vperm.xlu0 %5855, %v8698_v21   ;;  %v4864_v15 = vsel %vm9623_vm4, %v4863_v51, %v4859_v18  ;;  %v4928_v24 = vsel %vm4346_vm1, %v4927_v53, %v4923_v54  ;;  %v4642_v23 = vsel %vm4388_vm7, %v4641_v58, %v4637_v33  ;;  %v10537_v51 = vld [vmem:[#allocation277_spill] sm:$0xff]  ;;  %v10538_v54 = vld [vmem:[#allocation54_spill] sm:$0xff]  ;;  %v10540_v58 = vld [vmem:[#allocation44_spill] sm:$0xff] }
 0x598   : > { %v4711_v31 = vsel %vm9621_vm5, %v4710_v1, %v4706_v39  ;;  %v4868_v17 = vrot.slane %v10536_v47, %v8503_v8  ;;  %v4647_v21 = vsel %vm4395_vm8, %v4646_v12, %v4642_v23  ;;  %v4725_v45 = vrot.slane %v10537_v51, %v8526_v20  ;;  %v10539_v39 = vld [vmem:[#allocation266_spill] sm:$0xff]  ;;  %v10542_v23 = vld [vmem:[#allocation260_spill] sm:$0xff] }
 0x599   : > { %v4933_v3 = vsel %vm4353_vm2, %v4932_v40, %v4928_v24  ;;  %v4716_v11 = vsel %vm9622_vm6, %v4715_v34, %v4711_v31  ;;  %v4937_v49 = vrot.slane %v3914_v38, %v8487_v43  ;;  %4102 = vperm.xlu1 %5856, %v10538_v54   ;;  %v3926_v33 = vpop.permute.xlu0 %3925  ;;  %v4656_v53 = vrot.slane %v10539_v39, %v8542_v61  ;;  %v10541_v34 = vld [vmem:[#allocation37_spill] sm:$0xff] }
 0x59a   : > { %v3917_v36 = vpop.permute.xlu1 %3916  ;;  %v4720_v57 = vrot.slane %v10540_v58, %v8519_v19  ;;  %v4869_v1 = vsel %vm9621_vm5, %v4868_v17, %v4864_v15  ;;  %v4651_v18 = vrot.slane %v10541_v34, %v8535_v5  ;;  %v4883_v40 = vrot.slane %v8783_v25, %v8526_v20  ;;  %v10544_v54 = vld [vmem:[#allocation45_spill] sm:$0xff] }
 0x59b   : > { %v4942_v12 = vrot.slane %v3917_v36, %v8494_v60  ;;  %4111 = vperm.xlu0 %5855, %v8722_v22   ;;  %v4874_v38 = vsel %vm9622_vm6, %v4873_v42, %v4869_v1  ;;  %v4938_v24 = vsel %vm4360_vm3, %v4937_v49, %v4933_v3  ;;  %v4597_v31 = vrot.slane %v10542_v23, %v8780_v46  ;;  %v10543_v42 = vld [vmem:[#allocation274_spill] sm:$0xff] }
 0x59c   : > { %v4721_v47 = vsel %vm4388_vm7, %v4720_v57, %v4716_v11  ;;  %v4878_v15 = vrot.slane %v8711_v56, %v8519_v19  ;;  %v4652_v17 = vsel %vm4402_vm9, %v4651_v18, %v4647_v21  ;;  %v4735_v36 = vrot.slane %v10543_v42, %v8542_v61  ;;  %v10549_v42 = vld [vmem:[#allocation268_spill] sm:$0xff] }
 0x59d   : > { %v4943_v22 = vsel %vm9623_vm4, %v4942_v12, %v4938_v24  ;;  %v4726_v51 = vsel %vm4395_vm8, %v4725_v45, %v4721_v47  ;;  %v4947_v25 = vrot.slane %v3920_v32, %v8503_v8  ;;  %4108 = vperm.xlu1 %5856, %v8694_v0   ;;  %v3932_v49 = vpop.permute.xlu0 %3931  ;;  %v4657_v11 = vsel %vm9624_vm10, %v4656_v53, %v4652_v17  ;;  %v10545_v45 = vld [vmem:[#allocation271_spill] sm:$0xff]  ;;  %v10546_v53 = vld [vmem:[#allocation38_spill] sm:$0xff] }
 0x59e   : > { %v3923_v3 = vpop.permute.xlu1 %3922  ;;  %v4730_v56 = vrot.slane %v10544_v54, %v8535_v5  ;;  %v4879_v39 = vsel %vm4388_vm7, %v4878_v15, %v4874_v38  ;;  %v4666_v58 = vrot.slane %v10545_v45, %v8558_v52  ;;  %v4893_v0 = vrot.slane %v8818_v27, %v8542_v61 }
 0x59f   : > { %v4952_v21 = vrot.slane %v3923_v3, %v8510_v10  ;;  %4117 = vperm.xlu0 %5855, %v8734_v14   ;;  %v4884_v32 = vsel %vm4395_vm8, %v4883_v40, %v4879_v39  ;;  %v4948_v57 = vsel %vm9621_vm5, %v4947_v25, %v4943_v22  ;;  %v4661_v1 = vrot.slane %v10546_v53, %v8552_v13  ;;  %v10547_v40 = vld [vmem:[#allocation279_spill] sm:$0xff] }
 0x5a0   : > { %v4731_v12 = vsel %vm4402_vm9, %v4730_v56, %v4726_v51  ;;  %v4888_v34 = vrot.slane %v8751_v29, %v8535_v5  ;;  %v4598_v18 = vsel %vm4437_vm14, %v4597_v31, %v4593_v63  ;;  %v4745_v27 = vrot.slane %v10547_v40, %v8558_v52  ;;  %v10548_v29 = vld [vmem:[#allocation46_spill] sm:$0xff] }
 0x5a1   : > { %v4953_v14 = vsel %vm9622_vm6, %v4952_v21, %v4948_v57  ;;  %v4736_v38 = vsel %vm9624_vm10, %v4735_v36, %v4731_v12  ;;  %v4957_v24 = vrot.slane %v3926_v33, %v8519_v19  ;;  %4114 = vperm.xlu1 %5856, %v8703_v44   ;;  %v3938_v47 = vpop.permute.xlu0 %3937  ;;  %vm9625_vm5 = vcmask 1042434  }
 0x5a2   : > { %v3929_v23 = vpop.permute.xlu1 %3928  ;;  %v4662_v15 = vsel %vm4416_vm11, %v4661_v1, %v4657_v11  ;;  %v4740_v22 = vrot.slane %v10548_v29, %v8552_v13  ;;  %v4889_v17 = vsel %vm4402_vm9, %v4888_v34, %v4884_v32  ;;  %vm5635_vm6 = vcmask 1043459   ;;  %v10550_v11 = vld [vmem:[#allocation39_spill] sm:$0xff] }
 0x5a3   : > { %v4962_v63 = vrot.slane %v3929_v23, %v8526_v20  ;;  %4123 = vperm.xlu0 %5855, %v8761_v59   ;;  %v4667_v31 = vsel %vm4423_vm12, %v4666_v58, %v4662_v15  ;;  %v4894_v33 = vsel %vm9624_vm10, %v4893_v0, %v4889_v17  ;;  %v4903_v44 = vrot.slane %v8853_v35, %v8558_v52  ;;  %v10551_v35 = vld [vmem:[#allocation276_spill] sm:$0xff]  ;;  %v10552_v32 = vld [vmem:[#allocation47_spill] sm:$0xff] }
 0x5a4   : > { %v4958_v51 = vsel %vm4388_vm7, %v4957_v24, %v4953_v14  ;;  %v4676_v36 = vrot.slane %v10549_v42, %v8780_v46  ;;  %v4741_v25 = vsel %vm4416_vm11, %v4740_v22, %v4736_v38  ;;  %vm9630_vm4 = vcmask 1044484   ;;  %v10554_v24 = vld [vmem:[#allocation40_spill] sm:$0xff] }
 0x5a5   : > { %v4898_v3 = vrot.slane %v8786_v28, %v8552_v13  ;;  %v4963_v59 = vsel %vm4395_vm8, %v4962_v63, %v4958_v51  ;;  %v4671_v54 = vrot.slane %v10550_v11, %v10493_v55  ;;  %v4746_v56 = vsel %vm4423_vm12, %v4745_v27, %v4741_v25  ;;  %4120 = vperm.xlu1 %5856, %v8726_v30   ;;  %v3944_v58 = vpop.permute.xlu0 %3943  ;;  %v10553_v28 = vld [vmem:[#allocation50_spill] sm:$0xff]  ;;  %v10558_v51 = vld [vmem:[#allocation284_spill] sm:$0xff] }
 0x5a6   : > { %v4755_v39 = vrot.slane %v10551_v35, %v8780_v46  ;;  %v4967_v21 = vrot.slane %v3932_v49, %v8535_v5  ;;  %v3935_v45 = vpop.permute.xlu1 %3934  ;;  %v4750_v0 = vrot.slane %v10552_v32, %v10493_v55  ;;  %v4834_v57 = vrot.slane %v10553_v28, %v8780_v46  ;;  %v10556_v63 = vld [vmem:[#allocation278_spill] sm:$0xff]  ;;  %v10559_v25 = vld [vmem:[#allocation56_spill] sm:$0xff]  ;;  %v10561_v32 = vld [vmem:[#allocation287_spill] sm:$0xff] }
 0x5a7   : > { %v4899_v53 = vsel %vm4416_vm11, %v4898_v3, %v4894_v33  ;;  %v4972_v1 = vrot.slane %v3935_v45, %v8542_v61  ;;  %4129 = vperm.xlu0 %5855, %v8797_v2   ;;  %v4672_v12 = vsel %vm4430_vm13, %v4671_v54, %v4667_v31  ;;  %v4913_v30 = vrot.slane %v8887_v48, %v8780_v46  ;;  %v10560_v35 = vld [vmem:[#allocation282_spill] sm:$0xff] }
 0x5a8   : > { %v4904_v49 = vsel %vm4423_vm12, %v4903_v44, %v4899_v53  ;;  %v4968_v34 = vsel %vm4402_vm9, %v4967_v21, %v4963_v59  ;;  %v4677_v14 = vsel %vm4437_vm14, %v4676_v36, %v4672_v12  ;;  %v4751_v38 = vsel %vm4430_vm13, %v4750_v0, %v4746_v56  ;;  %v10563_v53 = vld [vmem:[#allocation400_spill] sm:$0xff] }
 0x5a9   : > { %v4908_v40 = vrot.slane %v8821_v62, %v10493_v55  ;;  %v4973_v27 = vsel %vm9624_vm10, %v4972_v1, %v4968_v34  ;;  %v4603_v2 = vsel %vm4444_vm15, %v4602_v4, %v4598_v18  ;;  %v4681_v48 = vrot.slane %v10554_v24, %v8810_v9  ;;  %4126 = vperm.xlu1 %5856, %v8738_v26   ;;  %v3950_v22 = vpop.permute.xlu0 %3949  ;;  %v10555_v62 = vld [vmem:[#allocation48_spill] sm:$0xff]  ;;  %v10566_v24 = vld [vmem:[#allocation397_spill] sm:$0xff] }
 0x5aa   : > { %v4756_v23 = vsel %vm4437_vm14, %v4755_v39, %v4751_v38  ;;  %v4977_v15 = vrot.slane %v3938_v47, %v8552_v13  ;;  %v3941_v29 = vpop.permute.xlu1 %3940  ;;  %v4760_v17 = vrot.slane %v10555_v62, %v8810_v9  ;;  %v4835_v31 = vsel %vm4437_vm14, %v4834_v57, %v10556_v63  ;;  %v10557_v47 = vld [vmem:[#allocation281_spill] sm:$0xff]  ;;  %v10562_v57 = vld [vmem:[#allocation171_spill] sm:$0xff] }
 0x5ab   : > { %v4909_v50 = vsel %vm4430_vm13, %v4908_v40, %v4904_v49  ;;  %v4982_v4 = vrot.slane %v3941_v29, %v8558_v52  ;;  %4135 = vperm.xlu0 %5855, %v8839_v7   ;;  %v4682_v18 = vsel %vm4444_vm15, %v4681_v48, %v4677_v14  ;;  %v4839_v26 = vrot.slane %v10557_v47, %v8810_v9  ;;  %v10564_v14 = vld [vmem:[#allocation55_spill] sm:$0xff] }
 0x5ac   : > { %v4914_v33 = vsel %vm4437_vm14, %v4913_v30, %v4909_v50  ;;  %v4978_v44 = vsel %vm4416_vm11, %v4977_v15, %v4973_v27  ;;  %v5632_v42 = vsel %vm9626_vm0, %v10558_v51, %v8878_v16  ;;  %v4761_v36 = vsel %vm4444_vm15, %v4760_v17, %v4756_v23  ;;  %v10567_v23 = vld [vmem:[#allocation173_spill] sm:$0xff]  ;;  %v10568_v15 = vld [vmem:[#allocation402_spill] sm:$0xff]  ;;  %v10570_v63 = vld [vmem:[#allocation399_spill] sm:$0xff] }
 0x5ad   : > { %v4918_v7 = vrot.slane %v10559_v25, %v8810_v9  ;;  %v4983_v3 = vsel %vm4423_vm12, %v4982_v4, %v4978_v44  ;;  %v5634_v59 = vsel %vm9625_vm5, %v4603_v2, %v5632_v42  ;;  %vm9629_vm10 = vcmask 1045509   ;;  %4132 = vperm.xlu1 %5856, %v10560_v35   ;;  %v9088_v39 = vpop.permute.xlu0 %3955  ;;  %v10565_v2 = vld [vmem:[#allocation172_spill] sm:$0xff]  ;;  %v10569_v17 = vld [vmem:[#allocation174_spill] sm:$0xff]  ;;  %v10571_v50 = vld [vmem:[#allocation175_spill] sm:$0xff] }
 0x5ae   : > { %v4840_v11 = vsel %vm4444_vm15, %v4839_v26, %v4835_v31  ;;  %v4987_v54 = vrot.slane %v3944_v58, %v10493_v55  ;;  %v3947_v56 = vpop.permute.xlu1 %3946  ;;  %v5636_v16 = vsel %vm5635_vm6, %v4682_v18, %v5634_v59  ;;  %vm9628_vm5 = vcmask 1046534   ;;  %v10572_v4 = vld [vmem:[#allocation404_spill] sm:$0xff]  ;;  %v10574_v44 = vld [vmem:[#allocation401_spill] sm:$0xff]  ;;  %v10577_v59 = vld [vmem:[#allocation178_spill] sm:$0xff] }
 0x5af   : > { %v4919_v21 = vsel %vm4444_vm15, %v4918_v7, %v4914_v33  ;;  %v4992_v45 = vrot.slane %v3947_v56, %v8780_v46  ;;  %4141 = vperm.xlu0 %5855, %v10561_v32   ;;  %v5638_v0 = vsel %vm9630_vm4, %v4761_v36, %v5636_v16  ;;  %v4997_v58 = vrot.slane %v3950_v22, %v8810_v9  ;;  %v10573_v33 = vld [vmem:[#allocation176_spill] sm:$0xff]  ;;  %v10575_v42 = vld [vmem:[#allocation177_spill] sm:$0xff]  ;;  %v10576_v36 = vld [vmem:[#allocation406_spill] sm:$0xff] }
 0x5b0   : > { %v4988_v28 = vsel %vm4430_vm13, %v4987_v54, %v4983_v3  ;;  %vm9627_vm0 = vcmask 1047559   ;;  %v3248_v1 = vadd.f32 %v10563_v53, %v10562_v57  ;;  %v5640_v12 = vsel %vm9629_vm10, %v4840_v11, %v5638_v0  ;;  %v10578_v11 = vld [vmem:[#allocation403_spill] sm:$0xff]  ;;  %v10580_v35 = vld [vmem:[#allocation408_spill] sm:$0xff]  ;;  %v10582_v0 = vld [vmem:[#allocation405_spill] sm:$0xff] }
 0x5b1   : > { %v4993_v49 = vsel %vm4437_vm14, %v4992_v45, %v4988_v28  ;;  %4138 = vperm.xlu1 %5856, %v10564_v14   ;;  %v9107_v38 = vpop.permute.xlu0 %3961  ;;  %v5642_v40 = vsel %vm9628_vm5, %v4919_v21, %v5640_v12  ;;  %v3247_v48 = vadd.f32 %v10566_v24, %v10565_v2  ;;  %v3250_v29 = vadd.f32 %v10568_v15, %v10567_v23  ;;  %v10579_v56 = vld [vmem:[#allocation179_spill] sm:$0xff]  ;;  %v10581_v32 = vld [vmem:[#allocation180_spill] sm:$0xff]  ;;  %v10583_v28 = vld [vmem:[#allocation181_spill] sm:$0xff] }
 0x5b2   : > { %v4998_v30 = vsel %vm4444_vm15, %v4997_v58, %v4993_v49  ;;  %v9104_v34 = vpop.permute.xlu1 %3952  ;;  %v3249_v31 = vadd.f32 %v10570_v63, %v10569_v17  ;;  %v3252_v18 = vadd.f32 %v10572_v4, %v10571_v50  ;;  %v3251_v51 = vadd.f32 %v10574_v44, %v10573_v33  ;;  %v10584_v57 = vld [vmem:[#allocation410_spill] sm:$0xff]  ;;  %v10589_v23 = vld [vmem:[#allocation184_spill] sm:$0xff]  ;;  %v10590_v15 = vld [vmem:[#allocation409_spill] sm:$0xff] }
 0x5b3   : > { %4147 = vperm.xlu0 %5855, %v3248_v1   ;;  %v5644_v27 = vsel %vm9627_vm0, %v4998_v30, %v5642_v40  ;;  %v3254_v25 = vadd.f32 %v10576_v36, %v10575_v42  ;;  %v3253_v54 = vadd.f32 %v10578_v11, %v10577_v59  ;;  %v3256_v16 = vadd.f32 %v10580_v35, %v10579_v56  ;;  %v10585_v49 = vld [vmem:[#allocation182_spill] sm:$0xff]  ;;  %v10586_v30 = vld [vmem:[#allocation407_spill] sm:$0xff]  ;;  %v10591_v17 = vld [vmem:[#allocation185_spill] sm:$0xff] }
 0x5b4   : > { %5654 = vst [vmem:[%s9113_s21] sm:$0xff] %v5644_v27  ;;  %v3255_v58 = vadd.f32 %v10582_v0, %v10581_v32  ;;  %v3258_v53 = vadd.f32 %v10584_v57, %v10583_v28  ;;  %v3257_v14 = vadd.f32 %v10586_v30, %v10585_v49  ;;  %v10587_v40 = vld [vmem:[#allocation183_spill] sm:$0xff]  ;;  %v10588_v27 = vld [vmem:[#allocation412_spill] sm:$0xff]  ;;  %v10592_v63 = vld [vmem:[#allocation414_spill] sm:$0xff]  ;;  %vm10609_vm0 = vcmask 326912  }
 0x5b5   : > { %4144 = vperm.xlu1 %5856, %v3247_v48   ;;  %v9120_v62 = vpop.permute.xlu0 %3967  ;;  %v3260_v2 = vadd.f32 %v10588_v27, %v10587_v40  ;;  %v10594_v33 = vld [vmem:[#allocation411_spill] sm:$0xff]  ;;  %v10596_v42 = vld [vmem:[#allocation416_spill] sm:$0xff]  ;;  %v10600_v32 = vld [vmem:[#allocation418_spill] sm:$0xff]  ;;  %vm10612_vm5 = vcmask 392512   ;;  %vm10615_vm10 = vcmask 458112  }
 0x5b6   : > { %v9118_v22 = vpop.permute.xlu1 %3958  ;;  %v10597_v11 = vld [vmem:[#allocation188_spill] sm:$0xff]  ;;  %v10601_v49 = vld [vmem:[#allocation190_spill] sm:$0xff]  ;;  %v10602_v30 = vld [vmem:[#allocation415_spill] sm:$0xff] }
 0x5b7   : > { %4153 = vperm.xlu0 %5855, %v3250_v29   ;;  %v3259_v29 = vadd.f32 %v10590_v15, %v10589_v23  ;;  %v10603_v27 = vld [vmem:[#allocation191_spill] sm:$0xff] }
 0x5b9   : > { %4150 = vperm.xlu1 %5856, %v3249_v31   ;;  %v9128_v26 = vpop.permute.xlu0 %3973  ;;  %v3262_v31 = vadd.f32 %v10592_v63, %v10591_v17 }
 0x5ba   : > { %v9126_v47 = vpop.permute.xlu1 %3964 }
 0x5bb   : > { %4159 = vperm.xlu0 %5855, %v3252_v18   ;;  %v10593_v18 = vld [vmem:[#allocation186_spill] sm:$0xff] }
 0x5bc   : > { %v3261_v44 = vadd.f32 %v10594_v33, %v10593_v18  ;;  %v10606_v18 = vld [vmem:[#allocation417_spill] sm:$0xff] }
 0x5bd   : > { %4156 = vperm.xlu1 %5856, %v3251_v51   ;;  %v9136_v3 = vpop.permute.xlu0 %3979  ;;  %v10595_v51 = vld [vmem:[#allocation187_spill] sm:$0xff] }
 0x5be   : > { %v9134_v7 = vpop.permute.xlu1 %3970  ;;  %v3264_v36 = vadd.f32 %v10596_v42, %v10595_v51  ;;  %v10607_v51 = vld [vmem:[#allocation193_spill] sm:$0xff]  ;;  %v10608_v42 = vld [vmem:[#allocation422_spill] sm:$0xff] }
 0x5bf   : > { %4165 = vperm.xlu0 %5855, %v3254_v25  }
 0x5c1   : > { %4162 = vperm.xlu1 %5856, %v3253_v54   ;;  %v9144_v45 = vpop.permute.xlu0 %3985  ;;  %v10598_v54 = vld [vmem:[#allocation413_spill] sm:$0xff] }
 0x5c2   : > { %v9142_v21 = vpop.permute.xlu1 %3976  ;;  %v3263_v56 = vadd.f32 %v10598_v54, %v10597_v11 }
 0x5c3   : > { %4171 = vperm.xlu0 %5855, %v3256_v16   ;;  %v10599_v16 = vld [vmem:[#allocation189_spill] sm:$0xff] }
 0x5c4   : > { %v3266_v0 = vadd.f32 %v10600_v32, %v10599_v16  ;;  %v10611_v16 = vld [vmem:[#allocation419_spill] sm:$0xff] }
 0x5c5   : > { %4168 = vperm.xlu1 %5856, %v3255_v58   ;;  %v9152_v12 = vpop.permute.xlu0 %3991 }
 0x5c6   : > { %v9150_v1 = vpop.permute.xlu1 %3982 }
 0x5c7   : > { %4177 = vperm.xlu0 %5855, %v3258_v53  }
 0x5c9   : > { %4174 = vperm.xlu1 %5856, %v3257_v14   ;;  %v9160_v48 = vpop.permute.xlu0 %3997  ;;  %v3265_v14 = vadd.f32 %v10602_v30, %v10601_v49 }
 0x5ca   : > { %v9158_v24 = vpop.permute.xlu1 %3988 }
 0x5cb   : > { %4183 = vperm.xlu0 %5855, %v3260_v2   ;;  %v10604_v2 = vld [vmem:[#allocation420_spill] sm:$0xff] }
 0x5cc   : > { %v3268_v23 = vadd.f32 %v10604_v2, %v10603_v27  ;;  %v10616_v27 = vld [vmem:[#allocation196_spill] sm:$0xff]  ;;  %v10617_v2 = vld [vmem:[#allocation421_spill] sm:$0xff] }
 0x5cd   : > { %4180 = vperm.xlu1 %5856, %v3259_v29   ;;  %v4004_v4 = vpop.permute.xlu0 %4003 }
 0x5ce   : > { %v9166_v50 = vpop.permute.xlu1 %3994  ;;  %v5085_v58 = vrot.slane %v4004_v4, %v8472_v37  ;;  %v10605_v4 = vld [vmem:[#allocation192_spill] sm:$0xff] }
 0x5cf   : > { %4189 = vperm.xlu0 %5855, %v3262_v31   ;;  %v3267_v33 = vadd.f32 %v10606_v18, %v10605_v4 }
 0x5d1   : > { %4186 = vperm.xlu1 %5856, %v3261_v44   ;;  %v4010_v59 = vpop.permute.xlu0 %4009 }
 0x5d2   : > { %v4001_v25 = vpop.permute.xlu1 %4000  ;;  %v5095_v29 = vrot.slane %v4010_v59, %v8487_v43 }
 0x5d3   : > { %4195 = vperm.xlu0 %5855, %v3264_v36   ;;  %v5081_v35 = vrot.slane %v4001_v25, %v8467_v6  ;;  %v3270_v36 = vadd.f32 %v10608_v42, %v10607_v51  ;;  %v10620_v51 = vld [vmem:[#allocation198_spill] sm:$0xff]  ;;  %v10621_v42 = vld [vmem:[#allocation423_spill] sm:$0xff] }
 0x5d5   : > { %4192 = vperm.xlu1 %5856, %v3263_v56   ;;  %v4016_v57 = vpop.permute.xlu0 %4015  ;;  %v5086_v40 = vsel %vm4346_vm1, %v5085_v58, %v5081_v35  ;;  %v10610_v35 = vld [vmem:[#allocation194_spill] sm:$0xff]  ;;  %v10613_v58 = vld [vmem:[#allocation195_spill] sm:$0xff] }
 0x5d6   : > { %v4007_v28 = vpop.permute.xlu1 %4006  ;;  %v5105_v11 = vrot.slane %v4016_v57, %v8503_v8  ;;  %v3269_v32 = vadd.f32 %v10611_v16, %v10610_v35 }
 0x5d7   : > { %v5090_v53 = vrot.slane %v4007_v28, %v8479_v41  ;;  %4201 = vperm.xlu0 %5855, %v3266_v0   ;;  %v10614_v28 = vld [vmem:[#allocation424_spill] sm:$0xff] }
 0x5d9   : > { %v5091_v15 = vsel %vm4353_vm2, %v5090_v53, %v5086_v40  ;;  %4198 = vperm.xlu1 %5856, %v3265_v14   ;;  %v4022_v63 = vpop.permute.xlu0 %4021  ;;  %v3272_v53 = vadd.f32 %v10614_v28, %v10613_v58  ;;  %v10625_v58 = vld [vmem:[#allocation200_spill] sm:$0xff]  ;;  %v10626_v28 = vld [vmem:[#allocation425_spill] sm:$0xff] }
 0x5da   : > { %v4013_v17 = vpop.permute.xlu1 %4012  ;;  %v5096_v44 = vsel %vm4360_vm3, %v5095_v29, %v5091_v15  ;;  %v5115_v30 = vrot.slane %v4022_v63, %v8519_v19  ;;  %v10618_v29 = vld [vmem:[#allocation197_spill] sm:$0xff] }
 0x5db   : > { %v5100_v31 = vrot.slane %v4013_v17, %v8494_v60  ;;  %4207 = vperm.xlu0 %5855, %v3268_v23   ;;  %v3271_v23 = vadd.f32 %v10617_v2, %v10616_v27  ;;  %v10619_v17 = vld [vmem:[#allocation5_spill] sm:$0xff] }
 0x5dd   : > { %v5101_v25 = vsel %vm10609_vm0, %v5100_v31, %v5096_v44  ;;  %4204 = vperm.xlu1 %5856, %v3267_v33   ;;  %v4028_v59 = vpop.permute.xlu0 %4027  ;;  %v3274_v31 = vadd.f32 %v10619_v17, %v10618_v29  ;;  %v10629_v29 = vld [vmem:[#allocation202_spill] sm:$0xff]  ;;  %v10630_v17 = vld [vmem:[#allocation237_spill] sm:$0xff] }
 0x5de   : > { %v4019_v54 = vpop.permute.xlu1 %4018  ;;  %v5106_v0 = vsel %vm10612_vm5, %v5105_v11, %v5101_v25  ;;  %v5125_v18 = vrot.slane %v4028_v59, %v8535_v5  ;;  %v10622_v11 = vld [vmem:[#allocation199_spill] sm:$0xff]  ;;  %vm10624_vm5 = vcmask 720512  }
 0x5df   : > { %v5110_v56 = vrot.slane %v4019_v54, %v8510_v10  ;;  %4213 = vperm.xlu0 %5855, %v3270_v36   ;;  %v3273_v36 = vadd.f32 %v10621_v42, %v10620_v51  ;;  %v10623_v54 = vld [vmem:[#allocation6_spill] sm:$0xff]  ;;  %v5002_v42 = vrot.slane %v9104_v34, %v8467_v6  ;;  %v10633_v34 = vld [vmem:[#allocation204_spill] sm:$0xff] }
 0x5e1   : > { %v5111_v49 = vsel %vm10615_vm10, %v5110_v56, %v5106_v0  ;;  %4210 = vperm.xlu1 %5856, %v3269_v32   ;;  %v4034_v57 = vpop.permute.xlu0 %4033  ;;  %v3276_v56 = vadd.f32 %v10623_v54, %v10622_v11  ;;  %vm10641_vm10 = vmmov %vm10609_vm0  ;;  %vm10646_vm0 = vcmask 392512  }
 0x5e2   : > { %v4025_v14 = vpop.permute.xlu1 %4024  ;;  %v5116_v15 = vsel %vm4388_vm7, %v5115_v30, %v5111_v49  ;;  %v5135_v16 = vrot.slane %v4034_v57, %v8552_v13  ;;  %v10627_v30 = vld [vmem:[#allocation201_spill] sm:$0xff]  ;;  %vm10649_vm4 = vmmov %vm10646_vm0 }
 0x5e3   : > { %v5120_v40 = vrot.slane %v4025_v14, %v8526_v20  ;;  %4219 = vperm.xlu0 %5855, %v3272_v53   ;;  %v3275_v53 = vadd.f32 %v10626_v28, %v10625_v58  ;;  %v10628_v14 = vld [vmem:[#allocation7_spill] sm:$0xff]  ;;  %v10636_v58 = vld [vmem:[#allocation9_spill] sm:$0xff] }
 0x5e5   : > { %v5121_v4 = vsel %vm4395_vm8, %v5120_v40, %v5116_v15  ;;  %4216 = vperm.xlu1 %5856, %v3271_v23   ;;  %v4040_v63 = vpop.permute.xlu0 %4039  ;;  %v3278_v40 = vadd.f32 %v10628_v14, %v10627_v30 }
 0x5e6   : > { %v4031_v33 = vpop.permute.xlu1 %4030  ;;  %v5126_v25 = vsel %vm4402_vm9, %v5125_v18, %v5121_v4  ;;  %v5145_v2 = vrot.slane %v4040_v63, %v10493_v55 }
 0x5e7   : > { %v5130_v44 = vrot.slane %v4031_v33, %v8542_v61  ;;  %4225 = vperm.xlu0 %5855, %v3274_v31   ;;  %v3277_v31 = vadd.f32 %v10630_v17, %v10629_v29  ;;  %v10631_v33 = vld [vmem:[#allocation203_spill] sm:$0xff]  ;;  %v10640_v17 = vld [vmem:[#allocation10_spill] sm:$0xff] }
 0x5e8   : > { %v10639_v29 = vld [vmem:[#allocation207_spill] sm:$0xff] }
 0x5e9   : > { %v5131_v35 = vsel %vm10624_vm5, %v5130_v44, %v5126_v25  ;;  %4222 = vperm.xlu1 %5856, %v3273_v36   ;;  %v4046_v59 = vpop.permute.xlu0 %4045  ;;  %v10632_v44 = vld [vmem:[#allocation8_spill] sm:$0xff]  ;;  %v5011_v36 = vrot.slane %v9118_v22, %v8479_v41  ;;  %vm10647_vm5 = vmmov %vm10641_vm10 }
 0x5ea   : > { %v4037_v32 = vpop.permute.xlu1 %4036  ;;  %v5136_v49 = vsel %vm4416_vm11, %v5135_v16, %v5131_v35  ;;  %v5155_v4 = vrot.slane %v4046_v59, %v8810_v9  ;;  %v3280_v51 = vadd.f32 %v10632_v44, %v10631_v33 }
 0x5eb   : > { %v5140_v0 = vrot.slane %v4037_v32, %v8558_v52  ;;  %4231 = vperm.xlu0 %5855, %v3276_v56   ;;  %v5006_v56 = vrot.slane %v9088_v39, %v8472_v37  ;;  %v10634_v32 = vld [vmem:[#allocation235_spill] sm:$0xff]  ;;  %v5021_v39 = vrot.slane %v9126_v47, %v8494_v60 }
 0x5ec   : > { %v3279_v59 = vadd.f32 %v10634_v32, %v10633_v34 }
 0x5ed   : > { %v5141_v27 = vsel %vm4423_vm12, %v5140_v0, %v5136_v49  ;;  %4228 = vperm.xlu1 %5856, %v3275_v53   ;;  %v4052_v57 = vpop.permute.xlu0 %4051  ;;  %v10635_v0 = vld [vmem:[#allocation205_spill] sm:$0xff]  ;;  %v5007_v28 = vsel %vm4346_vm1, %v5006_v56, %v5002_v42  ;;  %v5026_v42 = vrot.slane %v9120_v62, %v8503_v8  ;;  %v5041_v62 = vrot.slane %v9142_v21, %v8526_v20 }
 0x5ee   : > { %v4043_v23 = vpop.permute.xlu1 %4042  ;;  %v5146_v18 = vsel %vm4430_vm13, %v5145_v2, %v5141_v27  ;;  %v5164_v35 = vrot.slane %v4052_v57, %v8472_v37  ;;  %v3282_v22 = vadd.f32 %v10636_v58, %v10635_v0  ;;  %v5012_v49 = vsel %vm4353_vm2, %v5011_v36, %v5007_v28  ;;  %v10637_v2 = vld [vmem:[#allocation206_spill] sm:$0xff]  ;;  %v10642_v36 = vld [vmem:[#allocation208_spill] sm:$0xff] }
 0x5ef   : > { %v5150_v15 = vrot.slane %v4043_v23, %v8780_v46  ;;  %4237 = vperm.xlu0 %5855, %v3278_v40   ;;  %v5016_v40 = vrot.slane %v9107_v38, %v8487_v43  ;;  %v10638_v23 = vld [vmem:[#allocation239_spill] sm:$0xff]  ;;  %v5031_v38 = vrot.slane %v9134_v7, %v8510_v10  ;;  %v5036_v28 = vrot.slane %v9128_v26, %v8519_v19 }
 0x5f0   : > { %v3281_v57 = vadd.f32 %v10638_v23, %v10637_v2  ;;  %v5051_v26 = vrot.slane %v9150_v1, %v8542_v61 }
 0x5f1   : > { %v5151_v63 = vsel %vm4437_vm14, %v5150_v15, %v5146_v18  ;;  %4234 = vperm.xlu1 %5856, %v3277_v31   ;;  %v4058_v54 = vpop.permute.xlu0 %4057  ;;  %v3284_v31 = vadd.f32 %v10640_v17, %v10639_v29 }
 0x5f2   : > { %v9239_v25 = vsel %vm4444_vm15, %v5155_v4, %v5151_v63  ;;  %v4049_v11 = vpop.permute.xlu1 %4048  ;;  %v5174_v15 = vrot.slane %v4058_v54, %v8487_v43  ;;  %v5017_v4 = vsel %vm4360_vm3, %v5016_v40, %v5012_v49  ;;  %v10650_v49 = vld [vmem:[#allocation210_spill] sm:$0xff]  ;;  %v10652_v40 = vld [vmem:[#allocation211_spill] sm:$0xff] }
 0x5f3   : > { %v5160_v16 = vrot.slane %v4049_v11, %v8467_v6  ;;  %4243 = vperm.xlu0 %5855, %v3280_v51   ;;  %v5022_v18 = vsel %vm10641_vm10, %v5021_v39, %v5017_v4  ;;  %v10643_v11 = vld [vmem:[#allocation236_spill] sm:$0xff]  ;;  %vm10648_vm10 = vcmask 458112   ;;  %v10651_v39 = vld [vmem:[#allocation241_spill] sm:$0xff] }
 0x5f4   : > { %v3283_v54 = vadd.f32 %v10643_v11, %v10642_v36  ;;  %v5027_v7 = vsel %vm10646_vm0, %v5026_v42, %v5022_v18  ;;  %vm10654_vm0 = vmmov %vm10648_vm10  ;;  %v10656_v18 = vld [vmem:[#allocation238_spill] sm:$0xff] }
 0x5f5   : > { %v5165_v53 = vsel %vm4346_vm1, %v5164_v35, %v5160_v16  ;;  %4240 = vperm.xlu1 %5856, %v3279_v59   ;;  %v10644_v35 = vld [vmem:[#allocation209_spill] sm:$0xff]  ;;  %v10645_v16 = vld [vmem:[#allocation11_spill] sm:$0xff]  ;;  %v5032_v59 = vsel %vm10648_vm10, %v5031_v38, %v5027_v7  ;;  %vm10673_vm10 = vcmask 1041409  }
 0x5f6   : > { %v4055_v30 = vpop.permute.xlu1 %4054  ;;  %v4064_v14 = vpop.permute.xlu0 %4063  ;;  %v3286_v34 = vadd.f32 %v10645_v16, %v10644_v35  ;;  %v5037_v21 = vsel %vm4388_vm7, %v5036_v28, %v5032_v59  ;;  %v5056_v35 = vrot.slane %v9144_v45, %v8552_v13  ;;  %v10661_v7 = vld [vmem:[#allocation243_spill] sm:$0xff]  ;;  %v5071_v45 = vrot.slane %v9166_v50, %v8780_v46 }
 0x5f7   : > { %v5169_v27 = vrot.slane %v4055_v30, %v8479_v41  ;;  %4249 = vperm.xlu0 %5855, %v3282_v22   ;;  %v5184_v56 = vrot.slane %v4064_v14, %v8503_v8  ;;  %v3285_v30 = vadd.f32 %v10651_v39, %v10650_v49 }
 0x5f9   : > { %v5170_v47 = vsel %vm4353_vm2, %v5169_v27, %v5165_v53  ;;  %4246 = vperm.xlu1 %5856, %v3281_v57   ;;  %v10653_v27 = vld [vmem:[#allocation12_spill] sm:$0xff]  ;;  %v5042_v57 = vsel %vm4395_vm8, %v5041_v62, %v5037_v21  ;;  %v10662_v62 = vld [vmem:[#allocation219_spill] sm:$0xff] }
 0x5fa   : > { %v4061_v33 = vpop.permute.xlu1 %4060  ;;  %v5175_v44 = vsel %vm4360_vm3, %v5174_v15, %v5170_v47  ;;  %v4070_v51 = vpop.permute.xlu0 %4069  ;;  %v3288_v2 = vadd.f32 %v10653_v27, %v10652_v40  ;;  %v10655_v47 = vld [vmem:[#allocation212_spill] sm:$0xff]  ;;  %v10666_v27 = vld [vmem:[#allocation242_spill] sm:$0xff] }
 0x5fb   : > { %v5179_v63 = vrot.slane %v4061_v33, %v8494_v60  ;;  %4255 = vperm.xlu0 %5855, %v3284_v31   ;;  %v5194_v14 = vrot.slane %v4070_v51, %v8519_v19  ;;  %v5046_v31 = vrot.slane %v9136_v3, %v8535_v5  ;;  %v3287_v38 = vadd.f32 %v10656_v18, %v10655_v47  ;;  %v10658_v51 = vld [vmem:[#allocation13_spill] sm:$0xff]  ;;  %v10665_v40 = vld [vmem:[#allocation220_spill] sm:$0xff]  ;;  %v10669_v18 = vld [vmem:[#allocation222_spill] sm:$0xff] }
 0x5fc   : > { %v5061_v3 = vrot.slane %v9158_v24, %v8558_v52 }
 0x5fd   : > { %v5180_v32 = vsel %vm10647_vm5, %v5179_v63, %v5175_v44  ;;  %4252 = vperm.xlu1 %5856, %v3283_v54   ;;  %v10657_v44 = vld [vmem:[#allocation213_spill] sm:$0xff]  ;;  %v5047_v1 = vsel %vm4402_vm9, %v5046_v31, %v5042_v57 }
 0x5fe   : > { %v4067_v0 = vpop.permute.xlu1 %4066  ;;  %v5185_v58 = vsel %vm10649_vm4, %v5184_v56, %v5180_v32  ;;  %v4076_v22 = vpop.permute.xlu0 %4075  ;;  %v3290_v42 = vadd.f32 %v10658_v51, %v10657_v44  ;;  %vm10659_vm4 = vcmask 720512   ;;  %v10668_v57 = vld [vmem:[#allocation17_spill] sm:$0xff]  ;;  %v10671_v51 = vld [vmem:[#allocation223_spill] sm:$0xff] }
 0x5ff   : > { %v5189_v53 = vrot.slane %v4067_v0, %v8510_v10  ;;  %4261 = vperm.xlu0 %5855, %v3286_v34   ;;  %v5204_v33 = vrot.slane %v4076_v22, %v8535_v5  ;;  %v5052_v36 = vsel %vm10659_vm4, %v5051_v26, %v5047_v1  ;;  %v10660_v34 = vld [vmem:[#allocation214_spill] sm:$0xff]  ;;  %v10663_v0 = vld [vmem:[#allocation16_spill] sm:$0xff]  ;;  %vm10664_vm5 = vmmov %vm10659_vm4  ;;  %vm10687_vm4 = vcmask 326912  }
 0x600   : > { %v3289_v32 = vadd.f32 %v10661_v7, %v10660_v34  ;;  %v5057_v24 = vsel %vm4416_vm11, %v5056_v35, %v5052_v36  ;;  %v10675_v34 = vld [vmem:[#allocation224_spill] sm:$0xff] }
 0x601   : > { %v5190_v23 = vsel %vm10654_vm0, %v5189_v53, %v5185_v58  ;;  %4258 = vperm.xlu1 %5856, %v3285_v30   ;;  %v3296_v58 = vadd.f32 %v10663_v0, %v10662_v62  ;;  %v5062_v28 = vsel %vm4423_vm12, %v5061_v3, %v5057_v24  ;;  %v5066_v30 = vrot.slane %v9152_v12, %v10493_v55  ;;  %v10676_v7 = vld [vmem:[#allocation244_spill] sm:$0xff]  ;;  %v10678_v62 = vld [vmem:[#allocation19_spill] sm:$0xff] }
 0x602   : > { %v4073_v15 = vpop.permute.xlu1 %4072  ;;  %v5195_v29 = vsel %vm4388_vm7, %v5194_v14, %v5190_v23  ;;  %v4082_v17 = vpop.permute.xlu0 %4081  ;;  %v10667_v23 = vld [vmem:[#allocation221_spill] sm:$0xff]  ;;  %vm10674_vm0 = vcmask 1042434  }
 0x603   : > { %v5199_v4 = vrot.slane %v4073_v15, %v8526_v20  ;;  %4267 = vperm.xlu0 %5855, %v3288_v2   ;;  %v5214_v59 = vrot.slane %v4082_v17, %v8552_v13  ;;  %v3295_v2 = vadd.f32 %v10666_v27, %v10665_v40  ;;  %v3298_v26 = vadd.f32 %v10668_v57, %v10667_v23  ;;  %v10683_v57 = vld [vmem:[#allocation228_spill] sm:$0xff] }
 0x604   : > { %v5067_v50 = vsel %vm4430_vm13, %v5066_v30, %v5062_v28  ;;  %v10679_v28 = vld [vmem:[#allocation226_spill] sm:$0xff]  ;;  %v10682_v30 = vld [vmem:[#allocation20_spill] sm:$0xff] }
 0x605   : > { %v5200_v63 = vsel %vm4395_vm8, %v5199_v4, %v5195_v29  ;;  %4264 = vperm.xlu1 %5856, %v3287_v38   ;;  %v5072_v29 = vsel %vm4437_vm14, %v5071_v45, %v5067_v50  ;;  %v5076_v4 = vrot.slane %v9160_v48, %v8810_v9  ;;  %v10670_v38 = vld [vmem:[#allocation247_spill] sm:$0xff]  ;;  %v10680_v45 = vld [vmem:[#allocation249_spill] sm:$0xff] }
 0x606   : > { %v4079_v11 = vpop.permute.xlu1 %4078  ;;  %v5205_v54 = vsel %vm4402_vm9, %v5204_v33, %v5200_v63  ;;  %v4088_v56 = vpop.permute.xlu0 %4087  ;;  %v3297_v33 = vadd.f32 %v10670_v38, %v10669_v18 }
 0x607   : > { %v5209_v16 = vrot.slane %v4079_v11, %v8542_v61  ;;  %4273 = vperm.xlu0 %5855, %v3290_v42   ;;  %v5224_v21 = vrot.slane %v4088_v56, %v10493_v55  ;;  %v10672_v42 = vld [vmem:[#allocation18_spill] sm:$0xff]  ;;  %v5077_v63 = vsel %vm4444_vm15, %v5076_v4, %v5072_v29  ;;  %v10685_v29 = vld [vmem:[#allocation216_spill] sm:$0xff] }
 0x608   : > { %v3300_v1 = vadd.f32 %v10672_v42, %v10671_v51  ;;  %v5645_v3 = vsel %vm10673_vm10, %v9239_v25, %v5077_v63  ;;  %v10692_v63 = vld [vmem:[#allocation14_spill] sm:$0xff]  ;;  %vm10693_vm10 = vcmask 458112  }
 0x609   : > { %v5210_v22 = vsel %vm10664_vm5, %v5209_v16, %v5205_v54  ;;  %4270 = vperm.xlu1 %5856, %v3289_v32   ;;  %v3299_v32 = vadd.f32 %v10676_v7, %v10675_v34  ;;  %vm10688_vm5 = vcmask 392512   ;;  %v10695_v34 = vld [vmem:[#allocation21_spill] sm:$0xff] }
 0x60a   : > { %v4085_v53 = vpop.permute.xlu1 %4084  ;;  %v5215_v49 = vsel %vm4416_vm11, %v5214_v59, %v5210_v22  ;;  %v4094_v39 = vpop.permute.xlu0 %4093  ;;  %v10677_v59 = vld [vmem:[#allocation225_spill] sm:$0xff] }
 0x60b   : > { %v5219_v14 = vrot.slane %v4085_v53, %v8558_v52  ;;  %4291 = vperm.xlu0 %5855, %v3296_v58   ;;  %v5234_v44 = vrot.slane %v4094_v39, %v8810_v9  ;;  %v3302_v0 = vadd.f32 %v10678_v62, %v10677_v59  ;;  %v3301_v53 = vadd.f32 %v10680_v45, %v10679_v28  ;;  %v10681_v39 = vld [vmem:[#allocation227_spill] sm:$0xff]  ;;  %v10696_v59 = vld [vmem:[#allocation218_spill] sm:$0xff]  ;;  %v10697_v62 = vld [vmem:[#allocation245_spill] sm:$0xff] }
 0x60c   : > { %v10698_v45 = vld [vmem:[#allocation232_spill] sm:$0xff] }
 0x60d   : > { %v5220_v15 = vsel %vm4423_vm12, %v5219_v14, %v5215_v49  ;;  %4288 = vperm.xlu1 %5856, %v3295_v2   ;;  %v3304_v14 = vadd.f32 %v10682_v30, %v10681_v39  ;;  %v10700_v30 = vld [vmem:[#allocation217_spill] sm:$0xff] }
 0x60e   : > { %v4091_v17 = vpop.permute.xlu1 %4090  ;;  %v5225_v12 = vsel %vm4430_vm13, %v5224_v21, %v5220_v15  ;;  %v4100_v31 = vpop.permute.xlu0 %4099 }
 0x60f   : > { %v5229_v47 = vrot.slane %v4091_v17, %v8780_v46  ;;  %4297 = vperm.xlu0 %5855, %v3298_v26   ;;  %v5243_v35 = vrot.slane %v4100_v31, %v8472_v37  ;;  %v10684_v26 = vld [vmem:[#allocation246_spill] sm:$0xff]  ;;  %v10686_v17 = vld [vmem:[#allocation240_spill] sm:$0xff] }
 0x610   : > { %v3303_v50 = vadd.f32 %v10684_v26, %v10683_v57  ;;  %v10703_v26 = vld [vmem:[#allocation231_spill] sm:$0xff] }
 0x611   : > { %v5230_v36 = vsel %vm4437_vm14, %v5229_v47, %v5225_v12  ;;  %4294 = vperm.xlu1 %5856, %v3297_v33   ;;  %v3291_v12 = vadd.f32 %v10686_v17, %v10685_v29  ;;  %v10689_v33 = vld [vmem:[#allocation230_spill] sm:$0xff]  ;;  %v10705_v17 = vld [vmem:[#allocation233_spill] sm:$0xff] }
 0x612   : > { %v5235_v48 = vsel %vm4444_vm15, %v5234_v44, %v5230_v36  ;;  %v4097_v11 = vpop.permute.xlu1 %4096  ;;  %v4106_v54 = vpop.permute.xlu0 %4105  ;;  %v10690_v44 = vld [vmem:[#allocation251_spill] sm:$0xff] }
 0x613   : > { %v9350_v56 = vsel %vm10674_vm0, %v5235_v48, %v5645_v3  ;;  %v5239_v16 = vrot.slane %v4097_v11, %v8467_v6  ;;  %4303 = vperm.xlu0 %5855, %v3300_v1   ;;  %v5253_v49 = vrot.slane %v4106_v54, %v8487_v43  ;;  %v3305_v51 = vadd.f32 %v10690_v44, %v10689_v33  ;;  %v10691_v1 = vld [vmem:[#allocation215_spill] sm:$0xff]  ;;  %v10707_v44 = vld [vmem:[#allocation234_spill] sm:$0xff] }
 0x614   : > { %v3292_v36 = vadd.f32 %v10692_v63, %v10691_v1  ;;  %vm10702_vm0 = vcmask 720512  }
 0x615   : > { %v5244_v25 = vsel %vm4346_vm1, %v5243_v35, %v5239_v16  ;;  %4300 = vperm.xlu1 %5856, %v3299_v32   ;;  %v10694_v16 = vld [vmem:[#allocation229_spill] sm:$0xff] }
 0x616   : > { %v4103_v58 = vpop.permute.xlu1 %4102  ;;  %v4112_v24 = vpop.permute.xlu0 %4111  ;;  %v3306_v7 = vadd.f32 %v10695_v34, %v10694_v16 }
 0x617   : > { %v5248_v22 = vrot.slane %v4103_v58, %v8479_v41  ;;  %4309 = vperm.xlu0 %5855, %v3302_v0   ;;  %v5263_v15 = vrot.slane %v4112_v24, %v8503_v8  ;;  %v3293_v0 = vadd.f32 %v10697_v62, %v10696_v59 }
 0x619   : > { %v5249_v40 = vsel %vm4353_vm2, %v5248_v22, %v5244_v25  ;;  %4306 = vperm.xlu1 %5856, %v3301_v53   ;;  %v10699_v53 = vld [vmem:[#allocation248_spill] sm:$0xff] }
 0x61a   : > { %v4109_v27 = vpop.permute.xlu1 %4108  ;;  %v5254_v2 = vsel %vm4360_vm3, %v5253_v49, %v5249_v40  ;;  %v4118_v21 = vpop.permute.xlu0 %4117  ;;  %v3307_v49 = vadd.f32 %v10699_v53, %v10698_v45 }
 0x61b   : > { %v5258_v23 = vrot.slane %v4109_v27, %v8494_v60  ;;  %4315 = vperm.xlu0 %5855, %v3304_v14   ;;  %v5273_v42 = vrot.slane %v4118_v21, %v8519_v19  ;;  %v10701_v14 = vld [vmem:[#allocation15_spill] sm:$0xff] }
 0x61c   : > { %v3294_v40 = vadd.f32 %v10701_v14, %v10700_v30 }
 0x61d   : > { %v5259_v31 = vsel %vm10687_vm4, %v5258_v23, %v5254_v2  ;;  %4312 = vperm.xlu1 %5856, %v3303_v50   ;;  %v10704_v50 = vld [vmem:[#allocation22_spill] sm:$0xff] }
 0x61e   : > { %v4115_v4 = vpop.permute.xlu1 %4114  ;;  %v5264_v47 = vsel %vm10688_vm5, %v5263_v15, %v5259_v31  ;;  %v4124_v18 = vpop.permute.xlu0 %4123  ;;  %v3308_v15 = vadd.f32 %v10704_v50, %v10703_v26 }
 0x61f   : > { %v5268_v38 = vrot.slane %v4115_v4, %v8510_v10  ;;  %4276 = vperm.xlu0 %5855, %v3291_v12   ;;  %v5283_v32 = vrot.slane %v4124_v18, %v8535_v5  ;;  %v10706_v12 = vld [vmem:[#allocation250_spill] sm:$0xff] }
 0x620   : > { %v3310_v31 = vadd.f32 %v10706_v12, %v10705_v17 }
 0x621   : > { %v5269_v3 = vsel %vm10693_vm10, %v5268_v38, %v5264_v47  ;;  %4318 = vperm.xlu1 %5856, %v3305_v51   ;;  %v10708_v51 = vld [vmem:[#allocation253_spill] sm:$0xff] }
 0x622   : > { %v4121_v48 = vpop.permute.xlu1 %4120  ;;  %v5274_v11 = vsel %vm4388_vm7, %v5273_v42, %v5269_v3  ;;  %v4130_v54 = vpop.permute.xlu0 %4129  ;;  %v3309_v42 = vadd.f32 %v10708_v51, %v10707_v44 }
 0x623   : > { %v5278_v35 = vrot.slane %v4121_v48, %v8526_v20  ;;  %4279 = vperm.xlu0 %5855, %v3292_v36   ;;  %v5293_v39 = vrot.slane %v4130_v54, %v8552_v13 }
 0x625   : > { %v5279_v25 = vsel %vm4395_vm8, %v5278_v35, %v5274_v11  ;;  %4321 = vperm.xlu1 %5856, %v3306_v7  }
 0x626   : > { %v4127_v58 = vpop.permute.xlu1 %4126  ;;  %v5284_v24 = vsel %vm4402_vm9, %v5283_v32, %v5279_v25  ;;  %v4136_v22 = vpop.permute.xlu0 %4135 }
 0x627   : > { %v5288_v28 = vrot.slane %v4127_v58, %v8542_v61  ;;  %4282 = vperm.xlu0 %5855, %v3293_v0   ;;  %v5303_v29 = vrot.slane %v4136_v22, %v10493_v55 }
 0x629   : > { %v5289_v27 = vsel %vm10702_vm0, %v5288_v28, %v5284_v24  ;;  %4324 = vperm.xlu1 %5856, %v3307_v49  }
 0x62a   : > { %v4133_v2 = vpop.permute.xlu1 %4132  ;;  %v5294_v21 = vsel %vm4416_vm11, %v5293_v39, %v5289_v27  ;;  %v4142_v23 = vpop.permute.xlu0 %4141 }
 0x62b   : > { %v5298_v57 = vrot.slane %v4133_v2, %v8558_v52  ;;  %4285 = vperm.xlu0 %5855, %v3294_v40   ;;  %v5313_v1 = vrot.slane %v4142_v23, %v8810_v9 }
 0x62d   : > { %v5299_v4 = vsel %vm4423_vm12, %v5298_v57, %v5294_v21  ;;  %4327 = vperm.xlu1 %5856, %v3308_v15  }
 0x62e   : > { %v4139_v47 = vpop.permute.xlu1 %4138  ;;  %v5304_v18 = vsel %vm4430_vm13, %v5303_v29, %v5299_v4  ;;  %v4148_v38 = vpop.permute.xlu0 %4147 }
 0x62f   : > { %v5308_v33 = vrot.slane %v4139_v47, %v8780_v46  ;;  %4333 = vperm.xlu0 %5855, %v3310_v31   ;;  %v5322_v54 = vrot.slane %v4148_v38, %v8472_v37 }
 0x631   : > { %v5309_v63 = vsel %vm4437_vm14, %v5308_v33, %v5304_v18  ;;  %4330 = vperm.xlu1 %5856, %v3309_v42  }
 0x632   : > { %v5314_v36 = vsel %vm4444_vm15, %v5313_v1, %v5309_v63  ;;  %v4145_v3 = vpop.permute.xlu1 %4144  ;;  %v4154_v48 = vpop.permute.xlu0 %4153 }
 0x633   : > { %v5647_v11 = vsel %vm5635_vm6, %v5314_v36, %v9350_v56  ;;  %v5318_v35 = vrot.slane %v4145_v3, %v8467_v6  ;;  %v5332_v59 = vrot.slane %v4154_v48, %v8487_v43  ;;  %vm10709_vm6 = vmmov %vm10687_vm4 }
 0x634   : > { %vm10710_vm4 = vmmov %vm10688_vm5 }
 0x635   : > { %v5323_v16 = vsel %vm4346_vm1, %v5322_v54, %v5318_v35  ;;  %vm10711_vm5 = vmmov %vm10693_vm10 }
 0x636   : > { %v4151_v34 = vpop.permute.xlu1 %4150  ;;  %v4160_v7 = vpop.permute.xlu0 %4159  ;;  %vm10712_vm10 = vmmov %vm10702_vm0  ;;  %vm10713_vm0 = vcmask 1044484  }
 0x637   : > { %v5327_v32 = vrot.slane %v4151_v34, %v8479_v41  ;;  %v5342_v24 = vrot.slane %v4160_v7, %v8503_v8 }
 0x639   : > { %v5328_v62 = vsel %vm4353_vm2, %v5327_v32, %v5323_v16 }
 0x63a   : > { %v4157_v0 = vpop.permute.xlu1 %4156  ;;  %v5333_v25 = vsel %vm4360_vm3, %v5332_v59, %v5328_v62  ;;  %v4166_v58 = vpop.permute.xlu0 %4165 }
 0x63b   : > { %v5337_v56 = vrot.slane %v4157_v0, %v8494_v60  ;;  %v5352_v39 = vrot.slane %v4166_v58, %v8519_v19 }
 0x63d   : > { %v5338_v22 = vsel %vm10709_vm6, %v5337_v56, %v5333_v25 }
 0x63e   : > { %v4163_v28 = vpop.permute.xlu1 %4162  ;;  %v5343_v45 = vsel %vm10710_vm4, %v5342_v24, %v5338_v22  ;;  %v4172_v53 = vpop.permute.xlu0 %4171 }
 0x63f   : > { %v5347_v49 = vrot.slane %v4163_v28, %v8510_v10  ;;  %v5362_v21 = vrot.slane %v4172_v53, %v8535_v5 }
 0x641   : > { %v5348_v30 = vsel %vm10711_vm5, %v5347_v49, %v5343_v45 }
 0x642   : > { %v4169_v14 = vpop.permute.xlu1 %4168  ;;  %v5353_v40 = vsel %vm4388_vm7, %v5352_v39, %v5348_v30  ;;  %v4178_v27 = vpop.permute.xlu0 %4177 }
 0x643   : > { %v5357_v2 = vrot.slane %v4169_v14, %v8526_v20  ;;  %v5372_v29 = vrot.slane %v4178_v27, %v8552_v13 }
 0x645   : > { %v5358_v23 = vsel %vm4395_vm8, %v5357_v2, %v5353_v40 }
 0x646   : > { %v4175_v57 = vpop.permute.xlu1 %4174  ;;  %v5363_v26 = vsel %vm4402_vm9, %v5362_v21, %v5358_v23  ;;  %v4184_v50 = vpop.permute.xlu0 %4183 }
 0x647   : > { %v5367_v15 = vrot.slane %v4175_v57, %v8542_v61  ;;  %v5382_v18 = vrot.slane %v4184_v50, %v10493_v55 }
 0x649   : > { %v5368_v17 = vsel %vm10712_vm10, %v5367_v15, %v5363_v26 }
 0x64a   : > { %v4181_v12 = vpop.permute.xlu1 %4180  ;;  %v5373_v31 = vsel %vm4416_vm11, %v5372_v29, %v5368_v17  ;;  %v4190_v4 = vpop.permute.xlu0 %4189 }
 0x64b   : > { %v5377_v47 = vrot.slane %v4181_v12, %v8558_v52  ;;  %v5392_v1 = vrot.slane %v4190_v4, %v8810_v9 }
 0x64d   : > { %v5378_v38 = vsel %vm4423_vm12, %v5377_v47, %v5373_v31 }
 0x64e   : > { %v4187_v33 = vpop.permute.xlu1 %4186  ;;  %v5383_v44 = vsel %vm4430_vm13, %v5382_v18, %v5378_v38  ;;  %v4196_v51 = vpop.permute.xlu0 %4195 }
 0x64f   : > { %v5387_v42 = vrot.slane %v4187_v33, %v8780_v46  ;;  %v5401_v35 = vrot.slane %v4196_v51, %v8472_v37 }
 0x651   : > { %v5388_v63 = vsel %vm4437_vm14, %v5387_v42, %v5383_v44 }
 0x652   : > { %v5393_v36 = vsel %vm4444_vm15, %v5392_v1, %v5388_v63  ;;  %v4193_v3 = vpop.permute.xlu1 %4192  ;;  %v4202_v48 = vpop.permute.xlu0 %4201 }
 0x653   : > { %v5648_v54 = vsel %vm10713_vm0, %v5393_v36, %v5647_v11  ;;  %v5397_v16 = vrot.slane %v4193_v3, %v8467_v6  ;;  %v5411_v62 = vrot.slane %v4202_v48, %v8487_v43  ;;  %vm10714_vm0 = vcmask 1045509  }
 0x655   : > { %v5402_v34 = vsel %vm4346_vm1, %v5401_v35, %v5397_v16 }
 0x656   : > { %v4199_v7 = vpop.permute.xlu1 %4198  ;;  %v4208_v32 = vpop.permute.xlu0 %4207 }
 0x657   : > { %v5406_v59 = vrot.slane %v4199_v7, %v8479_v41  ;;  %v5421_v24 = vrot.slane %v4208_v32, %v8503_v8 }
 0x659   : > { %v5407_v0 = vsel %vm4353_vm2, %v5406_v59, %v5402_v34 }
 0x65a   : > { %v4205_v25 = vpop.permute.xlu1 %4204  ;;  %v5412_v58 = vsel %vm4360_vm3, %v5411_v62, %v5407_v0  ;;  %v4214_v56 = vpop.permute.xlu0 %4213 }
 0x65b   : > { %v5416_v11 = vrot.slane %v4205_v25, %v8494_v60  ;;  %v5431_v39 = vrot.slane %v4214_v56, %v8519_v19 }
 0x65d   : > { %v5417_v22 = vsel %vm10709_vm6, %v5416_v11, %v5412_v58 }
 0x65e   : > { %v4211_v28 = vpop.permute.xlu1 %4210  ;;  %v5422_v45 = vsel %vm10710_vm4, %v5421_v24, %v5417_v22  ;;  %v4220_v53 = vpop.permute.xlu0 %4219 }
 0x65f   : > { %v5426_v49 = vrot.slane %v4211_v28, %v8510_v10  ;;  %v5441_v21 = vrot.slane %v4220_v53, %v8535_v5 }
 0x661   : > { %v5427_v30 = vsel %vm10711_vm5, %v5426_v49, %v5422_v45 }
 0x662   : > { %v4217_v14 = vpop.permute.xlu1 %4216  ;;  %v5432_v40 = vsel %vm4388_vm7, %v5431_v39, %v5427_v30  ;;  %v4226_v27 = vpop.permute.xlu0 %4225 }
 0x663   : > { %v5436_v2 = vrot.slane %v4217_v14, %v8526_v20  ;;  %v5451_v29 = vrot.slane %v4226_v27, %v8552_v13 }
 0x665   : > { %v5437_v23 = vsel %vm4395_vm8, %v5436_v2, %v5432_v40 }
 0x666   : > { %v4223_v57 = vpop.permute.xlu1 %4222  ;;  %v5442_v26 = vsel %vm4402_vm9, %v5441_v21, %v5437_v23  ;;  %v4232_v50 = vpop.permute.xlu0 %4231 }
 0x667   : > { %v5446_v15 = vrot.slane %v4223_v57, %v8542_v61  ;;  %v5461_v18 = vrot.slane %v4232_v50, %v10493_v55 }
 0x669   : > { %v5447_v17 = vsel %vm10712_vm10, %v5446_v15, %v5442_v26 }
 0x66a   : > { %v4229_v12 = vpop.permute.xlu1 %4228  ;;  %v5452_v31 = vsel %vm4416_vm11, %v5451_v29, %v5447_v17  ;;  %v4238_v4 = vpop.permute.xlu0 %4237 }
 0x66b   : > { %v5456_v47 = vrot.slane %v4229_v12, %v8558_v52  ;;  %v5471_v1 = vrot.slane %v4238_v4, %v8810_v9 }
 0x66d   : > { %v5457_v38 = vsel %vm4423_vm12, %v5456_v47, %v5452_v31 }
 0x66e   : > { %v4235_v33 = vpop.permute.xlu1 %4234  ;;  %v5462_v44 = vsel %vm4430_vm13, %v5461_v18, %v5457_v38  ;;  %v4244_v51 = vpop.permute.xlu0 %4243 }
 0x66f   : > { %v5466_v42 = vrot.slane %v4235_v33, %v8780_v46  ;;  %v5480_v39 = vrot.slane %v4244_v51, %v8472_v37 }
 0x671   : > { %v5467_v63 = vsel %vm4437_vm14, %v5466_v42, %v5462_v44 }
 0x672   : > { %v5472_v36 = vsel %vm4444_vm15, %v5471_v1, %v5467_v63  ;;  %v4241_v3 = vpop.permute.xlu1 %4240  ;;  %v4250_v48 = vpop.permute.xlu0 %4249 }
 0x673   : > { %v9479_v35 = vsel %vm10714_vm0, %v5472_v36, %v5648_v54  ;;  %v5476_v54 = vrot.slane %v4241_v3, %v8467_v6  ;;  %v5490_v23 = vrot.slane %v4250_v48, %v8487_v43 }
 0x675   : > { %v5481_v40 = vsel %vm4346_vm1, %v5480_v39, %v5476_v54 }
 0x676   : > { %v4247_v16 = vpop.permute.xlu1 %4246  ;;  %v4256_v34 = vpop.permute.xlu0 %4255 }
 0x677   : > { %v5485_v49 = vrot.slane %v4247_v16, %v8479_v41  ;;  %v5500_v4 = vrot.slane %v4256_v34, %v8503_v8 }
 0x679   : > { %v5486_v27 = vsel %vm4353_vm2, %v5485_v49, %v5481_v40 }
 0x67a   : > { %v4253_v7 = vpop.permute.xlu1 %4252  ;;  %v4262_v32 = vpop.permute.xlu0 %4261  ;;  %v5491_v29 = vsel %vm4360_vm3, %v5490_v23, %v5486_v27 }
 0x67b   : > { %v5495_v2 = vrot.slane %v4253_v7, %v8494_v60  ;;  %v5510_v42 = vrot.slane %v4262_v32, %v8519_v19 }
 0x67d   : > { %v5496_v17 = vsel %vm10709_vm6, %v5495_v2, %v5491_v29 }
 0x67e   : > { %v4259_v59 = vpop.permute.xlu1 %4258  ;;  %v4268_v62 = vpop.permute.xlu0 %4267  ;;  %v5501_v38 = vsel %vm10710_vm4, %v5500_v4, %v5496_v17 }
 0x67f   : > { %v5505_v12 = vrot.slane %v4259_v59, %v8510_v10  ;;  %v5520_v7 = vrot.slane %v4268_v62, %v8535_v5 }
 0x681   : > { %v5506_v33 = vsel %vm10711_vm5, %v5505_v12, %v5501_v38 }
 0x682   : > { %v4265_v0 = vpop.permute.xlu1 %4264  ;;  %v9481_v25 = vpop.permute.xlu0 %4273  ;;  %v5511_v3 = vsel %vm4388_vm7, %v5510_v42, %v5506_v33 }
 0x683   : > { %v5515_v44 = vrot.slane %v4265_v0, %v8526_v20 }
 0x685   : > { %v5516_v48 = vsel %vm4395_vm8, %v5515_v44, %v5511_v3 }
 0x686   : > { %v4271_v58 = vpop.permute.xlu1 %4270  ;;  %v4292_v56 = vpop.permute.xlu0 %4291 }
 0x687   : > { %v5559_v26 = vrot.slane %v4292_v56, %v8472_v37  ;;  %v5525_v16 = vrot.slane %v4271_v58, %v8542_v61 }
 0x68a   : > { %v4289_v11 = vpop.permute.xlu1 %4288  ;;  %v4298_v24 = vpop.permute.xlu0 %4297 }
 0x68b   : > { %v5555_v21 = vrot.slane %v4289_v11, %v8467_v6 }
 0x68d   : > { %v5560_v31 = vsel %vm4346_vm1, %v5559_v26, %v5555_v21  ;;  %vm10715_vm1 = vmmov %vm10709_vm6 }
 0x68e   : > { %v4295_v22 = vpop.permute.xlu1 %4294  ;;  %v4304_v28 = vpop.permute.xlu0 %4303 }
 0x68f   : > { %v5564_v57 = vrot.slane %v4295_v22, %v8479_v41  ;;  %v5569_v41 = vrot.slane %v4298_v24, %v8487_v43  ;;  %v5530_v22 = vrot.slane %v9481_v25, %v8552_v13 }
 0x691   : > { %v5565_v6 = vsel %vm4353_vm2, %v5564_v57, %v5560_v31  ;;  %vm10716_vm2 = vmmov %vm10710_vm4 }
 0x692   : > { %v4301_v45 = vpop.permute.xlu1 %4300  ;;  %v4310_v53 = vpop.permute.xlu0 %4309  ;;  %v5570_v51 = vsel %vm4360_vm3, %v5569_v41, %v5565_v6  ;;  %vm10717_vm3 = vmmov %vm10711_vm5 }
 0x693   : > { %v5574_v47 = vrot.slane %v4301_v45, %v8494_v60  ;;  %v5579_v60 = vrot.slane %v4304_v28, %v8503_v8  ;;  %v5521_v8 = vsel %vm4402_vm9, %v5520_v7, %v5516_v48 }
 0x694   : > { %v5526_v11 = vsel %vm10712_vm10, %v5525_v16, %v5521_v8 }
 0x695   : > { %v5575_v1 = vsel %vm10715_vm1, %v5574_v47, %v5570_v51  ;;  %v5531_v49 = vsel %vm4416_vm11, %v5530_v22, %v5526_v11 }
 0x696   : > { %v4307_v30 = vpop.permute.xlu1 %4306  ;;  %v4316_v14 = vpop.permute.xlu0 %4315  ;;  %v5580_v34 = vsel %vm10716_vm2, %v5579_v60, %v5575_v1 }
 0x697   : > { %v5584_v63 = vrot.slane %v4307_v30, %v8510_v10  ;;  %v5589_v10 = vrot.slane %v4310_v53, %v8519_v19  ;;  %v5599_v19 = vrot.slane %v4316_v14, %v8535_v5 }
 0x699   : > { %v5585_v32 = vsel %vm10717_vm3, %v5584_v63, %v5580_v34 }
 0x69a   : > { %v4313_v50 = vpop.permute.xlu1 %4312  ;;  %v4277_v15 = vpop.permute.xlu0 %4276  ;;  %v5590_v24 = vsel %vm4388_vm7, %v5589_v10, %v5585_v32  ;;  %vm10718_vm7 = vmmov %vm10712_vm10 }
 0x69b   : > { %v5594_v59 = vrot.slane %v4313_v50, %v8526_v20  ;;  %v5535_v58 = vrot.slane %v4277_v15, %v8558_v52 }
 0x69d   : > { %v5595_v62 = vsel %vm4395_vm8, %v5594_v59, %v5590_v24  ;;  %v5536_v30 = vsel %vm4423_vm12, %v5535_v58, %v5531_v49  ;;  %vm10719_vm8 = vcmask 1046534  }
 0x69e   : > { %v4319_v18 = vpop.permute.xlu1 %4318  ;;  %v4280_v37 = vpop.permute.xlu0 %4279 }
 0x69f   : > { %v5604_v28 = vrot.slane %v4319_v18, %v8542_v61  ;;  %v5540_v20 = vrot.slane %v4280_v37, %v10493_v55  ;;  %v5600_v61 = vsel %vm4402_vm9, %v5599_v19, %v5595_v62  ;;  %vm10720_vm9 = vcmask 1047559  }
 0x6a1   : > { %v5605_v5 = vsel %vm10718_vm7, %v5604_v28, %v5600_v61 }
 0x6a2   : > { %v4322_v36 = vpop.permute.xlu1 %4321  ;;  %v4283_v43 = vpop.permute.xlu0 %4282 }
 0x6a3   : > { %v5609_v45 = vrot.slane %v4322_v36, %v8552_v13  ;;  %v5545_v53 = vrot.slane %v4283_v43, %v8780_v46  ;;  %v5541_v13 = vsel %vm4430_vm13, %v5540_v20, %v5536_v30 }
 0x6a5   : > { %v5610_v27 = vsel %vm4416_vm11, %v5609_v45, %v5605_v5  ;;  %v5546_v2 = vsel %vm4437_vm14, %v5545_v53, %v5541_v13 }
 0x6a6   : > { %v4325_v0 = vpop.permute.xlu1 %4324  ;;  %v4286_v56 = vpop.permute.xlu0 %4285 }
 0x6a7   : > { %v5614_v39 = vrot.slane %v4325_v0, %v8558_v52  ;;  %v5550_v25 = vrot.slane %v4286_v56, %v8810_v9 }
 0x6a9   : > { %v5615_v21 = vsel %vm4423_vm12, %v5614_v39, %v5610_v27  ;;  %v5551_v23 = vsel %vm4444_vm15, %v5550_v25, %v5546_v2 }
 0x6aa   : > { %v4328_v54 = vpop.permute.xlu1 %4327  ;;  %v4334_v14 = vpop.permute.xlu0 %4333  ;;  %v5650_v15 = vsel %vm10719_vm8, %v5551_v23, %v9479_v35 }
 0x6ab   : > { %v5619_v40 = vrot.slane %v4328_v54, %v10493_v55  ;;  %v5629_v26 = vrot.slane %v4334_v14, %v8810_v9 }
 0x6ad   : > { %v5620_v57 = vsel %vm4430_vm13, %v5619_v40, %v5615_v21 }
 0x6ae   : > { %v4331_v52 = vpop.permute.xlu1 %4330 }
 0x6af   : > { %v5624_v55 = vrot.slane %v4331_v52, %v8780_v46 }
 0x6b1   : > { %v5625_v50 = vsel %vm4437_vm14, %v5624_v55, %v5620_v57 }
 0x6b2   : > { %v5630_v46 = vsel %vm4444_vm15, %v5629_v26, %v5625_v50 }
 0x6b3   : > { %v5651_v29 = vsel %vm10720_vm9, %v5630_v46, %v5650_v15 }
 0x6b4   : > { %5655 = vst [vmem:[%s9113_s21 + $0x8] sm:$0xff] %v5651_v29 }
 0x6b5   : > { %5872 = shalt.err (!%p5869_p6)
}
 0x6b6   : > { %s5873_s7 = scalar_lea.hbm %s9550_s29, 256  ;;  %s5877_s10 = scalar_lea.hbm %s9609_s3, 1024 }
 0x6b7   : > { %p5874_p7 = scmp.ne.s32.totalorder %s9550_s29, %s5873_s7  ;;  %p5878_p11 = scmp.lt.s32.totalorder %s9550_s29, %s9609_s3 }
 0x6b8   : > { %p5879_p12 = scmp.lt.s32.totalorder %s5877_s10, %s5873_s7 }
 0x6b9   : > { %p5875_p9 = pnand %p5874_p7, %p6002_p4 }
 0x6ba   : > { %p5880_p13 = por %p5879_p12, %p5878_p11 }
 0x6bb   : > { %p5876_p10 = pneg %p5875_p9 }
 0x6bd   : > { %p5881_p0 = pnand %p5880_p13, %p5876_p10 }
 0x6bf   : > { %5884 = shalt.err (!%p5881_p0)
}
 0x6c0   : > { %s5940_s19 = smov 128   ;;  %s5941_s21 = smov 8  }
 0x6c1   : > { %5796 = dma.vmem_to_hbm [thread:$0]  (%p6002_p4), %s9552_s26, 256, %s9550_s29, %s9561_s15, %s5940_s19, %s5940_s19, %s5941_s21  }
 0x6c2 PF: > { %p5802_p1 = scmp.ge.s32.totalorder %s5935_s17, 2  ;;  %s5686_s23 = sand.u32 1, %s5915_s12  }
 0x6c3   : > { %s5687_s27 = scalar_lea.sflag [#allocation3], %s5686_s23 }
 0x6c4   : > { %p5799_p2 = pnand %p5802_p1, %p6009_p8 }
 0x6c6   : > { %p5800_p3 = pneg %p5799_p2 }
 0x6c8   : > { %5910 = dma.done.wait (%p5800_p3), %s5687_s27, 256  }
 0x6c9   : > { %5912 = vsyncadd (%p5800_p3), %s5687_s27, 4294967040  ;;  %s16_s17 = sadd.s32 1, %s5935_s17   ;;  %s10721_s12 = smov %s5919_s13 }
 0x6ca   : > { %p13_p5 = scmp.ge.s32.totalorder %s16_s17, 6   ;;  %s10722_s13 = smov %s5923_s14 }
 0x6cb   : > { %s10723_s14 = smov %s6015_s25  ;;  %s10724_s15 = smov %s5931_s16 }
 0x6cc   : > { %s10725_s16 = smov %s10727_s20  ;;  %15 = sbr.rel (!%p13_p5) target bundleno = 4 (0x4), region = 73 }
 0x6d1   :  { %5692 = vsyncpa [#allocation3], 1 }
 0x6d2   :  { %5694 = vsyncpa [#allocation3 + $0x1], 1 }

</bundles_post_ra>
